<compile_context>
chip_gen: v7x
topology: tpu7x:2x2x1
jax: 0.10.0
libtpu: 0.0.40
codegen_flags: <defaults>
</compile_context>

<pallas_src>
import jax
import jax.numpy as jnp
from jax.experimental import pallas as pl
from jax.experimental.pallas import tpu as pltpu

# ----------------------------- configuration -----------------------------
B = 2                     # batch
T_SZ = 16                 # template image size
S_SZ = 32                 # search image size
PATCH = 4                 # patch-embed conv kernel/stride
EMBED_DIM = 32            # transformer width
DEPTH = 2                 # number of transformer blocks
NUM_HEADS = 2
HEAD_DIM = EMBED_DIM // NUM_HEADS     # 16
HEAD_CHANNEL = 16         # Corner_Predictor "channel"
N_T = (T_SZ // PATCH) ** 2            # 16 template tokens
N_S = (S_SZ // PATCH) ** 2            # 64 search tokens
N_TOK = 2 * N_T + N_S                 # 96 tokens total
FEAT_SZ = S_SZ // PATCH               # 8
STRIDE = PATCH                        # feature-map stride w.r.t. search image
IMG_SZ = FEAT_SZ * STRIDE             # 32
PATCH_COLS = 3 * PATCH * PATCH        # 48
N_TOWER = 4                           # conv layers per corner tower
HEAD_PAD = 32                         # per-tower channels zero-padded to this lane width
TOWER_LANES = 2 * HEAD_PAD            # tl/br towers packed side-by-side (64 lanes)
BN_EPS = 1e-5
LN_EPS = 1e-5


def _gelu_tanh(v):
    # TODO(synk): torch.nn.GELU default is exact-erf; tanh approximation used here
    #             because erf has no guaranteed Mosaic lowering (difference ~1e-3).
    c = 0.7978845608028654  # sqrt(2/pi)
    return 0.5 * v * (1.0 + jnp.tanh(c * (v + 0.044715 * v * v * v)))


# ----------------------------- fully fused kernel -----------------------------
def _mixformer_kernel(cols_ref, pos_ref, patch_w_ref, patch_b_ref,
                      ln1_g_ref, ln1_b_ref, qkv_w_ref, qkv_b_ref,
                      proj_w_ref, proj_b_ref, ln2_g_ref, ln2_b_ref,
                      fc1_w_ref, fc1_b_ref, fc2_w_ref, fc2_b_ref,
                      tw_ref, tb_ref, w5_ref, b5_ref, out_ref):
    """One batch element: full backbone + full CORNER head, all in registers."""
    bf16 = jnp.bfloat16
    f32 = jnp.float32
    scale = HEAD_DIM ** -0.5
    NT2 = 2 * N_T

    def layernorm(v, g, b):
        mu = jnp.mean(v, axis=-1, keepdims=True)
        var = jnp.mean(jnp.square(v - mu), axis=-1, keepdims=True)
        return (v - mu) * jax.lax.rsqrt(var + LN_EPS) * g + b

    def softmax_lanes(s):
        m = jnp.max(s, axis=-1, keepdims=True)
        p = jnp.exp(s - m)
        return p * pl.reciprocal(jnp.sum(p, axis=-1, keepdims=True), approx=True)

    # ---- patch embed (dense over patch columns) + positional embedding ----
    x = (jnp.dot(cols_ref[0].astype(bf16), patch_w_ref[...],
                 preferred_element_type=f32)
         + patch_b_ref[...] + pos_ref[0])                            # (N_TOK, C) f32

    # ---- DEPTH mixed-attention transformer blocks (static unroll) ----
    for d in range(DEPTH):
        h = layernorm(x, ln1_g_ref[d], ln1_b_ref[d])
        # fused QKV: one (C, 3C) matmul, per-head q/k/v as static lane slices
        qkv = (jnp.dot(h.astype(bf16), qkv_w_ref[d],
                       preferred_element_type=f32) + qkv_b_ref[d])   # (N_TOK, 3C)
        head_outs = []
        for hd in range(NUM_HEADS):                                  # static unroll
            q = qkv[:, hd * HEAD_DIM:(hd + 1) * HEAD_DIM].astype(bf16)
            k = qkv[:, EMBED_DIM + hd * HEAD_DIM:
                       EMBED_DIM + (hd + 1) * HEAD_DIM].astype(bf16)
            v = qkv[:, 2 * EMBED_DIM + hd * HEAD_DIM:
                       2 * EMBED_DIM + (hd + 1) * HEAD_DIM].astype(bf16)
            # mixed-attention mask expressed structurally (no -1e30 mask tensor):
            # template queries attend to the 32 template keys only.
            s_t = jax.lax.dot_general(q[:NT2], k[:NT2], (((1,), (1,)), ((), ())),
                                      preferred_element_type=f32) * scale
            o_t = jnp.dot(softmax_lanes(s_t).astype(bf16), v[:NT2],
                          preferred_element_type=f32)                # (NT2, dh)
            # search queries attend to all keys.
            s_s = jax.lax.dot_general(q[NT2:], k, (((1,), (1,)), ((), ())),
                                      preferred_element_type=f32) * scale
            o_s = jnp.dot(softmax_lanes(s_s).astype(bf16), v,
                          preferred_element_type=f32)                # (N_S, dh)
            head_outs.append(jnp.concatenate([o_t, o_s], axis=0))    # (N_TOK, dh)
        o_all = jnp.concatenate(head_outs, axis=-1)                  # (N_TOK, C)
        x = x + (jnp.dot(o_all.astype(bf16), proj_w_ref[d],
                         preferred_element_type=f32) + proj_b_ref[d])

        # ---- MLP ----
        h = layernorm(x, ln2_g_ref[d], ln2_b_ref[d])
        h = jnp.dot(h.astype(bf16), fc1_w_ref[d], preferred_element_type=f32) + fc1_b_ref[d]
        h = _gelu_tanh(h)
        h = jnp.dot(h.astype(bf16), fc2_w_ref[d], preferred_element_type=f32) + fc2_b_ref[d]
        x = x + h

    # ---- CORNER head (fused, no HBM round trip) ----
    fs = FEAT_SZ
    hw = fs * fs
    feat = x[NT2:, :]                                   # (hw, C) search tokens, rows h*fs+w
    hcur = jnp.concatenate([feat, feat], axis=-1)       # (hw, 64): lanes [0:32]=tl, [32:64]=br

    # per-tap sublane shift + border mask (replaces 9 shift-matrix matmuls)
    ridx = jax.lax.broadcasted_iota(jnp.int32, (hw, 1), 0).astype(f32)
    hrow = jnp.floor(ridx * (1.0 / fs))
    wcol = ridx - hrow * fs
    taps = []
    for k in range(9):
        dh, dw = k // 3 - 1, k % 3 - 1
        off = dh * fs + dw                              # flat row offset of input tap
        valid = ((hrow + dh >= 0.0) & (hrow + dh <= fs - 1.0)
                 & (wcol + dw >= 0.0) & (wcol + dw <= fs - 1.0))
        taps.append(((-off) % hw, valid))

    for layer in range(N_TOWER):                        # static unroll
        chunks = []
        for shift, valid in taps:
            rolled = hcur if shift == 0 else pltpu.roll(hcur, shift, 0)
            chunks.append(jnp.where(valid, rolled, 0.0).astype(bf16))
        slab = jnp.concatenate(chunks, axis=-1)         # (hw, 9*64) bf16
        acc = jnp.dot(slab, tw_ref[layer], preferred_element_type=f32)
        hcur = jnp.maximum(acc + tb_ref[layer], 0.0)    # BN folded, ReLU; both towers at once

    # 1x1 conv for both towers in one dot -> (2, hw) score rows; softmax along lanes
    s = (jax.lax.dot_general(w5_ref[...], hcur.astype(bf16), (((1,), (1,)), ((), ())),
                             preferred_element_type=f32) + b5_ref[...])
    p = softmax_lanes(s)                                # (2, hw): row 0 = tl, row 1 = br

    # soft-argmax coordinate rows built in-register
    idx = jax.lax.broadcasted_iota(jnp.int32, (1, hw), 1).astype(f32)
    hq = jnp.floor(idx * (1.0 / fs))
    cx = (idx - hq * fs) * float(STRIDE)                # x varies fast
    cy = hq * float(STRIDE)
    ex = jnp.sum(p * cx, axis=-1, keepdims=True)        # (2, 1) = [x_tl, x_br]
    ey = jnp.sum(p * cy, axis=-1, keepdims=True)        # (2, 1) = [y_tl, y_br]

    lane4 = jax.lax.broadcasted_iota(jnp.int32, (1, 4), 1)
    box = (ex[0:1, :] * (lane4 == 0).astype(f32)
           + ey[0:1, :] * (lane4 == 1).astype(f32)
           + ex[1:2, :] * (lane4 == 2).astype(f32)
           + ey[1:2, :] * (lane4 == 3).astype(f32))     # (1, 4) xyxy
    out_ref[0] = box * (1.0 / IMG_SZ)


def _rep_spec(shape):
    """Full-array block replicated across the (batch) grid."""
    nd = len(shape)
    return pl.BlockSpec(shape, lambda b, _nd=nd: (0,) * _nd)


def mixformer_call(pp, cols):
    Bq = cols.shape[0]
    C, D = EMBED_DIM, DEPTH
    in_specs = [
        pl.BlockSpec((1, N_TOK, PATCH_COLS), lambda b: (b, 0, 0)),
        _rep_spec((1, N_TOK, C)),
        _rep_spec((PATCH_COLS, C)),
        _rep_spec((1, C)),
        _rep_spec((D, 1, C)), _rep_spec((D, 1, C)),
        _rep_spec((D, C, 3 * C)), _rep_spec((D, 1, 3 * C)),
        _rep_spec((D, C, C)), _rep_spec((D, 1, C)),
        _rep_spec((D, 1, C)), _rep_spec((D, 1, C)),
        _rep_spec((D, C, 4 * C)), _rep_spec((D, 1, 4 * C)),
        _rep_spec((D, 4 * C, C)), _rep_spec((D, 1, C)),
        _rep_spec((N_TOWER, 9 * TOWER_LANES, TOWER_LANES)),
        _rep_spec((N_TOWER, 1, TOWER_LANES)),
        _rep_spec((2, TOWER_LANES)),
        _rep_spec((2, 1)),
    ]
    return pl.pallas_call(
        _mixformer_kernel,
        out_shape=jax.ShapeDtypeStruct((Bq, 1, 4), jnp.float32),
        grid=(Bq,),
        in_specs=in_specs,
        out_specs=pl.BlockSpec((1, 1, 4), lambda b: (b, 0, 0)),
        compiler_params=pltpu.CompilerParams(dimension_semantics=("parallel",)),
    )(cols, pp["pos"], pp["patch_w"], pp["patch_b"],
      pp["ln1_g"], pp["ln1_b"], pp["qkv_w"], pp["qkv_b"],
      pp["proj_w"], pp["proj_b"], pp["ln2_g"], pp["ln2_b"],
      pp["fc1_w"], pp["fc1_b"], pp["fc2_w"], pp["fc2_b"],
      pp["tower_w"], pp["tower_b"], pp["conv5_w"], pp["conv5_b"])


# ----------------------------- glue helpers -----------------------------
def _patchify(x, p):
    """NCHW -> (B, nH*nW, C*p*p), columns in (c, kh, kw) order (PyTorch conv layout)."""
    Bq, C, H, W = x.shape
    hp, wp = H // p, W // p
    x = x.reshape(Bq, C, hp, p, wp, p)
    x = x.transpose(0, 2, 4, 1, 3, 5)            # (B, hp, wp, C, p, p)
    return x.reshape(Bq, hp * wp, C * p * p)


def box_xyxy_to_cxcywh(x):
    x0, y0, x1, y1 = x[:, 0], x[:, 1], x[:, 2], x[:, 3]
    return jnp.stack([(x0 + x1) / 2.0, (y0 + y1) / 2.0, x1 - x0, y1 - y0], axis=-1)


# ----------------------------- parameters -----------------------------
def init_params(key):
    """Raw parameters in PyTorch layouts (synthetic, deterministic)."""
    ks = iter(jax.random.split(key, 128))

    def nrm(shape, scale=0.02):
        return scale * jax.random.normal(next(ks), shape, dtype=jnp.float32)

    C = EMBED_DIM
    p = {
        "patch_w": nrm((C, 3, PATCH, PATCH)),           # Conv2d(3, C, P, stride=P)
        "patch_b": jnp.zeros((C,), jnp.float32),
        "pos_t": nrm((1, N_T, C)),
        "pos_s": nrm((1, N_S, C)),
        "blocks": [],
    }
    for _ in range(DEPTH):
        p["blocks"].append(dict(
            ln1_g=jnp.ones((C,), jnp.float32), ln1_b=jnp.zeros((C,), jnp.float32),
            qkv_w=nrm((C, 3 * C)), qkv_b=jnp.zeros((3 * C,), jnp.float32),
            proj_w=nrm((C, C)), proj_b=jnp.zeros((C,), jnp.float32),
            ln2_g=jnp.ones((C,), jnp.float32), ln2_b=jnp.zeros((C,), jnp.float32),
            fc1_w=nrm((C, 4 * C)), fc1_b=jnp.zeros((4 * C,), jnp.float32),
            fc2_w=nrm((4 * C, C)), fc2_b=jnp.zeros((C,), jnp.float32),
        ))

    ch = HEAD_CHANNEL
    tower_chans = [(C, ch), (ch, ch // 2), (ch // 2, ch // 4), (ch // 4, ch // 8)]
    for pre in ("tl", "br"):
        tower = []
        for cin, cout in tower_chans:
            tower.append(dict(
                w=nrm((cout, cin, 3, 3)), b=jnp.zeros((cout,), jnp.float32),
                bn_g=jnp.ones((cout,), jnp.float32), bn_b=jnp.zeros((cout,), jnp.float32),
                bn_m=jnp.zeros((cout,), jnp.float32), bn_v=jnp.ones((cout,), jnp.float32),
            ))
        p[f"{pre}_tower"] = tower
        p[f"{pre}_conv5_w"] = nrm((1, ch // 8, 1, 1))
        p[f"{pre}_conv5_b"] = jnp.zeros((1,), jnp.float32)
    return p


def pack_params(raw):
    """One-time host packing: fold BN, fuse QKV, block-pack corner towers, cast MXU weights bf16."""
    C = EMBED_DIM
    bf16 = jnp.bfloat16
    pp = {}
    pp["patch_w"] = raw["patch_w"].reshape(C, -1).T.astype(bf16)          # (48, C)
    pp["patch_b"] = raw["patch_b"].reshape(1, C)
    pp["pos"] = jnp.concatenate([raw["pos_t"], raw["pos_t"], raw["pos_s"]], axis=1)

    def stack(fn, dtype=jnp.float32):
        return jnp.stack([fn(bp) for bp in raw["blocks"]], axis=0).astype(dtype)

    pp["ln1_g"] = stack(lambda bp: bp["ln1_g"].reshape(1, C))
    pp["ln1_b"] = stack(lambda bp: bp["ln1_b"].reshape(1, C))
    pp["ln2_g"] = stack(lambda bp: bp["ln2_g"].reshape(1, C))
    pp["ln2_b"] = stack(lambda bp: bp["ln2_b"].reshape(1, C))
    # fused QKV: (D, C, 3C), columns ordered [q | k | v], each split head-major
    pp["qkv_w"] = stack(lambda bp: bp["qkv_w"], bf16)
    pp["qkv_b"] = stack(lambda bp: bp["qkv_b"].reshape(1, 3 * C))
    pp["proj_w"] = stack(lambda bp: bp["proj_w"], bf16)
    pp["proj_b"] = stack(lambda bp: bp["proj_b"].reshape(1, C))
    pp["fc1_w"] = stack(lambda bp: bp["fc1_w"], bf16)
    pp["fc1_b"] = stack(lambda bp: bp["fc1_b"].reshape(1, 4 * C))
    pp["fc2_w"] = stack(lambda bp: bp["fc2_w"], bf16)
    pp["fc2_b"] = stack(lambda bp: bp["fc2_b"].reshape(1, C))

    # corner head: fold BN, rearrange per-tap (Cin, Cout), zero-pad to 32, then
    # block-pack taps along Cin and tl/br towers block-diagonally along lanes.
    folded = {}
    for pre in ("tl", "br"):
        layers_w, layers_b = [], []
        for cp in raw[f"{pre}_tower"]:
            scale = cp["bn_g"] / jnp.sqrt(cp["bn_v"] + BN_EPS)
            wf = cp["w"] * scale[:, None, None, None]                 # (Cout, Cin, 3, 3)
            bf_ = (cp["b"] - cp["bn_m"]) * scale + cp["bn_b"]         # (Cout,)
            cout, cin = wf.shape[0], wf.shape[1]
            wt = wf.transpose(2, 3, 1, 0).reshape(9, cin, cout)       # tap k = kh*3 + kw
            wt = jnp.pad(wt, ((0, 0), (0, HEAD_PAD - cin), (0, HEAD_PAD - cout)))
            bt = jnp.pad(bf_, (0, HEAD_PAD - cout)).reshape(1, HEAD_PAD)
            layers_w.append(wt)                                        # (9, 32, 32)
            layers_b.append(bt)
        folded[pre] = (layers_w, layers_b)

    z = jnp.zeros((HEAD_PAD, HEAD_PAD), jnp.float32)
    tw, tb = [], []
    for layer in range(N_TOWER):
        blocks = []
        for k in range(9):
            tl_k = folded["tl"][0][layer][k]
            br_k = folded["br"][0][layer][k]
            top = jnp.concatenate([tl_k, z], axis=1)
            bot = jnp.concatenate([z, br_k], axis=1)
            blocks.append(jnp.concatenate([top, bot], axis=0))        # (64, 64) block-diag
        tw.append(jnp.concatenate(blocks, axis=0))                    # (9*64, 64)
        tb.append(jnp.concatenate([folded["tl"][1][layer],
                                   folded["br"][1][layer]], axis=1))  # (1, 64)
    pp["tower_w"] = jnp.stack(tw).astype(bf16)     # (4, 576, 64)
    pp["tower_b"] = jnp.stack(tb)                  # (4, 1, 64)

    w5_tl = raw["tl_conv5_w"].reshape(1, -1)       # (1, ch//8)
    w5_br = raw["br_conv5_w"].reshape(1, -1)
    row0 = jnp.pad(w5_tl, ((0, 0), (0, TOWER_LANES - w5_tl.shape[1])))
    row1 = jnp.pad(w5_br, ((0, 0), (HEAD_PAD, HEAD_PAD - w5_br.shape[1])))
    pp["conv5_w"] = jnp.concatenate([row0, row1], axis=0).astype(bf16)   # (2, 64)
    pp["conv5_b"] = jnp.concatenate([raw["tl_conv5_b"].reshape(1, 1),
                                     raw["br_conv5_b"].reshape(1, 1)], axis=0)  # (2, 1)
    return pp


# ----------------------------- model forward -----------------------------
def mixformer_forward(pp, template, online_template, search):
    # PyTorch handles accidental 5-D (1, B, C, H, W) inputs by squeezing dim 0.
    if template.ndim == 5:
        template = template[0]
    if online_template.ndim == 5:
        online_template = online_template[0]
    if search.ndim == 5:
        search = search[0]
    Bq = search.shape[0]

    # one-time layout prep (XLA): patchify + concat tokens [template, online_template, search]
    cols = jnp.concatenate([_patchify(template, PATCH),
                            _patchify(online_template, PATCH),
                            _patchify(search, PATCH)], axis=1)        # (B, N_TOK, 48)

    # single fused kernel: backbone + CORNER head -> normalized xyxy (B, 1, 4)
    xyxy = mixformer_call(pp, cols)[:, 0, :]

    outputs_coord = box_xyxy_to_cxcywh(xyxy)
    outputs_coord_new = outputs_coord.reshape(Bq, 1, 4)
    out = {"pred_boxes": outputs_coord_new}
    return out, outputs_coord_new


# ----------------------------- main -----------------------------
if __name__ == "__main__":
    key = jax.random.PRNGKey(0)
    kp, kt, ko, ks = jax.random.split(key, 4)
    raw_params = init_params(kp)
    packed = pack_params(raw_params)

    template = jax.random.normal(kt, (B, 3, T_SZ, T_SZ), dtype=jnp.float32)
    online_template = jax.random.normal(ko, (B, 3, T_SZ, T_SZ), dtype=jnp.float32)
    search = jax.random.normal(ks, (B, 3, S_SZ, S_SZ), dtype=jnp.float32)

    fwd = jax.jit(mixformer_forward)
    out, coord = fwd(packed, template, online_template, search)
    jax.block_until_ready(coord)
    assert coord.shape == (B, 1, 4)
    assert bool(jnp.all(jnp.isfinite(coord)))
    print("KERNEL_OK")
</pallas_src>

<mosaic_0001>
module attributes {stable_mosaic.version = 11 : i64} {
  func.func @_mixformer_kernel(%arg0: i32, %arg1: memref<1x96x48xf32, #tpu.memory_space<vmem>>, %arg2: memref<1x96x32xf32, #tpu.memory_space<vmem>>, %arg3: memref<48x32xbf16, #tpu.memory_space<vmem>>, %arg4: memref<1x32xf32, #tpu.memory_space<vmem>>, %arg5: memref<2x1x32xf32, #tpu.memory_space<vmem>>, %arg6: memref<2x1x32xf32, #tpu.memory_space<vmem>>, %arg7: memref<2x32x96xbf16, #tpu.memory_space<vmem>>, %arg8: memref<2x1x96xf32, #tpu.memory_space<vmem>>, %arg9: memref<2x32x32xbf16, #tpu.memory_space<vmem>>, %arg10: memref<2x1x32xf32, #tpu.memory_space<vmem>>, %arg11: memref<2x1x32xf32, #tpu.memory_space<vmem>>, %arg12: memref<2x1x32xf32, #tpu.memory_space<vmem>>, %arg13: memref<2x32x128xbf16, #tpu.memory_space<vmem>>, %arg14: memref<2x1x128xf32, #tpu.memory_space<vmem>>, %arg15: memref<2x128x32xbf16, #tpu.memory_space<vmem>>, %arg16: memref<2x1x32xf32, #tpu.memory_space<vmem>>, %arg17: memref<4x576x64xbf16, #tpu.memory_space<vmem>>, %arg18: memref<4x1x64xf32, #tpu.memory_space<vmem>>, %arg19: memref<2x64xbf16, #tpu.memory_space<vmem>>, %arg20: memref<2x1xf32, #tpu.memory_space<vmem>>, %arg21: memref<1x1x4xf32, #tpu.memory_space<vmem>>) attributes {dimension_semantics = [#tpu.dimension_semantics<parallel>], iteration_bounds = array<i64: 2>, scalar_prefetch = 0 : i64, scratch_operands = 0 : i64, tpu.core_type = #tpu.core_type<tc>, window_params = [{transform_indices = @transform_0, window_bounds = array<i64: 1, 96, 48>}, {pipeline_mode = #tpu.pipeline_mode<synchronous>, transform_indices = @transform_1, window_bounds = array<i64: 1, 96, 32>}, {pipeline_mode = #tpu.pipeline_mode<synchronous>, transform_indices = @transform_2, window_bounds = array<i64: 48, 32>}, {pipeline_mode = #tpu.pipeline_mode<synchronous>, transform_indices = @transform_3, window_bounds = array<i64: 1, 32>}, {pipeline_mode = #tpu.pipeline_mode<synchronous>, transform_indices = @transform_4, window_bounds = array<i64: 2, 1, 32>}, {pipeline_mode = #tpu.pipeline_mode<synchronous>, transform_indices = @transform_5, window_bounds = array<i64: 2, 1, 32>}, {pipeline_mode = #tpu.pipeline_mode<synchronous>, transform_indices = @transform_6, window_bounds = array<i64: 2, 32, 96>}, {pipeline_mode = #tpu.pipeline_mode<synchronous>, transform_indices = @transform_7, window_bounds = array<i64: 2, 1, 96>}, {pipeline_mode = #tpu.pipeline_mode<synchronous>, transform_indices = @transform_8, window_bounds = array<i64: 2, 32, 32>}, {pipeline_mode = #tpu.pipeline_mode<synchronous>, transform_indices = @transform_9, window_bounds = array<i64: 2, 1, 32>}, {pipeline_mode = #tpu.pipeline_mode<synchronous>, transform_indices = @transform_10, window_bounds = array<i64: 2, 1, 32>}, {pipeline_mode = #tpu.pipeline_mode<synchronous>, transform_indices = @transform_11, window_bounds = array<i64: 2, 1, 32>}, {pipeline_mode = #tpu.pipeline_mode<synchronous>, transform_indices = @transform_12, window_bounds = array<i64: 2, 32, 128>}, {pipeline_mode = #tpu.pipeline_mode<synchronous>, transform_indices = @transform_13, window_bounds = array<i64: 2, 1, 128>}, {pipeline_mode = #tpu.pipeline_mode<synchronous>, transform_indices = @transform_14, window_bounds = array<i64: 2, 128, 32>}, {pipeline_mode = #tpu.pipeline_mode<synchronous>, transform_indices = @transform_15, window_bounds = array<i64: 2, 1, 32>}, {pipeline_mode = #tpu.pipeline_mode<synchronous>, transform_indices = @transform_16, window_bounds = array<i64: 4, 576, 64>}, {pipeline_mode = #tpu.pipeline_mode<synchronous>, transform_indices = @transform_17, window_bounds = array<i64: 4, 1, 64>}, {pipeline_mode = #tpu.pipeline_mode<synchronous>, transform_indices = @transform_18, window_bounds = array<i64: 2, 64>}, {pipeline_mode = #tpu.pipeline_mode<synchronous>, transform_indices = @transform_19, window_bounds = array<i64: 2, 1>}, {transform_indices = @transform_20, window_bounds = array<i64: 1, 1, 4>}]} {
    %c0 = arith.constant 0 : index
    %c0_0 = arith.constant 0 : index
    %c0_1 = arith.constant 0 : index
    %0 = vector.load %arg1[%c0, %c0_0, %c0_1] : memref<1x96x48xf32, #tpu.memory_space<vmem>>, vector<1x96x48xf32>
    %1 = vector.shape_cast %0 : vector<1x96x48xf32> to vector<96x48xf32>
    %2 = arith.truncf %1 : vector<96x48xf32> to vector<96x48xbf16>
    %c0_2 = arith.constant 0 : index
    %c0_3 = arith.constant 0 : index
    %3 = vector.load %arg3[%c0_2, %c0_3] : memref<48x32xbf16, #tpu.memory_space<vmem>>, vector<48x32xbf16>
    %cst = arith.constant dense<0.000000e+00> : vector<96x32xf32>
    %4 = tpu.matmul %2, %3, %cst {dimension_numbers = #tpu.dot_dimension_numbers<[1], [0], [0], [1], [0, 0, 1, 1], [], []>} : vector<96x48xbf16>, vector<48x32xbf16>, vector<96x32xf32> -> vector<96x32xf32>
    %c0_4 = arith.constant 0 : index
    %c0_5 = arith.constant 0 : index
    %5 = vector.load %arg4[%c0_4, %c0_5] : memref<1x32xf32, #tpu.memory_space<vmem>>, vector<1x32xf32>
    %6 = vector.broadcast %5 : vector<1x32xf32> to vector<96x32xf32>
    %7 = arith.addf %4, %6 : vector<96x32xf32>
    %c0_6 = arith.constant 0 : index
    %c0_7 = arith.constant 0 : index
    %c0_8 = arith.constant 0 : index
    %8 = vector.load %arg2[%c0_6, %c0_7, %c0_8] : memref<1x96x32xf32, #tpu.memory_space<vmem>>, vector<1x96x32xf32>
    %9 = vector.shape_cast %8 : vector<1x96x32xf32> to vector<96x32xf32>
    %10 = arith.addf %7, %9 : vector<96x32xf32>
    %c0_9 = arith.constant 0 : index
    %c0_10 = arith.constant 0 : index
    %c0_11 = arith.constant 0 : index
    %11 = vector.load %arg5[%c0_9, %c0_10, %c0_11] : memref<2x1x32xf32, #tpu.memory_space<vmem>>, vector<1x1x32xf32>
    %12 = vector.shape_cast %11 : vector<1x1x32xf32> to vector<1x32xf32>
    %c0_12 = arith.constant 0 : index
    %c0_13 = arith.constant 0 : index
    %c0_14 = arith.constant 0 : index
    %13 = vector.load %arg6[%c0_12, %c0_13, %c0_14] : memref<2x1x32xf32, #tpu.memory_space<vmem>>, vector<1x1x32xf32>
    %14 = vector.shape_cast %13 : vector<1x1x32xf32> to vector<1x32xf32>
    %cst_15 = arith.constant dense<0.000000e+00> : vector<96xf32>
    %15 = vector.multi_reduction <add>, %10, %cst_15 [1] : vector<96x32xf32> to vector<96xf32>
    %16 = vector.shape_cast %15 : vector<96xf32> to vector<96x1xf32>
    %cst_16 = arith.constant 3.200000e+01 : f32
    %17 = vector.broadcast %cst_16 : f32 to vector<96x1xf32>
    %18 = arith.divf %16, %17 : vector<96x1xf32>
    %19 = vector.broadcast %18 : vector<96x1xf32> to vector<96x32xf32>
    %20 = arith.subf %10, %19 : vector<96x32xf32>
    %21 = arith.mulf %20, %20 : vector<96x32xf32>
    %cst_17 = arith.constant dense<0.000000e+00> : vector<96xf32>
    %22 = vector.multi_reduction <add>, %21, %cst_17 [1] : vector<96x32xf32> to vector<96xf32>
    %23 = vector.shape_cast %22 : vector<96xf32> to vector<96x1xf32>
    %cst_18 = arith.constant 3.200000e+01 : f32
    %24 = vector.broadcast %cst_18 : f32 to vector<96x1xf32>
    %25 = arith.divf %23, %24 : vector<96x1xf32>
    %26 = vector.broadcast %18 : vector<96x1xf32> to vector<96x32xf32>
    %27 = arith.subf %10, %26 : vector<96x32xf32>
    %cst_19 = arith.constant 9.99999974E-6 : f32
    %28 = vector.broadcast %cst_19 : f32 to vector<96x1xf32>
    %29 = arith.addf %25, %28 : vector<96x1xf32>
    %30 = math.rsqrt %29 : vector<96x1xf32>
    %31 = vector.broadcast %30 : vector<96x1xf32> to vector<96x32xf32>
    %32 = arith.mulf %27, %31 : vector<96x32xf32>
    %33 = vector.broadcast %12 : vector<1x32xf32> to vector<96x32xf32>
    %34 = arith.mulf %32, %33 : vector<96x32xf32>
    %35 = vector.broadcast %14 : vector<1x32xf32> to vector<96x32xf32>
    %36 = arith.addf %34, %35 : vector<96x32xf32>
    %37 = arith.truncf %36 : vector<96x32xf32> to vector<96x32xbf16>
    %c0_20 = arith.constant 0 : index
    %c0_21 = arith.constant 0 : index
    %c0_22 = arith.constant 0 : index
    %38 = vector.load %arg7[%c0_20, %c0_21, %c0_22] : memref<2x32x96xbf16, #tpu.memory_space<vmem>>, vector<1x32x96xbf16>
    %39 = vector.shape_cast %38 : vector<1x32x96xbf16> to vector<32x96xbf16>
    %cst_23 = arith.constant dense<0.000000e+00> : vector<96x96xf32>
    %40 = tpu.matmul %37, %39, %cst_23 {dimension_numbers = #tpu.dot_dimension_numbers<[1], [0], [0], [1], [0, 0, 1, 1], [], []>} : vector<96x32xbf16>, vector<32x96xbf16>, vector<96x96xf32> -> vector<96x96xf32>
    %c0_24 = arith.constant 0 : index
    %c0_25 = arith.constant 0 : index
    %c0_26 = arith.constant 0 : index
    %41 = vector.load %arg8[%c0_24, %c0_25, %c0_26] : memref<2x1x96xf32, #tpu.memory_space<vmem>>, vector<1x1x96xf32>
    %42 = vector.shape_cast %41 : vector<1x1x96xf32> to vector<1x96xf32>
    %43 = vector.broadcast %42 : vector<1x96xf32> to vector<96x96xf32>
    %44 = arith.addf %40, %43 : vector<96x96xf32>
    %45 = vector.extract_strided_slice %44 {offsets = [0, 0], sizes = [96, 16], strides = [1, 1]} : vector<96x96xf32> to vector<96x16xf32>
    %46 = arith.truncf %45 : vector<96x16xf32> to vector<96x16xbf16>
    %47 = vector.extract_strided_slice %44 {offsets = [0, 32], sizes = [96, 16], strides = [1, 1]} : vector<96x96xf32> to vector<96x16xf32>
    %48 = arith.truncf %47 : vector<96x16xf32> to vector<96x16xbf16>
    %49 = vector.extract_strided_slice %44 {offsets = [0, 64], sizes = [96, 16], strides = [1, 1]} : vector<96x96xf32> to vector<96x16xf32>
    %50 = arith.truncf %49 : vector<96x16xf32> to vector<96x16xbf16>
    %51 = vector.extract_strided_slice %46 {offsets = [0, 0], sizes = [32, 16], strides = [1, 1]} : vector<96x16xbf16> to vector<32x16xbf16>
    %52 = vector.extract_strided_slice %48 {offsets = [0, 0], sizes = [32, 16], strides = [1, 1]} : vector<96x16xbf16> to vector<32x16xbf16>
    %cst_27 = arith.constant dense<0.000000e+00> : vector<32x32xf32>
    %53 = tpu.matmul %51, %52, %cst_27 {dimension_numbers = #tpu.dot_dimension_numbers<[1], [1], [0], [0], [0, 0, 1, 0], [], []>} : vector<32x16xbf16>, vector<32x16xbf16>, vector<32x32xf32> -> vector<32x32xf32>
    %cst_28 = arith.constant 2.500000e-01 : f32
    %54 = vector.broadcast %cst_28 : f32 to vector<32x32xf32>
    %55 = arith.mulf %53, %54 : vector<32x32xf32>
    %cst_29 = arith.constant dense<0xFF800000> : vector<32xf32>
    %56 = vector.multi_reduction <maximumf>, %55, %cst_29 [1] : vector<32x32xf32> to vector<32xf32>
    %57 = vector.shape_cast %56 : vector<32xf32> to vector<32x1xf32>
    %58 = vector.broadcast %57 : vector<32x1xf32> to vector<32x32xf32>
    %59 = arith.subf %55, %58 : vector<32x32xf32>
    %60 = math.exp %59 : vector<32x32xf32>
    %cst_30 = arith.constant dense<0.000000e+00> : vector<32xf32>
    %61 = vector.multi_reduction <add>, %60, %cst_30 [1] : vector<32x32xf32> to vector<32xf32>
    %62 = vector.shape_cast %61 : vector<32xf32> to vector<32x1xf32>
    %63 = tpu.reciprocal %62 {approx = true} : vector<32x1xf32> -> vector<32x1xf32>
    %64 = vector.broadcast %63 : vector<32x1xf32> to vector<32x32xf32>
    %65 = arith.mulf %60, %64 : vector<32x32xf32>
    %66 = arith.truncf %65 : vector<32x32xf32> to vector<32x32xbf16>
    %67 = vector.extract_strided_slice %50 {offsets = [0, 0], sizes = [32, 16], strides = [1, 1]} : vector<96x16xbf16> to vector<32x16xbf16>
    %cst_31 = arith.constant dense<0.000000e+00> : vector<32x16xf32>
    %68 = tpu.matmul %66, %67, %cst_31 {dimension_numbers = #tpu.dot_dimension_numbers<[1], [0], [0], [1], [0, 0, 1, 1], [], []>} : vector<32x32xbf16>, vector<32x16xbf16>, vector<32x16xf32> -> vector<32x16xf32>
    %69 = vector.extract_strided_slice %46 {offsets = [32, 0], sizes = [64, 16], strides = [1, 1]} : vector<96x16xbf16> to vector<64x16xbf16>
    %cst_32 = arith.constant dense<0.000000e+00> : vector<64x96xf32>
    %70 = tpu.matmul %69, %48, %cst_32 {dimension_numbers = #tpu.dot_dimension_numbers<[1], [1], [0], [0], [0, 0, 1, 0], [], []>} : vector<64x16xbf16>, vector<96x16xbf16>, vector<64x96xf32> -> vector<64x96xf32>
    %cst_33 = arith.constant 2.500000e-01 : f32
    %71 = vector.broadcast %cst_33 : f32 to vector<64x96xf32>
    %72 = arith.mulf %70, %71 : vector<64x96xf32>
    %cst_34 = arith.constant dense<0xFF800000> : vector<64xf32>
    %73 = vector.multi_reduction <maximumf>, %72, %cst_34 [1] : vector<64x96xf32> to vector<64xf32>
    %74 = vector.shape_cast %73 : vector<64xf32> to vector<64x1xf32>
    %75 = vector.broadcast %74 : vector<64x1xf32> to vector<64x96xf32>
    %76 = arith.subf %72, %75 : vector<64x96xf32>
    %77 = math.exp %76 : vector<64x96xf32>
    %cst_35 = arith.constant dense<0.000000e+00> : vector<64xf32>
    %78 = vector.multi_reduction <add>, %77, %cst_35 [1] : vector<64x96xf32> to vector<64xf32>
    %79 = vector.shape_cast %78 : vector<64xf32> to vector<64x1xf32>
    %80 = tpu.reciprocal %79 {approx = true} : vector<64x1xf32> -> vector<64x1xf32>
    %81 = vector.broadcast %80 : vector<64x1xf32> to vector<64x96xf32>
    %82 = arith.mulf %77, %81 : vector<64x96xf32>
    %83 = arith.truncf %82 : vector<64x96xf32> to vector<64x96xbf16>
    %cst_36 = arith.constant dense<0.000000e+00> : vector<64x16xf32>
    %84 = tpu.matmul %83, %50, %cst_36 {dimension_numbers = #tpu.dot_dimension_numbers<[1], [0], [0], [1], [0, 0, 1, 1], [], []>} : vector<64x96xbf16>, vector<96x16xbf16>, vector<64x16xf32> -> vector<64x16xf32>
    %85 = tpu.concatenate %68, %84 in 0 : vector<32x16xf32>, vector<64x16xf32> -> vector<96x16xf32>
    %86 = vector.extract_strided_slice %44 {offsets = [0, 16], sizes = [96, 16], strides = [1, 1]} : vector<96x96xf32> to vector<96x16xf32>
    %87 = arith.truncf %86 : vector<96x16xf32> to vector<96x16xbf16>
    %88 = vector.extract_strided_slice %44 {offsets = [0, 48], sizes = [96, 16], strides = [1, 1]} : vector<96x96xf32> to vector<96x16xf32>
    %89 = arith.truncf %88 : vector<96x16xf32> to vector<96x16xbf16>
    %90 = vector.extract_strided_slice %44 {offsets = [0, 80], sizes = [96, 16], strides = [1, 1]} : vector<96x96xf32> to vector<96x16xf32>
    %91 = arith.truncf %90 : vector<96x16xf32> to vector<96x16xbf16>
    %92 = vector.extract_strided_slice %87 {offsets = [0, 0], sizes = [32, 16], strides = [1, 1]} : vector<96x16xbf16> to vector<32x16xbf16>
    %93 = vector.extract_strided_slice %89 {offsets = [0, 0], sizes = [32, 16], strides = [1, 1]} : vector<96x16xbf16> to vector<32x16xbf16>
    %cst_37 = arith.constant dense<0.000000e+00> : vector<32x32xf32>
    %94 = tpu.matmul %92, %93, %cst_37 {dimension_numbers = #tpu.dot_dimension_numbers<[1], [1], [0], [0], [0, 0, 1, 0], [], []>} : vector<32x16xbf16>, vector<32x16xbf16>, vector<32x32xf32> -> vector<32x32xf32>
    %cst_38 = arith.constant 2.500000e-01 : f32
    %95 = vector.broadcast %cst_38 : f32 to vector<32x32xf32>
    %96 = arith.mulf %94, %95 : vector<32x32xf32>
    %cst_39 = arith.constant dense<0xFF800000> : vector<32xf32>
    %97 = vector.multi_reduction <maximumf>, %96, %cst_39 [1] : vector<32x32xf32> to vector<32xf32>
    %98 = vector.shape_cast %97 : vector<32xf32> to vector<32x1xf32>
    %99 = vector.broadcast %98 : vector<32x1xf32> to vector<32x32xf32>
    %100 = arith.subf %96, %99 : vector<32x32xf32>
    %101 = math.exp %100 : vector<32x32xf32>
    %cst_40 = arith.constant dense<0.000000e+00> : vector<32xf32>
    %102 = vector.multi_reduction <add>, %101, %cst_40 [1] : vector<32x32xf32> to vector<32xf32>
    %103 = vector.shape_cast %102 : vector<32xf32> to vector<32x1xf32>
    %104 = tpu.reciprocal %103 {approx = true} : vector<32x1xf32> -> vector<32x1xf32>
    %105 = vector.broadcast %104 : vector<32x1xf32> to vector<32x32xf32>
    %106 = arith.mulf %101, %105 : vector<32x32xf32>
    %107 = arith.truncf %106 : vector<32x32xf32> to vector<32x32xbf16>
    %108 = vector.extract_strided_slice %91 {offsets = [0, 0], sizes = [32, 16], strides = [1, 1]} : vector<96x16xbf16> to vector<32x16xbf16>
    %cst_41 = arith.constant dense<0.000000e+00> : vector<32x16xf32>
    %109 = tpu.matmul %107, %108, %cst_41 {dimension_numbers = #tpu.dot_dimension_numbers<[1], [0], [0], [1], [0, 0, 1, 1], [], []>} : vector<32x32xbf16>, vector<32x16xbf16>, vector<32x16xf32> -> vector<32x16xf32>
    %110 = vector.extract_strided_slice %87 {offsets = [32, 0], sizes = [64, 16], strides = [1, 1]} : vector<96x16xbf16> to vector<64x16xbf16>
    %cst_42 = arith.constant dense<0.000000e+00> : vector<64x96xf32>
    %111 = tpu.matmul %110, %89, %cst_42 {dimension_numbers = #tpu.dot_dimension_numbers<[1], [1], [0], [0], [0, 0, 1, 0], [], []>} : vector<64x16xbf16>, vector<96x16xbf16>, vector<64x96xf32> -> vector<64x96xf32>
    %cst_43 = arith.constant 2.500000e-01 : f32
    %112 = vector.broadcast %cst_43 : f32 to vector<64x96xf32>
    %113 = arith.mulf %111, %112 : vector<64x96xf32>
    %cst_44 = arith.constant dense<0xFF800000> : vector<64xf32>
    %114 = vector.multi_reduction <maximumf>, %113, %cst_44 [1] : vector<64x96xf32> to vector<64xf32>
    %115 = vector.shape_cast %114 : vector<64xf32> to vector<64x1xf32>
    %116 = vector.broadcast %115 : vector<64x1xf32> to vector<64x96xf32>
    %117 = arith.subf %113, %116 : vector<64x96xf32>
    %118 = math.exp %117 : vector<64x96xf32>
    %cst_45 = arith.constant dense<0.000000e+00> : vector<64xf32>
    %119 = vector.multi_reduction <add>, %118, %cst_45 [1] : vector<64x96xf32> to vector<64xf32>
    %120 = vector.shape_cast %119 : vector<64xf32> to vector<64x1xf32>
    %121 = tpu.reciprocal %120 {approx = true} : vector<64x1xf32> -> vector<64x1xf32>
    %122 = vector.broadcast %121 : vector<64x1xf32> to vector<64x96xf32>
    %123 = arith.mulf %118, %122 : vector<64x96xf32>
    %124 = arith.truncf %123 : vector<64x96xf32> to vector<64x96xbf16>
    %cst_46 = arith.constant dense<0.000000e+00> : vector<64x16xf32>
    %125 = tpu.matmul %124, %91, %cst_46 {dimension_numbers = #tpu.dot_dimension_numbers<[1], [0], [0], [1], [0, 0, 1, 1], [], []>} : vector<64x96xbf16>, vector<96x16xbf16>, vector<64x16xf32> -> vector<64x16xf32>
    %126 = tpu.concatenate %109, %125 in 0 : vector<32x16xf32>, vector<64x16xf32> -> vector<96x16xf32>
    %127 = tpu.concatenate %85, %126 in 1 : vector<96x16xf32>, vector<96x16xf32> -> vector<96x32xf32>
    %128 = arith.truncf %127 : vector<96x32xf32> to vector<96x32xbf16>
    %c0_47 = arith.constant 0 : index
    %c0_48 = arith.constant 0 : index
    %c0_49 = arith.constant 0 : index
    %129 = vector.load %arg9[%c0_47, %c0_48, %c0_49] : memref<2x32x32xbf16, #tpu.memory_space<vmem>>, vector<1x32x32xbf16>
    %130 = vector.shape_cast %129 : vector<1x32x32xbf16> to vector<32x32xbf16>
    %cst_50 = arith.constant dense<0.000000e+00> : vector<96x32xf32>
    %131 = tpu.matmul %128, %130, %cst_50 {dimension_numbers = #tpu.dot_dimension_numbers<[1], [0], [0], [1], [0, 0, 1, 1], [], []>} : vector<96x32xbf16>, vector<32x32xbf16>, vector<96x32xf32> -> vector<96x32xf32>
    %c0_51 = arith.constant 0 : index
    %c0_52 = arith.constant 0 : index
    %c0_53 = arith.constant 0 : index
    %132 = vector.load %arg10[%c0_51, %c0_52, %c0_53] : memref<2x1x32xf32, #tpu.memory_space<vmem>>, vector<1x1x32xf32>
    %133 = vector.shape_cast %132 : vector<1x1x32xf32> to vector<1x32xf32>
    %134 = vector.broadcast %133 : vector<1x32xf32> to vector<96x32xf32>
    %135 = arith.addf %131, %134 : vector<96x32xf32>
    %136 = arith.addf %10, %135 : vector<96x32xf32>
    %c0_54 = arith.constant 0 : index
    %c0_55 = arith.constant 0 : index
    %c0_56 = arith.constant 0 : index
    %137 = vector.load %arg11[%c0_54, %c0_55, %c0_56] : memref<2x1x32xf32, #tpu.memory_space<vmem>>, vector<1x1x32xf32>
    %138 = vector.shape_cast %137 : vector<1x1x32xf32> to vector<1x32xf32>
    %c0_57 = arith.constant 0 : index
    %c0_58 = arith.constant 0 : index
    %c0_59 = arith.constant 0 : index
    %139 = vector.load %arg12[%c0_57, %c0_58, %c0_59] : memref<2x1x32xf32, #tpu.memory_space<vmem>>, vector<1x1x32xf32>
    %140 = vector.shape_cast %139 : vector<1x1x32xf32> to vector<1x32xf32>
    %cst_60 = arith.constant dense<0.000000e+00> : vector<96xf32>
    %141 = vector.multi_reduction <add>, %136, %cst_60 [1] : vector<96x32xf32> to vector<96xf32>
    %142 = vector.shape_cast %141 : vector<96xf32> to vector<96x1xf32>
    %cst_61 = arith.constant 3.200000e+01 : f32
    %143 = vector.broadcast %cst_61 : f32 to vector<96x1xf32>
    %144 = arith.divf %142, %143 : vector<96x1xf32>
    %145 = vector.broadcast %144 : vector<96x1xf32> to vector<96x32xf32>
    %146 = arith.subf %136, %145 : vector<96x32xf32>
    %147 = arith.mulf %146, %146 : vector<96x32xf32>
    %cst_62 = arith.constant dense<0.000000e+00> : vector<96xf32>
    %148 = vector.multi_reduction <add>, %147, %cst_62 [1] : vector<96x32xf32> to vector<96xf32>
    %149 = vector.shape_cast %148 : vector<96xf32> to vector<96x1xf32>
    %cst_63 = arith.constant 3.200000e+01 : f32
    %150 = vector.broadcast %cst_63 : f32 to vector<96x1xf32>
    %151 = arith.divf %149, %150 : vector<96x1xf32>
    %152 = vector.broadcast %144 : vector<96x1xf32> to vector<96x32xf32>
    %153 = arith.subf %136, %152 : vector<96x32xf32>
    %cst_64 = arith.constant 9.99999974E-6 : f32
    %154 = vector.broadcast %cst_64 : f32 to vector<96x1xf32>
    %155 = arith.addf %151, %154 : vector<96x1xf32>
    %156 = math.rsqrt %155 : vector<96x1xf32>
    %157 = vector.broadcast %156 : vector<96x1xf32> to vector<96x32xf32>
    %158 = arith.mulf %153, %157 : vector<96x32xf32>
    %159 = vector.broadcast %138 : vector<1x32xf32> to vector<96x32xf32>
    %160 = arith.mulf %158, %159 : vector<96x32xf32>
    %161 = vector.broadcast %140 : vector<1x32xf32> to vector<96x32xf32>
    %162 = arith.addf %160, %161 : vector<96x32xf32>
    %163 = arith.truncf %162 : vector<96x32xf32> to vector<96x32xbf16>
    %c0_65 = arith.constant 0 : index
    %c0_66 = arith.constant 0 : index
    %c0_67 = arith.constant 0 : index
    %164 = vector.load %arg13[%c0_65, %c0_66, %c0_67] : memref<2x32x128xbf16, #tpu.memory_space<vmem>>, vector<1x32x128xbf16>
    %165 = vector.shape_cast %164 : vector<1x32x128xbf16> to vector<32x128xbf16>
    %cst_68 = arith.constant dense<0.000000e+00> : vector<96x128xf32>
    %166 = tpu.matmul %163, %165, %cst_68 {dimension_numbers = #tpu.dot_dimension_numbers<[1], [0], [0], [1], [0, 0, 1, 1], [], []>} : vector<96x32xbf16>, vector<32x128xbf16>, vector<96x128xf32> -> vector<96x128xf32>
    %c0_69 = arith.constant 0 : index
    %c0_70 = arith.constant 0 : index
    %c0_71 = arith.constant 0 : index
    %167 = vector.load %arg14[%c0_69, %c0_70, %c0_71] : memref<2x1x128xf32, #tpu.memory_space<vmem>>, vector<1x1x128xf32>
    %168 = vector.shape_cast %167 : vector<1x1x128xf32> to vector<1x128xf32>
    %169 = vector.broadcast %168 : vector<1x128xf32> to vector<96x128xf32>
    %170 = arith.addf %166, %169 : vector<96x128xf32>
    %cst_72 = arith.constant 5.000000e-01 : f32
    %171 = vector.broadcast %cst_72 : f32 to vector<96x128xf32>
    %172 = arith.mulf %171, %170 : vector<96x128xf32>
    %cst_73 = arith.constant 4.471500e-02 : f32
    %173 = vector.broadcast %cst_73 : f32 to vector<96x128xf32>
    %174 = arith.mulf %173, %170 : vector<96x128xf32>
    %175 = arith.mulf %174, %170 : vector<96x128xf32>
    %176 = arith.mulf %175, %170 : vector<96x128xf32>
    %177 = arith.addf %170, %176 : vector<96x128xf32>
    %cst_74 = arith.constant 0.797884583 : f32
    %178 = vector.broadcast %cst_74 : f32 to vector<96x128xf32>
    %179 = arith.mulf %178, %177 : vector<96x128xf32>
    %180 = math.tanh %179 : vector<96x128xf32>
    %cst_75 = arith.constant 1.000000e+00 : f32
    %181 = vector.broadcast %cst_75 : f32 to vector<96x128xf32>
    %182 = arith.addf %181, %180 : vector<96x128xf32>
    %183 = arith.mulf %172, %182 : vector<96x128xf32>
    %184 = arith.truncf %183 : vector<96x128xf32> to vector<96x128xbf16>
    %c0_76 = arith.constant 0 : index
    %c0_77 = arith.constant 0 : index
    %c0_78 = arith.constant 0 : index
    %185 = vector.load %arg15[%c0_76, %c0_77, %c0_78] : memref<2x128x32xbf16, #tpu.memory_space<vmem>>, vector<1x128x32xbf16>
    %186 = vector.shape_cast %185 : vector<1x128x32xbf16> to vector<128x32xbf16>
    %cst_79 = arith.constant dense<0.000000e+00> : vector<96x32xf32>
    %187 = tpu.matmul %184, %186, %cst_79 {dimension_numbers = #tpu.dot_dimension_numbers<[1], [0], [0], [1], [0, 0, 1, 1], [], []>} : vector<96x128xbf16>, vector<128x32xbf16>, vector<96x32xf32> -> vector<96x32xf32>
    %c0_80 = arith.constant 0 : index
    %c0_81 = arith.constant 0 : index
    %c0_82 = arith.constant 0 : index
    %188 = vector.load %arg16[%c0_80, %c0_81, %c0_82] : memref<2x1x32xf32, #tpu.memory_space<vmem>>, vector<1x1x32xf32>
    %189 = vector.shape_cast %188 : vector<1x1x32xf32> to vector<1x32xf32>
    %190 = vector.broadcast %189 : vector<1x32xf32> to vector<96x32xf32>
    %191 = arith.addf %187, %190 : vector<96x32xf32>
    %192 = arith.addf %136, %191 : vector<96x32xf32>
    %c1 = arith.constant 1 : index
    %c0_83 = arith.constant 0 : index
    %c0_84 = arith.constant 0 : index
    %193 = vector.load %arg5[%c1, %c0_83, %c0_84] : memref<2x1x32xf32, #tpu.memory_space<vmem>>, vector<1x1x32xf32>
    %194 = vector.shape_cast %193 : vector<1x1x32xf32> to vector<1x32xf32>
    %c1_85 = arith.constant 1 : index
    %c0_86 = arith.constant 0 : index
    %c0_87 = arith.constant 0 : index
    %195 = vector.load %arg6[%c1_85, %c0_86, %c0_87] : memref<2x1x32xf32, #tpu.memory_space<vmem>>, vector<1x1x32xf32>
    %196 = vector.shape_cast %195 : vector<1x1x32xf32> to vector<1x32xf32>
    %cst_88 = arith.constant dense<0.000000e+00> : vector<96xf32>
    %197 = vector.multi_reduction <add>, %192, %cst_88 [1] : vector<96x32xf32> to vector<96xf32>
    %198 = vector.shape_cast %197 : vector<96xf32> to vector<96x1xf32>
    %cst_89 = arith.constant 3.200000e+01 : f32
    %199 = vector.broadcast %cst_89 : f32 to vector<96x1xf32>
    %200 = arith.divf %198, %199 : vector<96x1xf32>
    %201 = vector.broadcast %200 : vector<96x1xf32> to vector<96x32xf32>
    %202 = arith.subf %192, %201 : vector<96x32xf32>
    %203 = arith.mulf %202, %202 : vector<96x32xf32>
    %cst_90 = arith.constant dense<0.000000e+00> : vector<96xf32>
    %204 = vector.multi_reduction <add>, %203, %cst_90 [1] : vector<96x32xf32> to vector<96xf32>
    %205 = vector.shape_cast %204 : vector<96xf32> to vector<96x1xf32>
    %cst_91 = arith.constant 3.200000e+01 : f32
    %206 = vector.broadcast %cst_91 : f32 to vector<96x1xf32>
    %207 = arith.divf %205, %206 : vector<96x1xf32>
    %208 = vector.broadcast %200 : vector<96x1xf32> to vector<96x32xf32>
    %209 = arith.subf %192, %208 : vector<96x32xf32>
    %cst_92 = arith.constant 9.99999974E-6 : f32
    %210 = vector.broadcast %cst_92 : f32 to vector<96x1xf32>
    %211 = arith.addf %207, %210 : vector<96x1xf32>
    %212 = math.rsqrt %211 : vector<96x1xf32>
    %213 = vector.broadcast %212 : vector<96x1xf32> to vector<96x32xf32>
    %214 = arith.mulf %209, %213 : vector<96x32xf32>
    %215 = vector.broadcast %194 : vector<1x32xf32> to vector<96x32xf32>
    %216 = arith.mulf %214, %215 : vector<96x32xf32>
    %217 = vector.broadcast %196 : vector<1x32xf32> to vector<96x32xf32>
    %218 = arith.addf %216, %217 : vector<96x32xf32>
    %219 = arith.truncf %218 : vector<96x32xf32> to vector<96x32xbf16>
    %c1_93 = arith.constant 1 : index
    %c0_94 = arith.constant 0 : index
    %c0_95 = arith.constant 0 : index
    %220 = vector.load %arg7[%c1_93, %c0_94, %c0_95] : memref<2x32x96xbf16, #tpu.memory_space<vmem>>, vector<1x32x96xbf16>
    %221 = vector.shape_cast %220 : vector<1x32x96xbf16> to vector<32x96xbf16>
    %cst_96 = arith.constant dense<0.000000e+00> : vector<96x96xf32>
    %222 = tpu.matmul %219, %221, %cst_96 {dimension_numbers = #tpu.dot_dimension_numbers<[1], [0], [0], [1], [0, 0, 1, 1], [], []>} : vector<96x32xbf16>, vector<32x96xbf16>, vector<96x96xf32> -> vector<96x96xf32>
    %c1_97 = arith.constant 1 : index
    %c0_98 = arith.constant 0 : index
    %c0_99 = arith.constant 0 : index
    %223 = vector.load %arg8[%c1_97, %c0_98, %c0_99] : memref<2x1x96xf32, #tpu.memory_space<vmem>>, vector<1x1x96xf32>
    %224 = vector.shape_cast %223 : vector<1x1x96xf32> to vector<1x96xf32>
    %225 = vector.broadcast %224 : vector<1x96xf32> to vector<96x96xf32>
    %226 = arith.addf %222, %225 : vector<96x96xf32>
    %227 = vector.extract_strided_slice %226 {offsets = [0, 0], sizes = [96, 16], strides = [1, 1]} : vector<96x96xf32> to vector<96x16xf32>
    %228 = arith.truncf %227 : vector<96x16xf32> to vector<96x16xbf16>
    %229 = vector.extract_strided_slice %226 {offsets = [0, 32], sizes = [96, 16], strides = [1, 1]} : vector<96x96xf32> to vector<96x16xf32>
    %230 = arith.truncf %229 : vector<96x16xf32> to vector<96x16xbf16>
    %231 = vector.extract_strided_slice %226 {offsets = [0, 64], sizes = [96, 16], strides = [1, 1]} : vector<96x96xf32> to vector<96x16xf32>
    %232 = arith.truncf %231 : vector<96x16xf32> to vector<96x16xbf16>
    %233 = vector.extract_strided_slice %228 {offsets = [0, 0], sizes = [32, 16], strides = [1, 1]} : vector<96x16xbf16> to vector<32x16xbf16>
    %234 = vector.extract_strided_slice %230 {offsets = [0, 0], sizes = [32, 16], strides = [1, 1]} : vector<96x16xbf16> to vector<32x16xbf16>
    %cst_100 = arith.constant dense<0.000000e+00> : vector<32x32xf32>
    %235 = tpu.matmul %233, %234, %cst_100 {dimension_numbers = #tpu.dot_dimension_numbers<[1], [1], [0], [0], [0, 0, 1, 0], [], []>} : vector<32x16xbf16>, vector<32x16xbf16>, vector<32x32xf32> -> vector<32x32xf32>
    %cst_101 = arith.constant 2.500000e-01 : f32
    %236 = vector.broadcast %cst_101 : f32 to vector<32x32xf32>
    %237 = arith.mulf %235, %236 : vector<32x32xf32>
    %cst_102 = arith.constant dense<0xFF800000> : vector<32xf32>
    %238 = vector.multi_reduction <maximumf>, %237, %cst_102 [1] : vector<32x32xf32> to vector<32xf32>
    %239 = vector.shape_cast %238 : vector<32xf32> to vector<32x1xf32>
    %240 = vector.broadcast %239 : vector<32x1xf32> to vector<32x32xf32>
    %241 = arith.subf %237, %240 : vector<32x32xf32>
    %242 = math.exp %241 : vector<32x32xf32>
    %cst_103 = arith.constant dense<0.000000e+00> : vector<32xf32>
    %243 = vector.multi_reduction <add>, %242, %cst_103 [1] : vector<32x32xf32> to vector<32xf32>
    %244 = vector.shape_cast %243 : vector<32xf32> to vector<32x1xf32>
    %245 = tpu.reciprocal %244 {approx = true} : vector<32x1xf32> -> vector<32x1xf32>
    %246 = vector.broadcast %245 : vector<32x1xf32> to vector<32x32xf32>
    %247 = arith.mulf %242, %246 : vector<32x32xf32>
    %248 = arith.truncf %247 : vector<32x32xf32> to vector<32x32xbf16>
    %249 = vector.extract_strided_slice %232 {offsets = [0, 0], sizes = [32, 16], strides = [1, 1]} : vector<96x16xbf16> to vector<32x16xbf16>
    %cst_104 = arith.constant dense<0.000000e+00> : vector<32x16xf32>
    %250 = tpu.matmul %248, %249, %cst_104 {dimension_numbers = #tpu.dot_dimension_numbers<[1], [0], [0], [1], [0, 0, 1, 1], [], []>} : vector<32x32xbf16>, vector<32x16xbf16>, vector<32x16xf32> -> vector<32x16xf32>
    %251 = vector.extract_strided_slice %228 {offsets = [32, 0], sizes = [64, 16], strides = [1, 1]} : vector<96x16xbf16> to vector<64x16xbf16>
    %cst_105 = arith.constant dense<0.000000e+00> : vector<64x96xf32>
    %252 = tpu.matmul %251, %230, %cst_105 {dimension_numbers = #tpu.dot_dimension_numbers<[1], [1], [0], [0], [0, 0, 1, 0], [], []>} : vector<64x16xbf16>, vector<96x16xbf16>, vector<64x96xf32> -> vector<64x96xf32>
    %cst_106 = arith.constant 2.500000e-01 : f32
    %253 = vector.broadcast %cst_106 : f32 to vector<64x96xf32>
    %254 = arith.mulf %252, %253 : vector<64x96xf32>
    %cst_107 = arith.constant dense<0xFF800000> : vector<64xf32>
    %255 = vector.multi_reduction <maximumf>, %254, %cst_107 [1] : vector<64x96xf32> to vector<64xf32>
    %256 = vector.shape_cast %255 : vector<64xf32> to vector<64x1xf32>
    %257 = vector.broadcast %256 : vector<64x1xf32> to vector<64x96xf32>
    %258 = arith.subf %254, %257 : vector<64x96xf32>
    %259 = math.exp %258 : vector<64x96xf32>
    %cst_108 = arith.constant dense<0.000000e+00> : vector<64xf32>
    %260 = vector.multi_reduction <add>, %259, %cst_108 [1] : vector<64x96xf32> to vector<64xf32>
    %261 = vector.shape_cast %260 : vector<64xf32> to vector<64x1xf32>
    %262 = tpu.reciprocal %261 {approx = true} : vector<64x1xf32> -> vector<64x1xf32>
    %263 = vector.broadcast %262 : vector<64x1xf32> to vector<64x96xf32>
    %264 = arith.mulf %259, %263 : vector<64x96xf32>
    %265 = arith.truncf %264 : vector<64x96xf32> to vector<64x96xbf16>
    %cst_109 = arith.constant dense<0.000000e+00> : vector<64x16xf32>
    %266 = tpu.matmul %265, %232, %cst_109 {dimension_numbers = #tpu.dot_dimension_numbers<[1], [0], [0], [1], [0, 0, 1, 1], [], []>} : vector<64x96xbf16>, vector<96x16xbf16>, vector<64x16xf32> -> vector<64x16xf32>
    %267 = tpu.concatenate %250, %266 in 0 : vector<32x16xf32>, vector<64x16xf32> -> vector<96x16xf32>
    %268 = vector.extract_strided_slice %226 {offsets = [0, 16], sizes = [96, 16], strides = [1, 1]} : vector<96x96xf32> to vector<96x16xf32>
    %269 = arith.truncf %268 : vector<96x16xf32> to vector<96x16xbf16>
    %270 = vector.extract_strided_slice %226 {offsets = [0, 48], sizes = [96, 16], strides = [1, 1]} : vector<96x96xf32> to vector<96x16xf32>
    %271 = arith.truncf %270 : vector<96x16xf32> to vector<96x16xbf16>
    %272 = vector.extract_strided_slice %226 {offsets = [0, 80], sizes = [96, 16], strides = [1, 1]} : vector<96x96xf32> to vector<96x16xf32>
    %273 = arith.truncf %272 : vector<96x16xf32> to vector<96x16xbf16>
    %274 = vector.extract_strided_slice %269 {offsets = [0, 0], sizes = [32, 16], strides = [1, 1]} : vector<96x16xbf16> to vector<32x16xbf16>
    %275 = vector.extract_strided_slice %271 {offsets = [0, 0], sizes = [32, 16], strides = [1, 1]} : vector<96x16xbf16> to vector<32x16xbf16>
    %cst_110 = arith.constant dense<0.000000e+00> : vector<32x32xf32>
    %276 = tpu.matmul %274, %275, %cst_110 {dimension_numbers = #tpu.dot_dimension_numbers<[1], [1], [0], [0], [0, 0, 1, 0], [], []>} : vector<32x16xbf16>, vector<32x16xbf16>, vector<32x32xf32> -> vector<32x32xf32>
    %cst_111 = arith.constant 2.500000e-01 : f32
    %277 = vector.broadcast %cst_111 : f32 to vector<32x32xf32>
    %278 = arith.mulf %276, %277 : vector<32x32xf32>
    %cst_112 = arith.constant dense<0xFF800000> : vector<32xf32>
    %279 = vector.multi_reduction <maximumf>, %278, %cst_112 [1] : vector<32x32xf32> to vector<32xf32>
    %280 = vector.shape_cast %279 : vector<32xf32> to vector<32x1xf32>
    %281 = vector.broadcast %280 : vector<32x1xf32> to vector<32x32xf32>
    %282 = arith.subf %278, %281 : vector<32x32xf32>
    %283 = math.exp %282 : vector<32x32xf32>
    %cst_113 = arith.constant dense<0.000000e+00> : vector<32xf32>
    %284 = vector.multi_reduction <add>, %283, %cst_113 [1] : vector<32x32xf32> to vector<32xf32>
    %285 = vector.shape_cast %284 : vector<32xf32> to vector<32x1xf32>
    %286 = tpu.reciprocal %285 {approx = true} : vector<32x1xf32> -> vector<32x1xf32>
    %287 = vector.broadcast %286 : vector<32x1xf32> to vector<32x32xf32>
    %288 = arith.mulf %283, %287 : vector<32x32xf32>
    %289 = arith.truncf %288 : vector<32x32xf32> to vector<32x32xbf16>
    %290 = vector.extract_strided_slice %273 {offsets = [0, 0], sizes = [32, 16], strides = [1, 1]} : vector<96x16xbf16> to vector<32x16xbf16>
    %cst_114 = arith.constant dense<0.000000e+00> : vector<32x16xf32>
    %291 = tpu.matmul %289, %290, %cst_114 {dimension_numbers = #tpu.dot_dimension_numbers<[1], [0], [0], [1], [0, 0, 1, 1], [], []>} : vector<32x32xbf16>, vector<32x16xbf16>, vector<32x16xf32> -> vector<32x16xf32>
    %292 = vector.extract_strided_slice %269 {offsets = [32, 0], sizes = [64, 16], strides = [1, 1]} : vector<96x16xbf16> to vector<64x16xbf16>
    %cst_115 = arith.constant dense<0.000000e+00> : vector<64x96xf32>
    %293 = tpu.matmul %292, %271, %cst_115 {dimension_numbers = #tpu.dot_dimension_numbers<[1], [1], [0], [0], [0, 0, 1, 0], [], []>} : vector<64x16xbf16>, vector<96x16xbf16>, vector<64x96xf32> -> vector<64x96xf32>
    %cst_116 = arith.constant 2.500000e-01 : f32
    %294 = vector.broadcast %cst_116 : f32 to vector<64x96xf32>
    %295 = arith.mulf %293, %294 : vector<64x96xf32>
    %cst_117 = arith.constant dense<0xFF800000> : vector<64xf32>
    %296 = vector.multi_reduction <maximumf>, %295, %cst_117 [1] : vector<64x96xf32> to vector<64xf32>
    %297 = vector.shape_cast %296 : vector<64xf32> to vector<64x1xf32>
    %298 = vector.broadcast %297 : vector<64x1xf32> to vector<64x96xf32>
    %299 = arith.subf %295, %298 : vector<64x96xf32>
    %300 = math.exp %299 : vector<64x96xf32>
    %cst_118 = arith.constant dense<0.000000e+00> : vector<64xf32>
    %301 = vector.multi_reduction <add>, %300, %cst_118 [1] : vector<64x96xf32> to vector<64xf32>
    %302 = vector.shape_cast %301 : vector<64xf32> to vector<64x1xf32>
    %303 = tpu.reciprocal %302 {approx = true} : vector<64x1xf32> -> vector<64x1xf32>
    %304 = vector.broadcast %303 : vector<64x1xf32> to vector<64x96xf32>
    %305 = arith.mulf %300, %304 : vector<64x96xf32>
    %306 = arith.truncf %305 : vector<64x96xf32> to vector<64x96xbf16>
    %cst_119 = arith.constant dense<0.000000e+00> : vector<64x16xf32>
    %307 = tpu.matmul %306, %273, %cst_119 {dimension_numbers = #tpu.dot_dimension_numbers<[1], [0], [0], [1], [0, 0, 1, 1], [], []>} : vector<64x96xbf16>, vector<96x16xbf16>, vector<64x16xf32> -> vector<64x16xf32>
    %308 = tpu.concatenate %291, %307 in 0 : vector<32x16xf32>, vector<64x16xf32> -> vector<96x16xf32>
    %309 = tpu.concatenate %267, %308 in 1 : vector<96x16xf32>, vector<96x16xf32> -> vector<96x32xf32>
    %310 = arith.truncf %309 : vector<96x32xf32> to vector<96x32xbf16>
    %c1_120 = arith.constant 1 : index
    %c0_121 = arith.constant 0 : index
    %c0_122 = arith.constant 0 : index
    %311 = vector.load %arg9[%c1_120, %c0_121, %c0_122] : memref<2x32x32xbf16, #tpu.memory_space<vmem>>, vector<1x32x32xbf16>
    %312 = vector.shape_cast %311 : vector<1x32x32xbf16> to vector<32x32xbf16>
    %cst_123 = arith.constant dense<0.000000e+00> : vector<96x32xf32>
    %313 = tpu.matmul %310, %312, %cst_123 {dimension_numbers = #tpu.dot_dimension_numbers<[1], [0], [0], [1], [0, 0, 1, 1], [], []>} : vector<96x32xbf16>, vector<32x32xbf16>, vector<96x32xf32> -> vector<96x32xf32>
    %c1_124 = arith.constant 1 : index
    %c0_125 = arith.constant 0 : index
    %c0_126 = arith.constant 0 : index
    %314 = vector.load %arg10[%c1_124, %c0_125, %c0_126] : memref<2x1x32xf32, #tpu.memory_space<vmem>>, vector<1x1x32xf32>
    %315 = vector.shape_cast %314 : vector<1x1x32xf32> to vector<1x32xf32>
    %316 = vector.broadcast %315 : vector<1x32xf32> to vector<96x32xf32>
    %317 = arith.addf %313, %316 : vector<96x32xf32>
    %318 = arith.addf %192, %317 : vector<96x32xf32>
    %c1_127 = arith.constant 1 : index
    %c0_128 = arith.constant 0 : index
    %c0_129 = arith.constant 0 : index
    %319 = vector.load %arg11[%c1_127, %c0_128, %c0_129] : memref<2x1x32xf32, #tpu.memory_space<vmem>>, vector<1x1x32xf32>
    %320 = vector.shape_cast %319 : vector<1x1x32xf32> to vector<1x32xf32>
    %c1_130 = arith.constant 1 : index
    %c0_131 = arith.constant 0 : index
    %c0_132 = arith.constant 0 : index
    %321 = vector.load %arg12[%c1_130, %c0_131, %c0_132] : memref<2x1x32xf32, #tpu.memory_space<vmem>>, vector<1x1x32xf32>
    %322 = vector.shape_cast %321 : vector<1x1x32xf32> to vector<1x32xf32>
    %cst_133 = arith.constant dense<0.000000e+00> : vector<96xf32>
    %323 = vector.multi_reduction <add>, %318, %cst_133 [1] : vector<96x32xf32> to vector<96xf32>
    %324 = vector.shape_cast %323 : vector<96xf32> to vector<96x1xf32>
    %cst_134 = arith.constant 3.200000e+01 : f32
    %325 = vector.broadcast %cst_134 : f32 to vector<96x1xf32>
    %326 = arith.divf %324, %325 : vector<96x1xf32>
    %327 = vector.broadcast %326 : vector<96x1xf32> to vector<96x32xf32>
    %328 = arith.subf %318, %327 : vector<96x32xf32>
    %329 = arith.mulf %328, %328 : vector<96x32xf32>
    %cst_135 = arith.constant dense<0.000000e+00> : vector<96xf32>
    %330 = vector.multi_reduction <add>, %329, %cst_135 [1] : vector<96x32xf32> to vector<96xf32>
    %331 = vector.shape_cast %330 : vector<96xf32> to vector<96x1xf32>
    %cst_136 = arith.constant 3.200000e+01 : f32
    %332 = vector.broadcast %cst_136 : f32 to vector<96x1xf32>
    %333 = arith.divf %331, %332 : vector<96x1xf32>
    %334 = vector.broadcast %326 : vector<96x1xf32> to vector<96x32xf32>
    %335 = arith.subf %318, %334 : vector<96x32xf32>
    %cst_137 = arith.constant 9.99999974E-6 : f32
    %336 = vector.broadcast %cst_137 : f32 to vector<96x1xf32>
    %337 = arith.addf %333, %336 : vector<96x1xf32>
    %338 = math.rsqrt %337 : vector<96x1xf32>
    %339 = vector.broadcast %338 : vector<96x1xf32> to vector<96x32xf32>
    %340 = arith.mulf %335, %339 : vector<96x32xf32>
    %341 = vector.broadcast %320 : vector<1x32xf32> to vector<96x32xf32>
    %342 = arith.mulf %340, %341 : vector<96x32xf32>
    %343 = vector.broadcast %322 : vector<1x32xf32> to vector<96x32xf32>
    %344 = arith.addf %342, %343 : vector<96x32xf32>
    %345 = arith.truncf %344 : vector<96x32xf32> to vector<96x32xbf16>
    %c1_138 = arith.constant 1 : index
    %c0_139 = arith.constant 0 : index
    %c0_140 = arith.constant 0 : index
    %346 = vector.load %arg13[%c1_138, %c0_139, %c0_140] : memref<2x32x128xbf16, #tpu.memory_space<vmem>>, vector<1x32x128xbf16>
    %347 = vector.shape_cast %346 : vector<1x32x128xbf16> to vector<32x128xbf16>
    %cst_141 = arith.constant dense<0.000000e+00> : vector<96x128xf32>
    %348 = tpu.matmul %345, %347, %cst_141 {dimension_numbers = #tpu.dot_dimension_numbers<[1], [0], [0], [1], [0, 0, 1, 1], [], []>} : vector<96x32xbf16>, vector<32x128xbf16>, vector<96x128xf32> -> vector<96x128xf32>
    %c1_142 = arith.constant 1 : index
    %c0_143 = arith.constant 0 : index
    %c0_144 = arith.constant 0 : index
    %349 = vector.load %arg14[%c1_142, %c0_143, %c0_144] : memref<2x1x128xf32, #tpu.memory_space<vmem>>, vector<1x1x128xf32>
    %350 = vector.shape_cast %349 : vector<1x1x128xf32> to vector<1x128xf32>
    %351 = vector.broadcast %350 : vector<1x128xf32> to vector<96x128xf32>
    %352 = arith.addf %348, %351 : vector<96x128xf32>
    %cst_145 = arith.constant 5.000000e-01 : f32
    %353 = vector.broadcast %cst_145 : f32 to vector<96x128xf32>
    %354 = arith.mulf %353, %352 : vector<96x128xf32>
    %cst_146 = arith.constant 4.471500e-02 : f32
    %355 = vector.broadcast %cst_146 : f32 to vector<96x128xf32>
    %356 = arith.mulf %355, %352 : vector<96x128xf32>
    %357 = arith.mulf %356, %352 : vector<96x128xf32>
    %358 = arith.mulf %357, %352 : vector<96x128xf32>
    %359 = arith.addf %352, %358 : vector<96x128xf32>
    %cst_147 = arith.constant 0.797884583 : f32
    %360 = vector.broadcast %cst_147 : f32 to vector<96x128xf32>
    %361 = arith.mulf %360, %359 : vector<96x128xf32>
    %362 = math.tanh %361 : vector<96x128xf32>
    %cst_148 = arith.constant 1.000000e+00 : f32
    %363 = vector.broadcast %cst_148 : f32 to vector<96x128xf32>
    %364 = arith.addf %363, %362 : vector<96x128xf32>
    %365 = arith.mulf %354, %364 : vector<96x128xf32>
    %366 = arith.truncf %365 : vector<96x128xf32> to vector<96x128xbf16>
    %c1_149 = arith.constant 1 : index
    %c0_150 = arith.constant 0 : index
    %c0_151 = arith.constant 0 : index
    %367 = vector.load %arg15[%c1_149, %c0_150, %c0_151] : memref<2x128x32xbf16, #tpu.memory_space<vmem>>, vector<1x128x32xbf16>
    %368 = vector.shape_cast %367 : vector<1x128x32xbf16> to vector<128x32xbf16>
    %cst_152 = arith.constant dense<0.000000e+00> : vector<96x32xf32>
    %369 = tpu.matmul %366, %368, %cst_152 {dimension_numbers = #tpu.dot_dimension_numbers<[1], [0], [0], [1], [0, 0, 1, 1], [], []>} : vector<96x128xbf16>, vector<128x32xbf16>, vector<96x32xf32> -> vector<96x32xf32>
    %c1_153 = arith.constant 1 : index
    %c0_154 = arith.constant 0 : index
    %c0_155 = arith.constant 0 : index
    %370 = vector.load %arg16[%c1_153, %c0_154, %c0_155] : memref<2x1x32xf32, #tpu.memory_space<vmem>>, vector<1x1x32xf32>
    %371 = vector.shape_cast %370 : vector<1x1x32xf32> to vector<1x32xf32>
    %372 = vector.broadcast %371 : vector<1x32xf32> to vector<96x32xf32>
    %373 = arith.addf %369, %372 : vector<96x32xf32>
    %374 = arith.addf %318, %373 : vector<96x32xf32>
    %375 = vector.extract_strided_slice %374 {offsets = [32, 0], sizes = [64, 32], strides = [1, 1]} : vector<96x32xf32> to vector<64x32xf32>
    %376 = tpu.concatenate %375, %375 in 1 : vector<64x32xf32>, vector<64x32xf32> -> vector<64x64xf32>
    %377 = tpu.iota {dimensions = array<i32: 0>} : vector<64x1xi32>
    %378 = arith.sitofp %377 : vector<64x1xi32> to vector<64x1xf32>
    %cst_156 = arith.constant 1.250000e-01 : f32
    %379 = vector.broadcast %cst_156 : f32 to vector<64x1xf32>
    %380 = arith.mulf %378, %379 : vector<64x1xf32>
    %381 = math.floor %380 : vector<64x1xf32>
    %cst_157 = arith.constant 8.000000e+00 : f32
    %382 = vector.broadcast %cst_157 : f32 to vector<64x1xf32>
    %383 = arith.mulf %381, %382 : vector<64x1xf32>
    %384 = arith.subf %378, %383 : vector<64x1xf32>
    %cst_158 = arith.constant -1.000000e+00 : f32
    %385 = vector.broadcast %cst_158 : f32 to vector<64x1xf32>
    %386 = arith.addf %381, %385 : vector<64x1xf32>
    %cst_159 = arith.constant 0.000000e+00 : f32
    %387 = vector.broadcast %cst_159 : f32 to vector<64x1xf32>
    %388 = arith.cmpf oge, %386, %387 : vector<64x1xf32>
    %cst_160 = arith.constant -1.000000e+00 : f32
    %389 = vector.broadcast %cst_160 : f32 to vector<64x1xf32>
    %390 = arith.addf %381, %389 : vector<64x1xf32>
    %cst_161 = arith.constant 7.000000e+00 : f32
    %391 = vector.broadcast %cst_161 : f32 to vector<64x1xf32>
    %392 = arith.cmpf ole, %390, %391 : vector<64x1xf32>
    %393 = arith.andi %388, %392 : vector<64x1xi1>
    %cst_162 = arith.constant -1.000000e+00 : f32
    %394 = vector.broadcast %cst_162 : f32 to vector<64x1xf32>
    %395 = arith.addf %384, %394 : vector<64x1xf32>
    %cst_163 = arith.constant 0.000000e+00 : f32
    %396 = vector.broadcast %cst_163 : f32 to vector<64x1xf32>
    %397 = arith.cmpf oge, %395, %396 : vector<64x1xf32>
    %398 = arith.andi %393, %397 : vector<64x1xi1>
    %cst_164 = arith.constant -1.000000e+00 : f32
    %399 = vector.broadcast %cst_164 : f32 to vector<64x1xf32>
    %400 = arith.addf %384, %399 : vector<64x1xf32>
    %cst_165 = arith.constant 7.000000e+00 : f32
    %401 = vector.broadcast %cst_165 : f32 to vector<64x1xf32>
    %402 = arith.cmpf ole, %400, %401 : vector<64x1xf32>
    %403 = arith.andi %398, %402 : vector<64x1xi1>
    %cst_166 = arith.constant -1.000000e+00 : f32
    %404 = vector.broadcast %cst_166 : f32 to vector<64x1xf32>
    %405 = arith.addf %381, %404 : vector<64x1xf32>
    %cst_167 = arith.constant 0.000000e+00 : f32
    %406 = vector.broadcast %cst_167 : f32 to vector<64x1xf32>
    %407 = arith.cmpf oge, %405, %406 : vector<64x1xf32>
    %cst_168 = arith.constant -1.000000e+00 : f32
    %408 = vector.broadcast %cst_168 : f32 to vector<64x1xf32>
    %409 = arith.addf %381, %408 : vector<64x1xf32>
    %cst_169 = arith.constant 7.000000e+00 : f32
    %410 = vector.broadcast %cst_169 : f32 to vector<64x1xf32>
    %411 = arith.cmpf ole, %409, %410 : vector<64x1xf32>
    %412 = arith.andi %407, %411 : vector<64x1xi1>
    %cst_170 = arith.constant 0.000000e+00 : f32
    %413 = vector.broadcast %cst_170 : f32 to vector<64x1xf32>
    %414 = arith.addf %384, %413 : vector<64x1xf32>
    %cst_171 = arith.constant 0.000000e+00 : f32
    %415 = vector.broadcast %cst_171 : f32 to vector<64x1xf32>
    %416 = arith.cmpf oge, %414, %415 : vector<64x1xf32>
    %417 = arith.andi %412, %416 : vector<64x1xi1>
    %cst_172 = arith.constant 0.000000e+00 : f32
    %418 = vector.broadcast %cst_172 : f32 to vector<64x1xf32>
    %419 = arith.addf %384, %418 : vector<64x1xf32>
    %cst_173 = arith.constant 7.000000e+00 : f32
    %420 = vector.broadcast %cst_173 : f32 to vector<64x1xf32>
    %421 = arith.cmpf ole, %419, %420 : vector<64x1xf32>
    %422 = arith.andi %417, %421 : vector<64x1xi1>
    %cst_174 = arith.constant -1.000000e+00 : f32
    %423 = vector.broadcast %cst_174 : f32 to vector<64x1xf32>
    %424 = arith.addf %381, %423 : vector<64x1xf32>
    %cst_175 = arith.constant 0.000000e+00 : f32
    %425 = vector.broadcast %cst_175 : f32 to vector<64x1xf32>
    %426 = arith.cmpf oge, %424, %425 : vector<64x1xf32>
    %cst_176 = arith.constant -1.000000e+00 : f32
    %427 = vector.broadcast %cst_176 : f32 to vector<64x1xf32>
    %428 = arith.addf %381, %427 : vector<64x1xf32>
    %cst_177 = arith.constant 7.000000e+00 : f32
    %429 = vector.broadcast %cst_177 : f32 to vector<64x1xf32>
    %430 = arith.cmpf ole, %428, %429 : vector<64x1xf32>
    %431 = arith.andi %426, %430 : vector<64x1xi1>
    %cst_178 = arith.constant 1.000000e+00 : f32
    %432 = vector.broadcast %cst_178 : f32 to vector<64x1xf32>
    %433 = arith.addf %384, %432 : vector<64x1xf32>
    %cst_179 = arith.constant 0.000000e+00 : f32
    %434 = vector.broadcast %cst_179 : f32 to vector<64x1xf32>
    %435 = arith.cmpf oge, %433, %434 : vector<64x1xf32>
    %436 = arith.andi %431, %435 : vector<64x1xi1>
    %cst_180 = arith.constant 1.000000e+00 : f32
    %437 = vector.broadcast %cst_180 : f32 to vector<64x1xf32>
    %438 = arith.addf %384, %437 : vector<64x1xf32>
    %cst_181 = arith.constant 7.000000e+00 : f32
    %439 = vector.broadcast %cst_181 : f32 to vector<64x1xf32>
    %440 = arith.cmpf ole, %438, %439 : vector<64x1xf32>
    %441 = arith.andi %436, %440 : vector<64x1xi1>
    %cst_182 = arith.constant 0.000000e+00 : f32
    %442 = vector.broadcast %cst_182 : f32 to vector<64x1xf32>
    %443 = arith.addf %381, %442 : vector<64x1xf32>
    %cst_183 = arith.constant 0.000000e+00 : f32
    %444 = vector.broadcast %cst_183 : f32 to vector<64x1xf32>
    %445 = arith.cmpf oge, %443, %444 : vector<64x1xf32>
    %cst_184 = arith.constant 0.000000e+00 : f32
    %446 = vector.broadcast %cst_184 : f32 to vector<64x1xf32>
    %447 = arith.addf %381, %446 : vector<64x1xf32>
    %cst_185 = arith.constant 7.000000e+00 : f32
    %448 = vector.broadcast %cst_185 : f32 to vector<64x1xf32>
    %449 = arith.cmpf ole, %447, %448 : vector<64x1xf32>
    %450 = arith.andi %445, %449 : vector<64x1xi1>
    %cst_186 = arith.constant -1.000000e+00 : f32
    %451 = vector.broadcast %cst_186 : f32 to vector<64x1xf32>
    %452 = arith.addf %384, %451 : vector<64x1xf32>
    %cst_187 = arith.constant 0.000000e+00 : f32
    %453 = vector.broadcast %cst_187 : f32 to vector<64x1xf32>
    %454 = arith.cmpf oge, %452, %453 : vector<64x1xf32>
    %455 = arith.andi %450, %454 : vector<64x1xi1>
    %cst_188 = arith.constant -1.000000e+00 : f32
    %456 = vector.broadcast %cst_188 : f32 to vector<64x1xf32>
    %457 = arith.addf %384, %456 : vector<64x1xf32>
    %cst_189 = arith.constant 7.000000e+00 : f32
    %458 = vector.broadcast %cst_189 : f32 to vector<64x1xf32>
    %459 = arith.cmpf ole, %457, %458 : vector<64x1xf32>
    %460 = arith.andi %455, %459 : vector<64x1xi1>
    %cst_190 = arith.constant 0.000000e+00 : f32
    %461 = vector.broadcast %cst_190 : f32 to vector<64x1xf32>
    %462 = arith.addf %381, %461 : vector<64x1xf32>
    %cst_191 = arith.constant 0.000000e+00 : f32
    %463 = vector.broadcast %cst_191 : f32 to vector<64x1xf32>
    %464 = arith.cmpf oge, %462, %463 : vector<64x1xf32>
    %cst_192 = arith.constant 0.000000e+00 : f32
    %465 = vector.broadcast %cst_192 : f32 to vector<64x1xf32>
    %466 = arith.addf %381, %465 : vector<64x1xf32>
    %cst_193 = arith.constant 7.000000e+00 : f32
    %467 = vector.broadcast %cst_193 : f32 to vector<64x1xf32>
    %468 = arith.cmpf ole, %466, %467 : vector<64x1xf32>
    %469 = arith.andi %464, %468 : vector<64x1xi1>
    %cst_194 = arith.constant 0.000000e+00 : f32
    %470 = vector.broadcast %cst_194 : f32 to vector<64x1xf32>
    %471 = arith.addf %384, %470 : vector<64x1xf32>
    %cst_195 = arith.constant 0.000000e+00 : f32
    %472 = vector.broadcast %cst_195 : f32 to vector<64x1xf32>
    %473 = arith.cmpf oge, %471, %472 : vector<64x1xf32>
    %474 = arith.andi %469, %473 : vector<64x1xi1>
    %cst_196 = arith.constant 0.000000e+00 : f32
    %475 = vector.broadcast %cst_196 : f32 to vector<64x1xf32>
    %476 = arith.addf %384, %475 : vector<64x1xf32>
    %cst_197 = arith.constant 7.000000e+00 : f32
    %477 = vector.broadcast %cst_197 : f32 to vector<64x1xf32>
    %478 = arith.cmpf ole, %476, %477 : vector<64x1xf32>
    %479 = arith.andi %474, %478 : vector<64x1xi1>
    %cst_198 = arith.constant 0.000000e+00 : f32
    %480 = vector.broadcast %cst_198 : f32 to vector<64x1xf32>
    %481 = arith.addf %381, %480 : vector<64x1xf32>
    %cst_199 = arith.constant 0.000000e+00 : f32
    %482 = vector.broadcast %cst_199 : f32 to vector<64x1xf32>
    %483 = arith.cmpf oge, %481, %482 : vector<64x1xf32>
    %cst_200 = arith.constant 0.000000e+00 : f32
    %484 = vector.broadcast %cst_200 : f32 to vector<64x1xf32>
    %485 = arith.addf %381, %484 : vector<64x1xf32>
    %cst_201 = arith.constant 7.000000e+00 : f32
    %486 = vector.broadcast %cst_201 : f32 to vector<64x1xf32>
    %487 = arith.cmpf ole, %485, %486 : vector<64x1xf32>
    %488 = arith.andi %483, %487 : vector<64x1xi1>
    %cst_202 = arith.constant 1.000000e+00 : f32
    %489 = vector.broadcast %cst_202 : f32 to vector<64x1xf32>
    %490 = arith.addf %384, %489 : vector<64x1xf32>
    %cst_203 = arith.constant 0.000000e+00 : f32
    %491 = vector.broadcast %cst_203 : f32 to vector<64x1xf32>
    %492 = arith.cmpf oge, %490, %491 : vector<64x1xf32>
    %493 = arith.andi %488, %492 : vector<64x1xi1>
    %cst_204 = arith.constant 1.000000e+00 : f32
    %494 = vector.broadcast %cst_204 : f32 to vector<64x1xf32>
    %495 = arith.addf %384, %494 : vector<64x1xf32>
    %cst_205 = arith.constant 7.000000e+00 : f32
    %496 = vector.broadcast %cst_205 : f32 to vector<64x1xf32>
    %497 = arith.cmpf ole, %495, %496 : vector<64x1xf32>
    %498 = arith.andi %493, %497 : vector<64x1xi1>
    %cst_206 = arith.constant 1.000000e+00 : f32
    %499 = vector.broadcast %cst_206 : f32 to vector<64x1xf32>
    %500 = arith.addf %381, %499 : vector<64x1xf32>
    %cst_207 = arith.constant 0.000000e+00 : f32
    %501 = vector.broadcast %cst_207 : f32 to vector<64x1xf32>
    %502 = arith.cmpf oge, %500, %501 : vector<64x1xf32>
    %cst_208 = arith.constant 1.000000e+00 : f32
    %503 = vector.broadcast %cst_208 : f32 to vector<64x1xf32>
    %504 = arith.addf %381, %503 : vector<64x1xf32>
    %cst_209 = arith.constant 7.000000e+00 : f32
    %505 = vector.broadcast %cst_209 : f32 to vector<64x1xf32>
    %506 = arith.cmpf ole, %504, %505 : vector<64x1xf32>
    %507 = arith.andi %502, %506 : vector<64x1xi1>
    %cst_210 = arith.constant -1.000000e+00 : f32
    %508 = vector.broadcast %cst_210 : f32 to vector<64x1xf32>
    %509 = arith.addf %384, %508 : vector<64x1xf32>
    %cst_211 = arith.constant 0.000000e+00 : f32
    %510 = vector.broadcast %cst_211 : f32 to vector<64x1xf32>
    %511 = arith.cmpf oge, %509, %510 : vector<64x1xf32>
    %512 = arith.andi %507, %511 : vector<64x1xi1>
    %cst_212 = arith.constant -1.000000e+00 : f32
    %513 = vector.broadcast %cst_212 : f32 to vector<64x1xf32>
    %514 = arith.addf %384, %513 : vector<64x1xf32>
    %cst_213 = arith.constant 7.000000e+00 : f32
    %515 = vector.broadcast %cst_213 : f32 to vector<64x1xf32>
    %516 = arith.cmpf ole, %514, %515 : vector<64x1xf32>
    %517 = arith.andi %512, %516 : vector<64x1xi1>
    %cst_214 = arith.constant 1.000000e+00 : f32
    %518 = vector.broadcast %cst_214 : f32 to vector<64x1xf32>
    %519 = arith.addf %381, %518 : vector<64x1xf32>
    %cst_215 = arith.constant 0.000000e+00 : f32
    %520 = vector.broadcast %cst_215 : f32 to vector<64x1xf32>
    %521 = arith.cmpf oge, %519, %520 : vector<64x1xf32>
    %cst_216 = arith.constant 1.000000e+00 : f32
    %522 = vector.broadcast %cst_216 : f32 to vector<64x1xf32>
    %523 = arith.addf %381, %522 : vector<64x1xf32>
    %cst_217 = arith.constant 7.000000e+00 : f32
    %524 = vector.broadcast %cst_217 : f32 to vector<64x1xf32>
    %525 = arith.cmpf ole, %523, %524 : vector<64x1xf32>
    %526 = arith.andi %521, %525 : vector<64x1xi1>
    %cst_218 = arith.constant 0.000000e+00 : f32
    %527 = vector.broadcast %cst_218 : f32 to vector<64x1xf32>
    %528 = arith.addf %384, %527 : vector<64x1xf32>
    %cst_219 = arith.constant 0.000000e+00 : f32
    %529 = vector.broadcast %cst_219 : f32 to vector<64x1xf32>
    %530 = arith.cmpf oge, %528, %529 : vector<64x1xf32>
    %531 = arith.andi %526, %530 : vector<64x1xi1>
    %cst_220 = arith.constant 0.000000e+00 : f32
    %532 = vector.broadcast %cst_220 : f32 to vector<64x1xf32>
    %533 = arith.addf %384, %532 : vector<64x1xf32>
    %cst_221 = arith.constant 7.000000e+00 : f32
    %534 = vector.broadcast %cst_221 : f32 to vector<64x1xf32>
    %535 = arith.cmpf ole, %533, %534 : vector<64x1xf32>
    %536 = arith.andi %531, %535 : vector<64x1xi1>
    %cst_222 = arith.constant 1.000000e+00 : f32
    %537 = vector.broadcast %cst_222 : f32 to vector<64x1xf32>
    %538 = arith.addf %381, %537 : vector<64x1xf32>
    %cst_223 = arith.constant 0.000000e+00 : f32
    %539 = vector.broadcast %cst_223 : f32 to vector<64x1xf32>
    %540 = arith.cmpf oge, %538, %539 : vector<64x1xf32>
    %cst_224 = arith.constant 1.000000e+00 : f32
    %541 = vector.broadcast %cst_224 : f32 to vector<64x1xf32>
    %542 = arith.addf %381, %541 : vector<64x1xf32>
    %cst_225 = arith.constant 7.000000e+00 : f32
    %543 = vector.broadcast %cst_225 : f32 to vector<64x1xf32>
    %544 = arith.cmpf ole, %542, %543 : vector<64x1xf32>
    %545 = arith.andi %540, %544 : vector<64x1xi1>
    %cst_226 = arith.constant 1.000000e+00 : f32
    %546 = vector.broadcast %cst_226 : f32 to vector<64x1xf32>
    %547 = arith.addf %384, %546 : vector<64x1xf32>
    %cst_227 = arith.constant 0.000000e+00 : f32
    %548 = vector.broadcast %cst_227 : f32 to vector<64x1xf32>
    %549 = arith.cmpf oge, %547, %548 : vector<64x1xf32>
    %550 = arith.andi %545, %549 : vector<64x1xi1>
    %cst_228 = arith.constant 1.000000e+00 : f32
    %551 = vector.broadcast %cst_228 : f32 to vector<64x1xf32>
    %552 = arith.addf %384, %551 : vector<64x1xf32>
    %cst_229 = arith.constant 7.000000e+00 : f32
    %553 = vector.broadcast %cst_229 : f32 to vector<64x1xf32>
    %554 = arith.cmpf ole, %552, %553 : vector<64x1xf32>
    %555 = arith.andi %550, %554 : vector<64x1xi1>
    %c9_i32 = arith.constant 9 : i32
    %556 = tpu.dynamic_rotate %376 by %c9_i32 dim 0 : vector<64x64xf32>, i32 -> vector<64x64xf32>
    %cst_230 = arith.constant 0.000000e+00 : f32
    %557 = vector.shape_cast %403 : vector<64x1xi1> to vector<64x1xi1>
    %558 = vector.broadcast %557 : vector<64x1xi1> to vector<64x64xi1>
    %559 = vector.broadcast %cst_230 : f32 to vector<64x64xf32>
    %560 = arith.select %558, %556, %559 : vector<64x64xi1>, vector<64x64xf32>
    %561 = arith.truncf %560 : vector<64x64xf32> to vector<64x64xbf16>
    %c8_i32 = arith.constant 8 : i32
    %562 = tpu.dynamic_rotate %376 by %c8_i32 dim 0 : vector<64x64xf32>, i32 -> vector<64x64xf32>
    %cst_231 = arith.constant 0.000000e+00 : f32
    %563 = vector.shape_cast %422 : vector<64x1xi1> to vector<64x1xi1>
    %564 = vector.broadcast %563 : vector<64x1xi1> to vector<64x64xi1>
    %565 = vector.broadcast %cst_231 : f32 to vector<64x64xf32>
    %566 = arith.select %564, %562, %565 : vector<64x64xi1>, vector<64x64xf32>
    %567 = arith.truncf %566 : vector<64x64xf32> to vector<64x64xbf16>
    %c7_i32 = arith.constant 7 : i32
    %568 = tpu.dynamic_rotate %376 by %c7_i32 dim 0 : vector<64x64xf32>, i32 -> vector<64x64xf32>
    %cst_232 = arith.constant 0.000000e+00 : f32
    %569 = vector.shape_cast %441 : vector<64x1xi1> to vector<64x1xi1>
    %570 = vector.broadcast %569 : vector<64x1xi1> to vector<64x64xi1>
    %571 = vector.broadcast %cst_232 : f32 to vector<64x64xf32>
    %572 = arith.select %570, %568, %571 : vector<64x64xi1>, vector<64x64xf32>
    %573 = arith.truncf %572 : vector<64x64xf32> to vector<64x64xbf16>
    %c1_i32 = arith.constant 1 : i32
    %574 = tpu.dynamic_rotate %376 by %c1_i32 dim 0 : vector<64x64xf32>, i32 -> vector<64x64xf32>
    %cst_233 = arith.constant 0.000000e+00 : f32
    %575 = vector.shape_cast %460 : vector<64x1xi1> to vector<64x1xi1>
    %576 = vector.broadcast %575 : vector<64x1xi1> to vector<64x64xi1>
    %577 = vector.broadcast %cst_233 : f32 to vector<64x64xf32>
    %578 = arith.select %576, %574, %577 : vector<64x64xi1>, vector<64x64xf32>
    %579 = arith.truncf %578 : vector<64x64xf32> to vector<64x64xbf16>
    %cst_234 = arith.constant 0.000000e+00 : f32
    %580 = vector.shape_cast %479 : vector<64x1xi1> to vector<64x1xi1>
    %581 = vector.broadcast %580 : vector<64x1xi1> to vector<64x64xi1>
    %582 = vector.broadcast %cst_234 : f32 to vector<64x64xf32>
    %583 = arith.select %581, %376, %582 : vector<64x64xi1>, vector<64x64xf32>
    %584 = arith.truncf %583 : vector<64x64xf32> to vector<64x64xbf16>
    %c63_i32 = arith.constant 63 : i32
    %585 = tpu.dynamic_rotate %376 by %c63_i32 dim 0 : vector<64x64xf32>, i32 -> vector<64x64xf32>
    %cst_235 = arith.constant 0.000000e+00 : f32
    %586 = vector.shape_cast %498 : vector<64x1xi1> to vector<64x1xi1>
    %587 = vector.broadcast %586 : vector<64x1xi1> to vector<64x64xi1>
    %588 = vector.broadcast %cst_235 : f32 to vector<64x64xf32>
    %589 = arith.select %587, %585, %588 : vector<64x64xi1>, vector<64x64xf32>
    %590 = arith.truncf %589 : vector<64x64xf32> to vector<64x64xbf16>
    %c57_i32 = arith.constant 57 : i32
    %591 = tpu.dynamic_rotate %376 by %c57_i32 dim 0 : vector<64x64xf32>, i32 -> vector<64x64xf32>
    %cst_236 = arith.constant 0.000000e+00 : f32
    %592 = vector.shape_cast %517 : vector<64x1xi1> to vector<64x1xi1>
    %593 = vector.broadcast %592 : vector<64x1xi1> to vector<64x64xi1>
    %594 = vector.broadcast %cst_236 : f32 to vector<64x64xf32>
    %595 = arith.select %593, %591, %594 : vector<64x64xi1>, vector<64x64xf32>
    %596 = arith.truncf %595 : vector<64x64xf32> to vector<64x64xbf16>
    %c56_i32 = arith.constant 56 : i32
    %597 = tpu.dynamic_rotate %376 by %c56_i32 dim 0 : vector<64x64xf32>, i32 -> vector<64x64xf32>
    %cst_237 = arith.constant 0.000000e+00 : f32
    %598 = vector.shape_cast %536 : vector<64x1xi1> to vector<64x1xi1>
    %599 = vector.broadcast %598 : vector<64x1xi1> to vector<64x64xi1>
    %600 = vector.broadcast %cst_237 : f32 to vector<64x64xf32>
    %601 = arith.select %599, %597, %600 : vector<64x64xi1>, vector<64x64xf32>
    %602 = arith.truncf %601 : vector<64x64xf32> to vector<64x64xbf16>
    %c55_i32 = arith.constant 55 : i32
    %603 = tpu.dynamic_rotate %376 by %c55_i32 dim 0 : vector<64x64xf32>, i32 -> vector<64x64xf32>
    %cst_238 = arith.constant 0.000000e+00 : f32
    %604 = vector.shape_cast %555 : vector<64x1xi1> to vector<64x1xi1>
    %605 = vector.broadcast %604 : vector<64x1xi1> to vector<64x64xi1>
    %606 = vector.broadcast %cst_238 : f32 to vector<64x64xf32>
    %607 = arith.select %605, %603, %606 : vector<64x64xi1>, vector<64x64xf32>
    %608 = arith.truncf %607 : vector<64x64xf32> to vector<64x64xbf16>
    %609 = tpu.concatenate %561, %567, %573, %579, %584, %590, %596, %602, %608 in 1 : vector<64x64xbf16>, vector<64x64xbf16>, vector<64x64xbf16>, vector<64x64xbf16>, vector<64x64xbf16>, vector<64x64xbf16>, vector<64x64xbf16>, vector<64x64xbf16>, vector<64x64xbf16> -> vector<64x576xbf16>
    %c0_239 = arith.constant 0 : index
    %c0_240 = arith.constant 0 : index
    %c0_241 = arith.constant 0 : index
    %610 = vector.load %arg17[%c0_239, %c0_240, %c0_241] : memref<4x576x64xbf16, #tpu.memory_space<vmem>>, vector<1x576x64xbf16>
    %611 = vector.shape_cast %610 : vector<1x576x64xbf16> to vector<576x64xbf16>
    %cst_242 = arith.constant dense<0.000000e+00> : vector<64x64xf32>
    %612 = tpu.matmul %609, %611, %cst_242 {dimension_numbers = #tpu.dot_dimension_numbers<[1], [0], [0], [1], [0, 0, 1, 1], [], []>} : vector<64x576xbf16>, vector<576x64xbf16>, vector<64x64xf32> -> vector<64x64xf32>
    %c0_243 = arith.constant 0 : index
    %c0_244 = arith.constant 0 : index
    %c0_245 = arith.constant 0 : index
    %613 = vector.load %arg18[%c0_243, %c0_244, %c0_245] : memref<4x1x64xf32, #tpu.memory_space<vmem>>, vector<1x1x64xf32>
    %614 = vector.shape_cast %613 : vector<1x1x64xf32> to vector<1x64xf32>
    %615 = vector.broadcast %614 : vector<1x64xf32> to vector<64x64xf32>
    %616 = arith.addf %612, %615 : vector<64x64xf32>
    %cst_246 = arith.constant 0.000000e+00 : f32
    %617 = vector.broadcast %cst_246 : f32 to vector<64x64xf32>
    %618 = arith.maximumf %616, %617 : vector<64x64xf32>
    %c9_i32_247 = arith.constant 9 : i32
    %619 = tpu.dynamic_rotate %618 by %c9_i32_247 dim 0 : vector<64x64xf32>, i32 -> vector<64x64xf32>
    %cst_248 = arith.constant 0.000000e+00 : f32
    %620 = vector.shape_cast %403 : vector<64x1xi1> to vector<64x1xi1>
    %621 = vector.broadcast %620 : vector<64x1xi1> to vector<64x64xi1>
    %622 = vector.broadcast %cst_248 : f32 to vector<64x64xf32>
    %623 = arith.select %621, %619, %622 : vector<64x64xi1>, vector<64x64xf32>
    %624 = arith.truncf %623 : vector<64x64xf32> to vector<64x64xbf16>
    %c8_i32_249 = arith.constant 8 : i32
    %625 = tpu.dynamic_rotate %618 by %c8_i32_249 dim 0 : vector<64x64xf32>, i32 -> vector<64x64xf32>
    %cst_250 = arith.constant 0.000000e+00 : f32
    %626 = vector.shape_cast %422 : vector<64x1xi1> to vector<64x1xi1>
    %627 = vector.broadcast %626 : vector<64x1xi1> to vector<64x64xi1>
    %628 = vector.broadcast %cst_250 : f32 to vector<64x64xf32>
    %629 = arith.select %627, %625, %628 : vector<64x64xi1>, vector<64x64xf32>
    %630 = arith.truncf %629 : vector<64x64xf32> to vector<64x64xbf16>
    %c7_i32_251 = arith.constant 7 : i32
    %631 = tpu.dynamic_rotate %618 by %c7_i32_251 dim 0 : vector<64x64xf32>, i32 -> vector<64x64xf32>
    %cst_252 = arith.constant 0.000000e+00 : f32
    %632 = vector.shape_cast %441 : vector<64x1xi1> to vector<64x1xi1>
    %633 = vector.broadcast %632 : vector<64x1xi1> to vector<64x64xi1>
    %634 = vector.broadcast %cst_252 : f32 to vector<64x64xf32>
    %635 = arith.select %633, %631, %634 : vector<64x64xi1>, vector<64x64xf32>
    %636 = arith.truncf %635 : vector<64x64xf32> to vector<64x64xbf16>
    %c1_i32_253 = arith.constant 1 : i32
    %637 = tpu.dynamic_rotate %618 by %c1_i32_253 dim 0 : vector<64x64xf32>, i32 -> vector<64x64xf32>
    %cst_254 = arith.constant 0.000000e+00 : f32
    %638 = vector.shape_cast %460 : vector<64x1xi1> to vector<64x1xi1>
    %639 = vector.broadcast %638 : vector<64x1xi1> to vector<64x64xi1>
    %640 = vector.broadcast %cst_254 : f32 to vector<64x64xf32>
    %641 = arith.select %639, %637, %640 : vector<64x64xi1>, vector<64x64xf32>
    %642 = arith.truncf %641 : vector<64x64xf32> to vector<64x64xbf16>
    %cst_255 = arith.constant 0.000000e+00 : f32
    %643 = vector.shape_cast %479 : vector<64x1xi1> to vector<64x1xi1>
    %644 = vector.broadcast %643 : vector<64x1xi1> to vector<64x64xi1>
    %645 = vector.broadcast %cst_255 : f32 to vector<64x64xf32>
    %646 = arith.select %644, %618, %645 : vector<64x64xi1>, vector<64x64xf32>
    %647 = arith.truncf %646 : vector<64x64xf32> to vector<64x64xbf16>
    %c63_i32_256 = arith.constant 63 : i32
    %648 = tpu.dynamic_rotate %618 by %c63_i32_256 dim 0 : vector<64x64xf32>, i32 -> vector<64x64xf32>
    %cst_257 = arith.constant 0.000000e+00 : f32
    %649 = vector.shape_cast %498 : vector<64x1xi1> to vector<64x1xi1>
    %650 = vector.broadcast %649 : vector<64x1xi1> to vector<64x64xi1>
    %651 = vector.broadcast %cst_257 : f32 to vector<64x64xf32>
    %652 = arith.select %650, %648, %651 : vector<64x64xi1>, vector<64x64xf32>
    %653 = arith.truncf %652 : vector<64x64xf32> to vector<64x64xbf16>
    %c57_i32_258 = arith.constant 57 : i32
    %654 = tpu.dynamic_rotate %618 by %c57_i32_258 dim 0 : vector<64x64xf32>, i32 -> vector<64x64xf32>
    %cst_259 = arith.constant 0.000000e+00 : f32
    %655 = vector.shape_cast %517 : vector<64x1xi1> to vector<64x1xi1>
    %656 = vector.broadcast %655 : vector<64x1xi1> to vector<64x64xi1>
    %657 = vector.broadcast %cst_259 : f32 to vector<64x64xf32>
    %658 = arith.select %656, %654, %657 : vector<64x64xi1>, vector<64x64xf32>
    %659 = arith.truncf %658 : vector<64x64xf32> to vector<64x64xbf16>
    %c56_i32_260 = arith.constant 56 : i32
    %660 = tpu.dynamic_rotate %618 by %c56_i32_260 dim 0 : vector<64x64xf32>, i32 -> vector<64x64xf32>
    %cst_261 = arith.constant 0.000000e+00 : f32
    %661 = vector.shape_cast %536 : vector<64x1xi1> to vector<64x1xi1>
    %662 = vector.broadcast %661 : vector<64x1xi1> to vector<64x64xi1>
    %663 = vector.broadcast %cst_261 : f32 to vector<64x64xf32>
    %664 = arith.select %662, %660, %663 : vector<64x64xi1>, vector<64x64xf32>
    %665 = arith.truncf %664 : vector<64x64xf32> to vector<64x64xbf16>
    %c55_i32_262 = arith.constant 55 : i32
    %666 = tpu.dynamic_rotate %618 by %c55_i32_262 dim 0 : vector<64x64xf32>, i32 -> vector<64x64xf32>
    %cst_263 = arith.constant 0.000000e+00 : f32
    %667 = vector.shape_cast %555 : vector<64x1xi1> to vector<64x1xi1>
    %668 = vector.broadcast %667 : vector<64x1xi1> to vector<64x64xi1>
    %669 = vector.broadcast %cst_263 : f32 to vector<64x64xf32>
    %670 = arith.select %668, %666, %669 : vector<64x64xi1>, vector<64x64xf32>
    %671 = arith.truncf %670 : vector<64x64xf32> to vector<64x64xbf16>
    %672 = tpu.concatenate %624, %630, %636, %642, %647, %653, %659, %665, %671 in 1 : vector<64x64xbf16>, vector<64x64xbf16>, vector<64x64xbf16>, vector<64x64xbf16>, vector<64x64xbf16>, vector<64x64xbf16>, vector<64x64xbf16>, vector<64x64xbf16>, vector<64x64xbf16> -> vector<64x576xbf16>
    %c1_264 = arith.constant 1 : index
    %c0_265 = arith.constant 0 : index
    %c0_266 = arith.constant 0 : index
    %673 = vector.load %arg17[%c1_264, %c0_265, %c0_266] : memref<4x576x64xbf16, #tpu.memory_space<vmem>>, vector<1x576x64xbf16>
    %674 = vector.shape_cast %673 : vector<1x576x64xbf16> to vector<576x64xbf16>
    %cst_267 = arith.constant dense<0.000000e+00> : vector<64x64xf32>
    %675 = tpu.matmul %672, %674, %cst_267 {dimension_numbers = #tpu.dot_dimension_numbers<[1], [0], [0], [1], [0, 0, 1, 1], [], []>} : vector<64x576xbf16>, vector<576x64xbf16>, vector<64x64xf32> -> vector<64x64xf32>
    %c1_268 = arith.constant 1 : index
    %c0_269 = arith.constant 0 : index
    %c0_270 = arith.constant 0 : index
    %676 = vector.load %arg18[%c1_268, %c0_269, %c0_270] : memref<4x1x64xf32, #tpu.memory_space<vmem>>, vector<1x1x64xf32>
    %677 = vector.shape_cast %676 : vector<1x1x64xf32> to vector<1x64xf32>
    %678 = vector.broadcast %677 : vector<1x64xf32> to vector<64x64xf32>
    %679 = arith.addf %675, %678 : vector<64x64xf32>
    %cst_271 = arith.constant 0.000000e+00 : f32
    %680 = vector.broadcast %cst_271 : f32 to vector<64x64xf32>
    %681 = arith.maximumf %679, %680 : vector<64x64xf32>
    %c9_i32_272 = arith.constant 9 : i32
    %682 = tpu.dynamic_rotate %681 by %c9_i32_272 dim 0 : vector<64x64xf32>, i32 -> vector<64x64xf32>
    %cst_273 = arith.constant 0.000000e+00 : f32
    %683 = vector.shape_cast %403 : vector<64x1xi1> to vector<64x1xi1>
    %684 = vector.broadcast %683 : vector<64x1xi1> to vector<64x64xi1>
    %685 = vector.broadcast %cst_273 : f32 to vector<64x64xf32>
    %686 = arith.select %684, %682, %685 : vector<64x64xi1>, vector<64x64xf32>
    %687 = arith.truncf %686 : vector<64x64xf32> to vector<64x64xbf16>
    %c8_i32_274 = arith.constant 8 : i32
    %688 = tpu.dynamic_rotate %681 by %c8_i32_274 dim 0 : vector<64x64xf32>, i32 -> vector<64x64xf32>
    %cst_275 = arith.constant 0.000000e+00 : f32
    %689 = vector.shape_cast %422 : vector<64x1xi1> to vector<64x1xi1>
    %690 = vector.broadcast %689 : vector<64x1xi1> to vector<64x64xi1>
    %691 = vector.broadcast %cst_275 : f32 to vector<64x64xf32>
    %692 = arith.select %690, %688, %691 : vector<64x64xi1>, vector<64x64xf32>
    %693 = arith.truncf %692 : vector<64x64xf32> to vector<64x64xbf16>
    %c7_i32_276 = arith.constant 7 : i32
    %694 = tpu.dynamic_rotate %681 by %c7_i32_276 dim 0 : vector<64x64xf32>, i32 -> vector<64x64xf32>
    %cst_277 = arith.constant 0.000000e+00 : f32
    %695 = vector.shape_cast %441 : vector<64x1xi1> to vector<64x1xi1>
    %696 = vector.broadcast %695 : vector<64x1xi1> to vector<64x64xi1>
    %697 = vector.broadcast %cst_277 : f32 to vector<64x64xf32>
    %698 = arith.select %696, %694, %697 : vector<64x64xi1>, vector<64x64xf32>
    %699 = arith.truncf %698 : vector<64x64xf32> to vector<64x64xbf16>
    %c1_i32_278 = arith.constant 1 : i32
    %700 = tpu.dynamic_rotate %681 by %c1_i32_278 dim 0 : vector<64x64xf32>, i32 -> vector<64x64xf32>
    %cst_279 = arith.constant 0.000000e+00 : f32
    %701 = vector.shape_cast %460 : vector<64x1xi1> to vector<64x1xi1>
    %702 = vector.broadcast %701 : vector<64x1xi1> to vector<64x64xi1>
    %703 = vector.broadcast %cst_279 : f32 to vector<64x64xf32>
    %704 = arith.select %702, %700, %703 : vector<64x64xi1>, vector<64x64xf32>
    %705 = arith.truncf %704 : vector<64x64xf32> to vector<64x64xbf16>
    %cst_280 = arith.constant 0.000000e+00 : f32
    %706 = vector.shape_cast %479 : vector<64x1xi1> to vector<64x1xi1>
    %707 = vector.broadcast %706 : vector<64x1xi1> to vector<64x64xi1>
    %708 = vector.broadcast %cst_280 : f32 to vector<64x64xf32>
    %709 = arith.select %707, %681, %708 : vector<64x64xi1>, vector<64x64xf32>
    %710 = arith.truncf %709 : vector<64x64xf32> to vector<64x64xbf16>
    %c63_i32_281 = arith.constant 63 : i32
    %711 = tpu.dynamic_rotate %681 by %c63_i32_281 dim 0 : vector<64x64xf32>, i32 -> vector<64x64xf32>
    %cst_282 = arith.constant 0.000000e+00 : f32
    %712 = vector.shape_cast %498 : vector<64x1xi1> to vector<64x1xi1>
    %713 = vector.broadcast %712 : vector<64x1xi1> to vector<64x64xi1>
    %714 = vector.broadcast %cst_282 : f32 to vector<64x64xf32>
    %715 = arith.select %713, %711, %714 : vector<64x64xi1>, vector<64x64xf32>
    %716 = arith.truncf %715 : vector<64x64xf32> to vector<64x64xbf16>
    %c57_i32_283 = arith.constant 57 : i32
    %717 = tpu.dynamic_rotate %681 by %c57_i32_283 dim 0 : vector<64x64xf32>, i32 -> vector<64x64xf32>
    %cst_284 = arith.constant 0.000000e+00 : f32
    %718 = vector.shape_cast %517 : vector<64x1xi1> to vector<64x1xi1>
    %719 = vector.broadcast %718 : vector<64x1xi1> to vector<64x64xi1>
    %720 = vector.broadcast %cst_284 : f32 to vector<64x64xf32>
    %721 = arith.select %719, %717, %720 : vector<64x64xi1>, vector<64x64xf32>
    %722 = arith.truncf %721 : vector<64x64xf32> to vector<64x64xbf16>
    %c56_i32_285 = arith.constant 56 : i32
    %723 = tpu.dynamic_rotate %681 by %c56_i32_285 dim 0 : vector<64x64xf32>, i32 -> vector<64x64xf32>
    %cst_286 = arith.constant 0.000000e+00 : f32
    %724 = vector.shape_cast %536 : vector<64x1xi1> to vector<64x1xi1>
    %725 = vector.broadcast %724 : vector<64x1xi1> to vector<64x64xi1>
    %726 = vector.broadcast %cst_286 : f32 to vector<64x64xf32>
    %727 = arith.select %725, %723, %726 : vector<64x64xi1>, vector<64x64xf32>
    %728 = arith.truncf %727 : vector<64x64xf32> to vector<64x64xbf16>
    %c55_i32_287 = arith.constant 55 : i32
    %729 = tpu.dynamic_rotate %681 by %c55_i32_287 dim 0 : vector<64x64xf32>, i32 -> vector<64x64xf32>
    %cst_288 = arith.constant 0.000000e+00 : f32
    %730 = vector.shape_cast %555 : vector<64x1xi1> to vector<64x1xi1>
    %731 = vector.broadcast %730 : vector<64x1xi1> to vector<64x64xi1>
    %732 = vector.broadcast %cst_288 : f32 to vector<64x64xf32>
    %733 = arith.select %731, %729, %732 : vector<64x64xi1>, vector<64x64xf32>
    %734 = arith.truncf %733 : vector<64x64xf32> to vector<64x64xbf16>
    %735 = tpu.concatenate %687, %693, %699, %705, %710, %716, %722, %728, %734 in 1 : vector<64x64xbf16>, vector<64x64xbf16>, vector<64x64xbf16>, vector<64x64xbf16>, vector<64x64xbf16>, vector<64x64xbf16>, vector<64x64xbf16>, vector<64x64xbf16>, vector<64x64xbf16> -> vector<64x576xbf16>
    %c2 = arith.constant 2 : index
    %c0_289 = arith.constant 0 : index
    %c0_290 = arith.constant 0 : index
    %736 = vector.load %arg17[%c2, %c0_289, %c0_290] : memref<4x576x64xbf16, #tpu.memory_space<vmem>>, vector<1x576x64xbf16>
    %737 = vector.shape_cast %736 : vector<1x576x64xbf16> to vector<576x64xbf16>
    %cst_291 = arith.constant dense<0.000000e+00> : vector<64x64xf32>
    %738 = tpu.matmul %735, %737, %cst_291 {dimension_numbers = #tpu.dot_dimension_numbers<[1], [0], [0], [1], [0, 0, 1, 1], [], []>} : vector<64x576xbf16>, vector<576x64xbf16>, vector<64x64xf32> -> vector<64x64xf32>
    %c2_292 = arith.constant 2 : index
    %c0_293 = arith.constant 0 : index
    %c0_294 = arith.constant 0 : index
    %739 = vector.load %arg18[%c2_292, %c0_293, %c0_294] : memref<4x1x64xf32, #tpu.memory_space<vmem>>, vector<1x1x64xf32>
    %740 = vector.shape_cast %739 : vector<1x1x64xf32> to vector<1x64xf32>
    %741 = vector.broadcast %740 : vector<1x64xf32> to vector<64x64xf32>
    %742 = arith.addf %738, %741 : vector<64x64xf32>
    %cst_295 = arith.constant 0.000000e+00 : f32
    %743 = vector.broadcast %cst_295 : f32 to vector<64x64xf32>
    %744 = arith.maximumf %742, %743 : vector<64x64xf32>
    %c9_i32_296 = arith.constant 9 : i32
    %745 = tpu.dynamic_rotate %744 by %c9_i32_296 dim 0 : vector<64x64xf32>, i32 -> vector<64x64xf32>
    %cst_297 = arith.constant 0.000000e+00 : f32
    %746 = vector.shape_cast %403 : vector<64x1xi1> to vector<64x1xi1>
    %747 = vector.broadcast %746 : vector<64x1xi1> to vector<64x64xi1>
    %748 = vector.broadcast %cst_297 : f32 to vector<64x64xf32>
    %749 = arith.select %747, %745, %748 : vector<64x64xi1>, vector<64x64xf32>
    %750 = arith.truncf %749 : vector<64x64xf32> to vector<64x64xbf16>
    %c8_i32_298 = arith.constant 8 : i32
    %751 = tpu.dynamic_rotate %744 by %c8_i32_298 dim 0 : vector<64x64xf32>, i32 -> vector<64x64xf32>
    %cst_299 = arith.constant 0.000000e+00 : f32
    %752 = vector.shape_cast %422 : vector<64x1xi1> to vector<64x1xi1>
    %753 = vector.broadcast %752 : vector<64x1xi1> to vector<64x64xi1>
    %754 = vector.broadcast %cst_299 : f32 to vector<64x64xf32>
    %755 = arith.select %753, %751, %754 : vector<64x64xi1>, vector<64x64xf32>
    %756 = arith.truncf %755 : vector<64x64xf32> to vector<64x64xbf16>
    %c7_i32_300 = arith.constant 7 : i32
    %757 = tpu.dynamic_rotate %744 by %c7_i32_300 dim 0 : vector<64x64xf32>, i32 -> vector<64x64xf32>
    %cst_301 = arith.constant 0.000000e+00 : f32
    %758 = vector.shape_cast %441 : vector<64x1xi1> to vector<64x1xi1>
    %759 = vector.broadcast %758 : vector<64x1xi1> to vector<64x64xi1>
    %760 = vector.broadcast %cst_301 : f32 to vector<64x64xf32>
    %761 = arith.select %759, %757, %760 : vector<64x64xi1>, vector<64x64xf32>
    %762 = arith.truncf %761 : vector<64x64xf32> to vector<64x64xbf16>
    %c1_i32_302 = arith.constant 1 : i32
    %763 = tpu.dynamic_rotate %744 by %c1_i32_302 dim 0 : vector<64x64xf32>, i32 -> vector<64x64xf32>
    %cst_303 = arith.constant 0.000000e+00 : f32
    %764 = vector.shape_cast %460 : vector<64x1xi1> to vector<64x1xi1>
    %765 = vector.broadcast %764 : vector<64x1xi1> to vector<64x64xi1>
    %766 = vector.broadcast %cst_303 : f32 to vector<64x64xf32>
    %767 = arith.select %765, %763, %766 : vector<64x64xi1>, vector<64x64xf32>
    %768 = arith.truncf %767 : vector<64x64xf32> to vector<64x64xbf16>
    %cst_304 = arith.constant 0.000000e+00 : f32
    %769 = vector.shape_cast %479 : vector<64x1xi1> to vector<64x1xi1>
    %770 = vector.broadcast %769 : vector<64x1xi1> to vector<64x64xi1>
    %771 = vector.broadcast %cst_304 : f32 to vector<64x64xf32>
    %772 = arith.select %770, %744, %771 : vector<64x64xi1>, vector<64x64xf32>
    %773 = arith.truncf %772 : vector<64x64xf32> to vector<64x64xbf16>
    %c63_i32_305 = arith.constant 63 : i32
    %774 = tpu.dynamic_rotate %744 by %c63_i32_305 dim 0 : vector<64x64xf32>, i32 -> vector<64x64xf32>
    %cst_306 = arith.constant 0.000000e+00 : f32
    %775 = vector.shape_cast %498 : vector<64x1xi1> to vector<64x1xi1>
    %776 = vector.broadcast %775 : vector<64x1xi1> to vector<64x64xi1>
    %777 = vector.broadcast %cst_306 : f32 to vector<64x64xf32>
    %778 = arith.select %776, %774, %777 : vector<64x64xi1>, vector<64x64xf32>
    %779 = arith.truncf %778 : vector<64x64xf32> to vector<64x64xbf16>
    %c57_i32_307 = arith.constant 57 : i32
    %780 = tpu.dynamic_rotate %744 by %c57_i32_307 dim 0 : vector<64x64xf32>, i32 -> vector<64x64xf32>
    %cst_308 = arith.constant 0.000000e+00 : f32
    %781 = vector.shape_cast %517 : vector<64x1xi1> to vector<64x1xi1>
    %782 = vector.broadcast %781 : vector<64x1xi1> to vector<64x64xi1>
    %783 = vector.broadcast %cst_308 : f32 to vector<64x64xf32>
    %784 = arith.select %782, %780, %783 : vector<64x64xi1>, vector<64x64xf32>
    %785 = arith.truncf %784 : vector<64x64xf32> to vector<64x64xbf16>
    %c56_i32_309 = arith.constant 56 : i32
    %786 = tpu.dynamic_rotate %744 by %c56_i32_309 dim 0 : vector<64x64xf32>, i32 -> vector<64x64xf32>
    %cst_310 = arith.constant 0.000000e+00 : f32
    %787 = vector.shape_cast %536 : vector<64x1xi1> to vector<64x1xi1>
    %788 = vector.broadcast %787 : vector<64x1xi1> to vector<64x64xi1>
    %789 = vector.broadcast %cst_310 : f32 to vector<64x64xf32>
    %790 = arith.select %788, %786, %789 : vector<64x64xi1>, vector<64x64xf32>
    %791 = arith.truncf %790 : vector<64x64xf32> to vector<64x64xbf16>
    %c55_i32_311 = arith.constant 55 : i32
    %792 = tpu.dynamic_rotate %744 by %c55_i32_311 dim 0 : vector<64x64xf32>, i32 -> vector<64x64xf32>
    %cst_312 = arith.constant 0.000000e+00 : f32
    %793 = vector.shape_cast %555 : vector<64x1xi1> to vector<64x1xi1>
    %794 = vector.broadcast %793 : vector<64x1xi1> to vector<64x64xi1>
    %795 = vector.broadcast %cst_312 : f32 to vector<64x64xf32>
    %796 = arith.select %794, %792, %795 : vector<64x64xi1>, vector<64x64xf32>
    %797 = arith.truncf %796 : vector<64x64xf32> to vector<64x64xbf16>
    %798 = tpu.concatenate %750, %756, %762, %768, %773, %779, %785, %791, %797 in 1 : vector<64x64xbf16>, vector<64x64xbf16>, vector<64x64xbf16>, vector<64x64xbf16>, vector<64x64xbf16>, vector<64x64xbf16>, vector<64x64xbf16>, vector<64x64xbf16>, vector<64x64xbf16> -> vector<64x576xbf16>
    %c3 = arith.constant 3 : index
    %c0_313 = arith.constant 0 : index
    %c0_314 = arith.constant 0 : index
    %799 = vector.load %arg17[%c3, %c0_313, %c0_314] : memref<4x576x64xbf16, #tpu.memory_space<vmem>>, vector<1x576x64xbf16>
    %800 = vector.shape_cast %799 : vector<1x576x64xbf16> to vector<576x64xbf16>
    %cst_315 = arith.constant dense<0.000000e+00> : vector<64x64xf32>
    %801 = tpu.matmul %798, %800, %cst_315 {dimension_numbers = #tpu.dot_dimension_numbers<[1], [0], [0], [1], [0, 0, 1, 1], [], []>} : vector<64x576xbf16>, vector<576x64xbf16>, vector<64x64xf32> -> vector<64x64xf32>
    %c3_316 = arith.constant 3 : index
    %c0_317 = arith.constant 0 : index
    %c0_318 = arith.constant 0 : index
    %802 = vector.load %arg18[%c3_316, %c0_317, %c0_318] : memref<4x1x64xf32, #tpu.memory_space<vmem>>, vector<1x1x64xf32>
    %803 = vector.shape_cast %802 : vector<1x1x64xf32> to vector<1x64xf32>
    %804 = vector.broadcast %803 : vector<1x64xf32> to vector<64x64xf32>
    %805 = arith.addf %801, %804 : vector<64x64xf32>
    %cst_319 = arith.constant 0.000000e+00 : f32
    %806 = vector.broadcast %cst_319 : f32 to vector<64x64xf32>
    %807 = arith.maximumf %805, %806 : vector<64x64xf32>
    %c0_320 = arith.constant 0 : index
    %c0_321 = arith.constant 0 : index
    %808 = vector.load %arg19[%c0_320, %c0_321] : memref<2x64xbf16, #tpu.memory_space<vmem>>, vector<2x64xbf16>
    %809 = arith.truncf %807 : vector<64x64xf32> to vector<64x64xbf16>
    %cst_322 = arith.constant dense<0.000000e+00> : vector<2x64xf32>
    %810 = tpu.matmul %808, %809, %cst_322 {dimension_numbers = #tpu.dot_dimension_numbers<[1], [1], [0], [0], [0, 0, 1, 0], [], []>} : vector<2x64xbf16>, vector<64x64xbf16>, vector<2x64xf32> -> vector<2x64xf32>
    %c0_323 = arith.constant 0 : index
    %c0_324 = arith.constant 0 : index
    %811 = vector.load %arg20[%c0_323, %c0_324] : memref<2x1xf32, #tpu.memory_space<vmem>>, vector<2x1xf32>
    %812 = vector.broadcast %811 : vector<2x1xf32> to vector<2x64xf32>
    %813 = arith.addf %810, %812 : vector<2x64xf32>
    %cst_325 = arith.constant dense<0xFF800000> : vector<2xf32>
    %814 = vector.multi_reduction <maximumf>, %813, %cst_325 [1] : vector<2x64xf32> to vector<2xf32>
    %815 = vector.shape_cast %814 : vector<2xf32> to vector<2x1xf32>
    %816 = vector.broadcast %815 : vector<2x1xf32> to vector<2x64xf32>
    %817 = arith.subf %813, %816 : vector<2x64xf32>
    %818 = math.exp %817 : vector<2x64xf32>
    %cst_326 = arith.constant dense<0.000000e+00> : vector<2xf32>
    %819 = vector.multi_reduction <add>, %818, %cst_326 [1] : vector<2x64xf32> to vector<2xf32>
    %820 = vector.shape_cast %819 : vector<2xf32> to vector<2x1xf32>
    %821 = tpu.reciprocal %820 {approx = true} : vector<2x1xf32> -> vector<2x1xf32>
    %822 = vector.broadcast %821 : vector<2x1xf32> to vector<2x64xf32>
    %823 = arith.mulf %818, %822 : vector<2x64xf32>
    %824 = tpu.iota {dimensions = array<i32: 1>} : vector<1x64xi32>
    %825 = arith.sitofp %824 : vector<1x64xi32> to vector<1x64xf32>
    %cst_327 = arith.constant 1.250000e-01 : f32
    %826 = vector.broadcast %cst_327 : f32 to vector<1x64xf32>
    %827 = arith.mulf %825, %826 : vector<1x64xf32>
    %828 = math.floor %827 : vector<1x64xf32>
    %cst_328 = arith.constant 8.000000e+00 : f32
    %829 = vector.broadcast %cst_328 : f32 to vector<1x64xf32>
    %830 = arith.mulf %828, %829 : vector<1x64xf32>
    %831 = arith.subf %825, %830 : vector<1x64xf32>
    %cst_329 = arith.constant 4.000000e+00 : f32
    %832 = vector.broadcast %cst_329 : f32 to vector<1x64xf32>
    %833 = arith.mulf %831, %832 : vector<1x64xf32>
    %cst_330 = arith.constant 4.000000e+00 : f32
    %834 = vector.broadcast %cst_330 : f32 to vector<1x64xf32>
    %835 = arith.mulf %828, %834 : vector<1x64xf32>
    %836 = vector.broadcast %833 : vector<1x64xf32> to vector<2x64xf32>
    %837 = arith.mulf %823, %836 : vector<2x64xf32>
    %cst_331 = arith.constant dense<0.000000e+00> : vector<2xf32>
    %838 = vector.multi_reduction <add>, %837, %cst_331 [1] : vector<2x64xf32> to vector<2xf32>
    %839 = vector.shape_cast %838 : vector<2xf32> to vector<2x1xf32>
    %840 = vector.broadcast %835 : vector<1x64xf32> to vector<2x64xf32>
    %841 = arith.mulf %823, %840 : vector<2x64xf32>
    %cst_332 = arith.constant dense<0.000000e+00> : vector<2xf32>
    %842 = vector.multi_reduction <add>, %841, %cst_332 [1] : vector<2x64xf32> to vector<2xf32>
    %843 = vector.shape_cast %842 : vector<2xf32> to vector<2x1xf32>
    %844 = tpu.iota {dimensions = array<i32: 1>} : vector<1x4xi32>
    %845 = vector.extract_strided_slice %839 {offsets = [0, 0], sizes = [1, 1], strides = [1, 1]} : vector<2x1xf32> to vector<1x1xf32>
    %c0_i32 = arith.constant 0 : i32
    %846 = vector.broadcast %c0_i32 : i32 to vector<1x4xi32>
    %847 = arith.cmpi eq, %844, %846 : vector<1x4xi32>
    %848 = arith.extui %847 : vector<1x4xi1> to vector<1x4xi32>
    %849 = arith.sitofp %848 : vector<1x4xi32> to vector<1x4xf32>
    %850 = vector.broadcast %845 : vector<1x1xf32> to vector<1x4xf32>
    %851 = arith.mulf %850, %849 : vector<1x4xf32>
    %852 = vector.extract_strided_slice %843 {offsets = [0, 0], sizes = [1, 1], strides = [1, 1]} : vector<2x1xf32> to vector<1x1xf32>
    %c1_i32_333 = arith.constant 1 : i32
    %853 = vector.broadcast %c1_i32_333 : i32 to vector<1x4xi32>
    %854 = arith.cmpi eq, %844, %853 : vector<1x4xi32>
    %855 = arith.extui %854 : vector<1x4xi1> to vector<1x4xi32>
    %856 = arith.sitofp %855 : vector<1x4xi32> to vector<1x4xf32>
    %857 = vector.broadcast %852 : vector<1x1xf32> to vector<1x4xf32>
    %858 = arith.mulf %857, %856 : vector<1x4xf32>
    %859 = arith.addf %851, %858 : vector<1x4xf32>
    %860 = vector.extract_strided_slice %839 {offsets = [1, 0], sizes = [1, 1], strides = [1, 1]} : vector<2x1xf32> to vector<1x1xf32>
    %c2_i32 = arith.constant 2 : i32
    %861 = vector.broadcast %c2_i32 : i32 to vector<1x4xi32>
    %862 = arith.cmpi eq, %844, %861 : vector<1x4xi32>
    %863 = arith.extui %862 : vector<1x4xi1> to vector<1x4xi32>
    %864 = arith.sitofp %863 : vector<1x4xi32> to vector<1x4xf32>
    %865 = vector.broadcast %860 : vector<1x1xf32> to vector<1x4xf32>
    %866 = arith.mulf %865, %864 : vector<1x4xf32>
    %867 = arith.addf %859, %866 : vector<1x4xf32>
    %868 = vector.extract_strided_slice %843 {offsets = [1, 0], sizes = [1, 1], strides = [1, 1]} : vector<2x1xf32> to vector<1x1xf32>
    %c3_i32 = arith.constant 3 : i32
    %869 = vector.broadcast %c3_i32 : i32 to vector<1x4xi32>
    %870 = arith.cmpi eq, %844, %869 : vector<1x4xi32>
    %871 = arith.extui %870 : vector<1x4xi1> to vector<1x4xi32>
    %872 = arith.sitofp %871 : vector<1x4xi32> to vector<1x4xf32>
    %873 = vector.broadcast %868 : vector<1x1xf32> to vector<1x4xf32>
    %874 = arith.mulf %873, %872 : vector<1x4xf32>
    %875 = arith.addf %867, %874 : vector<1x4xf32>
    %cst_334 = arith.constant 3.125000e-02 : f32
    %876 = vector.broadcast %cst_334 : f32 to vector<1x4xf32>
    %877 = arith.mulf %875, %876 : vector<1x4xf32>
    %c0_335 = arith.constant 0 : index
    %c0_336 = arith.constant 0 : index
    %c0_337 = arith.constant 0 : index
    %878 = vector.load %arg21[%c0_335, %c0_336, %c0_337] : memref<1x1x4xf32, #tpu.memory_space<vmem>>, vector<1x1x4xf32>
    %879 = vector.shape_cast %878 : vector<1x1x4xf32> to vector<1x4xf32>
    %880 = vector.shape_cast %877 : vector<1x4xf32> to vector<1x1x4xf32>
    tpu.vector_store %arg21[%c0_335, %c0_336, %c0_337], %880 {strides = array<i32>} : memref<1x1x4xf32, #tpu.memory_space<vmem>>, vector<1x1x4xf32>,
    return
  }
  func.func @transform_0(%arg0: i32) -> (i32, i32, i32) {
    %c0_i32 = arith.constant 0 : i32
    %c0_i32_0 = arith.constant 0 : i32
    %c0_i32_1 = arith.constant 0 : i32
    return %arg0, %c0_i32, %c0_i32_0 : i32, i32, i32
  }
  func.func @transform_1(%arg0: i32) -> (i32, i32, i32) {
    %c0_i32 = arith.constant 0 : i32
    %c0_i32_0 = arith.constant 0 : i32
    %c0_i32_1 = arith.constant 0 : i32
    %c0_i32_2 = arith.constant 0 : i32
    return %c0_i32, %c0_i32_0, %c0_i32_1 : i32, i32, i32
  }
  func.func @transform_2(%arg0: i32) -> (i32, i32) {
    %c0_i32 = arith.constant 0 : i32
    %c0_i32_0 = arith.constant 0 : i32
    %c0_i32_1 = arith.constant 0 : i32
    return %c0_i32, %c0_i32_0 : i32, i32
  }
  func.func @transform_3(%arg0: i32) -> (i32, i32) {
    %c0_i32 = arith.constant 0 : i32
    %c0_i32_0 = arith.constant 0 : i32
    %c0_i32_1 = arith.constant 0 : i32
    return %c0_i32, %c0_i32_0 : i32, i32
  }
  func.func @transform_4(%arg0: i32) -> (i32, i32, i32) {
    %c0_i32 = arith.constant 0 : i32
    %c0_i32_0 = arith.constant 0 : i32
    %c0_i32_1 = arith.constant 0 : i32
    %c0_i32_2 = arith.constant 0 : i32
    return %c0_i32, %c0_i32_0, %c0_i32_1 : i32, i32, i32
  }
  func.func @transform_5(%arg0: i32) -> (i32, i32, i32) {
    %c0_i32 = arith.constant 0 : i32
    %c0_i32_0 = arith.constant 0 : i32
    %c0_i32_1 = arith.constant 0 : i32
    %c0_i32_2 = arith.constant 0 : i32
    return %c0_i32, %c0_i32_0, %c0_i32_1 : i32, i32, i32
  }
  func.func @transform_6(%arg0: i32) -> (i32, i32, i32) {
    %c0_i32 = arith.constant 0 : i32
    %c0_i32_0 = arith.constant 0 : i32
    %c0_i32_1 = arith.constant 0 : i32
    %c0_i32_2 = arith.constant 0 : i32
    return %c0_i32, %c0_i32_0, %c0_i32_1 : i32, i32, i32
  }
  func.func @transform_7(%arg0: i32) -> (i32, i32, i32) {
    %c0_i32 = arith.constant 0 : i32
    %c0_i32_0 = arith.constant 0 : i32
    %c0_i32_1 = arith.constant 0 : i32
    %c0_i32_2 = arith.constant 0 : i32
    return %c0_i32, %c0_i32_0, %c0_i32_1 : i32, i32, i32
  }
  func.func @transform_8(%arg0: i32) -> (i32, i32, i32) {
    %c0_i32 = arith.constant 0 : i32
    %c0_i32_0 = arith.constant 0 : i32
    %c0_i32_1 = arith.constant 0 : i32
    %c0_i32_2 = arith.constant 0 : i32
    return %c0_i32, %c0_i32_0, %c0_i32_1 : i32, i32, i32
  }
  func.func @transform_9(%arg0: i32) -> (i32, i32, i32) {
    %c0_i32 = arith.constant 0 : i32
    %c0_i32_0 = arith.constant 0 : i32
    %c0_i32_1 = arith.constant 0 : i32
    %c0_i32_2 = arith.constant 0 : i32
    return %c0_i32, %c0_i32_0, %c0_i32_1 : i32, i32, i32
  }
  func.func @transform_10(%arg0: i32) -> (i32, i32, i32) {
    %c0_i32 = arith.constant 0 : i32
    %c0_i32_0 = arith.constant 0 : i32
    %c0_i32_1 = arith.constant 0 : i32
    %c0_i32_2 = arith.constant 0 : i32
    return %c0_i32, %c0_i32_0, %c0_i32_1 : i32, i32, i32
  }
  func.func @transform_11(%arg0: i32) -> (i32, i32, i32) {
    %c0_i32 = arith.constant 0 : i32
    %c0_i32_0 = arith.constant 0 : i32
    %c0_i32_1 = arith.constant 0 : i32
    %c0_i32_2 = arith.constant 0 : i32
    return %c0_i32, %c0_i32_0, %c0_i32_1 : i32, i32, i32
  }
  func.func @transform_12(%arg0: i32) -> (i32, i32, i32) {
    %c0_i32 = arith.constant 0 : i32
    %c0_i32_0 = arith.constant 0 : i32
    %c0_i32_1 = arith.constant 0 : i32
    %c0_i32_2 = arith.constant 0 : i32
    return %c0_i32, %c0_i32_0, %c0_i32_1 : i32, i32, i32
  }
  func.func @transform_13(%arg0: i32) -> (i32, i32, i32) {
    %c0_i32 = arith.constant 0 : i32
    %c0_i32_0 = arith.constant 0 : i32
    %c0_i32_1 = arith.constant 0 : i32
    %c0_i32_2 = arith.constant 0 : i32
    return %c0_i32, %c0_i32_0, %c0_i32_1 : i32, i32, i32
  }
  func.func @transform_14(%arg0: i32) -> (i32, i32, i32) {
    %c0_i32 = arith.constant 0 : i32
    %c0_i32_0 = arith.constant 0 : i32
    %c0_i32_1 = arith.constant 0 : i32
    %c0_i32_2 = arith.constant 0 : i32
    return %c0_i32, %c0_i32_0, %c0_i32_1 : i32, i32, i32
  }
  func.func @transform_15(%arg0: i32) -> (i32, i32, i32) {
    %c0_i32 = arith.constant 0 : i32
    %c0_i32_0 = arith.constant 0 : i32
    %c0_i32_1 = arith.constant 0 : i32
    %c0_i32_2 = arith.constant 0 : i32
    return %c0_i32, %c0_i32_0, %c0_i32_1 : i32, i32, i32
  }
  func.func @transform_16(%arg0: i32) -> (i32, i32, i32) {
    %c0_i32 = arith.constant 0 : i32
    %c0_i32_0 = arith.constant 0 : i32
    %c0_i32_1 = arith.constant 0 : i32
    %c0_i32_2 = arith.constant 0 : i32
    return %c0_i32, %c0_i32_0, %c0_i32_1 : i32, i32, i32
  }
  func.func @transform_17(%arg0: i32) -> (i32, i32, i32) {
    %c0_i32 = arith.constant 0 : i32
    %c0_i32_0 = arith.constant 0 : i32
    %c0_i32_1 = arith.constant 0 : i32
    %c0_i32_2 = arith.constant 0 : i32
    return %c0_i32, %c0_i32_0, %c0_i32_1 : i32, i32, i32
  }
  func.func @transform_18(%arg0: i32) -> (i32, i32) {
    %c0_i32 = arith.constant 0 : i32
    %c0_i32_0 = arith.constant 0 : i32
    %c0_i32_1 = arith.constant 0 : i32
    return %c0_i32, %c0_i32_0 : i32, i32
  }
  func.func @transform_19(%arg0: i32) -> (i32, i32) {
    %c0_i32 = arith.constant 0 : i32
    %c0_i32_0 = arith.constant 0 : i32
    %c0_i32_1 = arith.constant 0 : i32
    return %c0_i32, %c0_i32_0 : i32, i32
  }
  func.func @transform_20(%arg0: i32) -> (i32, i32, i32) {
    %c0_i32 = arith.constant 0 : i32
    %c0_i32_0 = arith.constant 0 : i32
    %c0_i32_1 = arith.constant 0 : i32
    return %arg0, %c0_i32, %c0_i32_0 : i32, i32, i32
  }
}

</mosaic_0001>

<bundles_post_ra>
// kernel: mixformer_forward.1
= control target key start
LH: loop header
LB: loop body
LE: loop exit
PB: predicated region body
PF: predicated region fallthrough
CT: control target
= control target key end

     0   :  { %s16611_s0 = inlined_call_operand.vmem [shape: f32[2,96,48], index: 0, kind: input, shape index: {}]   ;;  %s16612_s1 = inlined_call_operand.vmem [shape: f32[1,96,32], index: 1, kind: input, shape index: {}]   ;;  %s16613_s2 = inlined_call_operand.vmem [shape: bf16[48,32], index: 2, kind: input, shape index: {}]   ;;  %s16614_s3 = inlined_call_operand.vmem [shape: f32[1,32], index: 3, kind: input, shape index: {}]   ;;  %s16615_s4 = inlined_call_operand.vmem [shape: f32[2,1,32], index: 4, kind: input, shape index: {}]   ;;  %s16616_s5 = inlined_call_operand.vmem [shape: f32[2,1,32], index: 5, kind: input, shape index: {}]   ;;  %s16617_s6 = inlined_call_operand.vmem [shape: bf16[2,32,96], index: 6, kind: input, shape index: {}]   ;;  %s16618_s7 = inlined_call_operand.vmem [shape: f32[2,1,96], index: 7, kind: input, shape index: {}]   ;;  %s16619_s8 = inlined_call_operand.vmem [shape: bf16[2,32,32], index: 8, kind: input, shape index: {}]   ;;  %s16620_s9 = inlined_call_operand.vmem [shape: f32[2,1,32], index: 9, kind: input, shape index: {}]   ;;  %s16621_s10 = inlined_call_operand.vmem [shape: f32[2,1,32], index: 10, kind: input, shape index: {}]   ;;  %s16622_s11 = inlined_call_operand.vmem [shape: f32[2,1,32], index: 11, kind: input, shape index: {}]   ;;  %s16623_s12 = inlined_call_operand.vmem [shape: bf16[2,32,128], index: 12, kind: input, shape index: {}]   ;;  %s16624_s13 = inlined_call_operand.vmem [shape: f32[2,1,128], index: 13, kind: input, shape index: {}]   ;;  %s16625_s14 = inlined_call_operand.vmem [shape: bf16[2,128,32], index: 14, kind: input, shape index: {}]   ;;  %s16626_s15 = inlined_call_operand.vmem [shape: f32[2,1,32], index: 15, kind: input, shape index: {}]   ;;  %s16627_s16 = inlined_call_operand.vmem [shape: bf16[4,576,64], index: 16, kind: input, shape index: {}]   ;;  %s16628_s17 = inlined_call_operand.vmem [shape: f32[4,1,64], index: 17, kind: input, shape index: {}]   ;;  %s16629_s18 = inlined_call_operand.vmem [shape: bf16[2,64], index: 18, kind: input, shape index: {}]   ;;  %s16630_s19 = inlined_call_operand.vmem [shape: f32[2,1], index: 19, kind: input, shape index: {}]   ;;  %s16631_s20 = inlined_call_operand.vmem [shape: f32[2,1,4], index: 20, kind: output, shape index: {}]  }
   0x1   :  { %17014 = sst [smem:[#allocation80_spill]] %s16611_s0 }
   0x2   :  { %17015 = sst [smem:[#allocation81_spill]] %s16612_s1  ;;  %s11080_s1 = smov 0  }
   0x3   :  { %17016 = sst [smem:[#allocation82_spill]] %s16613_s2 }
   0x4   :  { %17017 = sst [smem:[#allocation83_spill]] %s16614_s3 }
   0x5   :  { %17018 = sst [smem:[#allocation84_spill]] %s16615_s4 }
   0x6 LB: > { %s8720_s22 = sadd.s32 4294967295, %s10963_s1   ;;  %p8724_p0 = scmp.ge.s32.totalorder %s10963_s1, 1  ;;  %s10963_s1 = sphi %s11080_s1, %s30_s1  }
   0x7   : > { %p562_p1 = scmp.lt.s32.totalorder %s10963_s1, 3 }
   0x9   : > { %p563_p2 = pnand %p8724_p0, %p562_p1 }
   0xb   : > { %566 = sbr.rel (%p563_p2) target bundleno = 10312 (0x2848), region = 100 }
  0x12   : > { %s17019_s2 = sld [smem:[#allocation82_spill]]  ;;  %p618_p3 = scmp.lt.s32.totalorder %s8720_s22, 1  ;;  %vm676_vm0 = vcmask 392192   ;;  %vm16645_vm1 = vcmask 261120   ;;  %vm1136_vm2 = vcmask 130048   ;;  %vm1418_vm3 = vcmask 785408  }
  0x13   : > { %s17020_s30 = sld [smem:[#allocation80_spill]]  ;;  %s17021_s24 = sld [smem:[#allocation83_spill]] }
  0x14   : > { %s18372_s22 = smov (!%p618_p3, %s8720_s22), 1  ;;  %s17022_s26 = sld [smem:[#allocation81_spill]] }
  0x15   : > { %s10346_s28 = smul.u32 96, %s18372_s22  ;;  %s17023_s21 = sld [smem:[#allocation84_spill]] }
  0x16   : > { %s10965_s27 = smov 96   ;;  %s16641_s4 = smov 80  }
  0x17   : > { %s16639_s29 = smov 112   ;;  %s16635_s3 = smov 16  }
  0x18   : > { %v10442_v0 = vld [vmem:[%s17019_s2] sm:$0xff]   ;;  %v10443_v1 = vld [vmem:[%s17019_s2 + $0x8] sm:$0xff]   ;;  %v10444_v2 = vld [vmem:[%s17019_s2 + $0x10] sm:$0xff]   ;;  %s625_s2 = scalar_lea.vmem %s16631_s20, %s18372_s22 }
  0x19   : > { %9844 = vmatprep.subr.bf16.mxu0 %v10442_v0  ;;  %s622_s0 = scalar_lea.vmem %s17020_s30, %s10346_s28  ;;  %v8726_v21 = vld [vmem:[%s17021_s24] ss:$0 sm:$0xff]  ;;  %s16643_s28 = smov 64  }
  0x1a   : > { %9845 = vmatpush3.bf16.msra.mxu0 %v10442_v0  ;;  %v627_v3 = vld [vmem:[%s622_s0] sm:$0xff]  ;;  %v628_v4 = vld [vmem:[%s622_s0 + $0x8] sm:$0xff]  ;;  %v629_v5 = vld [vmem:[%s622_s0 + $0x10] sm:$0xff]  ;;  %s16637_s30 = smov 48   ;;  %s17027_s24 = smov 16  }
  0x1b   : > { %9846 = vmatprep.subr.bf16.mxu0 %v10443_v1  ;;  %v639_v6 = vpack.c.bf16 %v628_v4, %v627_v3  ;;  %v630_v7 = vld [vmem:[%s622_s0 + $0x18] sm:$0xff]  ;;  %v631_v8 = vld [vmem:[%s622_s0 + $0x20] sm:$0xff]  ;;  %v632_v9 = vld [vmem:[%s622_s0 + $0x28] sm:$0xff] }
  0x1c   : > { %v640_v10 = vpack.c.bf16 %v630_v7, %v629_v5  ;;  %v641_v11 = vpack.c.bf16 %v632_v9, %v631_v8  ;;  %v633_v12 = vld [vmem:[%s622_s0 + $0x30] sm:$0xff]  ;;  %v634_v13 = vld [vmem:[%s622_s0 + $0x38] sm:$0xff]  ;;  %v635_v14 = vld [vmem:[%s622_s0 + $0x40] sm:$0xff] }
  0x1d   : > { %9850 = vmatprep.mubr.msk.bf16.mxu0 %vm676_vm0, %v639_v6  ;;  %v636_v15 = vld [vmem:[%s622_s0 + $0x48] sm:$0xff]  ;;  %v642_v16 = vpack.c.bf16 %v634_v13, %v633_v12  ;;  %v637_v18 = vld [vmem:[%s622_s0 + $0x50] sm:$0xff]  ;;  %v638_v19 = vld [vmem:[%s622_s0 + $0x58] sm:$0xff] }
  0x1e   : > { %9847 = vmatpush3.bf16.msra.mxu0 %v10443_v1  ;;  %v643_v17 = vpack.c.bf16 %v636_v15, %v635_v14  ;;  %v644_v20 = vpack.c.bf16 %v638_v19, %v637_v18  ;;  %v778_v23 = vld [vmem:[%s17022_s26 + $0x10] sm:$0xff]  ;;  %v776_v26 = vld [vmem:[%s17022_s26] sm:$0xff]  ;;  %v779_v29 = vld [vmem:[%s17022_s26 + $0x18] sm:$0xff] }
  0x1f   : > { %9848 = vmatprep.subr.bf16.mxu0 %v10444_v2  ;;  %v777_v33 = vld [vmem:[%s17022_s26 + $0x8] sm:$0xff]  ;;  %v780_v5 = vld [vmem:[%s17022_s26 + $0x20] sm:$0xff]  ;;  %v782_v12 = vld [vmem:[%s17022_s26 + $0x30] sm:$0xff] }
  0x20   : > { %v781_v13 = vld [vmem:[%s17022_s26 + $0x28] sm:$0xff] }
  0x22   : > { %9849 = vmatpush3.bf16.msra.mxu0 %v10444_v2 }
  0x25   : > { %9851 = vmatmul.mubr.msk.bf16.vlgmr.msra.gmra.mrb[0].mxu0 %vm676_vm0, %v640_v10 }
  0x26   : > { %9854 = vmatprep.mubr.msk.bf16.mxu0 %vm676_vm0, %v641_v11 }
  0x2d   : > { %9855 = vmatmul.mubr.msk.bf16.gmra.mrb[4].mxu0 %vm676_vm0, %v642_v16 }
  0x2e   : > { %9858 = vmatprep.mubr.msk.bf16.mxu0 %vm676_vm0, %v643_v17 }
  0x35   : > { %9859 = vmatmul.mubr.msk.bf16.gmra.mrb[8].mxu0 %vm676_vm0, %v644_v20  ;;  %v783_v20 = vld [vmem:[%s17022_s26 + $0x38] sm:$0xff] }
  0xf8   : > { %v9852_v22 = vpop.f32.mrb[0].mxu0 }
  0xf9   : > { %v738_v24 = vadd.f32 %v9852_v22, %v8726_v21  ;;  %v729_v25 = vpop.f32.mrb[1].mxu0 }
  0xfa   : > { %v730_v27 = vadd.f32 %v8726_v21, %v729_v25  ;;  %v9853_v28 = vpop.f32.mrb[2].mxu0 }
  0xfb   : > { %v11121_v30 = vadd.f32 %v778_v23, %v738_v24  ;;  %v741_v31 = vadd.f32 %v9853_v28, %v8726_v21  ;;  %v732_v32 = vpop.f32.mrb[3].mxu0  ;;  %v785_v28 = vld [vmem:[%s17022_s26 + $0x48] sm:$0xff] }
  0xfc   : > { %v11126_v34 = vadd.f32 %v776_v26, %v730_v27  ;;  %v733_v35 = vadd.f32 %v8726_v21, %v732_v32  ;;  %v786_v27 = vld [vmem:[%s17022_s26 + $0x50] sm:$0xff] }
  0xfd   : > { %v11128_v36 = vadd.f32 %v779_v29, %v741_v31  ;;  %v809_v37 = vsel %vm16645_vm1, %v11121_v30, 0.0 }
  0xfe   : > { %v11132_v38 = vadd.f32 %v777_v33, %v733_v35  ;;  %810 = vadd.xlane.f32.xlu1 %v809_v37  ;;  %v803_v39 = vsel %vm16645_vm1, %v11126_v34, 0.0  ;;  %v787_v35 = vld [vmem:[%s17022_s26 + $0x58] sm:$0xff] }
  0xff   : > { %804 = vadd.xlane.f32.xlu0 %v803_v39  ;;  %v812_v40 = vsel %vm16645_vm1, %v11128_v36, 0.0 }
 0x100   : > { %v806_v41 = vsel %vm16645_vm1, %v11132_v38, 0.0  ;;  %v9856_v42 = vpop.f32.mrb[4].mxu0 }
 0x101   : > { %v754_v43 = vadd.f32 %v9856_v42, %v8726_v21  ;;  %v745_v44 = vpop.f32.mrb[5].mxu0  ;;  %v10445_v42 = vld [vmem:[%s16617_s6] sm:$0xff]  }
 0x102   : > { %813 = vadd.xlane.f32.xlu1 %v812_v40  ;;  %v746_v45 = vadd.f32 %v8726_v21, %v745_v44  ;;  %v9857_v46 = vpop.f32.mrb[6].mxu0  ;;  %9862 = vmatprep.subr.bf16.mxu1 %v10445_v42 }
 0x103   : > { %807 = vadd.xlane.f32.xlu0 %v806_v41  ;;  %v757_v47 = vadd.f32 %v9857_v46, %v8726_v21  ;;  %v748_v48 = vpop.f32.mrb[7].mxu0  ;;  %v11174_v17 = vadd.f32 %v782_v12, %v754_v43  ;;  %9863 = vmatpush3.bf16.msra.mxu1 %v10445_v42  ;;  %v10446_v43 = vld [vmem:[%s16617_s6 + $0x8] sm:$0xff]  }
 0x104   : > { %v749_v49 = vadd.f32 %v8726_v21, %v748_v48  ;;  %v11160_v10 = vadd.f32 %v780_v5, %v746_v45  ;;  %9864 = vmatprep.subr.bf16.mxu1 %v10446_v43 }
 0x105   : > { %v11187_v23 = vadd.f32 %v783_v20, %v757_v47  ;;  %v821_v25 = vsel %vm16645_vm1, %v11174_v17, 0.0 }
 0x106   : > { %v11176_v18 = vadd.f32 %v781_v13, %v749_v49  ;;  %v815_v19 = vsel %vm16645_vm1, %v11160_v10, 0.0 }
 0x107   : > { %v824_v33 = vsel %vm16645_vm1, %v11187_v23, 0.0  ;;  %9865 = vmatpush3.bf16.msra.mxu1 %v10446_v43 }
 0x108   : > { %v9860_v50 = vpop.f32.mrb[8].mxu0  ;;  %v818_v26 = vsel %vm16645_vm1, %v11176_v18, 0.0 }
 0x109   : > { %v770_v51 = vadd.f32 %v9860_v50, %v8726_v21  ;;  %v761_v52 = vpop.f32.mrb[9].mxu0 }
 0x10a   : > { %v762_v53 = vadd.f32 %v8726_v21, %v761_v52  ;;  %v9861_v54 = vpop.f32.mrb[10].mxu0 }
 0x10b   : > { %v773_v55 = vadd.f32 %v9861_v54, %v8726_v21  ;;  %v764_v56 = vpop.f32.mrb[11].mxu0  ;;  %v11201_v29 = vadd.f32 %v786_v27, %v770_v51 }
 0x10c   : > { %v765_v57 = vadd.f32 %v8726_v21, %v764_v56  ;;  %v784_v21 = vld [vmem:[%s17022_s26 + $0x40] sm:$0xff] }
 0x10d   : > { %v11189_v24 = vadd.f32 %v784_v21, %v762_v53  ;;  %v11212_v37 = vadd.f32 %v787_v35, %v773_v55  ;;  %v833_v39 = vsel %vm16645_vm1, %v11201_v29, 0.0 }
 0x10e   : > { %v11203_v31 = vadd.f32 %v785_v28, %v765_v57  ;;  %v11257_v28 = vld [vmem:[%s16616_s5] ss:$0 sm:$0xff] }
 0x10f   : > { %v827_v32 = vsel %vm16645_vm1, %v11189_v24, 0.0  ;;  %v836_v41 = vsel %vm16645_vm1, %v11212_v37, 0.0 }
 0x110   : > { %v830_v40 = vsel %vm16645_vm1, %v11203_v31, 0.0 }
 0x18b   : > { %v811_v58 = vpop.xlane.xlu1 %810 }
 0x18c   : > { %v842_v59 = vmul.f32 0.03125, %v811_v58  ;;  %v805_v60 = vpop.xlane.xlu0 %804 }
 0x18d   : > { %v840_v61 = vmul.f32 0.03125, %v805_v60 }
 0x18e   : > { %v11141_v62 = vsub.f32 %v11121_v30, %v842_v59 }
 0x18f   : > { %v11144_v63 = vsub.f32 %v11126_v34, %v840_v61  ;;  %v814_v0 = vpop.xlane.xlu1 %813 }
 0x190   : > { %v843_v1 = vmul.f32 0.03125, %v814_v0  ;;  %v808_v2 = vpop.xlane.xlu0 %807  ;;  %v866_v9 = vmul.f32 %v11141_v62, %v11141_v62 }
 0x191   : > { %v841_v3 = vmul.f32 0.03125, %v808_v2  ;;  %v864_v4 = vmul.f32 %v11144_v63, %v11144_v63 }
 0x192   : > { %v11152_v6 = vsub.f32 %v11128_v36, %v843_v1  ;;  %v882_v14 = vsel %vm16645_vm1, %v866_v9, 0.0  ;;  %v11240_v9 = vld [vmem:[%s17023_s21] ss:$0 sm:$0xff] }
 0x193   : > { %v11155_v7 = vsub.f32 %v11132_v38, %v841_v3  ;;  %v876_v8 = vsel %vm16645_vm1, %v864_v4, 0.0 }
 0x194   : > { %877 = vadd.xlane.f32.xlu0 %v876_v8  ;;  %v867_v16 = vmul.f32 %v11152_v6, %v11152_v6 }
 0x195   : > { %v865_v11 = vmul.f32 %v11155_v7, %v11155_v7 }
 0x196   : > { %v885_v22 = vsel %vm16645_vm1, %v867_v16, 0.0 }
 0x197   : > { %v879_v15 = vsel %vm16645_vm1, %v865_v11, 0.0 }
 0x198   : > { %883 = vadd.xlane.f32.xlu0 %v882_v14  ;;  %880 = vadd.xlane.f32.xlu1 %v879_v15 }
 0x19c   : > { %816 = vadd.xlane.f32.xlu0 %v815_v19  ;;  %886 = vadd.xlane.f32.xlu1 %v885_v22 }
 0x1a0   : > { %822 = vadd.xlane.f32.xlu0 %v821_v25  ;;  %819 = vadd.xlane.f32.xlu1 %v818_v26 }
 0x1a4   : > { %828 = vadd.xlane.f32.xlu0 %v827_v32  ;;  %825 = vadd.xlane.f32.xlu1 %v824_v33 }
 0x1a8   : > { %834 = vadd.xlane.f32.xlu0 %v833_v39  ;;  %831 = vadd.xlane.f32.xlu1 %v830_v40 }
 0x1ac   : > { %837 = vadd.xlane.f32.xlu1 %v836_v41 }
 0x221   : > { %v878_v44 = vpop.xlane.xlu0 %877 }
 0x222   : > { %v912_v45 = vmul.f32 0.03125, %v878_v44 }
 0x224   : > { %v924_v46 = vadd.f32 1e-05, %v912_v45 }
 0x225   : > { %v881_v47 = vpop.xlane.xlu1 %880  ;;  %v884_v48 = vpop.xlane.xlu0 %883 }
 0x226   : > { %10617 = vrsqrt.f32 %v924_v46  ;;  %v913_v49 = vmul.f32 0.03125, %v881_v47  ;;  %v914_v50 = vmul.f32 0.03125, %v884_v48 }
 0x228   : > { %v925_v51 = vadd.f32 1e-05, %v913_v49  ;;  %v926_v52 = vadd.f32 1e-05, %v914_v50 }
 0x229   : > { %v887_v53 = vpop.xlane.xlu1 %886  ;;  %v817_v54 = vpop.xlane.xlu0 %816 }
 0x22a   : > { %10619 = vrsqrt.f32 %v925_v51  ;;  %v915_v55 = vmul.f32 0.03125, %v887_v53  ;;  %v844_v56 = vmul.f32 0.03125, %v817_v54 }
 0x22b   : > { %10621 = vrsqrt.f32 %v926_v52 }
 0x22c   : > { %v927_v57 = vadd.f32 1e-05, %v915_v55  ;;  %v11227_v58 = vsub.f32 %v11160_v10, %v844_v56 }
 0x22d   : > { %v820_v59 = vpop.xlane.xlu1 %819  ;;  %v823_v60 = vpop.xlane.xlu0 %822 }
 0x22e   : > { %10623 = vrsqrt.f32 %v927_v57  ;;  %v845_v61 = vmul.f32 0.03125, %v820_v59  ;;  %v846_v0 = vmul.f32 0.03125, %v823_v60  ;;  %v868_v8 = vmul.f32 %v11227_v58, %v11227_v58 }
 0x230   : > { %v10618_v1 = vpop.eup %10617  ;;  %v11230_v2 = vsub.f32 %v11176_v18, %v845_v61  ;;  %v11233_v3 = vsub.f32 %v11174_v17, %v846_v0  ;;  %v888_v27 = vsel %vm16645_vm1, %v868_v8, 0.0 }
 0x231   : > { %v826_v4 = vpop.xlane.xlu1 %825  ;;  %v829_v5 = vpop.xlane.xlu0 %828  ;;  %v948_v11 = vmul.f32 %v10618_v1, %v11144_v63 }
 0x232   : > { %v847_v12 = vmul.f32 0.03125, %v826_v4  ;;  %v869_v13 = vmul.f32 %v11230_v2, %v11230_v2  ;;  %v870_v14 = vmul.f32 %v11233_v3, %v11233_v3  ;;  %v848_v15 = vmul.f32 0.03125, %v829_v5 }
 0x233   : > { %v966_v22 = vmul.f32 %v11240_v9, %v948_v11 }
 0x234   : > { %v10620_v16 = vpop.eup %10619  ;;  %v11248_v19 = vsub.f32 %v11187_v23, %v847_v12  ;;  %v891_v20 = vsel %vm16645_vm1, %v869_v13, 0.0  ;;  %v894_v21 = vsel %vm16645_vm1, %v870_v14, 0.0  ;;  %v11264_v41 = vsub.f32 %v11189_v24, %v848_v15 }
 0x235   : > { %v10622_v25 = vpop.eup %10621  ;;  %892 = vadd.xlane.f32.xlu1 %v891_v20  ;;  %v832_v63 = vpop.xlane.xlu1 %831  ;;  %895 = vadd.xlane.f32.xlu0 %v894_v21  ;;  %v949_v32 = vmul.f32 %v10620_v16, %v11155_v7  ;;  %v984_v46 = vadd.f32 %v11257_v28, %v966_v22 }
 0x236   : > { %v835_v26 = vpop.xlane.xlu0 %834  ;;  %v849_v33 = vmul.f32 0.03125, %v832_v63  ;;  %v871_v39 = vmul.f32 %v11248_v19, %v11248_v19  ;;  %v950_v40 = vmul.f32 %v10622_v25, %v11141_v62  ;;  %v872_v55 = vmul.f32 %v11264_v41, %v11264_v41 }
 0x237   : > { %v850_v35 = vmul.f32 0.03125, %v835_v26  ;;  %v967_v42 = vmul.f32 %v11240_v9, %v949_v32 }
 0x238   : > { %v10624_v43 = vpop.eup %10623  ;;  %v11268_v44 = vsub.f32 %v11203_v31, %v849_v33  ;;  %v897_v7 = vsel %vm16645_vm1, %v871_v39, 0.0  ;;  %v968_v49 = vmul.f32 %v11240_v9, %v950_v40  ;;  %v900_v1 = vsel %vm16645_vm1, %v872_v55, 0.0 }
 0x239   : > { %v11271_v45 = vsub.f32 %v11201_v29, %v850_v35  ;;  %898 = vadd.xlane.f32.xlu1 %v897_v7  ;;  %v838_v47 = vpop.xlane.xlu1 %837  ;;  %889 = vadd.xlane.f32.xlu0 %v888_v27  ;;  %v985_v62 = vadd.f32 %v11257_v28, %v967_v42  ;;  %v951_v48 = vmul.f32 %v10624_v43, %v11152_v6 }
 0x23a   : > { %v851_v50 = vmul.f32 0.03125, %v838_v47  ;;  %v873_v51 = vmul.f32 %v11268_v44, %v11268_v44  ;;  %v986_v59 = vadd.f32 %v11257_v28, %v968_v49 }
 0x23b   : > { %v874_v52 = vmul.f32 %v11271_v45, %v11271_v45  ;;  %v996_v53 = vpack.c.bf16 %v985_v62, %v984_v46  ;;  %v969_v54 = vmul.f32 %v11240_v9, %v951_v48 }
 0x23c   : > { %v11286_v56 = vsub.f32 %v11212_v37, %v851_v50  ;;  %v903_v6 = vsel %vm16645_vm1, %v873_v51, 0.0 }
 0x23d   : > { %v906_v57 = vsel %vm16645_vm1, %v874_v52, 0.0  ;;  %904 = vadd.xlane.f32.xlu1 %v903_v6  ;;  %9866 = vmatprep.mubr.msk.bf16.mxu1 %vm16645_vm1, %v996_v53  ;;  %v987_v60 = vadd.f32 %v11257_v28, %v969_v54 }
 0x23e   : > { %907 = vadd.xlane.f32.xlu0 %v906_v57  ;;  %v875_v61 = vmul.f32 %v11286_v56, %v11286_v56 }
 0x23f   : > { %v997_v0 = vpack.c.bf16 %v987_v60, %v986_v59 }
 0x240   : > { %v909_v4 = vsel %vm16645_vm1, %v875_v61, 0.0 }
 0x241   : > { %910 = vadd.xlane.f32.xlu1 %v909_v4  ;;  %9867 = vmatmul.mubr.msk.bf16.vlgmr.msra.gmra.mrb[0].mxu1 %vm16645_vm1, %v997_v0 }
 0x242   : > { %901 = vadd.xlane.f32.xlu0 %v900_v1 }
 0x2c2   : > { %v893_v5 = vpop.xlane.xlu1 %892  ;;  %v896_v8 = vpop.xlane.xlu0 %895 }
 0x2c3   : > { %v917_v11 = vmul.f32 0.03125, %v893_v5  ;;  %v918_v12 = vmul.f32 0.03125, %v896_v8 }
 0x2c5   : > { %v929_v13 = vadd.f32 1e-05, %v917_v11  ;;  %v930_v14 = vadd.f32 1e-05, %v918_v12 }
 0x2c6   : > { %v899_v15 = vpop.xlane.xlu1 %898  ;;  %v890_v16 = vpop.xlane.xlu0 %889 }
 0x2c7   : > { %10625 = vrsqrt.f32 %v929_v13  ;;  %v919_v20 = vmul.f32 0.03125, %v899_v15  ;;  %v916_v21 = vmul.f32 0.03125, %v890_v16 }
 0x2c8   : > { %10627 = vrsqrt.f32 %v930_v14 }
 0x2c9   : > { %v931_v22 = vadd.f32 1e-05, %v919_v20  ;;  %v928_v25 = vadd.f32 1e-05, %v916_v21 }
 0x2ca   : > { %v905_v63 = vpop.xlane.xlu1 %904 }
 0x2cb   : > { %10629 = vrsqrt.f32 %v931_v22  ;;  %v921_v26 = vmul.f32 0.03125, %v905_v63  ;;  %v908_v27 = vpop.xlane.xlu0 %907 }
 0x2cc   : > { %10631 = vrsqrt.f32 %v928_v25  ;;  %v922_v32 = vmul.f32 0.03125, %v908_v27  ;;  %v8738_v25 = vld [vmem:[%s16618_s7] ss:$0 sm:$0xff] }
 0x2cd   : > { %v933_v33 = vadd.f32 1e-05, %v921_v26 }
 0x2ce   : > { %v934_v35 = vadd.f32 1e-05, %v922_v32  ;;  %v911_v39 = vpop.xlane.xlu1 %910 }
 0x2cf   : > { %10633 = vrsqrt.f32 %v933_v33  ;;  %v923_v40 = vmul.f32 0.03125, %v911_v39  ;;  %v902_v42 = vpop.xlane.xlu0 %901 }
 0x2d0   : > { %10635 = vrsqrt.f32 %v934_v35  ;;  %v920_v43 = vmul.f32 0.03125, %v902_v42 }
 0x2d1   : > { %v10626_v7 = vpop.eup %10625  ;;  %v935_v46 = vadd.f32 1e-05, %v923_v40 }
 0x2d2   : > { %v10628_v47 = vpop.eup %10627  ;;  %v932_v62 = vadd.f32 1e-05, %v920_v43  ;;  %v953_v48 = vmul.f32 %v10626_v7, %v11230_v2 }
 0x2d3   : > { %10637 = vrsqrt.f32 %v935_v46  ;;  %v954_v49 = vmul.f32 %v10628_v47, %v11233_v3 }
 0x2d4   : > { %10639 = vrsqrt.f32 %v932_v62  ;;  %v971_v55 = vmul.f32 %v11240_v9, %v953_v48 }
 0x2d5   : > { %v10630_v50 = vpop.eup %10629  ;;  %v972_v53 = vmul.f32 %v11240_v9, %v954_v49 }
 0x2d6   : > { %v10632_v51 = vpop.eup %10631  ;;  %v955_v52 = vmul.f32 %v10630_v50, %v11248_v19  ;;  %v989_v19 = vadd.f32 %v11257_v28, %v971_v55 }
 0x2d7   : > { %v952_v54 = vmul.f32 %v10632_v51, %v11227_v58  ;;  %v990_v2 = vadd.f32 %v11257_v28, %v972_v53 }
 0x2d8   : > { %v973_v6 = vmul.f32 %v11240_v9, %v955_v52 }
 0x2d9   : > { %v10634_v57 = vpop.eup %10633  ;;  %v970_v59 = vmul.f32 %v11240_v9, %v952_v54 }
 0x2da   : > { %v10636_v60 = vpop.eup %10635  ;;  %v991_v3 = vadd.f32 %v11257_v28, %v973_v6  ;;  %v957_v0 = vmul.f32 %v10634_v57, %v11268_v44 }
 0x2db   : > { %v988_v61 = vadd.f32 %v11257_v28, %v970_v59  ;;  %v958_v58 = vmul.f32 %v10636_v60, %v11271_v45 }
 0x2dc   : > { %v999_v1 = vpack.c.bf16 %v991_v3, %v990_v2  ;;  %v975_v14 = vmul.f32 %v11240_v9, %v957_v0 }
 0x2dd   : > { %v10638_v4 = vpop.eup %10637  ;;  %v998_v5 = vpack.c.bf16 %v989_v19, %v988_v61  ;;  %v976_v12 = vmul.f32 %v11240_v9, %v958_v58 }
 0x2de   : > { %v10640_v8 = vpop.eup %10639  ;;  %v959_v11 = vmul.f32 %v10638_v4, %v11286_v56  ;;  %v993_v20 = vadd.f32 %v11257_v28, %v975_v14 }
 0x2df   : > { %9870 = vmatprep.mubr.msk.bf16.mxu1 %vm16645_vm1, %v998_v5  ;;  %v956_v13 = vmul.f32 %v10640_v8, %v11264_v41  ;;  %v994_v15 = vadd.f32 %v11257_v28, %v976_v12 }
 0x2e0   : > { %9871 = vmatmul.mubr.msk.bf16.gmra.mrb[4].mxu1 %vm16645_vm1, %v999_v1  ;;  %v977_v44 = vmul.f32 %v11240_v9, %v959_v11 }
 0x2e1   : > { %v974_v45 = vmul.f32 %v11240_v9, %v956_v13 }
 0x2e2   : > { %v995_v16 = vadd.f32 %v11257_v28, %v977_v44 }
 0x2e3   : > { %v992_v56 = vadd.f32 %v11257_v28, %v974_v45 }
 0x2e4   : > { %v1001_v21 = vpack.c.bf16 %v995_v16, %v994_v15 }
 0x2e5   : > { %v1000_v22 = vpack.c.bf16 %v993_v20, %v992_v56 }
 0x2e7   : > { %9874 = vmatprep.mubr.msk.bf16.mxu1 %vm16645_vm1, %v1000_v22 }
 0x2e8   : > { %9875 = vmatmul.mubr.msk.bf16.gmra.mrb[8].mxu1 %vm16645_vm1, %v1001_v21 }
 0x314   : > { %v9868_v41 = vpop.f32.mrb[0].mxu1 }
 0x315   : > { %v1077_v9 = vpop.f32.mrb[1].mxu1  ;;  %v1086_v26 = vadd.f32 %v9868_v41, %v8738_v25 }
 0x316   : > { %v9869_v63 = vpop.f32.mrb[2].mxu1  ;;  %v1078_v33 = vadd.f32 %v8738_v25, %v1077_v9 }
 0x317   : > { %v1089_v27 = vadd.f32 %v9869_v63, %v8738_v25  ;;  %v1080_v32 = vpop.f32.mrb[3].mxu1 }
 0x318   : > { %v1081_v35 = vadd.f32 %v8738_v25, %v1080_v32 }
 0x319   : > { %v11329_v39 = vpack.c.bf16 %v1089_v27, %v1086_v26 }
 0x31a   : > { %v11331_v28 = vpack.c.bf16 %v1081_v35, %v1078_v33 }
 0x31b   : > { %1134 = vrot.lane.b32.xlu1 %v11329_v39, %s10965_s27 }
 0x31c   : > { %1132 = vrot.lane.b32.xlu0 %v11331_v28, %s10965_s27  ;;  %9882 = vmatprep.mubr.msk.bf16.mxu1 %vm1136_vm2, %v11331_v28 }
 0x38d   : > { %v11347_v43 = vpop.permute.xlu1 %1134 }
 0x38e   : > { %v11339_v40 = vpop.permute.xlu0 %1132  ;;  %v11354_v7 = vsel %vm1136_vm2, %v11347_v43, 0 }
 0x38f   : > { %10314 = vmatprep.subr.msk.bf16.mxu1 %vm1136_vm2, %v11339_v40  ;;  %v11345_v42 = vsel %vm1136_vm2, %v11339_v40, 0 }
 0x390   : > { %9879 = vmatpush3.bf16.xpose.msra.mxu1 %v11345_v42 }
 0x391   : > { %10315 = vmatprep.subr.msk.bf16.mxu1 %vm1136_vm2, %v11347_v43 }
 0x398   : > { %9881 = vmatpush3.bf16.xpose.msra.mxu1 %v11354_v7 }
 0x39f   : > { %9883 = vmatmul.mubr.msk.bf16.vlgmr.msra.gmra.mrb[12].mxu1 %vm1136_vm2, %v11329_v39 }
 0x3b3   : > { %v9872_v46 = vpop.f32.mrb[4].mxu1 }
 0x3b4   : > { %v1093_v47 = vpop.f32.mrb[5].mxu1  ;;  %v1102_v48 = vadd.f32 %v9872_v46, %v8738_v25 }
 0x3b5   : > { %v9873_v62 = vpop.f32.mrb[6].mxu1  ;;  %v1094_v51 = vadd.f32 %v8738_v25, %v1093_v47 }
 0x3b6   : > { %v1105_v49 = vadd.f32 %v9873_v62, %v8738_v25  ;;  %v1096_v50 = vpop.f32.mrb[7].mxu1 }
 0x3b7   : > { %v1097_v52 = vadd.f32 %v8738_v25, %v1096_v50 }
 0x3b8   : > { %v11359_v53 = vpack.c.bf16 %v1105_v49, %v1102_v48 }
 0x3b9   : > { %v11361_v54 = vpack.c.bf16 %v1097_v52, %v1094_v51 }
 0x3bb   : > { %v9876_v55 = vpop.f32.mrb[8].mxu1 }
 0x3bc   : > { %v1109_v6 = vpop.f32.mrb[9].mxu1  ;;  %v1118_v59 = vadd.f32 %v9876_v55, %v8738_v25 }
 0x3bd   : > { %v9877_v57 = vpop.f32.mrb[10].mxu1  ;;  %v1110_v3 = vadd.f32 %v8738_v25, %v1109_v6 }
 0x3be   : > { %v1121_v60 = vadd.f32 %v9877_v57, %v8738_v25  ;;  %v1112_v2 = vpop.f32.mrb[11].mxu1 }
 0x3bf   : > { %v1113_v61 = vadd.f32 %v8738_v25, %v1112_v2 }
 0x3c0   : > { %v11363_v19 = vpack.c.bf16 %v1121_v60, %v1118_v59 }
 0x3c1   : > { %v11365_v0 = vpack.c.bf16 %v1113_v61, %v1110_v3 }
 0x472   : > { %v9884_v58 = vpop.f32.mrb[12].mxu1 }
 0x473   : > { %v1183_v1 = vpop.f32.mrb[13].mxu1  ;;  %v1200_v14 = vmul.f32 0.25, %v9884_v58 }
 0x474   : > { %v1198_v4 = vmul.f32 0.25, %v1183_v1  ;;  %v9885_v5 = vpop.f32.mrb[14].mxu1 }
 0x475   : > { %v1186_v8 = vpop.f32.mrb[15].mxu1  ;;  %v1201_v11 = vmul.f32 0.25, %v9885_v5  ;;  %v1208_v15 = vsel %vm16645_vm1, %v1200_v14, -inf }
 0x476   : > { %v1199_v12 = vmul.f32 0.25, %v1186_v8  ;;  %v1202_v13 = vsel %vm16645_vm1, %v1198_v4, -inf }
 0x477   : > { %1203 = vmax.xlane.f32.xlu1 %v1202_v13  ;;  %v1211_v45 = vsel %vm16645_vm1, %v1201_v11, -inf }
 0x478   : > { %v1205_v44 = vsel %vm16645_vm1, %v1199_v12, -inf }
 0x479   : > { %1206 = vmax.xlane.f32.xlu0 %v1205_v44 }
 0x47b   : > { %1212 = vmax.xlane.f32.xlu1 %v1211_v45 }
 0x47d   : > { %1209 = vmax.xlane.f32.xlu0 %v1208_v15 }
 0x504   : > { %v1204_v16 = vpop.xlane.xlu1 %1203 }
 0x505   : > { %v1214_v22 = vsub.f32 %v1198_v4, %v1204_v16 }
 0x506   : > { %v1207_v56 = vpop.xlane.xlu0 %1206 }
 0x507   : > { %v1215_v20 = vsub.f32 %v1199_v12, %v1207_v56  ;;  %v1218_v27 = vmul.f32 1.442695, %v1214_v22 }
 0x508   : > { %v1213_v21 = vpop.xlane.xlu1 %1212 }
 0x509   : > { %v1217_v41 = vsub.f32 %v1201_v11, %v1213_v21  ;;  %v1220_v25 = vmul.f32 1.442695, %v1215_v20 }
 0x50a   : > { %v1210_v9 = vpop.xlane.xlu0 %1209 }
 0x50b   : > { %v1224_v63 = vmul.f32 1.442695, %v1217_v41  ;;  %v1216_v26 = vsub.f32 %v1200_v14, %v1210_v9 }
 0x50d   : > { %10641 = vpow2.f32 %v1224_v63  ;;  %v1222_v32 = vmul.f32 1.442695, %v1216_v26 }
 0x50e   : > { %10643 = vpow2.f32 %v1220_v25 }
 0x50f   : > { %10645 = vpow2.f32 %v1222_v32 }
 0x510   : > { %10647 = vpow2.f32 %v1218_v27 }
 0x517   : > { %v10642_v33 = vpop.eup %10641 }
 0x518   : > { %v10644_v35 = vpop.eup %10643  ;;  %v1235_v46 = vsel %vm16645_vm1, %v10642_v33, 0.0 }
 0x519   : > { %v10646_v47 = vpop.eup %10645  ;;  %1236 = vadd.xlane.f32.xlu1 %v1235_v46  ;;  %v1229_v49 = vsel %vm16645_vm1, %v10644_v35, 0.0 }
 0x51a   : > { %v1232_v62 = vsel %vm16645_vm1, %v10646_v47, 0.0  ;;  %v10648_v48 = vpop.eup %10647 }
 0x51b   : > { %1233 = vadd.xlane.f32.xlu0 %v1232_v62  ;;  %v1226_v50 = vsel %vm16645_vm1, %v10648_v48, 0.0 }
 0x51d   : > { %1230 = vadd.xlane.f32.xlu1 %v1229_v49 }
 0x51f   : > { %1227 = vadd.xlane.f32.xlu0 %v1226_v50 }
 0x52e   : > { %1250 = vrot.lane.b32.xlu1 %v11329_v39, %s16643_s28 }
 0x532   : > { %1313 = vrot.lane.b32.xlu1 %v11361_v54, %s10965_s27 }
 0x535   : > { %1248 = vrot.lane.b32.xlu0 %v11331_v28, %s16643_s28 }
 0x536   : > { %1315 = vrot.lane.b32.xlu1 %v11359_v53, %s10965_s27 }
 0x539   : > { %1317 = vrot.lane.b32.xlu0 %v11365_v0, %s10965_s27 }
 0x53a   : > { %1319 = vrot.lane.b32.xlu1 %v11363_v19, %s10965_s27 }
 0x5a6   : > { %v1237_v51 = vpop.xlane.xlu1 %1236 }
 0x5a8   : > { %v1234_v52 = vpop.xlane.xlu0 %1233 }
 0x5a9   : > { %10649 = vrcp.f32 %v1234_v52 }
 0x5aa   : > { %v1231_v55 = vpop.xlane.xlu1 %1230 }
 0x5ab   : > { %10651 = vrcp.f32 %v1231_v55 }
 0x5ac   : > { %10653 = vrcp.f32 %v1237_v51  ;;  %v1228_v6 = vpop.xlane.xlu0 %1227 }
 0x5ad   : > { %10655 = vrcp.f32 %v1228_v6 }
 0x5ae   : > { %v1251_v59 = vpop.permute.xlu1 %1250 }
 0x5b0   : > { %v1249_v57 = vpop.permute.xlu0 %1248 }
 0x5b1   : > { %9886 = vmatprep.subr.bf16.mxu1 %v1249_v57  ;;  %9914 = vmatprep.subr.bf16.mxu0 %v1249_v57 }
 0x5b2   : > { %9887 = vmatpush3.bf16.msra.mxu1 %v1249_v57  ;;  %9915 = vmatpush3.bf16.msra.mxu0 %v1249_v57  ;;  %v1314_v12 = vpop.permute.xlu1 %1313 }
 0x5b3   : > { %9888 = vmatprep.subr.bf16.mxu1 %v1251_v59  ;;  %9916 = vmatprep.subr.bf16.mxu0 %v1251_v59  ;;  %v10650_v60 = vpop.eup %10649 }
 0x5b4   : > { %v1244_v58 = vmul.f32 %v10650_v60, %v10646_v47  ;;  %v1318_v44 = vpop.permute.xlu0 %1317 }
 0x5b5   : > { %v10652_v2 = vpop.eup %10651 }
 0x5b6   : > { %v10654_v3 = vpop.eup %10653  ;;  %9889 = vmatpush3.bf16.msra.mxu1 %v1251_v59  ;;  %9917 = vmatpush3.bf16.msra.mxu0 %v1251_v59  ;;  %v1243_v4 = vmul.f32 %v10652_v2, %v10644_v35  ;;  %v1316_v13 = vpop.permute.xlu1 %1315 }
 0x5b7   : > { %v10656_v61 = vpop.eup %10655  ;;  %10316 = vmatprep.subr.msk.bf16.mxu1 %vm1136_vm2, %v11339_v40  ;;  %v1245_v5 = vmul.f32 %v10654_v3, %v10642_v33  ;;  %v1334_v40 = vsel %vm1136_vm2, %v1314_v12, 0  ;;  %v1337_v14 = vsel %vm1136_vm2, %v1316_v13, 0 }
 0x5b8   : > { %v1242_v1 = vmul.f32 %v10656_v61, %v10648_v48 }
 0x5b9   : > { %v1247_v11 = vpack.c.bf16 %v1245_v5, %v1244_v58 }
 0x5ba   : > { %v1246_v8 = vpack.c.bf16 %v1243_v4, %v1242_v1 }
 0x5bc   : > { %9890 = vmatprep.mubr.msk.bf16.mxu1 %vm16645_vm1, %v1246_v8 }
 0x5bd   : > { %9891 = vmatmul.mubr.msk.bf16.vlgmr.msra.gmra.mrb[16].mxu1 %vm16645_vm1, %v1247_v11 }
 0x5be   : > { %9906 = vmatprep.mubr.msk.bf16.mxu1 %vm1136_vm2, %v11361_v54 }
 0x5bf   : > { %9895 = vmatpush3.bf16.xpose.msra.mxu1 %v11345_v42  ;;  %v1340_v42 = vsel %vm1136_vm2, %v1318_v44, 0 }
 0x5c0   : > { %10317 = vmatprep.subr.msk.bf16.mxu1 %vm1136_vm2, %v11347_v43  ;;  %v1320_v43 = vpop.permute.xlu1 %1319 }
 0x5c7   : > { %9897 = vmatpush3.bf16.xpose.msra.mxu1 %v11354_v7  ;;  %v1343_v7 = vsel %vm1136_vm2, %v1320_v43, 0 }
 0x5c8   : > { %10318 = vmatprep.subr.msk.bf16.mxu1 %vm1136_vm2, %v1314_v12 }
 0x5cf   : > { %9899 = vmatpush3.bf16.xpose.msra.mxu1 %v1334_v40 }
 0x5d0   : > { %10319 = vmatprep.subr.msk.bf16.mxu1 %vm1136_vm2, %v1316_v13 }
 0x5d7   : > { %9901 = vmatpush3.bf16.xpose.msra.mxu1 %v1337_v14 }
 0x5d8   : > { %10320 = vmatprep.subr.msk.bf16.mxu1 %vm1136_vm2, %v1318_v44 }
 0x5df   : > { %9903 = vmatpush3.bf16.xpose.msra.mxu1 %v1340_v42 }
 0x5e0   : > { %10321 = vmatprep.subr.msk.bf16.mxu1 %vm1136_vm2, %v1320_v43 }
 0x5e7   : > { %9905 = vmatpush3.bf16.xpose.msra.mxu1 %v1343_v7 }
 0x5ee   : > { %9907 = vmatmul.mubr.msk.bf16.vlgmr.msra.gmra.mrb[20].mxu1 %vm1136_vm2, %v11359_v53 }
 0x5ef   : > { %9910 = vmatprep.mubr.msk.bf16.mxu1 %vm1136_vm2, %v11365_v0 }
 0x5f6   : > { %9911 = vmatmul.mubr.msk.bf16.gmra.mrb[24].mxu1 %vm1136_vm2, %v11363_v19 }
 0x690   : > { %v11411_v45 = vpop.f32.mrb[16].mxu1 }
 0x691   : > { %v11413_v15 = vpop.f32.mrb[17].mxu1 }
 0x692   : > { %v11415_v16 = vpop.f32.mrb[18].mxu1 }
 0x693   : > { %v11417_v56 = vpop.f32.mrb[19].mxu1 }
 0x6c1   : > { %v9908_v20 = vpop.f32.mrb[20].mxu1 }
 0x6c2   : > { %v1379_v21 = vpop.f32.mrb[21].mxu1  ;;  %v1412_v9 = vmul.f32 0.25, %v9908_v20 }
 0x6c3   : > { %v1410_v22 = vmul.f32 0.25, %v1379_v21  ;;  %v9909_v41 = vpop.f32.mrb[22].mxu1 }
 0x6c4   : > { %v1382_v25 = vpop.f32.mrb[23].mxu1  ;;  %v1413_v32 = vmul.f32 0.25, %v9909_v41  ;;  %v1425_v35 = vsel %vm1418_vm3, %v1412_v9, -inf }
 0x6c5   : > { %v1411_v63 = vmul.f32 0.25, %v1382_v25  ;;  %v1419_v26 = vsel %vm1418_vm3, %v1410_v22, -inf }
 0x6c6   : > { %1420 = vmax.xlane.f32.xlu0 %v1419_v26  ;;  %v1428_v50 = vsel %vm1418_vm3, %v1413_v32, -inf }
 0x6c7   : > { %v1422_v27 = vsel %vm1418_vm3, %v1411_v63, -inf }
 0x6c8   : > { %1423 = vmax.xlane.f32.xlu1 %v1422_v27 }
 0x6c9   : > { %v9912_v33 = vpop.f32.mrb[24].mxu1 }
 0x6ca   : > { %1426 = vmax.xlane.f32.xlu0 %v1425_v35  ;;  %v1395_v46 = vpop.f32.mrb[25].mxu1  ;;  %v1416_v55 = vmul.f32 0.25, %v9912_v33 }
 0x6cb   : > { %v9913_v47 = vpop.f32.mrb[26].mxu1  ;;  %v1414_v48 = vmul.f32 0.25, %v1395_v46 }
 0x6cc   : > { %v1398_v62 = vpop.f32.mrb[27].mxu1  ;;  %v1417_v51 = vmul.f32 0.25, %v9913_v47  ;;  %v1437_v59 = vsel %vm1418_vm3, %v1416_v55, -inf }
 0x6cd   : > { %v1415_v49 = vmul.f32 0.25, %v1398_v62  ;;  %v1431_v6 = vsel %vm1418_vm3, %v1414_v48, -inf }
 0x6ce   : > { %1429 = vmax.xlane.f32.xlu0 %v1428_v50  ;;  %v1440_v57 = vsel %vm1418_vm3, %v1417_v51, -inf }
 0x6cf   : > { %v1434_v52 = vsel %vm1418_vm3, %v1415_v49, -inf }
 0x6d0   : > { %1435 = vmax.xlane.f32.xlu1 %v1434_v52 }
 0x6d2   : > { %1432 = vmax.xlane.f32.xlu0 %v1431_v6 }
 0x6d4   : > { %1441 = vmax.xlane.f32.xlu1 %v1440_v57 }
 0x6d6   : > { %1438 = vmax.xlane.f32.xlu0 %v1437_v59 }
 0x6e5   : > { %1513 = vrot.lane.b32.xlu1 %v11359_v53, %s16643_s28 }
 0x6e9   : > { %1515 = vrot.lane.b32.xlu1 %v11365_v0, %s16643_s28 }
 0x6ec   : > { %1511 = vrot.lane.b32.xlu0 %v11361_v54, %s16643_s28 }
 0x6ed   : > { %1517 = vrot.lane.b32.xlu1 %v11363_v19, %s16643_s28 }
 0x6f0   : > { %1604 = vrot.lane.b32.xlu0 %v11331_v28, %s16641_s4 }
 0x6f1   : > { %1606 = vrot.lane.b32.xlu1 %v11329_v39, %s16641_s4 }
 0x753   : > { %v1421_v60 = vpop.xlane.xlu0 %1420 }
 0x754   : > { %v1443_v2 = vsub.f32 %v1410_v22, %v1421_v60 }
 0x755   : > { %v1424_v61 = vpop.xlane.xlu1 %1423 }
 0x756   : > { %v1451_v1 = vmul.f32 1.442695, %v1443_v2  ;;  %v1444_v5 = vsub.f32 %v1411_v63, %v1424_v61 }
 0x757   : > { %v1427_v3 = vpop.xlane.xlu0 %1426 }
 0x758   : > { %v1445_v58 = vsub.f32 %v1412_v9, %v1427_v3  ;;  %v1453_v13 = vmul.f32 1.442695, %v1444_v5 }
 0x75a   : > { %v1455_v4 = vmul.f32 1.442695, %v1445_v58 }
 0x75b   : > { %v1430_v8 = vpop.xlane.xlu0 %1429 }
 0x75c   : > { %10657 = vpow2.f32 %v1455_v4  ;;  %v1446_v11 = vsub.f32 %v1413_v32, %v1430_v8 }
 0x75d   : > { %v1436_v12 = vpop.xlane.xlu1 %1435  ;;  %10659 = vpow2.f32 %v1451_v1 }
 0x75e   : > { %v1457_v40 = vmul.f32 1.442695, %v1446_v11  ;;  %v1448_v7 = vsub.f32 %v1415_v49, %v1436_v12 }
 0x75f   : > { %v1433_v14 = vpop.xlane.xlu0 %1432 }
 0x760   : > { %10661 = vpow2.f32 %v1457_v40  ;;  %v1447_v42 = vsub.f32 %v1414_v48, %v1433_v14  ;;  %v1461_v26 = vmul.f32 1.442695, %v1448_v7 }
 0x761   : > { %v1442_v44 = vpop.xlane.xlu1 %1441  ;;  %10663 = vpow2.f32 %v1453_v13 }
 0x762   : > { %v1450_v43 = vsub.f32 %v1417_v51, %v1442_v44  ;;  %v1459_v9 = vmul.f32 1.442695, %v1447_v42 }
 0x763   : > { %v1439_v20 = vpop.xlane.xlu0 %1438 }
 0x764   : > { %v1465_v21 = vmul.f32 1.442695, %v1450_v43  ;;  %v1449_v22 = vsub.f32 %v1416_v55, %v1439_v20 }
 0x765   : > { %v1514_v41 = vpop.permute.xlu1 %1513 }
 0x766   : > { %v11439_v25 = vpop.eup %10657  ;;  %v1463_v63 = vmul.f32 1.442695, %v1449_v22  ;;  %10665 = vpow2.f32 %v1465_v21 }
 0x767   : > { %v1512_v27 = vpop.permute.xlu0 %1511  ;;  %v1473_v32 = vsel %vm1418_vm3, %v11439_v25, 0.0  ;;  %v11443_v33 = vpop.eup %10659 }
 0x768   : > { %10667 = vpow2.f32 %v1463_v63  ;;  %1474 = vadd.xlane.f32.xlu0 %v1473_v32  ;;  %9918 = vmatprep.subr.bf16.mxu0 %v1512_v27  ;;  %v1467_v62 = vsel %vm1418_vm3, %v11443_v33, 0.0 }
 0x769   : > { %9919 = vmatpush3.bf16.msra.mxu0 %v1512_v27  ;;  %v1516_v35 = vpop.permute.xlu1 %1515  ;;  %10669 = vpow2.f32 %v1459_v9 }
 0x76a   : > { %v11445_v46 = vpop.eup %10661  ;;  %9920 = vmatprep.subr.bf16.mxu0 %v1514_v41  ;;  %10671 = vpow2.f32 %v1461_v26 }
 0x76b   : > { %v1605_v47 = vpop.permute.xlu0 %1604  ;;  %v1476_v48 = vsel %vm1418_vm3, %v11445_v46, 0.0  ;;  %v11455_v50 = vpop.eup %10663 }
 0x76c   : > { %1468 = vadd.xlane.f32.xlu0 %v1467_v62  ;;  %10324 = vmatprep.subr.msk.bf16.mxu1 %vm1136_vm2, %v1605_v47  ;;  %v11453_v49 = vsel %vm1136_vm2, %v1605_v47, 0  ;;  %v1470_v52 = vsel %vm1418_vm3, %v11455_v50, 0.0 }
 0x76d   : > { %1477 = vadd.xlane.f32.xlu1 %v1476_v48  ;;  %9921 = vmatpush3.bf16.msra.mxu0 %v1514_v41  ;;  %v1518_v51 = vpop.permute.xlu1 %1517 }
 0x76e   : > { %9951 = vmatpush3.bf16.xpose.msra.mxu1 %v11453_v49  ;;  %9922 = vmatprep.subr.bf16.mxu0 %v1516_v35 }
 0x770   : > { %v11460_v55 = vpop.eup %10665 }
 0x771   : > { %1471 = vadd.xlane.f32.xlu1 %v1470_v52  ;;  %9923 = vmatpush3.bf16.msra.mxu0 %v1516_v35  ;;  %v11462_v6 = vpop.permute.xlu1 %1606  ;;  %v1488_v2 = vsel %vm1418_vm3, %v11460_v55, 0.0 }
 0x772   : > { %v11464_v57 = vpop.eup %10667  ;;  %9924 = vmatprep.subr.bf16.mxu0 %v1518_v51  ;;  %10325 = vmatprep.subr.msk.bf16.mxu1 %vm1136_vm2, %v11462_v6  ;;  %v11478_v61 = vsel %vm1136_vm2, %v11462_v6, 0 }
 0x773   : > { %v1485_v59 = vsel %vm1418_vm3, %v11464_v57, 0.0  ;;  %v11470_v60 = vpop.eup %10669 }
 0x774   : > { %1486 = vadd.xlane.f32.xlu0 %v1485_v59  ;;  %v11474_v3 = vpop.eup %10671  ;;  %v1479_v58 = vsel %vm1418_vm3, %v11470_v60, 0.0 }
 0x775   : > { %1489 = vadd.xlane.f32.xlu1 %v1488_v2  ;;  %9925 = vmatpush3.bf16.msra.mxu0 %v1518_v51  ;;  %v1482_v1 = vsel %vm1418_vm3, %v11474_v3, 0.0 }
 0x776   : > { %9953 = vmatpush3.bf16.xpose.msra.mxu1 %v11478_v61  ;;  %10322 = vmatprep.subr.msk.bf16.mxu0 %vm1136_vm2, %v1605_v47 }
 0x778   : > { %1480 = vadd.xlane.f32.xlu0 %v1479_v58 }
 0x779   : > { %1483 = vadd.xlane.f32.xlu1 %v1482_v1 }
 0x78a   : > { %1600 = vrot.lane.b32.xlu1 %v11331_v28, %s16639_s29 }
 0x78e   : > { %1602 = vrot.lane.b32.xlu1 %v11329_v39, %s16639_s29  ;;  %1788 = vrot.lane.b32.xlu0 %v11361_v54, %s16641_s4 }
 0x792   : > { %1794 = vrot.lane.b32.xlu1 %v11363_v19, %s16641_s4  ;;  %1790 = vrot.lane.b32.xlu0 %v11359_v53, %s16641_s4 }
 0x796   : > { %1782 = vrot.lane.b32.xlu1 %v11359_v53, %s16639_s29  ;;  %1792 = vrot.lane.b32.xlu0 %v11365_v0, %s16641_s4  ;;  %s17025_s4 = smov 112  }
 0x79a   : > { %1786 = vrot.lane.b32.xlu1 %v11363_v19, %s16639_s29  ;;  %1780 = vrot.lane.b32.xlu0 %v11361_v54, %s16639_s29 }
 0x79e   : > { %1784 = vrot.lane.b32.xlu0 %v11365_v0, %s16639_s29  ;;  %s17026_s29 = smov 48  }
 0x7f5   : > { %v1475_v4 = vpop.xlane.xlu0 %1474 }
 0x7f9   : > { %v1469_v5 = vpop.xlane.xlu0 %1468 }
 0x7fa   : > { %v1478_v8 = vpop.xlane.xlu1 %1477 }
 0x7fb   : > { %10673 = vrcp.f32 %v1478_v8 }
 0x7fc   : > { %10675 = vrcp.f32 %v1469_v5 }
 0x7fd   : > { %10677 = vrcp.f32 %v1475_v4 }
 0x7fe   : > { %v1472_v11 = vpop.xlane.xlu1 %1471 }
 0x7ff   : > { %10679 = vrcp.f32 %v1472_v11 }
 0x801   : > { %v1487_v12 = vpop.xlane.xlu0 %1486 }
 0x802   : > { %v1490_v40 = vpop.xlane.xlu1 %1489  ;;  %10681 = vrcp.f32 %v1487_v12 }
 0x803   : > { %10683 = vrcp.f32 %v1490_v40 }
 0x805   : > { %v1481_v13 = vpop.xlane.xlu0 %1480  ;;  %v10674_v14 = vpop.eup %10673 }
 0x806   : > { %10685 = vrcp.f32 %v1481_v13  ;;  %v1484_v44 = vpop.xlane.xlu1 %1483  ;;  %v10676_v42 = vpop.eup %10675  ;;  %v1502_v20 = vmul.f32 %v10674_v14, %v11445_v46 }
 0x807   : > { %10687 = vrcp.f32 %v1484_v44  ;;  %v10678_v43 = vpop.eup %10677  ;;  %v1499_v41 = vmul.f32 %v10676_v42, %v11443_v33 }
 0x808   : > { %v1501_v63 = vmul.f32 %v10678_v43, %v11439_v25 }
 0x809   : > { %v10680_v7 = vpop.eup %10679  ;;  %v1789_v21 = vpop.permute.xlu0 %1788 }
 0x80a   : > { %10326 = vmatprep.subr.msk.bf16.mxu1 %vm1136_vm2, %v1789_v21  ;;  %v1809_v22 = vsel %vm1136_vm2, %v1789_v21, 0  ;;  %v1500_v9 = vmul.f32 %v10680_v7, %v11455_v50  ;;  %v1508_v32 = vpack.c.bf16 %v1502_v20, %v1501_v63  ;;  %v1601_v46 = vpop.permute.xlu1 %1600 }
 0x80b   : > { %9955 = vmatpush3.bf16.xpose.msra.mxu1 %v1809_v22 }
 0x80c   : > { %v1507_v26 = vpack.c.bf16 %v1500_v9, %v1499_v41  ;;  %v10682_v27 = vpop.eup %10681 }
 0x80d   : > { %v1791_v35 = vpop.permute.xlu0 %1790  ;;  %v10684_v47 = vpop.eup %10683  ;;  %v1505_v50 = vmul.f32 %v10682_v27, %v11464_v57 }
 0x80e   : > { %9926 = vmatprep.mubr.msk.bf16.mxu0 %vm1418_vm3, %v1507_v26  ;;  %10327 = vmatprep.subr.msk.bf16.mxu1 %vm1136_vm2, %v1791_v35  ;;  %v1506_v51 = vmul.f32 %v10684_v47, %v11460_v55  ;;  %v1812_v52 = vsel %vm1136_vm2, %v1791_v35, 0 }
 0x80f   : > { %9927 = vmatmul.mubr.msk.bf16.vlgmr.msra.gmra.mrb[12].mxu0 %vm1418_vm3, %v1508_v32 }
 0x810   : > { %v10686_v62 = vpop.eup %10685  ;;  %9935 = vmatpush3.bf16.xpose.msra.mxu0 %v11453_v49  ;;  %v1603_v49 = vpop.permute.xlu1 %1602  ;;  %v1510_v1 = vpack.c.bf16 %v1506_v51, %v1505_v50 }
 0x811   : > { %v10688_v33 = vpop.eup %10687  ;;  %10323 = vmatprep.subr.msk.bf16.mxu0 %vm1136_vm2, %v11462_v6  ;;  %v1793_v25 = vpop.permute.xlu0 %1792  ;;  %v1503_v48 = vmul.f32 %v10686_v62, %v11470_v60 }
 0x812   : > { %v1504_v59 = vmul.f32 %v10688_v33, %v11474_v3  ;;  %v1815_v55 = vsel %vm1136_vm2, %v1793_v25, 0 }
 0x813   : > { %9957 = vmatpush3.bf16.xpose.msra.mxu1 %v1812_v52 }
 0x814   : > { %10328 = vmatprep.subr.msk.bf16.mxu1 %vm1136_vm2, %v1793_v25  ;;  %v1509_v2 = vpack.c.bf16 %v1504_v59, %v1503_v48  ;;  %v1795_v6 = vpop.permute.xlu1 %1794 }
 0x815   : > { %v1781_v58 = vpop.permute.xlu0 %1780  ;;  %v1818_v57 = vsel %vm1136_vm2, %v1795_v6, 0 }
 0x816   : > { %9930 = vmatprep.mubr.msk.bf16.mxu0 %vm1418_vm3, %v1509_v2  ;;  %9962 = vmatprep.mubr.msk.bf16.mxu1 %vm1136_vm2, %v1781_v58 }
 0x817   : > { %9931 = vmatmul.mubr.msk.bf16.gmra.mrb[16].mxu0 %vm1418_vm3, %v1510_v1 }
 0x818   : > { %9937 = vmatpush3.bf16.xpose.msra.mxu0 %v11478_v61  ;;  %9938 = vmatprep.mubr.msk.bf16.mxu0 %vm1136_vm2, %v1601_v46  ;;  %v1783_v60 = vpop.permute.xlu1 %1782 }
 0x819   : > { %v1785_v3 = vpop.permute.xlu0 %1784 }
 0x81b   : > { %9959 = vmatpush3.bf16.xpose.msra.mxu1 %v1815_v55 }
 0x81c   : > { %10329 = vmatprep.subr.msk.bf16.mxu1 %vm1136_vm2, %v1795_v6  ;;  %v1787_v61 = vpop.permute.xlu1 %1786 }
 0x81f   : > { %9939 = vmatmul.mubr.msk.bf16.vlgmr.msra.gmra.mrb[20].mxu0 %vm1136_vm2, %v1603_v49 }
 0x823   : > { %9961 = vmatpush3.bf16.xpose.msra.mxu1 %v1818_v57 }
 0x82a   : > { %9963 = vmatmul.mubr.msk.bf16.vlgmr.msra.gmra.mrb[28].mxu1 %vm1136_vm2, %v1783_v60 }
 0x82b   : > { %9966 = vmatprep.mubr.msk.bf16.mxu1 %vm1136_vm2, %v1785_v3 }
 0x832   : > { %9967 = vmatmul.mubr.msk.bf16.gmra.mrb[32].mxu1 %vm1136_vm2, %v1787_v61 }
 0x8e2   : > { %v11536_v4 = vpop.f32.mrb[12].mxu0 }
 0x8e3   : > { %v11538_v5 = vpop.f32.mrb[13].mxu0 }
 0x8e4   : > { %v11540_v8 = vpop.f32.mrb[14].mxu0 }
 0x8e5   : > { %v11542_v11 = vpop.f32.mrb[15].mxu0 }
 0x8ea   : > { %v11544_v12 = vpop.f32.mrb[16].mxu0 }
 0x8eb   : > { %v11546_v40 = vpop.f32.mrb[17].mxu0 }
 0x8ec   : > { %v11548_v13 = vpop.f32.mrb[18].mxu0 }
 0x8ed   : > { %v11550_v14 = vpop.f32.mrb[19].mxu0 }
 0x8f2   : > { %v9940_v44 = vpop.f32.mrb[20].mxu0 }
 0x8f3   : > { %v1654_v42 = vpop.f32.mrb[21].mxu0  ;;  %v1671_v21 = vmul.f32 0.25, %v9940_v44 }
 0x8f4   : > { %v1669_v43 = vmul.f32 0.25, %v1654_v42  ;;  %v9941_v7 = vpop.f32.mrb[22].mxu0 }
 0x8f5   : > { %v1657_v20 = vpop.f32.mrb[23].mxu0  ;;  %v11557_v63 = vmul.f32 0.25, %v9941_v7  ;;  %v1679_v26 = vsel %vm16645_vm1, %v1671_v21, -inf }
 0x8f6   : > { %v11552_v22 = vmul.f32 0.25, %v1657_v20  ;;  %v1673_v41 = vsel %vm16645_vm1, %v1669_v43, -inf }
 0x8f7   : > { %1674 = vmax.xlane.f32.xlu0 %v1673_v41  ;;  %v1682_v32 = vsel %vm16645_vm1, %v11557_v63, -inf }
 0x8f8   : > { %v1676_v9 = vsel %vm16645_vm1, %v11552_v22, -inf }
 0x8f9   : > { %1677 = vmax.xlane.f32.xlu1 %v1676_v9 }
 0x8fb   : > { %1680 = vmax.xlane.f32.xlu0 %v1679_v26 }
 0x8fd   : > { %v9964_v27 = vpop.f32.mrb[28].mxu1 }
 0x8fe   : > { %v1854_v35 = vpop.f32.mrb[29].mxu1  ;;  %v1887_v48 = vmul.f32 0.25, %v9964_v27 }
 0x8ff   : > { %1683 = vmax.xlane.f32.xlu0 %v1682_v32  ;;  %v1885_v47 = vmul.f32 0.25, %v1854_v35  ;;  %v9965_v46 = vpop.f32.mrb[30].mxu1 }
 0x900   : > { %v1857_v62 = vpop.f32.mrb[31].mxu1  ;;  %v1888_v50 = vmul.f32 0.25, %v9965_v46  ;;  %v1899_v59 = vsel %vm1418_vm3, %v1887_v48, -inf }
 0x901   : > { %v1886_v33 = vmul.f32 0.25, %v1857_v62  ;;  %v1893_v25 = vsel %vm1418_vm3, %v1885_v47, -inf }
 0x902   : > { %v1902_v1 = vsel %vm1418_vm3, %v1888_v50, -inf }
 0x903   : > { %1894 = vmax.xlane.f32.xlu0 %v1893_v25  ;;  %v1896_v51 = vsel %vm1418_vm3, %v1886_v33, -inf }
 0x904   : > { %1897 = vmax.xlane.f32.xlu1 %v1896_v51 }
 0x905   : > { %v9968_v52 = vpop.f32.mrb[32].mxu1 }
 0x906   : > { %v1870_v2 = vpop.f32.mrb[33].mxu1  ;;  %v11572_v60 = vmul.f32 0.25, %v9968_v52 }
 0x907   : > { %1900 = vmax.xlane.f32.xlu0 %v1899_v59  ;;  %v11565_v49 = vmul.f32 0.25, %v1870_v2  ;;  %v9969_v58 = vpop.f32.mrb[34].mxu1 }
 0x908   : > { %1903 = vmax.xlane.f32.xlu1 %v1902_v1  ;;  %v1873_v55 = vpop.f32.mrb[35].mxu1  ;;  %v11574_v3 = vmul.f32 0.25, %v9969_v58  ;;  %v1911_v44 = vsel %vm1418_vm3, %v11572_v60, -inf }
 0x909   : > { %v11568_v6 = vmul.f32 0.25, %v1873_v55  ;;  %v1905_v57 = vsel %vm1418_vm3, %v11565_v49, -inf }
 0x90a   : > { %v1914_v42 = vsel %vm1418_vm3, %v11574_v3, -inf }
 0x90b   : > { %1906 = vmax.xlane.f32.xlu0 %v1905_v57  ;;  %v1908_v61 = vsel %vm1418_vm3, %v11568_v6, -inf }
 0x90c   : > { %1909 = vmax.xlane.f32.xlu1 %v1908_v61 }
 0x90f   : > { %1912 = vmax.xlane.f32.xlu0 %v1911_v44 }
 0x910   : > { %1915 = vmax.xlane.f32.xlu1 %v1914_v42 }
 0x925   : > { %1719 = vrot.lane.b32.xlu0 %v11331_v28, %s16637_s30 }
 0x984   : > { %v1675_v7 = vpop.xlane.xlu0 %1674 }
 0x985   : > { %v1685_v20 = vsub.f32 %v1669_v43, %v1675_v7 }
 0x986   : > { %v1678_v35 = vpop.xlane.xlu1 %1677 }
 0x987   : > { %v1689_v26 = vmul.f32 1.442695, %v1685_v20 }
 0x988   : > { %v1681_v41 = vpop.xlane.xlu0 %1680 }
 0x989   : > { %v1687_v9 = vsub.f32 %v1671_v21, %v1681_v41 }
 0x98b   : > { %v1693_v27 = vmul.f32 1.442695, %v1687_v9 }
 0x98c   : > { %v1684_v32 = vpop.xlane.xlu0 %1683 }
 0x98d   : > { %10689 = vpow2.f32 %v1693_v27 }
 0x98e   : > { %10691 = vpow2.f32 %v1689_v26 }
 0x990   : > { %v1895_v46 = vpop.xlane.xlu0 %1894 }
 0x991   : > { %v1917_v62 = vsub.f32 %v1885_v47, %v1895_v46  ;;  %v1898_v25 = vpop.xlane.xlu1 %1897  ;;  %v1688_v47 = vsub.f32 %v11557_v63, %v1684_v32 }
 0x992   : > { %v1918_v51 = vsub.f32 %v1886_v33, %v1898_v25 }
 0x993   : > { %v1925_v52 = vmul.f32 1.442695, %v1917_v62  ;;  %v1695_v7 = vmul.f32 1.442695, %v1688_v47 }
 0x994   : > { %v1927_v59 = vmul.f32 1.442695, %v1918_v51  ;;  %v1901_v2 = vpop.xlane.xlu0 %1900 }
 0x995   : > { %10693 = vpow2.f32 %v1925_v52  ;;  %v1919_v58 = vsub.f32 %v1887_v48, %v1901_v2  ;;  %v1904_v28 = vpop.xlane.xlu1 %1903 }
 0x996   : > { %10695 = vpow2.f32 %v1927_v59  ;;  %v1920_v21 = vsub.f32 %v1888_v50, %v1904_v28  ;;  %v1686_v50 = vsub.f32 %v11552_v22, %v1678_v35 }
 0x997   : > { %v11584_v1 = vpop.eup %10689  ;;  %v1929_v43 = vmul.f32 1.442695, %v1919_v58 }
 0x998   : > { %v1907_v55 = vpop.xlane.xlu0 %1906  ;;  %v1703_v57 = vsel %vm16645_vm1, %v11584_v1, 0.0  ;;  %v11588_v61 = vpop.eup %10691  ;;  %v1931_v33 = vmul.f32 1.442695, %v1920_v21  ;;  %v1691_v63 = vmul.f32 1.442695, %v1686_v50 }
 0x999   : > { %1704 = vadd.xlane.f32.xlu0 %v1703_v57  ;;  %10697 = vpow2.f32 %v1929_v43  ;;  %v1697_v48 = vsel %vm16645_vm1, %v11588_v61, 0.0  ;;  %v1910_v52 = vpop.xlane.xlu1 %1909  ;;  %v1921_v59 = vsub.f32 %v11565_v49, %v1907_v55 }
 0x99a   : > { %10699 = vpow2.f32 %v1931_v33 }
 0x99b   : > { %10701 = vpow2.f32 %v1695_v7  ;;  %v1933_v2 = vmul.f32 1.442695, %v1921_v59 }
 0x99c   : > { %v1913_v44 = vpop.xlane.xlu0 %1912  ;;  %10703 = vpow2.f32 %v1691_v63 }
 0x99d   : > { %1698 = vadd.xlane.f32.xlu0 %v1697_v48  ;;  %v1923_v58 = vsub.f32 %v11572_v60, %v1913_v44  ;;  %v1916_v28 = vpop.xlane.xlu1 %1915  ;;  %10705 = vpow2.f32 %v1933_v2  ;;  %v1922_v60 = vsub.f32 %v11568_v6, %v1910_v52 }
 0x99e   : > { %v1924_v21 = vsub.f32 %v11574_v3, %v1916_v28 }
 0x99f   : > { %v11593_v42 = vpop.eup %10693  ;;  %v1937_v43 = vmul.f32 1.442695, %v1923_v58 }
 0x9a0   : > { %v11596_v20 = vpop.permute.xlu0 %1719  ;;  %v1941_v41 = vsel %vm1418_vm3, %v11593_v42, 0.0  ;;  %v11600_v9 = vpop.eup %10695  ;;  %v1939_v57 = vmul.f32 1.442695, %v1924_v21 }
 0x9a1   : > { %9942 = vmatprep.subr.bf16.mxu0 %v11596_v20  ;;  %1942 = vadd.xlane.f32.xlu1 %v1941_v41  ;;  %v1944_v26 = vsel %vm1418_vm3, %v11600_v9, 0.0  ;;  %10707 = vpow2.f32 %v1937_v43 }
 0x9a2   : > { %9943 = vmatpush3.bf16.msra.mxu0 %v11596_v20  ;;  %10709 = vpow2.f32 %v1939_v57 }
 0x9a3   : > { %v11606_v22 = vpop.eup %10697 }
 0x9a4   : > { %v1947_v27 = vsel %vm1418_vm3, %v11606_v22, 0.0  ;;  %v11610_v32 = vpop.eup %10699 }
 0x9a5   : > { %1945 = vadd.xlane.f32.xlu1 %v1944_v26  ;;  %v1950_v35 = vsel %vm1418_vm3, %v11610_v32, 0.0  ;;  %v10702_v46 = vpop.eup %10701 }
 0x9a6   : > { %v1706_v62 = vsel %vm16645_vm1, %v10702_v46, 0.0  ;;  %v10704_v25 = vpop.eup %10703 }
 0x9a7   : > { %v1700_v51 = vsel %vm16645_vm1, %v10704_v25, 0.0 }
 0x9a9   : > { %1948 = vadd.xlane.f32.xlu1 %v1947_v27 }
 0x9ad   : > { %1951 = vadd.xlane.f32.xlu1 %v1950_v35 }
 0x9b1   : > { %1707 = vadd.xlane.f32.xlu1 %v1706_v62 }
 0x9b3   : > { %1985 = vrot.lane.b32.xlu0 %v11361_v54, %s16637_s30  ;;  %v11623_v54 = vpop.eup %10705 }
 0x9b4   : > { %v1953_v47 = vsel %vm1418_vm3, %v11623_v54, 0.0  ;;  %v11627_v49 = vpop.eup %10707 }
 0x9b5   : > { %1701 = vadd.xlane.f32.xlu1 %v1700_v51  ;;  %v1959_v55 = vsel %vm1418_vm3, %v11627_v49, 0.0  ;;  %v11632_v3 = vpop.eup %10709 }
 0x9b6   : > { %v1962_v33 = vsel %vm1418_vm3, %v11632_v3, 0.0 }
 0x9c6   : > { %1721 = vrot.lane.b32.xlu1 %v11329_v39, %s16637_s30  ;;  %v1935_v39 = vmul.f32 1.442695, %v1922_v60 }
 0x9c8   : > { %10711 = vpow2.f32 %v1935_v39 }
 0x9d2   : > { %1954 = vadd.xlane.f32.xlu0 %v1953_v47  ;;  %v11636_v44 = vpop.eup %10711 }
 0x9d3   : > { %v1956_v48 = vsel %vm1418_vm3, %v11636_v44, 0.0 }
 0x9d6   : > { %1960 = vadd.xlane.f32.xlu0 %v1959_v55 }
 0x9da   : > { %1963 = vadd.xlane.f32.xlu0 %v1962_v33 }
 0x9ea   : > { %1957 = vadd.xlane.f32.xlu1 %v1956_v48 }
 0x9f0   : > { %1987 = vrot.lane.b32.xlu0 %v11359_v53, %s16637_s30 }
 0x9fb   : > { %1989 = vrot.lane.b32.xlu1 %v11365_v0, %s16637_s30 }
 0x9ff   : > { %1991 = vrot.lane.b32.xlu1 %v11363_v19, %s16637_s30 }
 0xa26   : > { %v1705_v7 = vpop.xlane.xlu0 %1704 }
 0xa27   : > { %10713 = vrcp.f32 %v1705_v7 }
 0xa2a   : > { %v1699_v26 = vpop.xlane.xlu0 %1698 }
 0xa2b   : > { %10715 = vrcp.f32 %v1699_v26 }
 0xa2e   : > { %v1943_v6 = vpop.xlane.xlu1 %1942 }
 0xa31   : > { %v10714_v0 = vpop.eup %10713 }
 0xa32   : > { %v1946_v50 = vpop.xlane.xlu1 %1945  ;;  %v1715_v21 = vmul.f32 %v10714_v0, %v11584_v1 }
 0xa35   : > { %v10716_v62 = vpop.eup %10715 }
 0xa36   : > { %v1949_v41 = vpop.xlane.xlu1 %1948  ;;  %v1713_v58 = vmul.f32 %v10716_v62, %v11588_v61  ;;  %v1986_v61 = vpop.permute.xlu0 %1985 }
 0xa3a   : > { %v1952_v63 = vpop.xlane.xlu1 %1951 }
 0xa3e   : > { %v1708_v27 = vpop.xlane.xlu1 %1707 }
 0xa3f   : > { %10717 = vrcp.f32 %v1708_v27 }
 0xa40   : > { %10719 = vrcp.f32 %v1946_v50 }
 0xa41   : > { %10721 = vrcp.f32 %v1943_v6 }
 0xa42   : > { %v1702_v35 = vpop.xlane.xlu1 %1701 }
 0xa43   : > { %10723 = vrcp.f32 %v1702_v35 }
 0xa44   : > { %10725 = vrcp.f32 %v1952_v63 }
 0xa45   : > { %10727 = vrcp.f32 %v1949_v41 }
 0xa46   : > { %v1722_v53 = vpop.permute.xlu1 %1721 }
 0xa47   : > { %9944 = vmatprep.subr.bf16.mxu0 %v1722_v53 }
 0xa48   : > { %9945 = vmatpush3.bf16.msra.mxu0 %v1722_v53 }
 0xa49   : > { %9970 = vmatprep.subr.bf16.mxu0 %v11596_v20  ;;  %v10718_v19 = vpop.eup %10717 }
 0xa4a   : > { %v10720_v51 = vpop.eup %10719  ;;  %v1716_v2 = vmul.f32 %v10718_v19, %v10702_v46  ;;  %v10447_v19 = vld [vmem:[%s16619_s8] sm:$0xff]  }
 0xa4b   : > { %v10722_v52 = vpop.eup %10721  ;;  %v1974_v43 = vmul.f32 %v10720_v51, %v11600_v9 }
 0xa4c   : > { %v1973_v47 = vmul.f32 %v10722_v52, %v11593_v42  ;;  %v1718_v60 = vpack.c.bf16 %v1716_v2, %v1715_v21 }
 0xa4d   : > { %v10724_v59 = vpop.eup %10723 }
 0xa4e   : > { %v1714_v28 = vmul.f32 %v10724_v59, %v10704_v25  ;;  %v1981_v55 = vpack.c.bf16 %v1974_v43, %v1973_v47 }
 0xa50   : > { %v1717_v57 = vpack.c.bf16 %v1714_v28, %v1713_v58 }
 0xa52   : > { %9946 = vmatprep.mubr.msk.bf16.mxu0 %vm16645_vm1, %v1717_v57 }
 0xa53   : > { %9947 = vmatmul.mubr.msk.bf16.vlgmr.msra.gmra.mrb[24].mxu0 %vm16645_vm1, %v1718_v60 }
 0xa54   : > { %9971 = vmatpush3.bf16.msra.mxu0 %v11596_v20  ;;  %9982 = vmatprep.mubr.msk.bf16.mxu0 %vm1418_vm3, %v1981_v55  ;;  %v10726_v20 = vpop.eup %10725 }
 0xa55   : > { %9972 = vmatprep.subr.bf16.mxu0 %v1722_v53  ;;  %v10728_v33 = vpop.eup %10727  ;;  %v1976_v48 = vmul.f32 %v10726_v20, %v11610_v32 }
 0xa56   : > { %v1975_v7 = vmul.f32 %v10728_v33, %v11606_v22 }
 0xa58   : > { %9973 = vmatpush3.bf16.msra.mxu0 %v1722_v53  ;;  %v1982_v41 = vpack.c.bf16 %v1976_v48, %v1975_v7 }
 0xa59   : > { %9974 = vmatprep.subr.bf16.mxu0 %v1986_v61 }
 0xa5c   : > { %9975 = vmatpush3.bf16.msra.mxu0 %v1986_v61 }
 0xa5f   : > { %v1955_v9 = vpop.xlane.xlu0 %1954 }
 0xa60   : > { %10729 = vrcp.f32 %v1955_v9 }
 0xa63   : > { %v1961_v1 = vpop.xlane.xlu0 %1960 }
 0xa67   : > { %v1964_v46 = vpop.xlane.xlu0 %1963 }
 0xa6a   : > { %v10730_v50 = vpop.eup %10729 }
 0xa6b   : > { %v1988_v25 = vpop.permute.xlu0 %1987  ;;  %v1977_v27 = vmul.f32 %v10730_v50, %v11623_v54  ;;  %v10448_v54 = vld [vmem:[%s16619_s8 + $0x8] sm:$0xff]  }
 0xa6c   : > { %9976 = vmatprep.subr.bf16.mxu0 %v1988_v25 }
 0xa6d   : > { %9977 = vmatpush3.bf16.msra.mxu0 %v1988_v25 }
 0xa77   : > { %v1958_v42 = vpop.xlane.xlu1 %1957 }
 0xa78   : > { %10731 = vrcp.f32 %v1958_v42 }
 0xa79   : > { %10733 = vrcp.f32 %v1964_v46 }
 0xa7a   : > { %10735 = vrcp.f32 %v1961_v1 }
 0xa7b   : > { %v1990_v39 = vpop.permute.xlu1 %1989 }
 0xa7c   : > { %9978 = vmatprep.subr.bf16.mxu0 %v1990_v39 }
 0xa7d   : > { %9979 = vmatpush3.bf16.msra.mxu0 %v1990_v39 }
 0xa7f   : > { %v1992_v6 = vpop.permute.xlu1 %1991 }
 0xa80   : > { %9980 = vmatprep.subr.bf16.mxu0 %v1992_v6 }
 0xa81   : > { %9981 = vmatpush3.bf16.msra.mxu0 %v1992_v6 }
 0xa82   : > { %v10732_v63 = vpop.eup %10731  ;;  %9990 = vmatprep.subr.bf16.mxu0 %v10447_v19 }
 0xa83   : > { %v10734_v26 = vpop.eup %10733  ;;  %v1978_v35 = vmul.f32 %v10732_v63, %v11636_v44 }
 0xa84   : > { %9983 = vmatmul.mubr.msk.bf16.vlgmr.msra.gmra.mrb[28].mxu0 %vm1418_vm3, %v1982_v41  ;;  %v10736_v53 = vpop.eup %10735  ;;  %v1980_v62 = vmul.f32 %v10734_v26, %v11632_v3 }
 0xa85   : > { %v1983_v0 = vpack.c.bf16 %v1978_v35, %v1977_v27  ;;  %v1979_v32 = vmul.f32 %v10736_v53, %v11627_v49  ;;  %9991 = vmatpush3.bf16.msra.mxu0 %v10447_v19 }
 0xa86   : > { %9992 = vmatprep.subr.bf16.mxu0 %v10448_v54 }
 0xa87   : > { %9986 = vmatprep.mubr.msk.bf16.mxu0 %vm1418_vm3, %v1983_v0  ;;  %v1984_v22 = vpack.c.bf16 %v1980_v62, %v1979_v32 }
 0xa89   : > { %9993 = vmatpush3.bf16.msra.mxu0 %v10448_v54 }
 0xa8c   : > { %9987 = vmatmul.mubr.msk.bf16.gmra.mrb[32].mxu0 %vm1418_vm3, %v1984_v22 }
 0xb26   : > { %v9948_v3 = vpop.f32.mrb[24].mxu0 }
 0xb27   : > { %v1765_v44 = vpop.f32.mrb[25].mxu0 }
 0xb28   : > { %v9949_v51 = vpop.f32.mrb[26].mxu0 }
 0xb29   : > { %v10370_v52 = vpack.i.bf16 %v9949_v51, %v9948_v3  ;;  %v1768_v49 = vpop.f32.mrb[27].mxu0 }
 0xb2a   : > { %v10365_v59 = vpack.i.bf16 %v1768_v49, %v1765_v44 }
 0xb2b   : > { %10371 = vrot.lane.b32.xlu1 %v10370_v52, %s16635_s3 }
 0xb2c   : > { %10366 = vrot.lane.b32.xlu0 %v10365_v59, %s16635_s3 }
 0xb57   : > { %v9984_v2 = vpop.f32.mrb[28].mxu0 }
 0xb58   : > { %v2043_v58 = vpop.f32.mrb[29].mxu0 }
 0xb59   : > { %v9985_v28 = vpop.f32.mrb[30].mxu0 }
 0xb5a   : > { %v10380_v43 = vpack.i.bf16 %v9985_v28, %v9984_v2  ;;  %v2046_v21 = vpop.f32.mrb[31].mxu0  ;;  %v8771_v2 = vld [vmem:[%s16620_s9] ss:$0 sm:$0xff] }
 0xb5b   : > { %v10375_v57 = vpack.i.bf16 %v2046_v21, %v2043_v58 }
 0xb5c   : > { %10381 = vrot.lane.b32.xlu1 %v10380_v43, %s16635_s3 }
 0xb5d   : > { %10376 = vrot.lane.b32.xlu0 %v10375_v57, %s16635_s3 }
 0xb5f   : > { %v9988_v47 = vpop.f32.mrb[32].mxu0 }
 0xb60   : > { %v2059_v60 = vpop.f32.mrb[33].mxu0 }
 0xb61   : > { %v9989_v55 = vpop.f32.mrb[34].mxu0 }
 0xb62   : > { %v10390_v61 = vpack.i.bf16 %v9989_v55, %v9988_v47  ;;  %v2062_v9 = vpop.f32.mrb[35].mxu0 }
 0xb63   : > { %v10385_v1 = vpack.i.bf16 %v2062_v9, %v2059_v60 }
 0xb64   : > { %10391 = vrot.lane.b32.xlu1 %v10390_v61, %s16635_s3 }
 0xb65   : > { %10386 = vrot.lane.b32.xlu0 %v10385_v1, %s16635_s3 }
 0xb9d   : > { %v10372_v46 = vpop.permute.xlu1 %10371 }
 0xb9e   : > { %v10374_v25 = vunpack.i.h.bf16 %v10372_v46  ;;  %v10373_v42 = vunpack.i.l.bf16 %v10372_v46  ;;  %v10367_v20 = vpop.permute.xlu0 %10366 }
 0xb9f   : > { %v10369_v39 = vunpack.i.h.bf16 %v10367_v20  ;;  %v10368_v33 = vunpack.i.l.bf16 %v10367_v20 }
 0xba0   : > { %v2125_v48 = vsel %vm1136_vm2, %v11415_v16, %v10374_v25  ;;  %v2124_v6 = vsel %vm1136_vm2, %v11411_v45, %v10373_v42 }
 0xba1   : > { %v2135_v50 = vpack.c.bf16 %v2125_v48, %v2124_v6  ;;  %v2123_v7 = vsel %vm1136_vm2, %v11417_v56, %v10369_v39  ;;  %v2122_v63 = vsel %vm1136_vm2, %v11413_v15, %v10368_v33 }
 0xba2   : > { %v2134_v41 = vpack.c.bf16 %v2123_v7, %v2122_v63 }
 0xba4   : > { %9994 = vmatprep.mubr.msk.bf16.mxu0 %vm16645_vm1, %v2134_v41 }
 0xba5   : > { %9995 = vmatmul.mubr.msk.bf16.vlgmr.msra.gmra.mrb[36].mxu0 %vm16645_vm1, %v2135_v50 }
 0xbce   : > { %v10382_v26 = vpop.permute.xlu1 %10381 }
 0xbcf   : > { %v10384_v27 = vunpack.i.h.bf16 %v10382_v26  ;;  %v10383_v35 = vunpack.i.l.bf16 %v10382_v26  ;;  %v10377_v53 = vpop.permute.xlu0 %10376 }
 0xbd0   : > { %v10379_v16 = vunpack.i.h.bf16 %v10377_v53  ;;  %v10378_v0 = vunpack.i.l.bf16 %v10377_v53 }
 0xbd1   : > { %v2129_v45 = vsel %vm1136_vm2, %v11540_v8, %v10384_v27  ;;  %v2128_v56 = vsel %vm1136_vm2, %v11536_v4, %v10383_v35 }
 0xbd2   : > { %v2127_v15 = vsel %vm1136_vm2, %v11542_v11, %v10379_v16  ;;  %v2126_v62 = vsel %vm1136_vm2, %v11538_v5, %v10378_v0  ;;  %v2137_v32 = vpack.c.bf16 %v2129_v45, %v2128_v56 }
 0xbd3   : > { %v2136_v22 = vpack.c.bf16 %v2127_v15, %v2126_v62 }
 0xbd5   : > { %9998 = vmatprep.mubr.msk.bf16.mxu0 %vm16645_vm1, %v2136_v22 }
 0xbd6   : > { %v10392_v19 = vpop.permute.xlu1 %10391  ;;  %9999 = vmatmul.mubr.msk.bf16.gmra.mrb[40].mxu0 %vm16645_vm1, %v2137_v32 }
 0xbd7   : > { %v10394_v54 = vunpack.i.h.bf16 %v10392_v19  ;;  %v10393_v3 = vunpack.i.l.bf16 %v10392_v19  ;;  %v10387_v44 = vpop.permute.xlu0 %10386 }
 0xbd8   : > { %v10389_v8 = vunpack.i.h.bf16 %v10387_v44  ;;  %v10388_v51 = vunpack.i.l.bf16 %v10387_v44 }
 0xbd9   : > { %v2133_v4 = vsel %vm1136_vm2, %v11548_v13, %v10394_v54  ;;  %v2132_v11 = vsel %vm1136_vm2, %v11544_v12, %v10393_v3 }
 0xbda   : > { %v2131_v5 = vsel %vm1136_vm2, %v11550_v14, %v10389_v8  ;;  %v2130_v52 = vsel %vm1136_vm2, %v11546_v40, %v10388_v51  ;;  %v2139_v49 = vpack.c.bf16 %v2133_v4, %v2132_v11 }
 0xbdb   : > { %v2138_v59 = vpack.c.bf16 %v2131_v5, %v2130_v52 }
 0xbdd   : > { %10002 = vmatprep.mubr.msk.bf16.mxu0 %vm16645_vm1, %v2138_v59 }
 0xbde   : > { %10003 = vmatmul.mubr.msk.bf16.gmra.mrb[44].mxu0 %vm16645_vm1, %v2139_v49 }
 0xc78   : > { %v9996_v13 = vpop.f32.mrb[36].mxu0 }
 0xc79   : > { %v2215_v58 = vpop.f32.mrb[37].mxu0  ;;  %v2224_v28 = vadd.f32 %v9996_v13, %v8771_v2 }
 0xc7a   : > { %v2216_v12 = vadd.f32 %v8771_v2, %v2215_v58  ;;  %v9997_v43 = vpop.f32.mrb[38].mxu0 }
 0xc7b   : > { %v2218_v21 = vpop.f32.mrb[39].mxu0  ;;  %v11713_v57 = vadd.f32 %v2224_v28, %v11121_v30  ;;  %v2227_v47 = vadd.f32 %v9997_v43, %v8771_v2  ;;  %v10449_v43 = vld [vmem:[%s16623_s12] sm:$0xff]  }
 0xc7c   : > { %v11710_v14 = vadd.f32 %v2216_v12, %v11126_v34  ;;  %v2219_v40 = vadd.f32 %v8771_v2, %v2218_v21  ;;  %10006 = vmatprep.subr.bf16.mxu1 %v10449_v43  ;;  %v10450_v21 = vld [vmem:[%s16623_s12 + $0x8] sm:$0xff]  }
 0xc7d   : > { %v11723_v9 = vadd.f32 %v2227_v47, %v11128_v36  ;;  %v2282_v34 = vsel %vm16645_vm1, %v11713_v57, 0.0  ;;  %10007 = vmatpush3.bf16.msra.mxu1 %v10449_v43 }
 0xc7e   : > { %v11716_v60 = vadd.f32 %v2219_v40, %v11132_v38  ;;  %v2276_v55 = vsel %vm16645_vm1, %v11710_v14, 0.0  ;;  %10008 = vmatprep.subr.bf16.mxu1 %v10450_v21 }
 0xc7f   : > { %2277 = vadd.xlane.f32.xlu0 %v2276_v55  ;;  %v2285_v30 = vsel %vm16645_vm1, %v11723_v9, 0.0 }
 0xc80   : > { %v2279_v61 = vsel %vm16645_vm1, %v11716_v60, 0.0 }
 0xc81   : > { %2280 = vadd.xlane.f32.xlu1 %v2279_v61  ;;  %10009 = vmatpush3.bf16.msra.mxu1 %v10450_v21 }
 0xc83   : > { %2283 = vadd.xlane.f32.xlu0 %v2282_v34 }
 0xc87   : > { %2286 = vadd.xlane.f32.xlu0 %v2285_v30 }
 0xca9   : > { %v10000_v38 = vpop.f32.mrb[40].mxu0 }
 0xcaa   : > { %v2231_v1 = vpop.f32.mrb[41].mxu0  ;;  %v2240_v46 = vadd.f32 %v10000_v38, %v8771_v2 }
 0xcab   : > { %v2232_v25 = vadd.f32 %v8771_v2, %v2231_v1  ;;  %v10001_v42 = vpop.f32.mrb[42].mxu0 }
 0xcac   : > { %v2234_v20 = vpop.f32.mrb[43].mxu0  ;;  %v2243_v33 = vadd.f32 %v10001_v42, %v8771_v2  ;;  %v11733_v48 = vadd.f32 %v2240_v46, %v11174_v17 }
 0xcad   : > { %v11730_v39 = vadd.f32 %v2232_v25, %v11160_v10  ;;  %v2235_v36 = vadd.f32 %v8771_v2, %v2234_v20 }
 0xcae   : > { %v11741_v7 = vadd.f32 %v2243_v33, %v11187_v23 }
 0xcaf   : > { %v11736_v6 = vadd.f32 %v2235_v36, %v11176_v18  ;;  %v2288_v50 = vsel %vm16645_vm1, %v11730_v39, 0.0  ;;  %v2294_v18 = vsel %vm16645_vm1, %v11733_v48, 0.0 }
 0xcb0   : > { %2289 = vadd.xlane.f32.xlu0 %v2288_v50  ;;  %v2297_v0 = vsel %vm16645_vm1, %v11741_v7, 0.0 }
 0xcb1   : > { %v10004_v63 = vpop.f32.mrb[44].mxu0  ;;  %v2291_v10 = vsel %vm16645_vm1, %v11736_v6, 0.0 }
 0xcb2   : > { %v2247_v41 = vpop.f32.mrb[45].mxu0  ;;  %2292 = vadd.xlane.f32.xlu1 %v2291_v10  ;;  %v2256_v26 = vadd.f32 %v10004_v63, %v8771_v2 }
 0xcb3   : > { %v2248_v27 = vadd.f32 %v8771_v2, %v2247_v41  ;;  %v10005_v17 = vpop.f32.mrb[46].mxu0 }
 0xcb4   : > { %v2250_v35 = vpop.f32.mrb[47].mxu0  ;;  %2295 = vadd.xlane.f32.xlu0 %v2294_v18  ;;  %v2259_v16 = vadd.f32 %v10005_v17, %v8771_v2  ;;  %v11753_v45 = vadd.f32 %v2256_v26, %v11201_v29 }
 0xcb5   : > { %v11748_v53 = vadd.f32 %v2248_v27, %v11189_v24  ;;  %v2251_v23 = vadd.f32 %v8771_v2, %v2250_v35 }
 0xcb6   : > { %2298 = vadd.xlane.f32.xlu1 %v2297_v0  ;;  %v11761_v62 = vadd.f32 %v2259_v16, %v11212_v37  ;;  %v2306_v32 = vsel %vm16645_vm1, %v11753_v45, 0.0 }
 0xcb7   : > { %v11756_v56 = vadd.f32 %v2251_v23, %v11203_v31  ;;  %v2300_v15 = vsel %vm16645_vm1, %v11748_v53, 0.0 }
 0xcb8   : > { %2301 = vadd.xlane.f32.xlu0 %v2300_v15  ;;  %v2309_v29 = vsel %vm16645_vm1, %v11761_v62, 0.0 }
 0xcb9   : > { %v2303_v24 = vsel %vm16645_vm1, %v11756_v56, 0.0 }
 0xcba   : > { %2304 = vadd.xlane.f32.xlu1 %v2303_v24 }
 0xcbc   : > { %2307 = vadd.xlane.f32.xlu0 %v2306_v32 }
 0xcbe   : > { %2310 = vadd.xlane.f32.xlu1 %v2309_v29 }
 0xd0c   : > { %v2278_v31 = vpop.xlane.xlu0 %2277 }
 0xd0d   : > { %v2312_v22 = vmul.f32 0.03125, %v2278_v31 }
 0xd0e   : > { %v2281_v19 = vpop.xlane.xlu1 %2280 }
 0xd0f   : > { %v11770_v54 = vsub.f32 %v11710_v14, %v2312_v22  ;;  %v2313_v37 = vmul.f32 0.03125, %v2281_v19 }
 0xd10   : > { %v2284_v3 = vpop.xlane.xlu0 %2283 }
 0xd11   : > { %v11773_v44 = vsub.f32 %v11716_v60, %v2313_v37  ;;  %v2314_v8 = vmul.f32 0.03125, %v2284_v3  ;;  %v2336_v51 = vmul.f32 %v11770_v54, %v11770_v54 }
 0xd13   : > { %v11778_v4 = vsub.f32 %v11713_v57, %v2314_v8  ;;  %v2348_v11 = vsel %vm16645_vm1, %v2336_v51, 0.0  ;;  %v2337_v5 = vmul.f32 %v11773_v44, %v11773_v44 }
 0xd14   : > { %2349 = vadd.xlane.f32.xlu0 %v2348_v11  ;;  %v2287_v52 = vpop.xlane.xlu0 %2286 }
 0xd15   : > { %v2315_v49 = vmul.f32 0.03125, %v2287_v52  ;;  %v2351_v59 = vsel %vm16645_vm1, %v2337_v5, 0.0  ;;  %v2338_v2 = vmul.f32 %v11778_v4, %v11778_v4 }
 0xd16   : > { %2352 = vadd.xlane.f32.xlu1 %v2351_v59 }
 0xd17   : > { %v11787_v13 = vsub.f32 %v11723_v9, %v2315_v49  ;;  %v2354_v58 = vsel %vm16645_vm1, %v2338_v2, 0.0 }
 0xd18   : > { %2355 = vadd.xlane.f32.xlu0 %v2354_v58 }
 0xd19   : > { %v2339_v28 = vmul.f32 %v11787_v13, %v11787_v13 }
 0xd1b   : > { %v2357_v12 = vsel %vm16645_vm1, %v2339_v28, 0.0 }
 0xd1c   : > { %2358 = vadd.xlane.f32.xlu1 %v2357_v12 }
 0xd3d   : > { %v2290_v40 = vpop.xlane.xlu0 %2289 }
 0xd3e   : > { %v2316_v47 = vmul.f32 0.03125, %v2290_v40 }
 0xd3f   : > { %v2293_v55 = vpop.xlane.xlu1 %2292 }
 0xd40   : > { %v11800_v61 = vsub.f32 %v11730_v39, %v2316_v47  ;;  %v2317_v34 = vmul.f32 0.03125, %v2293_v55 }
 0xd41   : > { %v2296_v30 = vpop.xlane.xlu0 %2295 }
 0xd42   : > { %v11803_v38 = vsub.f32 %v11736_v6, %v2317_v34  ;;  %v2318_v1 = vmul.f32 0.03125, %v2296_v30  ;;  %v2340_v46 = vmul.f32 %v11800_v61, %v11800_v61 }
 0xd43   : > { %v2299_v25 = vpop.xlane.xlu1 %2298 }
 0xd44   : > { %v11808_v42 = vsub.f32 %v11733_v48, %v2318_v1  ;;  %v2319_v20 = vmul.f32 0.03125, %v2299_v25  ;;  %v2360_v33 = vsel %vm16645_vm1, %v2340_v46, 0.0  ;;  %v2341_v36 = vmul.f32 %v11803_v38, %v11803_v38  ;;  %v11850_v1 = vld [vmem:[%s16621_s10] ss:$0 sm:$0xff] }
 0xd45   : > { %2361 = vadd.xlane.f32.xlu0 %v2360_v33  ;;  %v2302_v50 = vpop.xlane.xlu0 %2301 }
 0xd46   : > { %v11814_v63 = vsub.f32 %v11741_v7, %v2319_v20  ;;  %v2320_v10 = vmul.f32 0.03125, %v2302_v50  ;;  %v2363_v41 = vsel %vm16645_vm1, %v2341_v36, 0.0  ;;  %v2342_v26 = vmul.f32 %v11808_v42, %v11808_v42  ;;  %v11858_v50 = vld [vmem:[%s16622_s11] ss:$0 sm:$0xff] }
 0xd47   : > { %v2305_v27 = vpop.xlane.xlu1 %2304  ;;  %2364 = vadd.xlane.f32.xlu1 %v2363_v41 }
 0xd48   : > { %v11820_v17 = vsub.f32 %v11748_v53, %v2320_v10  ;;  %v2321_v18 = vmul.f32 0.03125, %v2305_v27  ;;  %v2366_v35 = vsel %vm16645_vm1, %v2342_v26, 0.0  ;;  %v2343_v16 = vmul.f32 %v11814_v63, %v11814_v63 }
 0xd49   : > { %2367 = vadd.xlane.f32.xlu0 %v2366_v35  ;;  %v2308_v23 = vpop.xlane.xlu0 %2307 }
 0xd4a   : > { %v11826_v0 = vsub.f32 %v11756_v56, %v2321_v18  ;;  %v2322_v15 = vmul.f32 0.03125, %v2308_v23  ;;  %v2369_v24 = vsel %vm16645_vm1, %v2343_v16, 0.0  ;;  %v2344_v32 = vmul.f32 %v11820_v17, %v11820_v17 }
 0xd4b   : > { %v2311_v29 = vpop.xlane.xlu1 %2310  ;;  %2370 = vadd.xlane.f32.xlu1 %v2369_v24 }
 0xd4c   : > { %v11832_v31 = vsub.f32 %v11753_v45, %v2322_v15  ;;  %v2323_v22 = vmul.f32 0.03125, %v2311_v29  ;;  %v2372_v19 = vsel %vm16645_vm1, %v2344_v32, 0.0  ;;  %v2345_v37 = vmul.f32 %v11826_v0, %v11826_v0 }
 0xd4d   : > { %2373 = vadd.xlane.f32.xlu0 %v2372_v19 }
 0xd4e   : > { %v11838_v3 = vsub.f32 %v11761_v62, %v2323_v22  ;;  %v2375_v8 = vsel %vm16645_vm1, %v2345_v37, 0.0  ;;  %v2346_v51 = vmul.f32 %v11832_v31, %v11832_v31 }
 0xd4f   : > { %2376 = vadd.xlane.f32.xlu1 %v2375_v8 }
 0xd50   : > { %v2378_v11 = vsel %vm16645_vm1, %v2346_v51, 0.0  ;;  %v2347_v5 = vmul.f32 %v11838_v3, %v11838_v3 }
 0xd51   : > { %2379 = vadd.xlane.f32.xlu0 %v2378_v11 }
 0xd52   : > { %v2381_v52 = vsel %vm16645_vm1, %v2347_v5, 0.0 }
 0xd53   : > { %2382 = vadd.xlane.f32.xlu1 %v2381_v52 }
 0xda1   : > { %v2350_v49 = vpop.xlane.xlu0 %2349 }
 0xda2   : > { %v2384_v59 = vmul.f32 0.03125, %v2350_v49 }
 0xda3   : > { %v2353_v2 = vpop.xlane.xlu1 %2352 }
 0xda4   : > { %v2396_v58 = vadd.f32 1e-05, %v2384_v59  ;;  %v2385_v28 = vmul.f32 0.03125, %v2353_v2 }
 0xda5   : > { %v2356_v12 = vpop.xlane.xlu0 %2355 }
 0xda6   : > { %10737 = vrsqrt.f32 %v2396_v58  ;;  %v2397_v43 = vadd.f32 1e-05, %v2385_v28  ;;  %v2386_v21 = vmul.f32 0.03125, %v2356_v12 }
 0xda8   : > { %10739 = vrsqrt.f32 %v2397_v43  ;;  %v2398_v40 = vadd.f32 1e-05, %v2386_v21 }
 0xda9   : > { %v2359_v47 = vpop.xlane.xlu1 %2358 }
 0xdaa   : > { %10741 = vrsqrt.f32 %v2398_v40  ;;  %v2387_v55 = vmul.f32 0.03125, %v2359_v47 }
 0xdac   : > { %v2399_v34 = vadd.f32 1e-05, %v2387_v55 }
 0xdae   : > { %10743 = vrsqrt.f32 %v2399_v34 }
 0xdb0   : > { %v10738_v30 = vpop.eup %10737 }
 0xdb1   : > { %v2420_v46 = vmul.f32 %v10738_v30, %v11770_v54 }
 0xdb2   : > { %v10740_v25 = vpop.eup %10739 }
 0xdb3   : > { %v2421_v20 = vmul.f32 %v10740_v25, %v11773_v44  ;;  %v2438_v33 = vmul.f32 %v11850_v1, %v2420_v46 }
 0xdb4   : > { %v10742_v36 = vpop.eup %10741 }
 0xdb5   : > { %v2422_v10 = vmul.f32 %v10742_v36, %v11778_v4  ;;  %v2439_v41 = vmul.f32 %v11850_v1, %v2421_v20  ;;  %v2456_v26 = vadd.f32 %v11858_v50, %v2438_v33 }
 0xdb7   : > { %v2457_v27 = vadd.f32 %v11858_v50, %v2439_v41  ;;  %v2440_v18 = vmul.f32 %v11850_v1, %v2422_v10 }
 0xdb8   : > { %v10744_v54 = vpop.eup %10743 }
 0xdb9   : > { %v2423_v44 = vmul.f32 %v10744_v54, %v11787_v13  ;;  %v2468_v35 = vpack.c.bf16 %v2457_v27, %v2456_v26  ;;  %v2458_v23 = vadd.f32 %v11858_v50, %v2440_v18 }
 0xdbb   : > { %v2441_v16 = vmul.f32 %v11850_v1, %v2423_v44  ;;  %10010 = vmatprep.mubr.msk.bf16.mxu1 %vm16645_vm1, %v2468_v35 }
 0xdbd   : > { %v2459_v4 = vadd.f32 %v11858_v50, %v2441_v16 }
 0xdbf   : > { %v2469_v15 = vpack.c.bf16 %v2459_v4, %v2458_v23 }
 0xdc1   : > { %10011 = vmatmul.mubr.msk.bf16.vlgmr.msra.gmra.mrb[36].mxu1 %vm16645_vm1, %v2469_v15 }
 0xdd2   : > { %v2362_v24 = vpop.xlane.xlu0 %2361 }
 0xdd3   : > { %v2388_v32 = vmul.f32 0.03125, %v2362_v24 }
 0xdd4   : > { %v2365_v29 = vpop.xlane.xlu1 %2364 }
 0xdd5   : > { %v2400_v22 = vadd.f32 1e-05, %v2388_v32  ;;  %v2389_v19 = vmul.f32 0.03125, %v2365_v29 }
 0xdd6   : > { %v2368_v37 = vpop.xlane.xlu0 %2367 }
 0xdd7   : > { %10745 = vrsqrt.f32 %v2400_v22  ;;  %v2401_v13 = vadd.f32 1e-05, %v2389_v19  ;;  %v2390_v8 = vmul.f32 0.03125, %v2368_v37 }
 0xdd8   : > { %v2371_v51 = vpop.xlane.xlu1 %2370 }
 0xdd9   : > { %10747 = vrsqrt.f32 %v2401_v13  ;;  %v2402_v11 = vadd.f32 1e-05, %v2390_v8  ;;  %v2391_v5 = vmul.f32 0.03125, %v2371_v51 }
 0xdda   : > { %v2374_v52 = vpop.xlane.xlu0 %2373 }
 0xddb   : > { %10749 = vrsqrt.f32 %v2402_v11  ;;  %v2403_v49 = vadd.f32 1e-05, %v2391_v5  ;;  %v2392_v59 = vmul.f32 0.03125, %v2374_v52  ;;  %v10451_v52 = vld [vmem:[%s16625_s14] sm:$0xff]  }
 0xddc   : > { %v2377_v2 = vpop.xlane.xlu1 %2376  ;;  %10022 = vmatprep.subr.bf16.mxu0 %v10451_v52 }
 0xddd   : > { %10751 = vrsqrt.f32 %v2403_v49  ;;  %v2404_v58 = vadd.f32 1e-05, %v2392_v59  ;;  %v2393_v28 = vmul.f32 0.03125, %v2377_v2  ;;  %10023 = vmatpush3.bf16.msra.mxu0 %v10451_v52  ;;  %v10455_v49 = vld [vmem:[%s16625_s14 + $0x20] sm:$0xff]   ;;  %v10456_v59 = vld [vmem:[%s16625_s14 + $0x28] sm:$0xff]   ;;  %v10457_v2 = vld [vmem:[%s16625_s14 + $0x30] sm:$0xff]  }
 0xdde   : > { %v2380_v12 = vpop.xlane.xlu0 %2379 }
 0xddf   : > { %10753 = vrsqrt.f32 %v2404_v58  ;;  %v2405_v43 = vadd.f32 1e-05, %v2393_v28  ;;  %v2394_v21 = vmul.f32 0.03125, %v2380_v12  ;;  %v10458_v58 = vld [vmem:[%s16625_s14 + $0x38] sm:$0xff]   ;;  %v11926_v28 = vld [vmem:[%s16624_s13] ss:$0 sm:$0xff] }
 0xde0   : > { %v2383_v40 = vpop.xlane.xlu1 %2382 }
 0xde1   : > { %v10746_v47 = vpop.eup %10745  ;;  %10755 = vrsqrt.f32 %v2405_v43  ;;  %v2406_v55 = vadd.f32 1e-05, %v2394_v21  ;;  %v2395_v34 = vmul.f32 0.03125, %v2383_v40 }
 0xde2   : > { %v2424_v30 = vmul.f32 %v10746_v47, %v11800_v61 }
 0xde3   : > { %v10748_v46 = vpop.eup %10747  ;;  %10757 = vrsqrt.f32 %v2406_v55  ;;  %v2407_v25 = vadd.f32 1e-05, %v2395_v34 }
 0xde4   : > { %v2425_v20 = vmul.f32 %v10748_v46, %v11803_v38  ;;  %v2442_v33 = vmul.f32 %v11850_v1, %v2424_v30 }
 0xde5   : > { %v10750_v36 = vpop.eup %10749  ;;  %10759 = vrsqrt.f32 %v2407_v25 }
 0xde6   : > { %v2443_v10 = vmul.f32 %v11850_v1, %v2425_v20  ;;  %v2426_v41 = vmul.f32 %v10750_v36, %v11808_v42  ;;  %v2460_v27 = vadd.f32 %v11858_v50, %v2442_v33 }
 0xde7   : > { %v10752_v26 = vpop.eup %10751 }
 0xde8   : > { %v2461_v54 = vadd.f32 %v11858_v50, %v2443_v10  ;;  %v2427_v61 = vmul.f32 %v10752_v26, %v11814_v63  ;;  %v2444_v18 = vmul.f32 %v11850_v1, %v2426_v41 }
 0xde9   : > { %v10754_v44 = vpop.eup %10753 }
 0xdea   : > { %v2470_v35 = vpack.c.bf16 %v2461_v54, %v2460_v27  ;;  %v2445_v38 = vmul.f32 %v11850_v1, %v2427_v61  ;;  %v2428_v16 = vmul.f32 %v10754_v44, %v11820_v17  ;;  %v2462_v42 = vadd.f32 %v11858_v50, %v2444_v18 }
 0xdeb   : > { %v10756_v23 = vpop.eup %10755 }
 0xdec   : > { %10014 = vmatprep.mubr.msk.bf16.mxu1 %vm16645_vm1, %v2470_v35  ;;  %v2463_v4 = vadd.f32 %v11858_v50, %v2445_v38  ;;  %v2429_v15 = vmul.f32 %v10756_v23, %v11826_v0  ;;  %v2446_v24 = vmul.f32 %v11850_v1, %v2428_v16 }
 0xded   : > { %v10758_v63 = vpop.eup %10757 }
 0xdee   : > { %v2471_v32 = vpack.c.bf16 %v2463_v4, %v2462_v42  ;;  %v2447_v29 = vmul.f32 %v11850_v1, %v2429_v15  ;;  %v2430_v22 = vmul.f32 %v10758_v63, %v11832_v31  ;;  %v2464_v17 = vadd.f32 %v11858_v50, %v2446_v24 }
 0xdef   : > { %v10760_v19 = vpop.eup %10759 }
 0xdf0   : > { %10015 = vmatmul.mubr.msk.bf16.gmra.mrb[40].mxu1 %vm16645_vm1, %v2471_v32  ;;  %v2465_v37 = vadd.f32 %v11858_v50, %v2447_v29  ;;  %v2431_v13 = vmul.f32 %v10760_v19, %v11838_v3  ;;  %v2448_v8 = vmul.f32 %v11850_v1, %v2430_v22  ;;  %v10452_v3 = vld [vmem:[%s16625_s14 + $0x8] sm:$0xff]  }
 0xdf1   : > { %10024 = vmatprep.subr.bf16.mxu0 %v10452_v3 }
 0xdf2   : > { %v2472_v0 = vpack.c.bf16 %v2465_v37, %v2464_v17  ;;  %v2449_v51 = vmul.f32 %v11850_v1, %v2431_v13  ;;  %v2466_v11 = vadd.f32 %v11858_v50, %v2448_v8  ;;  %10025 = vmatpush3.bf16.msra.mxu0 %v10452_v3  ;;  %v10453_v1 = vld [vmem:[%s16625_s14 + $0x10] sm:$0xff]  }
 0xdf3   : > { %10026 = vmatprep.subr.bf16.mxu0 %v10453_v1 }
 0xdf4   : > { %10018 = vmatprep.mubr.msk.bf16.mxu1 %vm16645_vm1, %v2472_v0  ;;  %v2467_v31 = vadd.f32 %v11858_v50, %v2449_v51  ;;  %v10454_v50 = vld [vmem:[%s16625_s14 + $0x18] sm:$0xff]  }
 0xdf6   : > { %v2473_v5 = vpack.c.bf16 %v2467_v31, %v2466_v11  ;;  %10027 = vmatpush3.bf16.msra.mxu0 %v10453_v1 }
 0xdf7   : > { %10028 = vmatprep.subr.bf16.mxu0 %v10454_v50 }
 0xdf8   : > { %10019 = vmatmul.mubr.msk.bf16.gmra.mrb[44].mxu1 %vm16645_vm1, %v2473_v5 }
 0xdfa   : > { %10029 = vmatpush3.bf16.msra.mxu0 %v10454_v50 }
 0xdfb   : > { %10030 = vmatprep.subr.bf16.mxu0 %v10455_v49 }
 0xdfe   : > { %10031 = vmatpush3.bf16.msra.mxu0 %v10455_v49 }
 0xdff   : > { %10032 = vmatprep.subr.bf16.mxu0 %v10456_v59 }
 0xe02   : > { %10033 = vmatpush3.bf16.msra.mxu0 %v10456_v59 }
 0xe03   : > { %10034 = vmatprep.subr.bf16.mxu0 %v10457_v2 }
 0xe06   : > { %10035 = vmatpush3.bf16.msra.mxu0 %v10457_v2 }
 0xe07   : > { %10036 = vmatprep.subr.bf16.mxu0 %v10458_v58 }
 0xe0a   : > { %10037 = vmatpush3.bf16.msra.mxu0 %v10458_v58 }
 0xe94   : > { %v10012_v12 = vpop.f32.mrb[36].mxu1 }
 0xe95   : > { %v2558_v43 = vadd.f32 %v10012_v12, %v11926_v28  ;;  %v2549_v21 = vpop.f32.mrb[37].mxu1 }
 0xe96   : > { %v2550_v40 = vadd.f32 %v11926_v28, %v2549_v21  ;;  %v10013_v47 = vpop.f32.mrb[38].mxu1 }
 0xe97   : > { %v2610_v55 = vmul.f32 0.044715, %v2558_v43  ;;  %v2561_v34 = vadd.f32 %v10013_v47, %v11926_v28  ;;  %v2552_v30 = vpop.f32.mrb[39].mxu1  ;;  %v2598_v17 = vmul.f32 0.5, %v2558_v43 }
 0xe98   : > { %v2608_v46 = vmul.f32 0.044715, %v2550_v40  ;;  %v2553_v25 = vadd.f32 %v11926_v28, %v2552_v30  ;;  %v2596_v8 = vmul.f32 0.5, %v2550_v40 }
 0xe99   : > { %v2622_v20 = vmul.f32 %v2610_v55, %v2558_v43  ;;  %v2611_v33 = vmul.f32 0.044715, %v2561_v34  ;;  %v2599_v37 = vmul.f32 0.5, %v2561_v34 }
 0xe9a   : > { %v2620_v36 = vmul.f32 %v2608_v46, %v2550_v40  ;;  %v2609_v10 = vmul.f32 0.044715, %v2553_v25  ;;  %v2597_v0 = vmul.f32 0.5, %v2553_v25 }
 0xe9b   : > { %v2634_v41 = vmul.f32 %v2622_v20, %v2558_v43  ;;  %v2623_v26 = vmul.f32 %v2611_v33, %v2561_v34 }
 0xe9c   : > { %v2632_v27 = vmul.f32 %v2620_v36, %v2550_v40  ;;  %v2621_v54 = vmul.f32 %v2609_v10, %v2553_v25 }
 0xe9d   : > { %v2646_v61 = vadd.f32 %v2634_v41, %v2558_v43  ;;  %v2635_v18 = vmul.f32 %v2623_v26, %v2561_v34 }
 0xe9e   : > { %v2633_v44 = vmul.f32 %v2621_v54, %v2553_v25  ;;  %v2644_v35 = vadd.f32 %v2632_v27, %v2550_v40 }
 0xe9f   : > { %v2658_v38 = vmul.f32 0.7978846, %v2646_v61  ;;  %v2647_v16 = vadd.f32 %v2635_v18, %v2561_v34 }
 0xea0   : > { %v2645_v23 = vadd.f32 %v2633_v44, %v2553_v25  ;;  %v2656_v42 = vmul.f32 0.7978846, %v2644_v35 }
 0xea1   : > { %10761 = vtanh.f32 %v2658_v38  ;;  %v2659_v4 = vmul.f32 0.7978846, %v2647_v16 }
 0xea2   : > { %v2657_v15 = vmul.f32 0.7978846, %v2645_v23  ;;  %10763 = vtanh.f32 %v2656_v42 }
 0xea3   : > { %10765 = vtanh.f32 %v2659_v4 }
 0xea4   : > { %10767 = vtanh.f32 %v2657_v15 }
 0xeab   : > { %v10762_v24 = vpop.eup %10761 }
 0xeac   : > { %v10764_v63 = vpop.eup %10763  ;;  %v2682_v32 = vadd.f32 1.0, %v10762_v24 }
 0xead   : > { %v10766_v29 = vpop.eup %10765  ;;  %v2680_v22 = vadd.f32 1.0, %v10764_v63 }
 0xeae   : > { %v10768_v19 = vpop.eup %10767  ;;  %v2683_v13 = vadd.f32 1.0, %v10766_v29  ;;  %v2694_v11 = vmul.f32 %v2682_v32, %v2598_v17 }
 0xeaf   : > { %v2681_v51 = vadd.f32 1.0, %v10768_v19  ;;  %v2692_v5 = vmul.f32 %v2680_v22, %v2596_v8 }
 0xeb0   : > { %v2695_v31 = vmul.f32 %v2683_v13, %v2599_v37 }
 0xeb1   : > { %v2693_v52 = vmul.f32 %v2681_v51, %v2597_v0 }
 0xeb2   : > { %v2705_v3 = vpack.c.bf16 %v2695_v31, %v2694_v11 }
 0xeb3   : > { %v2704_v1 = vpack.c.bf16 %v2693_v52, %v2692_v5 }
 0xeb5   : > { %10038 = vmatprep.mubr.bf16.mxu0 %v2704_v1 }
 0xeb6   : > { %10039 = vmatmul.mubr.bf16.vlgmr.msra.gmra.mrb[48].mxu0 %v2705_v3 }
 0xec3   : > { %v10016_v50 = vpop.f32.mrb[40].mxu1 }
 0xec4   : > { %v11933_v49 = vadd.f32 %v10016_v50, %v11926_v28  ;;  %v2565_v59 = vpop.f32.mrb[41].mxu1 }
 0xec5   : > { %v11936_v2 = vadd.f32 %v11926_v28, %v2565_v59  ;;  %v10017_v58 = vpop.f32.mrb[42].mxu1 }
 0xec6   : > { %v2614_v12 = vmul.f32 0.044715, %v11933_v49  ;;  %v11940_v43 = vadd.f32 %v10017_v58, %v11926_v28  ;;  %v2568_v21 = vpop.f32.mrb[43].mxu1 }
 0xec7   : > { %v2612_v40 = vmul.f32 0.044715, %v11936_v2  ;;  %v11944_v47 = vadd.f32 %v11926_v28, %v2568_v21 }
 0xec8   : > { %v2626_v55 = vmul.f32 %v2614_v12, %v11933_v49  ;;  %v2615_v34 = vmul.f32 0.044715, %v11940_v43 }
 0xec9   : > { %v2624_v30 = vmul.f32 %v2612_v40, %v11936_v2  ;;  %v2613_v46 = vmul.f32 0.044715, %v11944_v47 }
 0xeca   : > { %v2638_v25 = vmul.f32 %v2626_v55, %v11933_v49  ;;  %v2627_v20 = vmul.f32 %v2615_v34, %v11940_v43 }
 0xecb   : > { %v2636_v33 = vmul.f32 %v2624_v30, %v11936_v2  ;;  %v2625_v36 = vmul.f32 %v2613_v46, %v11944_v47  ;;  %v10020_v10 = vpop.f32.mrb[44].mxu1 }
 0xecc   : > { %v2639_v41 = vmul.f32 %v2627_v20, %v11940_v43  ;;  %v11956_v26 = vadd.f32 %v10020_v10, %v11926_v28  ;;  %v2581_v27 = vpop.f32.mrb[45].mxu1  ;;  %v2650_v54 = vadd.f32 %v2638_v25, %v11933_v49  ;;  %v2602_v25 = vmul.f32 0.5, %v11933_v49 }
 0xecd   : > { %v2637_v61 = vmul.f32 %v2625_v36, %v11944_v47  ;;  %v11961_v18 = vadd.f32 %v11926_v28, %v2581_v27  ;;  %v10021_v44 = vpop.f32.mrb[46].mxu1  ;;  %v2648_v35 = vadd.f32 %v2636_v33, %v11936_v2  ;;  %v2603_v20 = vmul.f32 0.5, %v11940_v43 }
 0xece   : > { %v2618_v38 = vmul.f32 0.044715, %v11956_v26  ;;  %v2593_v16 = vadd.f32 %v10021_v44, %v11926_v28  ;;  %v2584_v23 = vpop.f32.mrb[47].mxu1  ;;  %v2651_v42 = vadd.f32 %v2639_v41, %v11940_v43  ;;  %v2662_v4 = vmul.f32 0.7978846, %v2650_v54 }
 0xecf   : > { %v2616_v15 = vmul.f32 0.044715, %v11961_v18  ;;  %v2585_v24 = vadd.f32 %v11926_v28, %v2584_v23  ;;  %v2649_v63 = vadd.f32 %v2637_v61, %v11944_v47  ;;  %v2660_v32 = vmul.f32 0.7978846, %v2648_v35 }
 0xed0   : > { %v2630_v29 = vmul.f32 %v2618_v38, %v11956_v26  ;;  %v2619_v22 = vmul.f32 0.044715, %v2593_v16  ;;  %v2663_v19 = vmul.f32 0.7978846, %v2651_v42  ;;  %10769 = vtanh.f32 %v2662_v4 }
 0xed1   : > { %v2628_v17 = vmul.f32 %v2616_v15, %v11961_v18  ;;  %v2617_v37 = vmul.f32 0.044715, %v2585_v24  ;;  %v2661_v13 = vmul.f32 0.7978846, %v2649_v63  ;;  %10771 = vtanh.f32 %v2660_v32 }
 0xed2   : > { %v2642_v8 = vmul.f32 %v2630_v29, %v11956_v26  ;;  %v2631_v0 = vmul.f32 %v2619_v22, %v2593_v16  ;;  %10773 = vtanh.f32 %v2663_v19  ;;  %v2600_v36 = vmul.f32 0.5, %v11936_v2 }
 0xed3   : > { %v2640_v51 = vmul.f32 %v2628_v17, %v11961_v18  ;;  %v2629_v28 = vmul.f32 %v2617_v37, %v2585_v24  ;;  %10775 = vtanh.f32 %v2661_v13  ;;  %v2601_v10 = vmul.f32 0.5, %v11944_v47 }
 0xed4   : > { %v2643_v11 = vmul.f32 %v2631_v0, %v2593_v16  ;;  %v2654_v31 = vadd.f32 %v2642_v8, %v11956_v26  ;;  %v2606_v43 = vmul.f32 0.5, %v11956_v26  ;;  %v2607_v2 = vmul.f32 0.5, %v2593_v16 }
 0xed5   : > { %v2641_v5 = vmul.f32 %v2629_v28, %v2585_v24  ;;  %v2652_v52 = vadd.f32 %v2640_v51, %v11961_v18  ;;  %v2604_v47 = vmul.f32 0.5, %v11961_v18  ;;  %v2605_v29 = vmul.f32 0.5, %v2585_v24  ;;  %v8791_v51 = vld [vmem:[%s16626_s15] ss:$0 sm:$0xff] }
 0xed6   : > { %v2655_v3 = vadd.f32 %v2643_v11, %v2593_v16  ;;  %v2666_v1 = vmul.f32 0.7978846, %v2654_v31 }
 0xed7   : > { %v2653_v50 = vadd.f32 %v2641_v5, %v2585_v24  ;;  %v2664_v59 = vmul.f32 0.7978846, %v2652_v52 }
 0xed8   : > { %v2667_v58 = vmul.f32 0.7978846, %v2655_v3  ;;  %10777 = vtanh.f32 %v2666_v1 }
 0xed9   : > { %v2665_v12 = vmul.f32 0.7978846, %v2653_v50  ;;  %10779 = vtanh.f32 %v2664_v59 }
 0xeda   : > { %v10770_v21 = vpop.eup %10769  ;;  %10781 = vtanh.f32 %v2667_v58 }
 0xedb   : > { %v10772_v40 = vpop.eup %10771  ;;  %v2686_v55 = vadd.f32 1.0, %v10770_v21  ;;  %10783 = vtanh.f32 %v2665_v12 }
 0xedc   : > { %v10774_v34 = vpop.eup %10773  ;;  %v2684_v30 = vadd.f32 1.0, %v10772_v40 }
 0xedd   : > { %v10776_v46 = vpop.eup %10775  ;;  %v2687_v33 = vadd.f32 1.0, %v10774_v34  ;;  %v2698_v27 = vmul.f32 %v2686_v55, %v2602_v25 }
 0xede   : > { %v2685_v41 = vadd.f32 1.0, %v10776_v46  ;;  %v2696_v61 = vmul.f32 %v2684_v30, %v2600_v36 }
 0xedf   : > { %v2699_v54 = vmul.f32 %v2687_v33, %v2603_v20 }
 0xee0   : > { %v2697_v44 = vmul.f32 %v2685_v41, %v2601_v10 }
 0xee1   : > { %v2707_v35 = vpack.c.bf16 %v2699_v54, %v2698_v27 }
 0xee2   : > { %v10778_v38 = vpop.eup %10777  ;;  %v2706_v23 = vpack.c.bf16 %v2697_v44, %v2696_v61 }
 0xee3   : > { %v10780_v42 = vpop.eup %10779  ;;  %v2690_v4 = vadd.f32 1.0, %v10778_v38 }
 0xee4   : > { %v10782_v15 = vpop.eup %10781  ;;  %10042 = vmatprep.mubr.bf16.mxu0 %v2706_v23  ;;  %v2688_v49 = vadd.f32 1.0, %v10780_v42 }
 0xee5   : > { %v10784_v63 = vpop.eup %10783  ;;  %10043 = vmatmul.mubr.bf16.gmra.mrb[52].mxu0 %v2707_v35  ;;  %v2691_v32 = vadd.f32 1.0, %v10782_v15  ;;  %v2702_v19 = vmul.f32 %v2690_v4, %v2606_v43 }
 0xee6   : > { %v2689_v22 = vadd.f32 1.0, %v10784_v63  ;;  %v2700_v37 = vmul.f32 %v2688_v49, %v2604_v47 }
 0xee7   : > { %v2703_v17 = vmul.f32 %v2691_v32, %v2607_v2 }
 0xee8   : > { %v2701_v13 = vmul.f32 %v2689_v22, %v2605_v29 }
 0xee9   : > { %v2709_v8 = vpack.c.bf16 %v2703_v17, %v2702_v19 }
 0xeea   : > { %v2708_v0 = vpack.c.bf16 %v2701_v13, %v2700_v37 }
 0xeec   : > { %10046 = vmatprep.mubr.bf16.mxu0 %v2708_v0 }
 0xeed   : > { %10047 = vmatmul.mubr.bf16.gmra.mrb[56].mxu0 %v2709_v8 }
 0xf89   : > { %v10040_v28 = vpop.f32.mrb[48].mxu0 }
 0xf8a   : > { %v2815_v26 = vpop.f32.mrb[49].mxu0  ;;  %v2824_v16 = vadd.f32 %v10040_v28, %v8791_v51 }
 0xf8b   : > { %v2816_v11 = vadd.f32 %v8791_v51, %v2815_v26  ;;  %v10041_v31 = vpop.f32.mrb[50].mxu0 }
 0xf8c   : > { %v2818_v18 = vpop.f32.mrb[51].mxu0  ;;  %v2827_v5 = vadd.f32 %v10041_v31, %v8791_v51  ;;  %v11989_v3 = vadd.f32 %v2824_v16, %v11713_v57 }
 0xf8d   : > { %v11986_v24 = vadd.f32 %v2816_v11, %v11710_v14  ;;  %v2819_v52 = vadd.f32 %v8791_v51, %v2818_v18  ;;  %v10459_v18 = vld [vmem:[%s16617_s6 + $0x10] sm:$0xff]  }
 0xf8e   : > { %v11997_v59 = vadd.f32 %v2827_v5, %v11723_v9  ;;  %v2884_v14 = vsel %vm16645_vm1, %v11989_v3, 0.0  ;;  %v10460_v5 = vld [vmem:[%s16617_s6 + $0x18] sm:$0xff]   ;;  %10050 = vmatprep.subr.bf16.mxu1 %v10459_v18 }
 0xf8f   : > { %v11992_v1 = vadd.f32 %v2819_v52, %v11716_v60  ;;  %v2878_v50 = vsel %vm16645_vm1, %v11986_v24, 0.0  ;;  %10051 = vmatpush3.bf16.msra.mxu1 %v10459_v18 }
 0xf90   : > { %2879 = vadd.xlane.f32.xlu0 %v2878_v50  ;;  %v2887_v57 = vsel %vm16645_vm1, %v11997_v59, 0.0  ;;  %10052 = vmatprep.subr.bf16.mxu1 %v10460_v5 }
 0xf91   : > { %v2881_v58 = vsel %vm16645_vm1, %v11992_v1, 0.0 }
 0xf92   : > { %2882 = vadd.xlane.f32.xlu1 %v2881_v58 }
 0xf93   : > { %10053 = vmatpush3.bf16.msra.mxu1 %v10460_v5 }
 0xf94   : > { %2885 = vadd.xlane.f32.xlu0 %v2884_v14 }
 0xf96   : > { %2888 = vadd.xlane.f32.xlu1 %v2887_v57 }
 0xfb8   : > { %v10044_v60 = vpop.f32.mrb[52].mxu0 }
 0xfb9   : > { %v2831_v12 = vpop.f32.mrb[53].mxu0  ;;  %v2840_v21 = vadd.f32 %v10044_v60, %v8791_v51 }
 0xfba   : > { %v2832_v40 = vadd.f32 %v8791_v51, %v2831_v12  ;;  %v10045_v55 = vpop.f32.mrb[54].mxu0 }
 0xfbb   : > { %v2834_v34 = vpop.f32.mrb[55].mxu0  ;;  %v2843_v30 = vadd.f32 %v10045_v55, %v8791_v51  ;;  %v12009_v25 = vadd.f32 %v2840_v21, %v11733_v48 }
 0xfbc   : > { %v12006_v9 = vadd.f32 %v2832_v40, %v11730_v39  ;;  %v2835_v46 = vadd.f32 %v8791_v51, %v2834_v34 }
 0xfbd   : > { %v12017_v36 = vadd.f32 %v2843_v30, %v11741_v7 }
 0xfbe   : > { %v12012_v20 = vadd.f32 %v2835_v46, %v11736_v6  ;;  %v2890_v33 = vsel %vm16645_vm1, %v12006_v9, 0.0  ;;  %v2896_v6 = vsel %vm16645_vm1, %v12009_v25, 0.0 }
 0xfbf   : > { %2891 = vadd.xlane.f32.xlu0 %v2890_v33  ;;  %v2899_v38 = vsel %vm16645_vm1, %v12017_v36, 0.0 }
 0xfc0   : > { %v10048_v10 = vpop.f32.mrb[56].mxu0  ;;  %v2893_v39 = vsel %vm16645_vm1, %v12012_v20, 0.0 }
 0xfc1   : > { %2894 = vadd.xlane.f32.xlu1 %v2893_v39  ;;  %v2847_v41 = vpop.f32.mrb[57].mxu0  ;;  %v2856_v27 = vadd.f32 %v10048_v10, %v8791_v51 }
 0xfc2   : > { %v2848_v54 = vadd.f32 %v8791_v51, %v2847_v41  ;;  %v10049_v48 = vpop.f32.mrb[58].mxu0 }
 0xfc3   : > { %2897 = vadd.xlane.f32.xlu0 %v2896_v6  ;;  %v2850_v61 = vpop.f32.mrb[59].mxu0  ;;  %v2859_v35 = vadd.f32 %v10049_v48, %v8791_v51  ;;  %v12029_v23 = vadd.f32 %v2856_v27, %v11753_v45 }
 0xfc4   : > { %v12024_v44 = vadd.f32 %v2848_v54, %v11748_v53  ;;  %v2851_v7 = vadd.f32 %v8791_v51, %v2850_v61 }
 0xfc5   : > { %2900 = vadd.xlane.f32.xlu1 %v2899_v38  ;;  %v12037_v15 = vadd.f32 %v2859_v35, %v11761_v62  ;;  %v2908_v49 = vsel %vm16645_vm1, %v12029_v23, 0.0 }
 0xfc6   : > { %v12032_v42 = vadd.f32 %v2851_v7, %v11756_v56  ;;  %v2902_v4 = vsel %vm16645_vm1, %v12024_v44, 0.0 }
 0xfc7   : > { %2903 = vadd.xlane.f32.xlu0 %v2902_v4  ;;  %v2911_v45 = vsel %vm16645_vm1, %v12037_v15, 0.0 }
 0xfc8   : > { %v2905_v53 = vsel %vm16645_vm1, %v12032_v42, 0.0 }
 0xfc9   : > { %2906 = vadd.xlane.f32.xlu1 %v2905_v53 }
 0xfcb   : > { %2909 = vadd.xlane.f32.xlu0 %v2908_v49 }
 0xfcd   : > { %2912 = vadd.xlane.f32.xlu1 %v2911_v45 }
0x101d   : > { %v2880_v56 = vpop.xlane.xlu0 %2879 }
0x101e   : > { %v2914_v63 = vmul.f32 0.03125, %v2880_v56 }
0x101f   : > { %v2883_v43 = vpop.xlane.xlu1 %2882 }
0x1020   : > { %v12046_v2 = vsub.f32 %v11986_v24, %v2914_v63  ;;  %v2915_v62 = vmul.f32 0.03125, %v2883_v43 }
0x1021   : > { %v2886_v32 = vpop.xlane.xlu0 %2885 }
0x1022   : > { %v12049_v47 = vsub.f32 %v11992_v1, %v2915_v62  ;;  %v2916_v29 = vmul.f32 0.03125, %v2886_v32  ;;  %v2938_v22 = vmul.f32 %v12046_v2, %v12046_v2 }
0x1023   : > { %v2889_v19 = vpop.xlane.xlu1 %2888 }
0x1024   : > { %v12054_v17 = vsub.f32 %v11989_v3, %v2916_v29  ;;  %v2917_v37 = vmul.f32 0.03125, %v2889_v19  ;;  %v2950_v13 = vsel %vm16645_vm1, %v2938_v22, 0.0  ;;  %v2939_v8 = vmul.f32 %v12049_v47, %v12049_v47 }
0x1025   : > { %2951 = vadd.xlane.f32.xlu0 %v2950_v13 }
0x1026   : > { %v12060_v0 = vsub.f32 %v11997_v59, %v2917_v37  ;;  %v2953_v51 = vsel %vm16645_vm1, %v2939_v8, 0.0  ;;  %v2940_v28 = vmul.f32 %v12054_v17, %v12054_v17 }
0x1027   : > { %2954 = vadd.xlane.f32.xlu1 %v2953_v51 }
0x1028   : > { %v2956_v26 = vsel %vm16645_vm1, %v2940_v28, 0.0  ;;  %v2941_v16 = vmul.f32 %v12060_v0, %v12060_v0 }
0x1029   : > { %2957 = vadd.xlane.f32.xlu0 %v2956_v26 }
0x102a   : > { %v2959_v11 = vsel %vm16645_vm1, %v2941_v16, 0.0 }
0x102b   : > { %2960 = vadd.xlane.f32.xlu1 %v2959_v11 }
0x104c   : > { %v2892_v31 = vpop.xlane.xlu0 %2891 }
0x104d   : > { %v2918_v52 = vmul.f32 0.03125, %v2892_v31 }
0x104e   : > { %v2895_v50 = vpop.xlane.xlu1 %2894 }
0x104f   : > { %v12076_v58 = vsub.f32 %v12006_v9, %v2918_v52  ;;  %v2919_v14 = vmul.f32 0.03125, %v2895_v50 }
0x1050   : > { %v2898_v57 = vpop.xlane.xlu0 %2897 }
0x1051   : > { %v12079_v60 = vsub.f32 %v12012_v20, %v2919_v14  ;;  %v2920_v12 = vmul.f32 0.03125, %v2898_v57  ;;  %v2942_v21 = vmul.f32 %v12076_v58, %v12076_v58 }
0x1052   : > { %v2901_v40 = vpop.xlane.xlu1 %2900 }
0x1053   : > { %v12084_v55 = vsub.f32 %v12009_v25, %v2920_v12  ;;  %v2921_v34 = vmul.f32 0.03125, %v2901_v40  ;;  %v2962_v30 = vsel %vm16645_vm1, %v2942_v21, 0.0  ;;  %v2943_v46 = vmul.f32 %v12079_v60, %v12079_v60  ;;  %v12126_v12 = vld [vmem:[%s17023_s21 + $0x1] ss:$0 sm:$0xff] }
0x1054   : > { %2963 = vadd.xlane.f32.xlu0 %v2962_v30  ;;  %v2904_v33 = vpop.xlane.xlu0 %2903 }
0x1055   : > { %v12090_v10 = vsub.f32 %v12017_v36, %v2921_v34  ;;  %v2922_v39 = vmul.f32 0.03125, %v2904_v33  ;;  %v2965_v41 = vsel %vm16645_vm1, %v2943_v46, 0.0  ;;  %v2944_v27 = vmul.f32 %v12084_v55, %v12084_v55  ;;  %v12134_v33 = vld [vmem:[%s16616_s5 + $0x1] ss:$0 sm:$0xff] }
0x1056   : > { %2966 = vadd.xlane.f32.xlu1 %v2965_v41  ;;  %v2907_v54 = vpop.xlane.xlu1 %2906 }
0x1057   : > { %v12096_v48 = vsub.f32 %v12024_v44, %v2922_v39  ;;  %v2923_v6 = vmul.f32 0.03125, %v2907_v54  ;;  %v2968_v61 = vsel %vm16645_vm1, %v2944_v27, 0.0  ;;  %v2945_v35 = vmul.f32 %v12090_v10, %v12090_v10 }
0x1058   : > { %2969 = vadd.xlane.f32.xlu0 %v2968_v61  ;;  %v2910_v7 = vpop.xlane.xlu0 %2909 }
0x1059   : > { %v12102_v38 = vsub.f32 %v12032_v42, %v2923_v6  ;;  %v2924_v4 = vmul.f32 0.03125, %v2910_v7  ;;  %v2971_v53 = vsel %vm16645_vm1, %v2945_v35, 0.0  ;;  %v2946_v49 = vmul.f32 %v12096_v48, %v12096_v48 }
0x105a   : > { %2972 = vadd.xlane.f32.xlu1 %v2971_v53  ;;  %v2913_v45 = vpop.xlane.xlu1 %2912 }
0x105b   : > { %v12108_v56 = vsub.f32 %v12029_v23, %v2924_v4  ;;  %v2925_v63 = vmul.f32 0.03125, %v2913_v45  ;;  %v2974_v43 = vsel %vm16645_vm1, %v2946_v49, 0.0  ;;  %v2947_v62 = vmul.f32 %v12102_v38, %v12102_v38 }
0x105c   : > { %2975 = vadd.xlane.f32.xlu0 %v2974_v43 }
0x105d   : > { %v12114_v32 = vsub.f32 %v12037_v15, %v2925_v63  ;;  %v2977_v29 = vsel %vm16645_vm1, %v2947_v62, 0.0  ;;  %v2948_v22 = vmul.f32 %v12108_v56, %v12108_v56 }
0x105e   : > { %2978 = vadd.xlane.f32.xlu1 %v2977_v29 }
0x105f   : > { %v2980_v19 = vsel %vm16645_vm1, %v2948_v22, 0.0  ;;  %v2949_v37 = vmul.f32 %v12114_v32, %v12114_v32 }
0x1060   : > { %2981 = vadd.xlane.f32.xlu0 %v2980_v19 }
0x1061   : > { %v2983_v13 = vsel %vm16645_vm1, %v2949_v37, 0.0 }
0x1062   : > { %2984 = vadd.xlane.f32.xlu1 %v2983_v13 }
0x10b2   : > { %v2952_v8 = vpop.xlane.xlu0 %2951 }
0x10b3   : > { %v2986_v51 = vmul.f32 0.03125, %v2952_v8 }
0x10b4   : > { %v2955_v28 = vpop.xlane.xlu1 %2954 }
0x10b5   : > { %v2998_v26 = vadd.f32 1e-05, %v2986_v51  ;;  %v2987_v16 = vmul.f32 0.03125, %v2955_v28 }
0x10b6   : > { %v2958_v11 = vpop.xlane.xlu0 %2957 }
0x10b7   : > { %10785 = vrsqrt.f32 %v2998_v26  ;;  %v2999_v31 = vadd.f32 1e-05, %v2987_v16  ;;  %v2988_v18 = vmul.f32 0.03125, %v2958_v11 }
0x10b8   : > { %v2961_v5 = vpop.xlane.xlu1 %2960 }
0x10b9   : > { %10787 = vrsqrt.f32 %v2999_v31  ;;  %v3000_v52 = vadd.f32 1e-05, %v2988_v18  ;;  %v2989_v50 = vmul.f32 0.03125, %v2961_v5 }
0x10bb   : > { %10789 = vrsqrt.f32 %v3000_v52  ;;  %v3001_v14 = vadd.f32 1e-05, %v2989_v50 }
0x10bd   : > { %10791 = vrsqrt.f32 %v3001_v14 }
0x10c1   : > { %v10786_v57 = vpop.eup %10785 }
0x10c2   : > { %v3022_v21 = vmul.f32 %v10786_v57, %v12046_v2 }
0x10c3   : > { %v10788_v40 = vpop.eup %10787 }
0x10c4   : > { %v3023_v34 = vmul.f32 %v10788_v40, %v12049_v47  ;;  %v3040_v30 = vmul.f32 %v12126_v12, %v3022_v21 }
0x10c5   : > { %v10790_v46 = vpop.eup %10789 }
0x10c6   : > { %v3024_v39 = vmul.f32 %v10790_v46, %v12054_v17  ;;  %v3041_v41 = vmul.f32 %v12126_v12, %v3023_v34  ;;  %v3058_v6 = vadd.f32 %v12134_v33, %v3040_v30 }
0x10c7   : > { %v10792_v27 = vpop.eup %10791 }
0x10c8   : > { %v3042_v54 = vmul.f32 %v12126_v12, %v3024_v39  ;;  %v3025_v2 = vmul.f32 %v10792_v27, %v12060_v0  ;;  %v3059_v47 = vadd.f32 %v12134_v33, %v3041_v41 }
0x10ca   : > { %v3043_v61 = vmul.f32 %v12126_v12, %v3025_v2  ;;  %v3070_v35 = vpack.c.bf16 %v3059_v47, %v3058_v6  ;;  %v3060_v7 = vadd.f32 %v12134_v33, %v3042_v54 }
0x10cc   : > { %v3061_v4 = vadd.f32 %v12134_v33, %v3043_v61  ;;  %10054 = vmatprep.mubr.msk.bf16.mxu1 %vm16645_vm1, %v3070_v35 }
0x10ce   : > { %v3071_v17 = vpack.c.bf16 %v3061_v4, %v3060_v7 }
0x10d0   : > { %10055 = vmatmul.mubr.msk.bf16.vlgmr.msra.gmra.mrb[48].mxu1 %vm16645_vm1, %v3071_v17 }
0x10e1   : > { %v2964_v53 = vpop.xlane.xlu0 %2963 }
0x10e2   : > { %v2990_v49 = vmul.f32 0.03125, %v2964_v53 }
0x10e3   : > { %v2967_v45 = vpop.xlane.xlu1 %2966 }
0x10e4   : > { %v3002_v0 = vadd.f32 1e-05, %v2990_v49  ;;  %v2991_v63 = vmul.f32 0.03125, %v2967_v45 }
0x10e5   : > { %v2970_v43 = vpop.xlane.xlu0 %2969 }
0x10e6   : > { %10793 = vrsqrt.f32 %v3002_v0  ;;  %v3003_v62 = vadd.f32 1e-05, %v2991_v63  ;;  %v2992_v29 = vmul.f32 0.03125, %v2970_v43 }
0x10e7   : > { %v2973_v22 = vpop.xlane.xlu1 %2972 }
0x10e8   : > { %10795 = vrsqrt.f32 %v3003_v62  ;;  %v3004_v19 = vadd.f32 1e-05, %v2992_v29  ;;  %v2993_v37 = vmul.f32 0.03125, %v2973_v22 }
0x10e9   : > { %v2976_v13 = vpop.xlane.xlu0 %2975 }
0x10ea   : > { %10797 = vrsqrt.f32 %v3004_v19  ;;  %v3005_v8 = vadd.f32 1e-05, %v2993_v37  ;;  %v2994_v51 = vmul.f32 0.03125, %v2976_v13 }
0x10eb   : > { %v2979_v28 = vpop.xlane.xlu1 %2978 }
0x10ec   : > { %10799 = vrsqrt.f32 %v3005_v8  ;;  %v3006_v26 = vadd.f32 1e-05, %v2994_v51  ;;  %v2995_v16 = vmul.f32 0.03125, %v2979_v28  ;;  %v8809_v8 = vld [vmem:[%s16618_s7 + $0x1] ss:$0 sm:$0xff] }
0x10ed   : > { %v2982_v11 = vpop.xlane.xlu0 %2981 }
0x10ee   : > { %10801 = vrsqrt.f32 %v3006_v26  ;;  %v3007_v31 = vadd.f32 1e-05, %v2995_v16  ;;  %v2996_v18 = vmul.f32 0.03125, %v2982_v11 }
0x10ef   : > { %v2985_v5 = vpop.xlane.xlu1 %2984 }
0x10f0   : > { %v10794_v52 = vpop.eup %10793  ;;  %10803 = vrsqrt.f32 %v3007_v31  ;;  %v3008_v50 = vadd.f32 1e-05, %v2996_v18  ;;  %v2997_v14 = vmul.f32 0.03125, %v2985_v5 }
0x10f1   : > { %v3026_v57 = vmul.f32 %v10794_v52, %v12076_v58 }
0x10f2   : > { %v10796_v21 = vpop.eup %10795  ;;  %10805 = vrsqrt.f32 %v3008_v50  ;;  %v3009_v40 = vadd.f32 1e-05, %v2997_v14 }
0x10f3   : > { %v3027_v34 = vmul.f32 %v10796_v21, %v12079_v60  ;;  %v3044_v30 = vmul.f32 %v12126_v12, %v3026_v57 }
0x10f4   : > { %v10798_v46 = vpop.eup %10797  ;;  %10807 = vrsqrt.f32 %v3009_v40 }
0x10f5   : > { %v3045_v39 = vmul.f32 %v12126_v12, %v3027_v34  ;;  %v3028_v41 = vmul.f32 %v10798_v46, %v12084_v55  ;;  %v3062_v54 = vadd.f32 %v12134_v33, %v3044_v30 }
0x10f6   : > { %v10800_v27 = vpop.eup %10799 }
0x10f7   : > { %v3063_v2 = vadd.f32 %v12134_v33, %v3045_v39  ;;  %v3029_v58 = vmul.f32 %v10800_v27, %v12090_v10  ;;  %v3046_v6 = vmul.f32 %v12126_v12, %v3028_v41 }
0x10f8   : > { %v10802_v47 = vpop.eup %10801 }
0x10f9   : > { %v3072_v61 = vpack.c.bf16 %v3063_v2, %v3062_v54  ;;  %v3047_v60 = vmul.f32 %v12126_v12, %v3029_v58  ;;  %v3030_v35 = vmul.f32 %v10802_v47, %v12096_v48  ;;  %v3064_v55 = vadd.f32 %v12134_v33, %v3046_v6 }
0x10fa   : > { %v10804_v7 = vpop.eup %10803 }
0x10fb   : > { %10058 = vmatprep.mubr.msk.bf16.mxu1 %vm16645_vm1, %v3072_v61  ;;  %v3065_v4 = vadd.f32 %v12134_v33, %v3047_v60  ;;  %v3031_v17 = vmul.f32 %v10804_v7, %v12102_v38  ;;  %v3048_v53 = vmul.f32 %v12126_v12, %v3030_v35 }
0x10fc   : > { %v10806_v10 = vpop.eup %10805 }
0x10fd   : > { %v3073_v49 = vpack.c.bf16 %v3065_v4, %v3064_v55  ;;  %v3049_v45 = vmul.f32 %v12126_v12, %v3031_v17  ;;  %v3032_v0 = vmul.f32 %v10806_v10, %v12108_v56  ;;  %v3066_v48 = vadd.f32 %v12134_v33, %v3048_v53 }
0x10fe   : > { %v10808_v63 = vpop.eup %10807 }
0x10ff   : > { %10059 = vmatmul.mubr.msk.bf16.gmra.mrb[52].mxu1 %vm16645_vm1, %v3073_v49  ;;  %v3067_v43 = vadd.f32 %v12134_v33, %v3049_v45  ;;  %v3033_v62 = vmul.f32 %v10808_v63, %v12114_v32  ;;  %v3050_v29 = vmul.f32 %v12126_v12, %v3032_v0 }
0x1101   : > { %v3074_v38 = vpack.c.bf16 %v3067_v43, %v3066_v48  ;;  %v3051_v22 = vmul.f32 %v12126_v12, %v3033_v62  ;;  %v3068_v19 = vadd.f32 %v12134_v33, %v3050_v29 }
0x1103   : > { %10062 = vmatprep.mubr.msk.bf16.mxu1 %vm16645_vm1, %v3074_v38  ;;  %v3069_v56 = vadd.f32 %v12134_v33, %v3051_v22 }
0x1105   : > { %v3075_v37 = vpack.c.bf16 %v3069_v56, %v3068_v19 }
0x1107   : > { %10063 = vmatmul.mubr.msk.bf16.gmra.mrb[56].mxu1 %vm16645_vm1, %v3075_v37 }
0x11a3   : > { %v10056_v13 = vpop.f32.mrb[48].mxu1 }
0x11a4   : > { %v3153_v32 = vpop.f32.mrb[49].mxu1  ;;  %v3162_v28 = vadd.f32 %v10056_v13, %v8809_v8 }
0x11a5   : > { %v10057_v51 = vpop.f32.mrb[50].mxu1  ;;  %v3154_v12 = vadd.f32 %v8809_v8, %v3153_v32 }
0x11a6   : > { %v3165_v26 = vadd.f32 %v10057_v51, %v8809_v8  ;;  %v3156_v16 = vpop.f32.mrb[51].mxu1 }
0x11a7   : > { %v3157_v11 = vadd.f32 %v8809_v8, %v3156_v16 }
0x11a8   : > { %v12178_v31 = vpack.c.bf16 %v3165_v26, %v3162_v28 }
0x11a9   : > { %v12180_v18 = vpack.c.bf16 %v3157_v11, %v3154_v12 }
0x11aa   : > { %3210 = vrot.lane.b32.xlu1 %v12178_v31, %s10965_s27 }
0x11ab   : > { %3208 = vrot.lane.b32.xlu0 %v12180_v18, %s10965_s27  ;;  %10070 = vmatprep.mubr.msk.bf16.mxu0 %vm1136_vm2, %v12180_v18 }
0x11d2   : > { %v10060_v33 = vpop.f32.mrb[52].mxu1 }
0x11d3   : > { %v3169_v5 = vpop.f32.mrb[53].mxu1  ;;  %v3178_v50 = vadd.f32 %v10060_v33, %v8809_v8 }
0x11d4   : > { %v10061_v52 = vpop.f32.mrb[54].mxu1  ;;  %v3170_v21 = vadd.f32 %v8809_v8, %v3169_v5 }
0x11d5   : > { %v3181_v14 = vadd.f32 %v10061_v52, %v8809_v8  ;;  %v3172_v57 = vpop.f32.mrb[55].mxu1 }
0x11d6   : > { %v3173_v40 = vadd.f32 %v8809_v8, %v3172_v57 }
0x11d7   : > { %v12188_v34 = vpack.c.bf16 %v3181_v14, %v3178_v50 }
0x11d8   : > { %v12190_v30 = vpack.c.bf16 %v3173_v40, %v3170_v21 }
0x11da   : > { %3388 = vrot.lane.b32.xlu1 %v12190_v30, %s10965_s27  ;;  %v10064_v46 = vpop.f32.mrb[56].mxu1  ;;  %10094 = vmatprep.mubr.msk.bf16.mxu1 %vm1136_vm2, %v12190_v30 }
0x11db   : > { %v3185_v39 = vpop.f32.mrb[57].mxu1  ;;  %v3194_v27 = vadd.f32 %v10064_v46, %v8809_v8 }
0x11dc   : > { %v10065_v41 = vpop.f32.mrb[58].mxu1  ;;  %v3186_v58 = vadd.f32 %v8809_v8, %v3185_v39 }
0x11dd   : > { %v3197_v54 = vadd.f32 %v10065_v41, %v8809_v8  ;;  %v3188_v2 = vpop.f32.mrb[59].mxu1 }
0x11de   : > { %v3189_v6 = vadd.f32 %v8809_v8, %v3188_v2  ;;  %3390 = vrot.lane.b32.xlu1 %v12188_v34, %s10965_s27 }
0x11df   : > { %v12198_v47 = vpack.c.bf16 %v3197_v54, %v3194_v27 }
0x11e0   : > { %v12200_v61 = vpack.c.bf16 %v3189_v6, %v3186_v58 }
0x11e2   : > { %3394 = vrot.lane.b32.xlu1 %v12198_v47, %s10965_s27  ;;  %3392 = vrot.lane.b32.xlu0 %v12200_v61, %s10965_s27  ;;  %s17024_s27 = smov 80  }
0x121c   : > { %v3211_v7 = vpop.permute.xlu1 %3210 }
0x121d   : > { %v3209_v60 = vpop.permute.xlu0 %3208  ;;  %v3222_v55 = vsel %vm1136_vm2, %v3211_v7, 0 }
0x121e   : > { %10330 = vmatprep.subr.msk.bf16.mxu0 %vm1136_vm2, %v3209_v60  ;;  %10332 = vmatprep.subr.msk.bf16.mxu1 %vm1136_vm2, %v3209_v60  ;;  %v3219_v35 = vsel %vm1136_vm2, %v3209_v60, 0 }
0x121f   : > { %10067 = vmatpush3.bf16.xpose.msra.mxu0 %v3219_v35  ;;  %10083 = vmatpush3.bf16.xpose.msra.mxu1 %v3219_v35 }
0x1220   : > { %10331 = vmatprep.subr.msk.bf16.mxu0 %vm1136_vm2, %v3211_v7  ;;  %10333 = vmatprep.subr.msk.bf16.mxu1 %vm1136_vm2, %v3211_v7 }
0x1227   : > { %10069 = vmatpush3.bf16.xpose.msra.mxu0 %v3222_v55  ;;  %10085 = vmatpush3.bf16.xpose.msra.mxu1 %v3222_v55 }
0x122e   : > { %10071 = vmatmul.mubr.msk.bf16.vlgmr.msra.gmra.mrb[60].mxu0 %vm1136_vm2, %v12178_v31 }
0x124c   : > { %v3389_v4 = vpop.permute.xlu1 %3388 }
0x124d   : > { %10334 = vmatprep.subr.msk.bf16.mxu1 %vm1136_vm2, %v3389_v4  ;;  %v3409_v17 = vsel %vm1136_vm2, %v3389_v4, 0 }
0x124e   : > { %10087 = vmatpush3.bf16.xpose.msra.mxu1 %v3409_v17 }
0x1250   : > { %v3391_v53 = vpop.permute.xlu1 %3390 }
0x1251   : > { %10335 = vmatprep.subr.msk.bf16.mxu1 %vm1136_vm2, %v3391_v53  ;;  %v3412_v10 = vsel %vm1136_vm2, %v3391_v53, 0 }
0x1254   : > { %v3393_v49 = vpop.permute.xlu0 %3392  ;;  %v3395_v0 = vpop.permute.xlu1 %3394 }
0x1255   : > { %v3415_v45 = vsel %vm1136_vm2, %v3393_v49, 0  ;;  %v3418_v63 = vsel %vm1136_vm2, %v3395_v0, 0 }
0x1256   : > { %10089 = vmatpush3.bf16.xpose.msra.mxu1 %v3412_v10 }
0x1257   : > { %10336 = vmatprep.subr.msk.bf16.mxu1 %vm1136_vm2, %v3393_v49 }
0x125e   : > { %10091 = vmatpush3.bf16.xpose.msra.mxu1 %v3415_v45 }
0x125f   : > { %10337 = vmatprep.subr.msk.bf16.mxu1 %vm1136_vm2, %v3395_v0 }
0x1266   : > { %10093 = vmatpush3.bf16.xpose.msra.mxu1 %v3418_v63 }
0x126d   : > { %10095 = vmatmul.mubr.msk.bf16.vlgmr.msra.gmra.mrb[60].mxu1 %vm1136_vm2, %v12188_v34 }
0x126e   : > { %10098 = vmatprep.mubr.msk.bf16.mxu1 %vm1136_vm2, %v12200_v61 }
0x1275   : > { %10099 = vmatmul.mubr.msk.bf16.gmra.mrb[64].mxu1 %vm1136_vm2, %v12198_v47 }
0x1301   : > { %v10072_v48 = vpop.f32.mrb[60].mxu0 }
0x1302   : > { %v3275_v43 = vmul.f32 0.25, %v10072_v48  ;;  %v3258_v62 = vpop.f32.mrb[61].mxu0 }
0x1303   : > { %v10073_v29 = vpop.f32.mrb[62].mxu0  ;;  %v3273_v38 = vmul.f32 0.25, %v3258_v62 }
0x1304   : > { %v3261_v22 = vpop.f32.mrb[63].mxu0  ;;  %v3283_v19 = vsel %vm16645_vm1, %v3275_v43, -inf  ;;  %v3276_v13 = vmul.f32 0.25, %v10073_v29 }
0x1305   : > { %v12229_v56 = vmul.f32 0.25, %v3261_v22  ;;  %3284 = vmax.xlane.f32.xlu0 %v3283_v19  ;;  %v3277_v8 = vsel %vm16645_vm1, %v3273_v38, -inf }
0x1306   : > { %v3286_v32 = vsel %vm16645_vm1, %v3276_v13, -inf }
0x1307   : > { %v3280_v37 = vsel %vm16645_vm1, %v12229_v56, -inf }
0x1308   : > { %3281 = vmax.xlane.f32.xlu1 %v3280_v37 }
0x1309   : > { %3278 = vmax.xlane.f32.xlu0 %v3277_v8 }
0x130d   : > { %3287 = vmax.xlane.f32.xlu0 %v3286_v32 }
0x1340   : > { %v10096_v51 = vpop.f32.mrb[60].mxu1 }
0x1341   : > { %v12235_v28 = vmul.f32 0.25, %v10096_v51  ;;  %v3454_v26 = vpop.f32.mrb[61].mxu1 }
0x1342   : > { %v10097_v16 = vpop.f32.mrb[62].mxu1  ;;  %v12237_v12 = vmul.f32 0.25, %v3454_v26 }
0x1343   : > { %v12239_v11 = vmul.f32 0.25, %v10097_v16  ;;  %v3457_v33 = vpop.f32.mrb[63].mxu1  ;;  %v3499_v5 = vsel %vm1418_vm3, %v12235_v28, -inf }
0x1344   : > { %3500 = vmax.xlane.f32.xlu0 %v3499_v5  ;;  %v12243_v52 = vmul.f32 0.25, %v3457_v33  ;;  %v3493_v14 = vsel %vm1418_vm3, %v12237_v12, -inf }
0x1345   : > { %v3502_v50 = vsel %vm1418_vm3, %v12239_v11, -inf }
0x1346   : > { %3503 = vmax.xlane.f32.xlu1 %v3502_v50  ;;  %v3496_v46 = vsel %vm1418_vm3, %v12243_v52, -inf }
0x1348   : > { %3494 = vmax.xlane.f32.xlu0 %v3493_v14  ;;  %v10100_v57 = vpop.f32.mrb[64].mxu1 }
0x1349   : > { %v12249_v21 = vmul.f32 0.25, %v10100_v57  ;;  %v3470_v40 = vpop.f32.mrb[65].mxu1 }
0x134a   : > { %3497 = vmax.xlane.f32.xlu1 %v3496_v46  ;;  %v10101_v39 = vpop.f32.mrb[66].mxu1  ;;  %v12253_v41 = vmul.f32 0.25, %v3470_v40 }
0x134b   : > { %v3473_v27 = vpop.f32.mrb[67].mxu1  ;;  %v3511_v54 = vsel %vm1418_vm3, %v12249_v21, -inf  ;;  %v12263_v58 = vmul.f32 0.25, %v10101_v39 }
0x134c   : > { %3512 = vmax.xlane.f32.xlu0 %v3511_v54  ;;  %v3505_v2 = vsel %vm1418_vm3, %v12253_v41, -inf  ;;  %v12265_v6 = vmul.f32 0.25, %v3473_v27 }
0x134d   : > { %v3514_v60 = vsel %vm1418_vm3, %v12263_v58, -inf }
0x134e   : > { %v3508_v35 = vsel %vm1418_vm3, %v12265_v6, -inf }
0x1350   : > { %3506 = vmax.xlane.f32.xlu0 %v3505_v2 }
0x135b   : > { %3325 = vrot.lane.b32.xlu1 %v12178_v31, %s16643_s28 }
0x1366   : > { %3323 = vrot.lane.b32.xlu0 %v12180_v18, %s16643_s28 }
0x137f   : > { %3515 = vmax.xlane.f32.xlu1 %v3514_v60 }
0x1383   : > { %3509 = vmax.xlane.f32.xlu1 %v3508_v35 }
0x1392   : > { %v3285_v7 = vpop.xlane.xlu0 %3284 }
0x1393   : > { %v3291_v55 = vsub.f32 %v3275_v43, %v3285_v7 }
0x1394   : > { %3587 = vrot.lane.b32.xlu1 %v12188_v34, %s16643_s28 }
0x1395   : > { %v3297_v4 = vmul.f32 1.442695, %v3291_v55  ;;  %v3282_v62 = vpop.xlane.xlu1 %3281 }
0x1396   : > { %v3279_v17 = vpop.xlane.xlu0 %3278  ;;  %v3290_v29 = vsub.f32 %v12229_v56, %v3282_v62 }
0x1397   : > { %10809 = vpow2.f32 %v3297_v4  ;;  %v3289_v53 = vsub.f32 %v3273_v38, %v3279_v17 }
0x1398   : > { %3589 = vrot.lane.b32.xlu1 %v12200_v61, %s16643_s28  ;;  %v3295_v22 = vmul.f32 1.442695, %v3290_v29 }
0x1399   : > { %v3293_v10 = vmul.f32 1.442695, %v3289_v53 }
0x139a   : > { %v3288_v0 = vpop.xlane.xlu0 %3287 }
0x139b   : > { %10811 = vpow2.f32 %v3293_v10  ;;  %v3292_v48 = vsub.f32 %v3276_v13, %v3288_v0 }
0x139d   : > { %v3299_v38 = vmul.f32 1.442695, %v3292_v48 }
0x139f   : > { %10813 = vpow2.f32 %v3299_v38 }
0x13a0   : > { %10815 = vpow2.f32 %v3295_v22 }
0x13a1   : > { %v12275_v49 = vpop.eup %10809 }
0x13a2   : > { %v3307_v45 = vsel %vm16645_vm1, %v12275_v49, 0.0 }
0x13a3   : > { %3308 = vadd.xlane.f32.xlu0 %v3307_v45 }
0x13a5   : > { %v12279_v63 = vpop.eup %10811 }
0x13a6   : > { %v3301_v43 = vsel %vm16645_vm1, %v12279_v63, 0.0 }
0x13a7   : > { %3302 = vadd.xlane.f32.xlu0 %v3301_v43 }
0x13a9   : > { %v12284_v19 = vpop.eup %10813 }
0x13aa   : > { %v3310_v37 = vsel %vm16645_vm1, %v12284_v19, 0.0  ;;  %v12288_v8 = vpop.eup %10815 }
0x13ab   : > { %v3304_v13 = vsel %vm16645_vm1, %v12288_v8, 0.0 }
0x13bc   : > { %3311 = vadd.xlane.f32.xlu1 %v3310_v37 }
0x13bd   : > { %3585 = vrot.lane.b32.xlu0 %v12190_v30, %s16643_s28 }
0x13c0   : > { %3305 = vadd.xlane.f32.xlu1 %v3304_v13 }
0x13d1   : > { %3591 = vrot.lane.b32.xlu1 %v12198_v47, %s16643_s28  ;;  %v3501_v56 = vpop.xlane.xlu0 %3500 }
0x13d2   : > { %v3519_v32 = vsub.f32 %v12235_v28, %v3501_v56 }
0x13d3   : > { %v3504_v51 = vpop.xlane.xlu1 %3503 }
0x13d4   : > { %v3529_v26 = vmul.f32 1.442695, %v3519_v32 }
0x13d5   : > { %v3495_v16 = vpop.xlane.xlu0 %3494 }
0x13d6   : > { %10817 = vpow2.f32 %v3529_v26  ;;  %v3517_v27 = vsub.f32 %v12237_v12, %v3495_v16 }
0x13d7   : > { %v3498_v33 = vpop.xlane.xlu1 %3497 }
0x13d8   : > { %v3518_v5 = vsub.f32 %v12243_v52, %v3498_v33  ;;  %v3525_v60 = vmul.f32 1.442695, %v3517_v27 }
0x13d9   : > { %v3513_v50 = vpop.xlane.xlu0 %3512 }
0x13da   : > { %v3527_v14 = vmul.f32 1.442695, %v3518_v5  ;;  %v3523_v57 = vsub.f32 %v12249_v21, %v3513_v50  ;;  %v3520_v21 = vsub.f32 %v12239_v11, %v3504_v51 }
0x13db   : > { %v12309_v35 = vpop.permute.xlu1 %3325 }
0x13dc   : > { %10819 = vpow2.f32 %v3527_v14  ;;  %v3537_v40 = vmul.f32 1.442695, %v3523_v57 }
0x13dd   : > { %v3507_v46 = vpop.xlane.xlu0 %3506 }
0x13de   : > { %10821 = vpow2.f32 %v3537_v40  ;;  %v3521_v39 = vsub.f32 %v12253_v41, %v3507_v46  ;;  %v3531_v41 = vmul.f32 1.442695, %v3520_v21 }
0x13e0   : > { %v12301_v28 = vpop.eup %10817  ;;  %v3533_v54 = vmul.f32 1.442695, %v3521_v39 }
0x13e1   : > { %v12303_v2 = vpop.permute.xlu0 %3323  ;;  %v3547_v52 = vsel %vm1418_vm3, %v12301_v28, 0.0 }
0x13e2   : > { %10823 = vpow2.f32 %v3533_v54  ;;  %3548 = vadd.xlane.f32.xlu0 %v3547_v52  ;;  %10074 = vmatprep.subr.bf16.mxu0 %v12303_v2 }
0x13e3   : > { %10075 = vmatpush3.bf16.msra.mxu0 %v12303_v2  ;;  %10825 = vpow2.f32 %v3525_v60 }
0x13e4   : > { %10076 = vmatprep.subr.bf16.mxu0 %v12309_v35  ;;  %10827 = vpow2.f32 %v3531_v41 }
0x13e6   : > { %v12313_v12 = vpop.eup %10819 }
0x13e7   : > { %10077 = vmatpush3.bf16.msra.mxu0 %v12309_v35  ;;  %v3544_v7 = vsel %vm1418_vm3, %v12313_v12, 0.0 }
0x13e8   : > { %v12318_v55 = vpop.eup %10821  ;;  %3545 = vadd.xlane.f32.xlu0 %v3544_v7  ;;  %10102 = vmatprep.subr.bf16.mxu0 %v12303_v2 }
0x13e9   : > { %v3559_v11 = vsel %vm1418_vm3, %v12318_v55, 0.0 }
0x13ec   : > { %v12323_v4 = vpop.eup %10823  ;;  %3560 = vadd.xlane.f32.xlu0 %v3559_v11 }
0x13ed   : > { %v3553_v17 = vsel %vm1418_vm3, %v12323_v4, 0.0  ;;  %v12327_v53 = vpop.eup %10825 }
0x13ee   : > { %v3541_v10 = vsel %vm1418_vm3, %v12327_v53, 0.0  ;;  %v12331_v45 = vpop.eup %10827 }
0x13ef   : > { %v3550_v0 = vsel %vm1418_vm3, %v12331_v45, 0.0 }
0x13f0   : > { %3554 = vadd.xlane.f32.xlu0 %v3553_v17 }
0x13f5   : > { %3542 = vadd.xlane.f32.xlu1 %v3541_v10 }
0x13f9   : > { %3551 = vadd.xlane.f32.xlu1 %v3550_v0 }
0x1406   : > { %3678 = vrot.lane.b32.xlu0 %v12180_v18, %s17024_s27 }
0x140a   : > { %3674 = vrot.lane.b32.xlu0 %v12180_v18, %s17025_s4 }
0x140c   : > { %v3516_v48 = vpop.xlane.xlu1 %3515 }
0x140d   : > { %v3524_v43 = vsub.f32 %v12263_v58, %v3516_v48 }
0x140f   : > { %v3539_v62 = vmul.f32 1.442695, %v3524_v43 }
0x1410   : > { %v3510_v29 = vpop.xlane.xlu1 %3509 }
0x1411   : > { %10829 = vpow2.f32 %v3539_v62  ;;  %v3522_v38 = vsub.f32 %v12265_v6, %v3510_v29 }
0x1413   : > { %v3535_v22 = vmul.f32 1.442695, %v3522_v38 }
0x1414   : > { %v3588_v58 = vpop.permute.xlu1 %3587 }
0x1415   : > { %10831 = vpow2.f32 %v3535_v22 }
0x1418   : > { %v3590_v51 = vpop.permute.xlu1 %3589 }
0x141b   : > { %v12341_v37 = vpop.eup %10829 }
0x141c   : > { %v3562_v13 = vsel %vm1418_vm3, %v12341_v37, 0.0 }
0x141d   : > { %3563 = vadd.xlane.f32.xlu1 %v3562_v13 }
0x141f   : > { %v12345_v56 = vpop.eup %10831 }
0x1420   : > { %v3556_v32 = vsel %vm1418_vm3, %v12345_v56, 0.0 }
0x1421   : > { %3557 = vadd.xlane.f32.xlu1 %v3556_v32 }
0x1430   : > { %v3309_v6 = vpop.xlane.xlu0 %3308 }
0x1432   : > { %3680 = vrot.lane.b32.xlu1 %v12178_v31, %s17024_s27 }
0x1434   : > { %v3303_v26 = vpop.xlane.xlu0 %3302 }
0x1436   : > { %3676 = vrot.lane.b32.xlu1 %v12178_v31, %s17025_s4 }
0x1438   : > { %v3586_v21 = vpop.permute.xlu0 %3585 }
0x1449   : > { %v3312_v16 = vpop.xlane.xlu1 %3311 }
0x144a   : > { %10833 = vrcp.f32 %v3312_v16 }
0x144b   : > { %10835 = vrcp.f32 %v3303_v26 }
0x144c   : > { %10837 = vrcp.f32 %v3309_v6 }
0x144d   : > { %v3306_v33 = vpop.xlane.xlu1 %3305 }
0x144e   : > { %10839 = vrcp.f32 %v3306_v33 }
0x1454   : > { %v10834_v5 = vpop.eup %10833 }
0x1455   : > { %v10836_v50 = vpop.eup %10835  ;;  %v3320_v40 = vmul.f32 %v10834_v5, %v12284_v19 }
0x1456   : > { %v10838_v14 = vpop.eup %10837  ;;  %v3317_v46 = vmul.f32 %v10836_v50, %v12279_v63  ;;  %v3592_v63 = vpop.permute.xlu1 %3591 }
0x1457   : > { %v3319_v27 = vmul.f32 %v10838_v14, %v12275_v49 }
0x1458   : > { %v10840_v57 = vpop.eup %10839 }
0x1459   : > { %v3318_v39 = vmul.f32 %v10840_v57, %v12288_v8  ;;  %v3322_v52 = vpack.c.bf16 %v3320_v40, %v3319_v27 }
0x145b   : > { %v3321_v54 = vpack.c.bf16 %v3318_v39, %v3317_v46 }
0x145d   : > { %10078 = vmatprep.mubr.msk.bf16.mxu0 %vm16645_vm1, %v3321_v54 }
0x145e   : > { %10079 = vmatmul.mubr.msk.bf16.vlgmr.msra.gmra.mrb[64].mxu0 %vm16645_vm1, %v3322_v52 }
0x145f   : > { %10103 = vmatpush3.bf16.msra.mxu0 %v12303_v2 }
0x1460   : > { %10104 = vmatprep.subr.bf16.mxu0 %v12309_v35 }
0x1463   : > { %10105 = vmatpush3.bf16.msra.mxu0 %v12309_v35 }
0x1464   : > { %10106 = vmatprep.subr.bf16.mxu0 %v3586_v21 }
0x1467   : > { %10107 = vmatpush3.bf16.msra.mxu0 %v3586_v21 }
0x1468   : > { %10108 = vmatprep.subr.bf16.mxu0 %v3588_v58 }
0x146b   : > { %10109 = vmatpush3.bf16.msra.mxu0 %v3588_v58 }
0x146c   : > { %10110 = vmatprep.subr.bf16.mxu0 %v3590_v51 }
0x146f   : > { %10111 = vmatpush3.bf16.msra.mxu0 %v3590_v51  ;;  %v3549_v49 = vpop.xlane.xlu0 %3548 }
0x1470   : > { %10112 = vmatprep.subr.bf16.mxu0 %v3592_v63 }
0x1473   : > { %10113 = vmatpush3.bf16.msra.mxu0 %v3592_v63 }
0x1475   : > { %v3546_v19 = vpop.xlane.xlu0 %3545 }
0x1476   : > { %10841 = vrcp.f32 %v3546_v19 }
0x1479   : > { %v3561_v8 = vpop.xlane.xlu0 %3560 }
0x147d   : > { %v3555_v60 = vpop.xlane.xlu0 %3554 }
0x1480   : > { %v10842_v7 = vpop.eup %10841 }
0x1481   : > { %v12362_v2 = vpop.permute.xlu0 %3678  ;;  %v3574_v10 = vmul.f32 %v10842_v7, %v12313_v12 }
0x1482   : > { %v3543_v41 = vpop.xlane.xlu1 %3542  ;;  %10338 = vmatprep.subr.msk.bf16.mxu0 %vm1136_vm2, %v12362_v2  ;;  %v12374_v22 = vsel %vm1136_vm2, %v12362_v2, 0 }
0x1483   : > { %10843 = vrcp.f32 %v3543_v41 }
0x1484   : > { %10845 = vrcp.f32 %v3549_v49 }
0x1485   : > { %v3675_v14 = vpop.permute.xlu0 %3674 }
0x1486   : > { %v3552_v35 = vpop.xlane.xlu1 %3551 }
0x1487   : > { %10847 = vrcp.f32 %v3552_v35 }
0x148d   : > { %v10844_v11 = vpop.eup %10843 }
0x148e   : > { %v3573_v17 = vmul.f32 %v10844_v11, %v12327_v53  ;;  %v10846_v0 = vpop.eup %10845 }
0x148f   : > { %v3575_v62 = vmul.f32 %v10846_v0, %v12301_v28 }
0x1490   : > { %v3581_v48 = vpack.c.bf16 %v3574_v10, %v3573_v17 }
0x1491   : > { %v10848_v43 = vpop.eup %10847 }
0x1492   : > { %v3576_v29 = vmul.f32 %v10848_v43, %v12331_v45  ;;  %10114 = vmatprep.mubr.msk.bf16.mxu0 %vm1418_vm3, %v3581_v48 }
0x1494   : > { %v3582_v38 = vpack.c.bf16 %v3576_v29, %v3575_v62 }
0x1496   : > { %10115 = vmatmul.mubr.msk.bf16.vlgmr.msra.gmra.mrb[68].mxu0 %vm1418_vm3, %v3582_v38 }
0x1497   : > { %10123 = vmatpush3.bf16.xpose.msra.mxu0 %v12374_v22 }
0x14aa   : > { %v3564_v53 = vpop.xlane.xlu1 %3563 }
0x14ab   : > { %10849 = vrcp.f32 %v3564_v53 }
0x14ac   : > { %10851 = vrcp.f32 %v3555_v60 }
0x14ad   : > { %10853 = vrcp.f32 %v3561_v8 }
0x14ae   : > { %v3558_v12 = vpop.xlane.xlu1 %3557 }
0x14af   : > { %10855 = vrcp.f32 %v3558_v12 }
0x14b2   : > { %v12377_v28 = vpop.permute.xlu1 %3680 }
0x14b3   : > { %10339 = vmatprep.subr.msk.bf16.mxu0 %vm1136_vm2, %v12377_v28  ;;  %v12383_v45 = vsel %vm1136_vm2, %v12377_v28, 0 }
0x14b4   : > { %10125 = vmatpush3.bf16.xpose.msra.mxu0 %v12383_v45 }
0x14b5   : > { %v10850_v13 = vpop.eup %10849 }
0x14b6   : > { %v10852_v32 = vpop.eup %10851  ;;  %v3580_v51 = vmul.f32 %v10850_v13, %v12341_v37  ;;  %v3677_v57 = vpop.permute.xlu1 %3676 }
0x14b7   : > { %v10854_v58 = vpop.eup %10853  ;;  %v3577_v26 = vmul.f32 %v10852_v32, %v12323_v4 }
0x14b8   : > { %v3579_v33 = vmul.f32 %v10854_v58, %v12318_v55 }
0x14b9   : > { %v10856_v6 = vpop.eup %10855 }
0x14ba   : > { %v3578_v16 = vmul.f32 %v10856_v6, %v12345_v56  ;;  %v3584_v50 = vpack.c.bf16 %v3580_v51, %v3579_v33 }
0x14bc   : > { %v3583_v5 = vpack.c.bf16 %v3578_v16, %v3577_v26 }
0x14be   : > { %10118 = vmatprep.mubr.msk.bf16.mxu0 %vm1418_vm3, %v3583_v5 }
0x14bf   : > { %10119 = vmatmul.mubr.msk.bf16.gmra.mrb[72].mxu0 %vm1418_vm3, %v3584_v50 }
0x14c0   : > { %10126 = vmatprep.mubr.msk.bf16.mxu0 %vm1136_vm2, %v3675_v14 }
0x14c7   : > { %10127 = vmatmul.mubr.msk.bf16.vlgmr.msra.gmra.mrb[76].mxu0 %vm1136_vm2, %v3677_v57 }
0x1531   : > { %v12394_v40 = vpop.f32.mrb[64].mxu0 }
0x1532   : > { %v12396_v37 = vpop.f32.mrb[65].mxu0 }
0x1533   : > { %v12398_v4 = vpop.f32.mrb[66].mxu0 }
0x1534   : > { %v12400_v56 = vpop.f32.mrb[67].mxu0 }
0x1569   : > { %v12402_v55 = vpop.f32.mrb[68].mxu0 }
0x156a   : > { %v12404_v46 = vpop.f32.mrb[69].mxu0 }
0x156b   : > { %v12406_v39 = vpop.f32.mrb[70].mxu0 }
0x156c   : > { %v12408_v27 = vpop.f32.mrb[71].mxu0 }
0x1592   : > { %v12410_v54 = vpop.f32.mrb[72].mxu0 }
0x1593   : > { %v12412_v52 = vpop.f32.mrb[73].mxu0 }
0x1594   : > { %v12414_v21 = vpop.f32.mrb[74].mxu0 }
0x1595   : > { %v12416_v63 = vpop.f32.mrb[75].mxu0 }
0x159a   : > { %v10128_v49 = vpop.f32.mrb[76].mxu0 }
0x159b   : > { %v3728_v19 = vpop.f32.mrb[77].mxu0  ;;  %v3745_v35 = vmul.f32 0.25, %v10128_v49 }
0x159c   : > { %v3743_v8 = vmul.f32 0.25, %v3728_v19  ;;  %v10129_v60 = vpop.f32.mrb[78].mxu0 }
0x159d   : > { %v3731_v41 = vpop.f32.mrb[79].mxu0  ;;  %v3746_v10 = vmul.f32 0.25, %v10129_v60  ;;  %v3753_v0 = vsel %vm16645_vm1, %v3745_v35, -inf }
0x159e   : > { %v3744_v7 = vmul.f32 0.25, %v3731_v41  ;;  %v3747_v11 = vsel %vm16645_vm1, %v3743_v8, -inf }
0x159f   : > { %3748 = vmax.xlane.f32.xlu0 %v3747_v11  ;;  %v3756_v48 = vsel %vm16645_vm1, %v3746_v10, -inf }
0x15a0   : > { %v3750_v17 = vsel %vm16645_vm1, %v3744_v7, -inf }
0x15a1   : > { %3751 = vmax.xlane.f32.xlu1 %v3750_v17 }
0x15a3   : > { %3754 = vmax.xlane.f32.xlu0 %v3753_v0 }
0x15a7   : > { %3757 = vmax.xlane.f32.xlu0 %v3756_v48 }
0x162c   : > { %v3749_v43 = vpop.xlane.xlu0 %3748 }
0x162d   : > { %v3759_v62 = vsub.f32 %v3743_v8, %v3749_v43 }
0x162e   : > { %v3752_v29 = vpop.xlane.xlu1 %3751 }
0x162f   : > { %v3763_v12 = vmul.f32 1.442695, %v3759_v62  ;;  %v3760_v13 = vsub.f32 %v3744_v7, %v3752_v29 }
0x1630   : > { %v3755_v38 = vpop.xlane.xlu0 %3754 }
0x1631   : > { %v3761_v53 = vsub.f32 %v3745_v35, %v3755_v38  ;;  %v3765_v51 = vmul.f32 1.442695, %v3760_v13 }
0x1633   : > { %v3767_v32 = vmul.f32 1.442695, %v3761_v53 }
0x1634   : > { %v3758_v58 = vpop.xlane.xlu0 %3757 }
0x1635   : > { %10857 = vpow2.f32 %v3767_v32  ;;  %v3762_v6 = vsub.f32 %v3746_v10, %v3758_v58 }
0x1636   : > { %10859 = vpow2.f32 %v3763_v12 }
0x1637   : > { %v3769_v26 = vmul.f32 1.442695, %v3762_v6 }
0x1639   : > { %10861 = vpow2.f32 %v3769_v26 }
0x163a   : > { %10863 = vpow2.f32 %v3765_v51 }
0x163f   : > { %v10858_v16 = vpop.eup %10857 }
0x1640   : > { %v3777_v33 = vsel %vm16645_vm1, %v10858_v16, 0.0  ;;  %v10860_v5 = vpop.eup %10859 }
0x1641   : > { %3778 = vadd.xlane.f32.xlu0 %v3777_v33  ;;  %v3771_v14 = vsel %vm16645_vm1, %v10860_v5, 0.0 }
0x1643   : > { %v10862_v50 = vpop.eup %10861 }
0x1644   : > { %v3780_v57 = vsel %vm16645_vm1, %v10862_v50, 0.0  ;;  %v10864_v49 = vpop.eup %10863 }
0x1645   : > { %3772 = vadd.xlane.f32.xlu0 %v3771_v14  ;;  %3781 = vadd.xlane.f32.xlu1 %v3780_v57  ;;  %v3774_v19 = vsel %vm16645_vm1, %v10864_v49, 0.0 }
0x1649   : > { %3775 = vadd.xlane.f32.xlu1 %v3774_v19 }
0x165a   : > { %3795 = vrot.lane.b32.xlu1 %v12178_v31, %s17026_s29 }
0x165b   : > { %3793 = vrot.lane.b32.xlu0 %v12180_v18, %s17026_s29 }
0x165e   : > { %3862 = vrot.lane.b32.xlu1 %v12190_v30, %s17024_s27 }
0x165f   : > { %3866 = vrot.lane.b32.xlu0 %v12200_v61, %s17024_s27 }
0x1662   : > { %3864 = vrot.lane.b32.xlu1 %v12188_v34, %s17024_s27 }
0x1663   : > { %3854 = vrot.lane.b32.xlu0 %v12190_v30, %s17025_s4 }
0x1666   : > { %3868 = vrot.lane.b32.xlu1 %v12198_v47, %s17024_s27  ;;  %s17435_s27 = smov 64  }
0x1667   : > { %3858 = vrot.lane.b32.xlu0 %v12200_v61, %s17025_s4 }
0x166a   : > { %3856 = vrot.lane.b32.xlu1 %v12188_v34, %s17025_s4 }
0x166e   : > { %3860 = vrot.lane.b32.xlu1 %v12198_v47, %s17025_s4 }
0x16ce   : > { %v3779_v31 = vpop.xlane.xlu0 %3778 }
0x16d2   : > { %v3773_v18 = vpop.xlane.xlu0 %3772  ;;  %v3782_v8 = vpop.xlane.xlu1 %3781 }
0x16d3   : > { %10865 = vrcp.f32 %v3782_v8 }
0x16d4   : > { %10867 = vrcp.f32 %v3773_v18 }
0x16d5   : > { %10869 = vrcp.f32 %v3779_v31 }
0x16d6   : > { %v3794_v60 = vpop.permute.xlu0 %3793  ;;  %v3776_v41 = vpop.xlane.xlu1 %3775 }
0x16d7   : > { %10871 = vrcp.f32 %v3776_v41  ;;  %10130 = vmatprep.subr.bf16.mxu0 %v3794_v60  ;;  %10158 = vmatprep.subr.bf16.mxu1 %v3794_v60 }
0x16d8   : > { %10131 = vmatpush3.bf16.msra.mxu0 %v3794_v60  ;;  %10159 = vmatpush3.bf16.msra.mxu1 %v3794_v60 }
0x16da   : > { %v3796_v35 = vpop.permute.xlu1 %3795  ;;  %v3867_v48 = vpop.permute.xlu0 %3866 }
0x16db   : > { %10132 = vmatprep.subr.bf16.mxu0 %v3796_v35  ;;  %10160 = vmatprep.subr.bf16.mxu1 %v3796_v35 }
0x16dc   : > { %10133 = vmatpush3.bf16.msra.mxu0 %v3796_v35  ;;  %10161 = vmatpush3.bf16.msra.mxu1 %v3796_v35 }
0x16dd   : > { %10340 = vmatprep.subr.msk.bf16.mxu0 %vm1136_vm2, %v12362_v2  ;;  %v10866_v7 = vpop.eup %10865 }
0x16de   : > { %v10868_v11 = vpop.eup %10867  ;;  %v3790_v0 = vmul.f32 %v10866_v7, %v10862_v50  ;;  %v3855_v12 = vpop.permute.xlu0 %3854 }
0x16df   : > { %v10870_v17 = vpop.eup %10869  ;;  %v3787_v43 = vmul.f32 %v10868_v11, %v10860_v5  ;;  %v3863_v2 = vpop.permute.xlu1 %3862 }
0x16e0   : > { %v3789_v29 = vmul.f32 %v10870_v17, %v10858_v16  ;;  %v3883_v13 = vsel %vm1136_vm2, %v3863_v2, 0 }
0x16e1   : > { %v10872_v10 = vpop.eup %10871 }
0x16e2   : > { %v3788_v62 = vmul.f32 %v10872_v10, %v10864_v49  ;;  %v3792_v53 = vpack.c.bf16 %v3790_v0, %v3789_v29  ;;  %v3859_v51 = vpop.permute.xlu0 %3858 }
0x16e3   : > { %v3865_v32 = vpop.permute.xlu1 %3864 }
0x16e4   : > { %v3791_v38 = vpack.c.bf16 %v3788_v62, %v3787_v43  ;;  %v3886_v58 = vsel %vm1136_vm2, %v3865_v32, 0 }
0x16e6   : > { %10134 = vmatprep.mubr.msk.bf16.mxu0 %vm16645_vm1, %v3791_v38 }
0x16e7   : > { %10135 = vmatmul.mubr.msk.bf16.vlgmr.msra.gmra.mrb[80].mxu0 %vm16645_vm1, %v3792_v53  ;;  %v3869_v6 = vpop.permute.xlu1 %3868 }
0x16e8   : > { %10139 = vmatpush3.bf16.xpose.msra.mxu0 %v12374_v22  ;;  %10150 = vmatprep.mubr.msk.bf16.mxu0 %vm1136_vm2, %v3855_v12  ;;  %v3889_v22 = vsel %vm1136_vm2, %v3867_v48, 0 }
0x16e9   : > { %10341 = vmatprep.subr.msk.bf16.mxu0 %vm1136_vm2, %v12377_v28  ;;  %v3892_v28 = vsel %vm1136_vm2, %v3869_v6, 0 }
0x16f0   : > { %10141 = vmatpush3.bf16.xpose.msra.mxu0 %v12383_v45  ;;  %v3857_v45 = vpop.permute.xlu1 %3856 }
0x16f1   : > { %10342 = vmatprep.subr.msk.bf16.mxu0 %vm1136_vm2, %v3863_v2 }
0x16f4   : > { %v3861_v26 = vpop.permute.xlu1 %3860 }
0x16f8   : > { %10143 = vmatpush3.bf16.xpose.msra.mxu0 %v3883_v13 }
0x16f9   : > { %10343 = vmatprep.subr.msk.bf16.mxu0 %vm1136_vm2, %v3865_v32 }
0x1700   : > { %10145 = vmatpush3.bf16.xpose.msra.mxu0 %v3886_v58 }
0x1701   : > { %10344 = vmatprep.subr.msk.bf16.mxu0 %vm1136_vm2, %v3867_v48 }
0x1708   : > { %10147 = vmatpush3.bf16.xpose.msra.mxu0 %v3889_v22 }
0x1709   : > { %10345 = vmatprep.subr.msk.bf16.mxu0 %vm1136_vm2, %v3869_v6 }
0x1710   : > { %10149 = vmatpush3.bf16.xpose.msra.mxu0 %v3892_v28 }
0x1717   : > { %10151 = vmatmul.mubr.msk.bf16.vlgmr.msra.gmra.mrb[84].mxu0 %vm1136_vm2, %v3857_v45 }
0x1718   : > { %10154 = vmatprep.mubr.msk.bf16.mxu0 %vm1136_vm2, %v3859_v51 }
0x171f   : > { %10155 = vmatmul.mubr.msk.bf16.gmra.mrb[88].mxu0 %vm1136_vm2, %v3861_v26 }
0x17ba   : > { %v12466_v16 = vpop.f32.mrb[80].mxu0 }
0x17bb   : > { %v12468_v33 = vpop.f32.mrb[81].mxu0 }
0x17bc   : > { %v12470_v5 = vpop.f32.mrb[82].mxu0 }
0x17bd   : > { %v10400_v50 = vpack.i.bf16 %v12470_v5, %v12466_v16  ;;  %v12474_v14 = vpop.f32.mrb[83].mxu0 }
0x17be   : > { %v10395_v57 = vpack.i.bf16 %v12474_v14, %v12468_v33 }
0x17ea   : > { %v10152_v49 = vpop.f32.mrb[84].mxu0 }
0x17eb   : > { %v3928_v19 = vpop.f32.mrb[85].mxu0  ;;  %v3961_v60 = vmul.f32 0.25, %v10152_v49 }
0x17ec   : > { %v3959_v31 = vmul.f32 0.25, %v3928_v19  ;;  %v10153_v18 = vpop.f32.mrb[86].mxu0 }
0x17ed   : > { %v3931_v8 = vpop.f32.mrb[87].mxu0  ;;  %v3962_v11 = vmul.f32 0.25, %v10153_v18  ;;  %v3973_v10 = vsel %vm1418_vm3, %v3961_v60, -inf }
0x17ee   : > { %v3960_v41 = vmul.f32 0.25, %v3931_v8  ;;  %v3967_v35 = vsel %vm1418_vm3, %v3959_v31, -inf }
0x17ef   : > { %3968 = vmax.xlane.f32.xlu0 %v3967_v35  ;;  %v3976_v38 = vsel %vm1418_vm3, %v3962_v11, -inf }
0x17f0   : > { %v3970_v7 = vsel %vm1418_vm3, %v3960_v41, -inf }
0x17f1   : > { %3971 = vmax.xlane.f32.xlu1 %v3970_v7 }
0x17f2   : > { %v10156_v17 = vpop.f32.mrb[88].mxu0 }
0x17f3   : > { %3974 = vmax.xlane.f32.xlu0 %v3973_v10  ;;  %v3944_v0 = vpop.f32.mrb[89].mxu0  ;;  %v3965_v2 = vmul.f32 0.25, %v10156_v17 }
0x17f4   : > { %v10157_v48 = vpop.f32.mrb[90].mxu0  ;;  %v3963_v62 = vmul.f32 0.25, %v3944_v0 }
0x17f5   : > { %v3947_v43 = vpop.f32.mrb[91].mxu0  ;;  %v3966_v53 = vmul.f32 0.25, %v10157_v48  ;;  %v3985_v58 = vsel %vm1418_vm3, %v3965_v2, -inf }
0x17f6   : > { %v12481_v29 = vmul.f32 0.25, %v3947_v43  ;;  %v3979_v13 = vsel %vm1418_vm3, %v3963_v62, -inf }
0x17f7   : > { %3977 = vmax.xlane.f32.xlu0 %v3976_v38  ;;  %v3988_v32 = vsel %vm1418_vm3, %v3966_v53, -inf }
0x17f8   : > { %v3982_v12 = vsel %vm1418_vm3, %v12481_v29, -inf }
0x17f9   : > { %3983 = vmax.xlane.f32.xlu1 %v3982_v12 }
0x17fb   : > { %3980 = vmax.xlane.f32.xlu0 %v3979_v13 }
0x17fd   : > { %3989 = vmax.xlane.f32.xlu1 %v3988_v32 }
0x17ff   : > { %3986 = vmax.xlane.f32.xlu0 %v3985_v58 }
0x187c   : > { %v3969_v22 = vpop.xlane.xlu0 %3968 }
0x187d   : > { %v3991_v6 = vsub.f32 %v3959_v31, %v3969_v22 }
0x187e   : > { %v3972_v28 = vpop.xlane.xlu1 %3971 }
0x187f   : > { %v3999_v26 = vmul.f32 1.442695, %v3991_v6  ;;  %v3992_v49 = vsub.f32 %v3960_v41, %v3972_v28 }
0x1880   : > { %v3975_v45 = vpop.xlane.xlu0 %3974 }
0x1881   : > { %v3993_v51 = vsub.f32 %v3961_v60, %v3975_v45  ;;  %v4001_v35 = vmul.f32 1.442695, %v3992_v49 }
0x1883   : > { %v4003_v19 = vmul.f32 1.442695, %v3993_v51 }
0x1884   : > { %v3978_v18 = vpop.xlane.xlu0 %3977 }
0x1885   : > { %10873 = vpow2.f32 %v4003_v19  ;;  %v3994_v8 = vsub.f32 %v3962_v11, %v3978_v18 }
0x1886   : > { %10875 = vpow2.f32 %v3999_v26  ;;  %v3984_v28 = vpop.xlane.xlu1 %3983 }
0x1887   : > { %v4005_v7 = vmul.f32 1.442695, %v3994_v8  ;;  %v3996_v26 = vsub.f32 %v12481_v29, %v3984_v28 }
0x1888   : > { %v3981_v17 = vpop.xlane.xlu0 %3980 }
0x1889   : > { %10877 = vpow2.f32 %v4005_v7  ;;  %v3995_v10 = vsub.f32 %v3963_v62, %v3981_v17  ;;  %v4009_v19 = vmul.f32 1.442695, %v3996_v26 }
0x188a   : > { %10879 = vpow2.f32 %v4001_v35  ;;  %v3990_v45 = vpop.xlane.xlu1 %3989 }
0x188b   : > { %v4007_v31 = vmul.f32 1.442695, %v3995_v10  ;;  %v3998_v51 = vsub.f32 %v3966_v53, %v3990_v45  ;;  %v10462_v45 = vld [vmem:[%s16619_s8 + $0x18] sm:$0xff]  }
0x188c   : > { %v3987_v0 = vpop.xlane.xlu0 %3986 }
0x188d   : > { %v3997_v48 = vsub.f32 %v3965_v2, %v3987_v0  ;;  %v4013_v49 = vmul.f32 1.442695, %v3998_v51 }
0x188f   : > { %v12489_v43 = vpop.eup %10873  ;;  %v4011_v38 = vmul.f32 1.442695, %v3997_v48 }
0x1890   : > { %v4021_v60 = vsel %vm1418_vm3, %v12489_v43, 0.0  ;;  %v10876_v41 = vpop.eup %10875 }
0x1891   : > { %10881 = vpow2.f32 %v4011_v38  ;;  %4022 = vadd.xlane.f32.xlu0 %v4021_v60  ;;  %v4015_v12 = vsel %vm1418_vm3, %v10876_v41, 0.0 }
0x1892   : > { %10883 = vpow2.f32 %v4007_v31 }
0x1893   : > { %v12493_v11 = vpop.eup %10877  ;;  %10885 = vpow2.f32 %v4013_v49 }
0x1894   : > { %v4024_v62 = vsel %vm1418_vm3, %v12493_v11, 0.0  ;;  %v10880_v13 = vpop.eup %10879  ;;  %10887 = vpow2.f32 %v4009_v19 }
0x1895   : > { %4016 = vadd.xlane.f32.xlu0 %v4015_v12  ;;  %4025 = vadd.xlane.f32.xlu1 %v4024_v62  ;;  %v4018_v2 = vsel %vm1418_vm3, %v10880_v13, 0.0 }
0x1899   : > { %4019 = vadd.xlane.f32.xlu1 %v4018_v2 }
0x189b   : > { %v12499_v32 = vpop.eup %10881 }
0x189c   : > { %v4033_v58 = vsel %vm1418_vm3, %v12499_v32, 0.0  ;;  %v12503_v22 = vpop.eup %10883 }
0x189d   : > { %4034 = vadd.xlane.f32.xlu0 %v4033_v58  ;;  %v4027_v6 = vsel %vm1418_vm3, %v12503_v22, 0.0 }
0x18a1   : > { %4028 = vadd.xlane.f32.xlu0 %v4027_v6 }
0x18aa   : > { %4061 = vrot.lane.b32.xlu1 %v12188_v34, %s17026_s29  ;;  %v12518_v34 = vpop.eup %10885 }
0x18ab   : > { %v12522_v18 = vpop.eup %10887 }
0x18ae   : > { %4063 = vrot.lane.b32.xlu1 %v12200_v61, %s17026_s29  ;;  %v4036_v61 = vsel %vm1418_vm3, %v12518_v34, 0.0 }
0x18b7   : > { %4059 = vrot.lane.b32.xlu0 %v12190_v30, %s17026_s29  ;;  %v4030_v30 = vsel %vm1418_vm3, %v12522_v18, 0.0 }
0x18bb   : > { %10396 = vrot.lane.b32.xlu0 %v10395_v57, %s17027_s24 }
0x18d2   : > { %4037 = vadd.xlane.f32.xlu1 %v4036_v61 }
0x18d6   : > { %4031 = vadd.xlane.f32.xlu1 %v4030_v30 }
0x18e7   : > { %4065 = vrot.lane.b32.xlu1 %v12198_v47, %s17026_s29  ;;  %s10971_s29 = smov 32  }
0x18eb   : > { %10401 = vrot.lane.b32.xlu1 %v10400_v50, %s17027_s24 }
0x191e   : > { %v4023_v33 = vpop.xlane.xlu0 %4022 }
0x1922   : > { %v4017_v14 = vpop.xlane.xlu0 %4016  ;;  %v4026_v57 = vpop.xlane.xlu1 %4025 }
0x1923   : > { %10889 = vrcp.f32 %v4017_v14 }
0x1926   : > { %v4020_v29 = vpop.xlane.xlu1 %4019 }
0x1927   : > { %10891 = vrcp.f32 %v4020_v29 }
0x1928   : > { %10893 = vrcp.f32 %v4026_v57 }
0x1929   : > { %10895 = vrcp.f32 %v4023_v33 }
0x192a   : > { %v4035_v53 = vpop.xlane.xlu0 %4034  ;;  %v4062_v17 = vpop.permute.xlu1 %4061 }
0x192d   : > { %v10890_v35 = vpop.eup %10889 }
0x192e   : > { %v4029_v8 = vpop.xlane.xlu0 %4028  ;;  %v4047_v0 = vmul.f32 %v10890_v35, %v10876_v41  ;;  %v4064_v31 = vpop.permute.xlu1 %4063 }
0x1931   : > { %v10892_v7 = vpop.eup %10891 }
0x1932   : > { %v4060_v10 = vpop.permute.xlu0 %4059  ;;  %v4048_v48 = vmul.f32 %v10892_v7, %v10880_v13  ;;  %v10894_v62 = vpop.eup %10893 }
0x1933   : > { %10162 = vmatprep.subr.bf16.mxu1 %v4060_v10  ;;  %v10896_v2 = vpop.eup %10895  ;;  %v4050_v58 = vmul.f32 %v10894_v62, %v12493_v11 }
0x1934   : > { %10163 = vmatpush3.bf16.msra.mxu1 %v4060_v10  ;;  %v4055_v47 = vpack.c.bf16 %v4048_v48, %v4047_v0  ;;  %v4049_v6 = vmul.f32 %v10896_v2, %v12489_v43 }
0x1935   : > { %10164 = vmatprep.subr.bf16.mxu1 %v4062_v17 }
0x1936   : > { %v10397_v16 = vpop.permute.xlu0 %10396  ;;  %10170 = vmatprep.mubr.msk.bf16.mxu1 %vm1418_vm3, %v4055_v47  ;;  %v4056_v28 = vpack.c.bf16 %v4050_v58, %v4049_v6 }
0x1937   : > { %v10399_v5 = vunpack.i.h.bf16 %v10397_v16  ;;  %v10398_v50 = vunpack.i.l.bf16 %v10397_v16 }
0x1938   : > { %10165 = vmatpush3.bf16.msra.mxu1 %v4062_v17 }
0x1939   : > { %v4197_v38 = vsel %vm1136_vm2, %v12400_v56, %v10399_v5  ;;  %v4196_v60 = vsel %vm1136_vm2, %v12396_v37, %v10398_v50  ;;  %10166 = vmatprep.subr.bf16.mxu1 %v4064_v31  ;;  %v10461_v56 = vld [vmem:[%s16619_s8 + $0x10] sm:$0xff]  }
0x193a   : > { %v4208_v41 = vpack.c.bf16 %v4197_v38, %v4196_v60  ;;  %v12565_v60 = vld [vmem:[%s16620_s9 + $0x1] ss:$0 sm:$0xff] }
0x193c   : > { %10167 = vmatpush3.bf16.msra.mxu1 %v4064_v31 }
0x195f   : > { %v4038_v12 = vpop.xlane.xlu1 %4037 }
0x1960   : > { %10897 = vrcp.f32 %v4038_v12 }
0x1961   : > { %10899 = vrcp.f32 %v4029_v8 }
0x1962   : > { %10901 = vrcp.f32 %v4035_v53 }
0x1963   : > { %v4032_v13 = vpop.xlane.xlu1 %4031 }
0x1964   : > { %10903 = vrcp.f32 %v4032_v13 }
0x1967   : > { %v4066_v37 = vpop.permute.xlu1 %4065 }
0x1968   : > { %10168 = vmatprep.subr.bf16.mxu1 %v4066_v37 }
0x1969   : > { %10169 = vmatpush3.bf16.msra.mxu1 %v4066_v37 }
0x196a   : > { %10178 = vmatprep.subr.bf16.mxu1 %v10461_v56  ;;  %v10898_v51 = vpop.eup %10897 }
0x196b   : > { %v10402_v26 = vpop.permute.xlu1 %10401  ;;  %v10900_v49 = vpop.eup %10899  ;;  %v4054_v14 = vmul.f32 %v10898_v51, %v12518_v34 }
0x196c   : > { %v10404_v19 = vunpack.i.h.bf16 %v10402_v26  ;;  %v10403_v11 = vunpack.i.l.bf16 %v10402_v26  ;;  %10171 = vmatmul.mubr.msk.bf16.vlgmr.msra.gmra.mrb[68].mxu1 %vm1418_vm3, %v4056_v28  ;;  %v10902_v61 = vpop.eup %10901  ;;  %v4051_v29 = vmul.f32 %v10900_v49, %v12503_v22 }
0x196d   : > { %10179 = vmatpush3.bf16.msra.mxu1 %v10461_v56  ;;  %v4053_v8 = vmul.f32 %v10902_v61, %v12499_v32 }
0x196e   : > { %v10904_v30 = vpop.eup %10903  ;;  %v4199_v43 = vsel %vm1136_vm2, %v12398_v4, %v10404_v19  ;;  %v4198_v33 = vsel %vm1136_vm2, %v12394_v40, %v10403_v11  ;;  %10180 = vmatprep.subr.bf16.mxu1 %v10462_v45 }
0x196f   : > { %v4209_v57 = vpack.c.bf16 %v4199_v43, %v4198_v33  ;;  %v4052_v53 = vmul.f32 %v10904_v30, %v12522_v18  ;;  %v4058_v7 = vpack.c.bf16 %v4054_v14, %v4053_v8 }
0x1971   : > { %v4057_v35 = vpack.c.bf16 %v4052_v53, %v4051_v29  ;;  %10181 = vmatpush3.bf16.msra.mxu1 %v10462_v45 }
0x1973   : > { %10174 = vmatprep.mubr.msk.bf16.mxu1 %vm1418_vm3, %v4057_v35 }
0x1974   : > { %10175 = vmatmul.mubr.msk.bf16.gmra.mrb[72].mxu1 %vm1418_vm3, %v4058_v7 }
0x1975   : > { %10182 = vmatprep.mubr.msk.bf16.mxu1 %vm16645_vm1, %v4208_v41 }
0x197c   : > { %10183 = vmatmul.mubr.msk.bf16.vlgmr.msra.gmra.mrb[76].mxu1 %vm16645_vm1, %v4209_v57 }
0x1a3f   : > { %v10172_v40 = vpop.f32.mrb[68].mxu1 }
0x1a40   : > { %v4117_v4 = vpop.f32.mrb[69].mxu1 }
0x1a41   : > { %v10173_v34 = vpop.f32.mrb[70].mxu1 }
0x1a42   : > { %v10410_v17 = vpack.i.bf16 %v10173_v34, %v10172_v40  ;;  %v4120_v22 = vpop.f32.mrb[71].mxu1 }
0x1a43   : > { %v10405_v10 = vpack.i.bf16 %v4120_v22, %v4117_v4 }
0x1a44   : > { %10411 = vrot.lane.b32.xlu1 %v10410_v17, %s17027_s24 }
0x1a45   : > { %10406 = vrot.lane.b32.xlu0 %v10405_v10, %s17027_s24 }
0x1a47   : > { %v10176_v32 = vpop.f32.mrb[72].mxu1 }
0x1a48   : > { %v4133_v18 = vpop.f32.mrb[73].mxu1 }
0x1a49   : > { %v10177_v0 = vpop.f32.mrb[74].mxu1 }
0x1a4a   : > { %v10420_v48 = vpack.i.bf16 %v10177_v0, %v10176_v32  ;;  %v4136_v47 = vpop.f32.mrb[75].mxu1 }
0x1a4b   : > { %v10415_v16 = vpack.i.bf16 %v4136_v47, %v4133_v18 }
0x1a4c   : > { %10421 = vrot.lane.b32.xlu1 %v10420_v48, %s17027_s24 }
0x1a4d   : > { %10416 = vrot.lane.b32.xlu0 %v10415_v16, %s17027_s24 }
0x1a4f   : > { %v10184_v5 = vpop.f32.mrb[76].mxu1 }
0x1a50   : > { %v4291_v50 = vpop.f32.mrb[77].mxu1  ;;  %v4300_v12 = vadd.f32 %v10184_v5, %v12565_v60 }
0x1a51   : > { %v10185_v31 = vpop.f32.mrb[78].mxu1  ;;  %v4292_v41 = vadd.f32 %v12565_v60, %v4291_v50 }
0x1a52   : > { %v4294_v38 = vpop.f32.mrb[79].mxu1  ;;  %v12574_v2 = vadd.f32 %v4300_v12, %v11989_v3  ;;  %v4303_v58 = vadd.f32 %v10185_v31, %v12565_v60 }
0x1a53   : > { %v12570_v62 = vadd.f32 %v4292_v41, %v11986_v24  ;;  %v4295_v13 = vadd.f32 %v12565_v60, %v4294_v38 }
0x1a54   : > { %v12583_v6 = vadd.f32 %v4303_v58, %v11997_v59  ;;  %v4360_v28 = vsel %vm16645_vm1, %v12574_v2, 0.0 }
0x1a55   : > { %v12578_v56 = vadd.f32 %v4295_v13, %v11992_v1  ;;  %v4354_v37 = vsel %vm16645_vm1, %v12570_v62, 0.0 }
0x1a56   : > { %v4363_v3 = vsel %vm16645_vm1, %v12583_v6, 0.0 }
0x1a57   : > { %v4357_v24 = vsel %vm16645_vm1, %v12578_v56, 0.0 }
0x1a6c   : > { %4355 = vadd.xlane.f32.xlu0 %v4354_v37 }
0x1a70   : > { %4358 = vadd.xlane.f32.xlu1 %v4357_v24  ;;  %4361 = vadd.xlane.f32.xlu0 %v4360_v28 }
0x1a74   : > { %4364 = vadd.xlane.f32.xlu0 %v4363_v3 }
0x1ab6   : > { %v10412_v1 = vpop.permute.xlu1 %10411 }
0x1ab7   : > { %v10414_v45 = vunpack.i.h.bf16 %v10412_v1  ;;  %v10413_v51 = vunpack.i.l.bf16 %v10412_v1  ;;  %v10407_v26 = vpop.permute.xlu0 %10406 }
0x1ab8   : > { %v10409_v49 = vunpack.i.h.bf16 %v10407_v26  ;;  %v10408_v19 = vunpack.i.l.bf16 %v10407_v26 }
0x1ab9   : > { %v4203_v59 = vsel %vm1136_vm2, %v12406_v39, %v10414_v45  ;;  %v4202_v11 = vsel %vm1136_vm2, %v12402_v55, %v10413_v51 }
0x1aba   : > { %v4201_v61 = vsel %vm1136_vm2, %v12408_v27, %v10409_v49  ;;  %v4200_v30 = vsel %vm1136_vm2, %v12404_v46, %v10408_v19  ;;  %v4211_v43 = vpack.c.bf16 %v4203_v59, %v4202_v11 }
0x1abb   : > { %v4210_v33 = vpack.c.bf16 %v4201_v61, %v4200_v30 }
0x1abd   : > { %10186 = vmatprep.mubr.msk.bf16.mxu1 %vm16645_vm1, %v4210_v33 }
0x1abe   : > { %v10422_v14 = vpop.permute.xlu1 %10421  ;;  %10187 = vmatmul.mubr.msk.bf16.gmra.mrb[80].mxu1 %vm16645_vm1, %v4211_v43 }
0x1abf   : > { %v10424_v57 = vunpack.i.h.bf16 %v10422_v14  ;;  %v10423_v29 = vunpack.i.l.bf16 %v10422_v14  ;;  %v10417_v53 = vpop.permute.xlu0 %10416  ;;  %v10463_v14 = vld [vmem:[%s16623_s12 + $0x10] sm:$0xff]  }
0x1ac0   : > { %v10419_v39 = vunpack.i.h.bf16 %v10417_v53  ;;  %v10418_v8 = vunpack.i.l.bf16 %v10417_v53  ;;  %10194 = vmatprep.subr.bf16.mxu0 %v10463_v14 }
0x1ac1   : > { %v4207_v55 = vsel %vm1136_vm2, %v12414_v21, %v10424_v57  ;;  %v4206_v27 = vsel %vm1136_vm2, %v12410_v54, %v10423_v29  ;;  %v10464_v57 = vld [vmem:[%s16623_s12 + $0x18] sm:$0xff]   ;;  %10195 = vmatpush3.bf16.msra.mxu0 %v10463_v14 }
0x1ac2   : > { %v4213_v35 = vpack.c.bf16 %v4207_v55, %v4206_v27  ;;  %v4205_v46 = vsel %vm1136_vm2, %v12416_v63, %v10419_v39  ;;  %v4204_v7 = vsel %vm1136_vm2, %v12412_v52, %v10418_v8  ;;  %10196 = vmatprep.subr.bf16.mxu0 %v10464_v57 }
0x1ac3   : > { %v4212_v40 = vpack.c.bf16 %v4205_v46, %v4204_v7 }
0x1ac5   : > { %10190 = vmatprep.mubr.msk.bf16.mxu1 %vm16645_vm1, %v4212_v40  ;;  %10197 = vmatpush3.bf16.msra.mxu0 %v10464_v57 }
0x1ac6   : > { %10191 = vmatmul.mubr.msk.bf16.gmra.mrb[84].mxu1 %vm16645_vm1, %v4213_v35 }
0x1af9   : > { %v4356_v34 = vpop.xlane.xlu0 %4355 }
0x1afa   : > { %v4390_v31 = vmul.f32 0.03125, %v4356_v34 }
0x1afc   : > { %v12643_v3 = vsub.f32 %v12570_v62, %v4390_v31 }
0x1afd   : > { %v4362_v47 = vpop.xlane.xlu0 %4361  ;;  %v4359_v16 = vpop.xlane.xlu1 %4358 }
0x1afe   : > { %v4391_v13 = vmul.f32 0.03125, %v4359_v16  ;;  %v4392_v45 = vmul.f32 0.03125, %v4362_v47  ;;  %v4414_v59 = vmul.f32 %v12643_v3, %v12643_v3 }
0x1b01   : > { %v4365_v1 = vpop.xlane.xlu0 %4364 }
0x1b02   : > { %v4393_v49 = vmul.f32 0.03125, %v4365_v1 }
0x1b91   : > { %v10188_v4 = vpop.f32.mrb[80].mxu1 }
0x1b92   : > { %v4307_v17 = vpop.f32.mrb[81].mxu1  ;;  %v4316_v21 = vadd.f32 %v10188_v4, %v12565_v60 }
0x1b93   : > { %v4308_v22 = vadd.f32 %v12565_v60, %v4307_v17  ;;  %v10189_v54 = vpop.f32.mrb[82].mxu1 }
0x1b94   : > { %v4310_v10 = vpop.f32.mrb[83].mxu1  ;;  %v4319_v63 = vadd.f32 %v10189_v54, %v12565_v60  ;;  %v12619_v18 = vadd.f32 %v4316_v21, %v12009_v25 }
0x1b95   : > { %v12614_v32 = vadd.f32 %v4308_v22, %v12006_v9  ;;  %v4311_v52 = vadd.f32 %v12565_v60, %v4310_v10 }
0x1b96   : > { %v12627_v5 = vadd.f32 %v4319_v63, %v12017_v36  ;;  %v4372_v12 = vsel %vm16645_vm1, %v12619_v18, 0.0 }
0x1b97   : > { %v12622_v0 = vadd.f32 %v4311_v52, %v12012_v20  ;;  %v4366_v48 = vsel %vm16645_vm1, %v12614_v32, 0.0 }
0x1b98   : > { %4367 = vadd.xlane.f32.xlu0 %v4366_v48  ;;  %v4375_v28 = vsel %vm16645_vm1, %v12627_v5, 0.0 }
0x1b99   : > { %v10192_v9 = vpop.f32.mrb[84].mxu1  ;;  %v4369_v50 = vsel %vm16645_vm1, %v12622_v0, 0.0 }
0x1b9a   : > { %v4323_v38 = vpop.f32.mrb[85].mxu1  ;;  %4370 = vadd.xlane.f32.xlu1 %v4369_v50  ;;  %v4332_v25 = vadd.f32 %v10192_v9, %v12565_v60 }
0x1b9b   : > { %v4324_v20 = vadd.f32 %v12565_v60, %v4323_v38  ;;  %v10193_v41 = vpop.f32.mrb[86].mxu1 }
0x1b9c   : > { %v4326_v58 = vpop.f32.mrb[87].mxu1  ;;  %4373 = vadd.xlane.f32.xlu0 %v4372_v12  ;;  %v4335_v37 = vadd.f32 %v10193_v41, %v12565_v60  ;;  %v12646_v51 = vadd.f32 %v4332_v25, %v12029_v23  ;;  %v12662_v23 = vsub.f32 %v12574_v2, %v4392_v45  ;;  %v4426_v2 = vsel %vm16645_vm1, %v4414_v59, 0.0 }
0x1b9d   : > { %v12636_v36 = vadd.f32 %v4324_v20, %v12024_v44  ;;  %v4327_v24 = vadd.f32 %v12565_v60, %v4326_v58  ;;  %v12654_v60 = vsub.f32 %v12578_v56, %v4391_v13  ;;  %v12669_v56 = vsub.f32 %v12583_v6, %v4393_v49 }
0x1b9e   : > { %4376 = vadd.xlane.f32.xlu1 %v4375_v28  ;;  %v12657_v62 = vadd.f32 %v4335_v37, %v12037_v15  ;;  %v4416_v61 = vmul.f32 %v12662_v23, %v12662_v23 }
0x1b9f   : > { %v12649_v26 = vadd.f32 %v4327_v24, %v12032_v42  ;;  %v4378_v44 = vsel %vm16645_vm1, %v12636_v36, 0.0  ;;  %v4384_v42 = vsel %vm16645_vm1, %v12646_v51, 0.0  ;;  %v4415_v11 = vmul.f32 %v12654_v60, %v12654_v60 }
0x1ba0   : > { %4379 = vadd.xlane.f32.xlu0 %v4378_v44  ;;  %v4387_v15 = vsel %vm16645_vm1, %v12657_v62, 0.0  ;;  %v4417_v43 = vmul.f32 %v12669_v56, %v12669_v56  ;;  %v4432_v6 = vsel %vm16645_vm1, %v4416_v61, 0.0 }
0x1ba1   : > { %v4381_v19 = vsel %vm16645_vm1, %v12649_v26, 0.0  ;;  %v4429_v30 = vsel %vm16645_vm1, %v4415_v11, 0.0 }
0x1ba2   : > { %4382 = vadd.xlane.f32.xlu1 %v4381_v19  ;;  %v4435_v33 = vsel %vm16645_vm1, %v4417_v43, 0.0 }
0x1ba4   : > { %4385 = vadd.xlane.f32.xlu0 %v4384_v42 }
0x1ba6   : > { %4388 = vadd.xlane.f32.xlu1 %v4387_v15 }
0x1ba8   : > { %4427 = vadd.xlane.f32.xlu0 %v4426_v2 }
0x1baa   : > { %4430 = vadd.xlane.f32.xlu1 %v4429_v30 }
0x1bac   : > { %4433 = vadd.xlane.f32.xlu0 %v4432_v6 }
0x1bae   : > { %4436 = vadd.xlane.f32.xlu1 %v4435_v33 }
0x1c25   : > { %v4368_v29 = vpop.xlane.xlu0 %4367 }
0x1c26   : > { %v4394_v53 = vmul.f32 0.03125, %v4368_v29 }
0x1c27   : > { %v4371_v39 = vpop.xlane.xlu1 %4370 }
0x1c28   : > { %v12690_v8 = vsub.f32 %v12614_v32, %v4394_v53  ;;  %v4395_v55 = vmul.f32 0.03125, %v4371_v39  ;;  %v12740_v53 = vld [vmem:[%s16621_s10 + $0x1] ss:$0 sm:$0xff] }
0x1c29   : > { %v4374_v27 = vpop.xlane.xlu0 %4373 }
0x1c2a   : > { %v12693_v35 = vsub.f32 %v12622_v0, %v4395_v55  ;;  %v4396_v46 = vmul.f32 0.03125, %v4374_v27  ;;  %v4418_v7 = vmul.f32 %v12690_v8, %v12690_v8 }
0x1c2b   : > { %v4377_v40 = vpop.xlane.xlu1 %4376 }
0x1c2c   : > { %v12698_v4 = vsub.f32 %v12619_v18, %v4396_v46  ;;  %v4397_v34 = vmul.f32 0.03125, %v4377_v40  ;;  %v4438_v17 = vsel %vm16645_vm1, %v4418_v7, 0.0  ;;  %v4419_v21 = vmul.f32 %v12693_v35, %v12693_v35  ;;  %v12748_v40 = vld [vmem:[%s16622_s11 + $0x1] ss:$0 sm:$0xff] }
0x1c2d   : > { %4439 = vadd.xlane.f32.xlu0 %v4438_v17  ;;  %v4380_v22 = vpop.xlane.xlu0 %4379 }
0x1c2e   : > { %v12704_v54 = vsub.f32 %v12627_v5, %v4397_v34  ;;  %v4398_v10 = vmul.f32 0.03125, %v4380_v22  ;;  %v4441_v63 = vsel %vm16645_vm1, %v4419_v21, 0.0  ;;  %v4420_v52 = vmul.f32 %v12698_v4, %v12698_v4 }
0x1c2f   : > { %v4383_v48 = vpop.xlane.xlu1 %4382  ;;  %4442 = vadd.xlane.f32.xlu1 %v4441_v63 }
0x1c30   : > { %v12710_v47 = vsub.f32 %v12636_v36, %v4398_v10  ;;  %v4399_v16 = vmul.f32 0.03125, %v4383_v48  ;;  %v4444_v9 = vsel %vm16645_vm1, %v4420_v52, 0.0  ;;  %v4421_v50 = vmul.f32 %v12704_v54, %v12704_v54 }
0x1c31   : > { %4445 = vadd.xlane.f32.xlu0 %v4444_v9  ;;  %v4386_v31 = vpop.xlane.xlu0 %4385  ;;  %v10466_v9 = vld [vmem:[%s16625_s14 + $0x48] sm:$0xff]  }
0x1c32   : > { %v12716_v38 = vsub.f32 %v12649_v26, %v4399_v16  ;;  %v4400_v25 = vmul.f32 0.03125, %v4386_v31  ;;  %v4447_v20 = vsel %vm16645_vm1, %v4421_v50, 0.0  ;;  %v4422_v41 = vmul.f32 %v12710_v47, %v12710_v47  ;;  %v10467_v50 = vld [vmem:[%s16625_s14 + $0x50] sm:$0xff]   ;;  %v10468_v31 = vld [vmem:[%s16625_s14 + $0x58] sm:$0xff]  }
0x1c33   : > { %v4389_v12 = vpop.xlane.xlu1 %4388  ;;  %4448 = vadd.xlane.f32.xlu1 %v4447_v20 }
0x1c34   : > { %v12722_v13 = vsub.f32 %v12646_v51, %v4400_v25  ;;  %v4401_v58 = vmul.f32 0.03125, %v4389_v12  ;;  %v4450_v37 = vsel %vm16645_vm1, %v4422_v41, 0.0  ;;  %v4423_v24 = vmul.f32 %v12716_v38, %v12716_v38  ;;  %v10469_v25 = vld [vmem:[%s16625_s14 + $0x60] sm:$0xff]   ;;  %v10470_v12 = vld [vmem:[%s16625_s14 + $0x68] sm:$0xff]  }
0x1c35   : > { %4451 = vadd.xlane.f32.xlu0 %v4450_v37  ;;  %v4428_v28 = vpop.xlane.xlu0 %4427 }
0x1c36   : > { %v12728_v1 = vsub.f32 %v12657_v62, %v4401_v58  ;;  %v4462_v45 = vmul.f32 0.03125, %v4428_v28  ;;  %v4453_v44 = vsel %vm16645_vm1, %v4423_v24, 0.0  ;;  %v4424_v49 = vmul.f32 %v12722_v13, %v12722_v13 }
0x1c37   : > { %v4431_v19 = vpop.xlane.xlu1 %4430  ;;  %4454 = vadd.xlane.f32.xlu1 %v4453_v44 }
0x1c38   : > { %v4474_v42 = vadd.f32 1e-05, %v4462_v45  ;;  %v4463_v59 = vmul.f32 0.03125, %v4431_v19  ;;  %v4456_v15 = vsel %vm16645_vm1, %v4424_v49, 0.0  ;;  %v4425_v11 = vmul.f32 %v12728_v1, %v12728_v1  ;;  %v10471_v49 = vld [vmem:[%s16625_s14 + $0x70] sm:$0xff]  }
0x1c39   : > { %4457 = vadd.xlane.f32.xlu0 %v4456_v15  ;;  %v4434_v2 = vpop.xlane.xlu0 %4433 }
0x1c3a   : > { %10905 = vrsqrt.f32 %v4474_v42  ;;  %v4475_v61 = vadd.f32 1e-05, %v4463_v59  ;;  %v4464_v30 = vmul.f32 0.03125, %v4434_v2  ;;  %v4459_v43 = vsel %vm16645_vm1, %v4425_v11, 0.0 }
0x1c3b   : > { %4460 = vadd.xlane.f32.xlu1 %v4459_v43  ;;  %v4437_v6 = vpop.xlane.xlu1 %4436 }
0x1c3c   : > { %10907 = vrsqrt.f32 %v4475_v61  ;;  %v4476_v33 = vadd.f32 1e-05, %v4464_v30  ;;  %v4465_v14 = vmul.f32 0.03125, %v4437_v6  ;;  %v10472_v61 = vld [vmem:[%s16625_s14 + $0x78] sm:$0xff]  }
0x1c3e   : > { %10909 = vrsqrt.f32 %v4476_v33  ;;  %v4477_v57 = vadd.f32 1e-05, %v4465_v14 }
0x1c40   : > { %10911 = vrsqrt.f32 %v4477_v57 }
0x1c44   : > { %v10906_v29 = vpop.eup %10905 }
0x1c45   : > { %v4498_v39 = vmul.f32 %v10906_v29, %v12643_v3 }
0x1c46   : > { %v10908_v55 = vpop.eup %10907 }
0x1c47   : > { %v4499_v27 = vmul.f32 %v10908_v55, %v12654_v60  ;;  %v4516_v46 = vmul.f32 %v12740_v53, %v4498_v39 }
0x1c48   : > { %v10910_v7 = vpop.eup %10909 }
0x1c49   : > { %v4500_v34 = vmul.f32 %v10910_v7, %v12662_v23  ;;  %v4517_v17 = vmul.f32 %v12740_v53, %v4499_v27  ;;  %v4534_v10 = vadd.f32 %v12748_v40, %v4516_v46 }
0x1c4a   : > { %v10912_v21 = vpop.eup %10911 }
0x1c4b   : > { %v4518_v22 = vmul.f32 %v12740_v53, %v4500_v34  ;;  %v4501_v3 = vmul.f32 %v10912_v21, %v12669_v56  ;;  %v4535_v60 = vadd.f32 %v12748_v40, %v4517_v17  ;;  %v10465_v56 = vld [vmem:[%s16625_s14 + $0x40] sm:$0xff]  }
0x1c4c   : > { %10210 = vmatprep.subr.bf16.mxu1 %v10465_v56 }
0x1c4d   : > { %v4519_v63 = vmul.f32 %v12740_v53, %v4501_v3  ;;  %v4546_v52 = vpack.c.bf16 %v4535_v60, %v4534_v10  ;;  %v4536_v48 = vadd.f32 %v12748_v40, %v4518_v22  ;;  %10211 = vmatpush3.bf16.msra.mxu1 %v10465_v56 }
0x1c4e   : > { %10212 = vmatprep.subr.bf16.mxu1 %v10466_v9 }
0x1c4f   : > { %v4537_v16 = vadd.f32 %v12748_v40, %v4519_v63  ;;  %10198 = vmatprep.mubr.msk.bf16.mxu0 %vm16645_vm1, %v4546_v52 }
0x1c51   : > { %v4547_v23 = vpack.c.bf16 %v4537_v16, %v4536_v48  ;;  %10213 = vmatpush3.bf16.msra.mxu1 %v10466_v9 }
0x1c52   : > { %10214 = vmatprep.subr.bf16.mxu1 %v10467_v50 }
0x1c53   : > { %10199 = vmatmul.mubr.msk.bf16.vlgmr.msra.gmra.mrb[92].mxu0 %vm16645_vm1, %v4547_v23 }
0x1c55   : > { %10215 = vmatpush3.bf16.msra.mxu1 %v10467_v50 }
0x1c56   : > { %10216 = vmatprep.subr.bf16.mxu1 %v10468_v31 }
0x1c59   : > { %10217 = vmatpush3.bf16.msra.mxu1 %v10468_v31 }
0x1c5a   : > { %10218 = vmatprep.subr.bf16.mxu1 %v10469_v25 }
0x1c5d   : > { %10219 = vmatpush3.bf16.msra.mxu1 %v10469_v25 }
0x1c5e   : > { %10220 = vmatprep.subr.bf16.mxu1 %v10470_v12 }
0x1c61   : > { %10221 = vmatpush3.bf16.msra.mxu1 %v10470_v12 }
0x1c62   : > { %10222 = vmatprep.subr.bf16.mxu1 %v10471_v49 }
0x1c65   : > { %10223 = vmatpush3.bf16.msra.mxu1 %v10471_v49 }
0x1c66   : > { %10224 = vmatprep.subr.bf16.mxu1 %v10472_v61 }
0x1c69   : > { %10225 = vmatpush3.bf16.msra.mxu1 %v10472_v61 }
0x1cba   : > { %v4440_v20 = vpop.xlane.xlu0 %4439 }
0x1cbb   : > { %v4466_v41 = vmul.f32 0.03125, %v4440_v20 }
0x1cbc   : > { %v4443_v58 = vpop.xlane.xlu1 %4442 }
0x1cbd   : > { %v4478_v37 = vadd.f32 1e-05, %v4466_v41  ;;  %v4467_v24 = vmul.f32 0.03125, %v4443_v58 }
0x1cbe   : > { %v4446_v28 = vpop.xlane.xlu0 %4445 }
0x1cbf   : > { %10913 = vrsqrt.f32 %v4478_v37  ;;  %v4479_v45 = vadd.f32 1e-05, %v4467_v24  ;;  %v4468_v44 = vmul.f32 0.03125, %v4446_v28 }
0x1cc0   : > { %v4449_v19 = vpop.xlane.xlu1 %4448 }
0x1cc1   : > { %10915 = vrsqrt.f32 %v4479_v45  ;;  %v4480_v42 = vadd.f32 1e-05, %v4468_v44  ;;  %v4469_v59 = vmul.f32 0.03125, %v4449_v19 }
0x1cc2   : > { %v4452_v15 = vpop.xlane.xlu0 %4451 }
0x1cc3   : > { %10917 = vrsqrt.f32 %v4480_v42  ;;  %v4481_v11 = vadd.f32 1e-05, %v4469_v59  ;;  %v4470_v2 = vmul.f32 0.03125, %v4452_v15 }
0x1cc4   : > { %v4455_v30 = vpop.xlane.xlu1 %4454 }
0x1cc5   : > { %10919 = vrsqrt.f32 %v4481_v11  ;;  %v4482_v43 = vadd.f32 1e-05, %v4470_v2  ;;  %v4471_v6 = vmul.f32 0.03125, %v4455_v30 }
0x1cc6   : > { %v4458_v33 = vpop.xlane.xlu0 %4457 }
0x1cc7   : > { %10921 = vrsqrt.f32 %v4482_v43  ;;  %v4483_v14 = vadd.f32 1e-05, %v4471_v6  ;;  %v4472_v57 = vmul.f32 0.03125, %v4458_v33 }
0x1cc8   : > { %v4461_v29 = vpop.xlane.xlu1 %4460 }
0x1cc9   : > { %v10914_v39 = vpop.eup %10913  ;;  %10923 = vrsqrt.f32 %v4483_v14  ;;  %v4484_v55 = vadd.f32 1e-05, %v4472_v57  ;;  %v4473_v27 = vmul.f32 0.03125, %v4461_v29 }
0x1cca   : > { %v4502_v46 = vmul.f32 %v10914_v39, %v12690_v8 }
0x1ccb   : > { %v10916_v7 = vpop.eup %10915  ;;  %10925 = vrsqrt.f32 %v4484_v55  ;;  %v4485_v34 = vadd.f32 1e-05, %v4473_v27 }
0x1ccc   : > { %v4503_v17 = vmul.f32 %v10916_v7, %v12693_v35  ;;  %v4520_v21 = vmul.f32 %v12740_v53, %v4502_v46 }
0x1ccd   : > { %v10918_v22 = vpop.eup %10917  ;;  %10927 = vrsqrt.f32 %v4485_v34 }
0x1cce   : > { %v4504_v3 = vmul.f32 %v10918_v22, %v12698_v4  ;;  %v4521_v10 = vmul.f32 %v12740_v53, %v4503_v17  ;;  %v4538_v52 = vadd.f32 %v12748_v40, %v4520_v21 }
0x1ccf   : > { %v10920_v60 = vpop.eup %10919 }
0x1cd0   : > { %v4505_v63 = vmul.f32 %v10920_v60, %v12704_v54  ;;  %v4539_v8 = vadd.f32 %v12748_v40, %v4521_v10  ;;  %v4522_v48 = vmul.f32 %v12740_v53, %v4504_v3 }
0x1cd1   : > { %v10922_v16 = vpop.eup %10921 }
0x1cd2   : > { %v4506_v35 = vmul.f32 %v10922_v16, %v12710_v47  ;;  %v4548_v23 = vpack.c.bf16 %v4539_v8, %v4538_v52  ;;  %v4523_v56 = vmul.f32 %v12740_v53, %v4505_v63  ;;  %v4540_v50 = vadd.f32 %v12748_v40, %v4522_v48 }
0x1cd3   : > { %v10924_v9 = vpop.eup %10923 }
0x1cd4   : > { %v4507_v4 = vmul.f32 %v10924_v9, %v12716_v38  ;;  %10202 = vmatprep.mubr.msk.bf16.mxu0 %vm16645_vm1, %v4548_v23  ;;  %v4541_v54 = vadd.f32 %v12748_v40, %v4523_v56  ;;  %v4524_v31 = vmul.f32 %v12740_v53, %v4506_v35 }
0x1cd5   : > { %v10926_v25 = vpop.eup %10925 }
0x1cd6   : > { %v4508_v20 = vmul.f32 %v10926_v25, %v12722_v13  ;;  %v4549_v41 = vpack.c.bf16 %v4541_v54, %v4540_v50  ;;  %v4525_v47 = vmul.f32 %v12740_v53, %v4507_v4  ;;  %v4542_v38 = vadd.f32 %v12748_v40, %v4524_v31 }
0x1cd7   : > { %v10928_v12 = vpop.eup %10927 }
0x1cd8   : > { %v4509_v58 = vmul.f32 %v10928_v12, %v12728_v1  ;;  %10203 = vmatmul.mubr.msk.bf16.gmra.mrb[96].mxu0 %vm16645_vm1, %v4549_v41  ;;  %v4543_v37 = vadd.f32 %v12748_v40, %v4525_v47  ;;  %v4526_v24 = vmul.f32 %v12740_v53, %v4508_v20  ;;  %v12816_v1 = vld [vmem:[%s16624_s13 + $0x1] ss:$0 sm:$0xff] }
0x1cda   : > { %v4550_v28 = vpack.c.bf16 %v4543_v37, %v4542_v38  ;;  %v4527_v45 = vmul.f32 %v12740_v53, %v4509_v58  ;;  %v4544_v13 = vadd.f32 %v12748_v40, %v4526_v24 }
0x1cdc   : > { %10206 = vmatprep.mubr.msk.bf16.mxu0 %vm16645_vm1, %v4550_v28  ;;  %v4545_v44 = vadd.f32 %v12748_v40, %v4527_v45 }
0x1cde   : > { %v4551_v49 = vpack.c.bf16 %v4545_v44, %v4544_v13 }
0x1ce0   : > { %10207 = vmatmul.mubr.msk.bf16.gmra.mrb[100].mxu0 %vm16645_vm1, %v4551_v49 }
0x1d26   : > { %v10200_v19 = vpop.f32.mrb[92].mxu0 }
0x1d27   : > { %v4638_v42 = vadd.f32 %v10200_v19, %v12816_v1  ;;  %v4629_v59 = vpop.f32.mrb[93].mxu0 }
0x1d28   : > { %v4630_v53 = vadd.f32 %v12816_v1, %v4629_v59  ;;  %v10201_v15 = vpop.f32.mrb[94].mxu0 }
0x1d29   : > { %v4690_v11 = vmul.f32 0.044715, %v4638_v42  ;;  %v4641_v2 = vadd.f32 %v10201_v15, %v12816_v1  ;;  %v4632_v61 = vpop.f32.mrb[95].mxu0  ;;  %v4678_v23 = vmul.f32 0.5, %v4638_v42 }
0x1d2a   : > { %v4688_v40 = vmul.f32 0.044715, %v4630_v53  ;;  %v4633_v30 = vadd.f32 %v12816_v1, %v4632_v61  ;;  %v4676_v4 = vmul.f32 0.5, %v4630_v53 }
0x1d2b   : > { %v4702_v43 = vmul.f32 %v4690_v11, %v4638_v42  ;;  %v4691_v6 = vmul.f32 0.044715, %v4641_v2  ;;  %v4679_v56 = vmul.f32 0.5, %v4641_v2 }
0x1d2c   : > { %v4700_v33 = vmul.f32 %v4688_v40, %v4630_v53  ;;  %v4689_v14 = vmul.f32 0.044715, %v4633_v30  ;;  %v4677_v50 = vmul.f32 0.5, %v4633_v30 }
0x1d2d   : > { %v4714_v57 = vmul.f32 %v4702_v43, %v4638_v42  ;;  %v4703_v29 = vmul.f32 %v4691_v6, %v4641_v2 }
0x1d2e   : > { %v4712_v39 = vmul.f32 %v4700_v33, %v4630_v53  ;;  %v4701_v55 = vmul.f32 %v4689_v14, %v4633_v30 }
0x1d2f   : > { %v4726_v27 = vadd.f32 %v4714_v57, %v4638_v42  ;;  %v4715_v46 = vmul.f32 %v4703_v29, %v4641_v2 }
0x1d30   : > { %v4713_v7 = vmul.f32 %v4701_v55, %v4633_v30  ;;  %v4724_v34 = vadd.f32 %v4712_v39, %v4630_v53 }
0x1d31   : > { %v4738_v17 = vmul.f32 0.7978846, %v4726_v27  ;;  %v4727_v21 = vadd.f32 %v4715_v46, %v4641_v2 }
0x1d32   : > { %v4725_v22 = vadd.f32 %v4713_v7, %v4633_v30  ;;  %v4736_v3 = vmul.f32 0.7978846, %v4724_v34 }
0x1d33   : > { %10929 = vtanh.f32 %v4738_v17  ;;  %v4739_v10 = vmul.f32 0.7978846, %v4727_v21 }
0x1d34   : > { %v4737_v60 = vmul.f32 0.7978846, %v4725_v22  ;;  %10931 = vtanh.f32 %v4736_v3 }
0x1d35   : > { %10933 = vtanh.f32 %v4739_v10 }
0x1d36   : > { %10935 = vtanh.f32 %v4737_v60 }
0x1d3d   : > { %v10930_v63 = vpop.eup %10929 }
0x1d3e   : > { %v10932_v52 = vpop.eup %10931  ;;  %v4762_v8 = vadd.f32 1.0, %v10930_v63 }
0x1d3f   : > { %v10934_v48 = vpop.eup %10933  ;;  %v4760_v16 = vadd.f32 1.0, %v10932_v52 }
0x1d40   : > { %v10936_v35 = vpop.eup %10935  ;;  %v4763_v9 = vadd.f32 1.0, %v10934_v48  ;;  %v4774_v31 = vmul.f32 %v4762_v8, %v4678_v23 }
0x1d41   : > { %v4761_v54 = vadd.f32 1.0, %v10936_v35  ;;  %v4772_v20 = vmul.f32 %v4760_v16, %v4676_v4 }
0x1d42   : > { %v4775_v25 = vmul.f32 %v4763_v9, %v4679_v56 }
0x1d43   : > { %v4773_v41 = vmul.f32 %v4761_v54, %v4677_v50 }
0x1d44   : > { %v4785_v47 = vpack.c.bf16 %v4775_v25, %v4774_v31 }
0x1d45   : > { %v4784_v12 = vpack.c.bf16 %v4773_v41, %v4772_v20 }
0x1d47   : > { %10226 = vmatprep.mubr.bf16.mxu1 %v4784_v12 }
0x1d48   : > { %10227 = vmatmul.mubr.bf16.vlgmr.msra.gmra.mrb[88].mxu1 %v4785_v47 }
0x1dab   : > { %v10204_v58 = vpop.f32.mrb[96].mxu0 }
0x1dac   : > { %v12823_v38 = vadd.f32 %v10204_v58, %v12816_v1  ;;  %v4645_v37 = vpop.f32.mrb[97].mxu0 }
0x1dad   : > { %v12826_v24 = vadd.f32 %v12816_v1, %v4645_v37  ;;  %v10205_v28 = vpop.f32.mrb[98].mxu0 }
0x1dae   : > { %v4694_v45 = vmul.f32 0.044715, %v12823_v38  ;;  %v12830_v13 = vadd.f32 %v10205_v28, %v12816_v1  ;;  %v4648_v44 = vpop.f32.mrb[99].mxu0 }
0x1daf   : > { %v4692_v49 = vmul.f32 0.044715, %v12826_v24  ;;  %v12834_v19 = vadd.f32 %v12816_v1, %v4648_v44 }
0x1db0   : > { %v4706_v42 = vmul.f32 %v4694_v45, %v12823_v38  ;;  %v4695_v59 = vmul.f32 0.044715, %v12830_v13 }
0x1db1   : > { %v4704_v53 = vmul.f32 %v4692_v49, %v12826_v24  ;;  %v4693_v15 = vmul.f32 0.044715, %v12834_v19 }
0x1db2   : > { %v4718_v11 = vmul.f32 %v4706_v42, %v12823_v38  ;;  %v4707_v2 = vmul.f32 %v4695_v59, %v12830_v13  ;;  %v4682_v42 = vmul.f32 0.5, %v12823_v38  ;;  %v4683_v59 = vmul.f32 0.5, %v12830_v13 }
0x1db3   : > { %v4716_v61 = vmul.f32 %v4704_v53, %v12826_v24  ;;  %v4705_v40 = vmul.f32 %v4693_v15, %v12834_v19  ;;  %v10208_v30 = vpop.f32.mrb[100].mxu0  ;;  %v4680_v15 = vmul.f32 0.5, %v12826_v24 }
0x1db4   : > { %v4719_v43 = vmul.f32 %v4707_v2, %v12830_v13  ;;  %v12846_v6 = vadd.f32 %v10208_v30, %v12816_v1  ;;  %v4661_v33 = vpop.f32.mrb[101].mxu0  ;;  %v4730_v14 = vadd.f32 %v4718_v11, %v12823_v38  ;;  %v4681_v11 = vmul.f32 0.5, %v12834_v19 }
0x1db5   : > { %v4717_v57 = vmul.f32 %v4705_v40, %v12834_v19  ;;  %v12851_v29 = vadd.f32 %v12816_v1, %v4661_v33  ;;  %v10209_v39 = vpop.f32.mrb[102].mxu0  ;;  %v4728_v55 = vadd.f32 %v4716_v61, %v12826_v24 }
0x1db6   : > { %v4698_v27 = vmul.f32 0.044715, %v12846_v6  ;;  %v4673_v46 = vadd.f32 %v10209_v39, %v12816_v1  ;;  %v4664_v7 = vpop.f32.mrb[103].mxu0  ;;  %v4731_v34 = vadd.f32 %v4719_v43, %v12830_v13  ;;  %v4742_v17 = vmul.f32 0.7978846, %v4730_v14 }
0x1db7   : > { %v4696_v21 = vmul.f32 0.044715, %v12851_v29  ;;  %v4665_v22 = vadd.f32 %v12816_v1, %v4664_v7  ;;  %v4729_v3 = vadd.f32 %v4717_v57, %v12834_v19  ;;  %v4740_v10 = vmul.f32 0.7978846, %v4728_v55 }
0x1db8   : > { %v4710_v60 = vmul.f32 %v4698_v27, %v12846_v6  ;;  %v4699_v63 = vmul.f32 0.044715, %v4673_v46  ;;  %v4743_v52 = vmul.f32 0.7978846, %v4731_v34  ;;  %10937 = vtanh.f32 %v4742_v17 }
0x1db9   : > { %v4708_v8 = vmul.f32 %v4696_v21, %v12851_v29  ;;  %v4697_v48 = vmul.f32 0.044715, %v4665_v22  ;;  %v4741_v16 = vmul.f32 0.7978846, %v4729_v3  ;;  %10939 = vtanh.f32 %v4740_v10 }
0x1dba   : > { %v4722_v35 = vmul.f32 %v4710_v60, %v12846_v6  ;;  %v4711_v23 = vmul.f32 %v4699_v63, %v4673_v46  ;;  %10941 = vtanh.f32 %v4743_v52  ;;  %v4686_v13 = vmul.f32 0.5, %v12846_v6 }
0x1dbb   : > { %v4720_v56 = vmul.f32 %v4708_v8, %v12851_v29  ;;  %v4709_v1 = vmul.f32 %v4697_v48, %v4665_v22  ;;  %10943 = vtanh.f32 %v4741_v16  ;;  %v4687_v24 = vmul.f32 0.5, %v4673_v46 }
0x1dbc   : > { %v4723_v9 = vmul.f32 %v4711_v23, %v4673_v46  ;;  %v4734_v4 = vadd.f32 %v4722_v35, %v12846_v6  ;;  %v4684_v19 = vmul.f32 0.5, %v12851_v29  ;;  %v4685_v17 = vmul.f32 0.5, %v4665_v22  ;;  %v8891_v6 = vld [vmem:[%s16626_s15 + $0x1] ss:$0 sm:$0xff] }
0x1dbd   : > { %v4721_v50 = vmul.f32 %v4709_v1, %v4665_v22  ;;  %v4732_v54 = vadd.f32 %v4720_v56, %v12851_v29 }
0x1dbe   : > { %v4735_v31 = vadd.f32 %v4723_v9, %v4673_v46  ;;  %v4746_v25 = vmul.f32 0.7978846, %v4734_v4 }
0x1dbf   : > { %v4733_v20 = vadd.f32 %v4721_v50, %v4665_v22  ;;  %v4744_v41 = vmul.f32 0.7978846, %v4732_v54 }
0x1dc0   : > { %v4747_v47 = vmul.f32 0.7978846, %v4735_v31  ;;  %10945 = vtanh.f32 %v4746_v25 }
0x1dc1   : > { %v4745_v12 = vmul.f32 0.7978846, %v4733_v20  ;;  %10947 = vtanh.f32 %v4744_v41 }
0x1dc2   : > { %v10938_v58 = vpop.eup %10937  ;;  %10949 = vtanh.f32 %v4747_v47 }
0x1dc3   : > { %v10940_v37 = vpop.eup %10939  ;;  %v4766_v28 = vadd.f32 1.0, %v10938_v58  ;;  %10951 = vtanh.f32 %v4745_v12 }
0x1dc4   : > { %v10942_v45 = vpop.eup %10941  ;;  %v4764_v44 = vadd.f32 1.0, %v10940_v37 }
0x1dc5   : > { %v10944_v49 = vpop.eup %10943  ;;  %v4767_v53 = vadd.f32 1.0, %v10942_v45  ;;  %v4778_v61 = vmul.f32 %v4766_v28, %v4682_v42 }
0x1dc6   : > { %v4765_v2 = vadd.f32 1.0, %v10944_v49  ;;  %v4776_v30 = vmul.f32 %v4764_v44, %v4680_v15 }
0x1dc7   : > { %v4779_v40 = vmul.f32 %v4767_v53, %v4683_v59  ;;  %v16671_v59 = vlaneseq }
0x1dc8   : > { %v4777_v43 = vmul.f32 %v4765_v2, %v4681_v11  ;;  %v10475_v11 = vld [vmem:[%s16627_s16 + $0x48] sm:$0xff]  }
0x1dc9   : > { %v4787_v33 = vpack.c.bf16 %v4779_v40, %v4778_v61  ;;  %v10476_v2 = vld [vmem:[%s16627_s16 + $0x8] sm:$0xff]   ;;  %v10479_v61 = vld [vmem:[%s16627_s16 + $0xc0] sm:$0xff]  }
0x1dca   : > { %v10946_v14 = vpop.eup %10945  ;;  %v4786_v57 = vpack.c.bf16 %v4777_v43, %v4776_v30  ;;  %v10480_v40 = vld [vmem:[%s16627_s16 + $0x80] sm:$0xff]   ;;  %v10477_v43 = vld [vmem:[%s16627_s16 + $0x50] sm:$0xff]   ;;  %9527 = vmatprep.subr.bf16.mxu1 %v10479_v61 }
0x1dcb   : > { %v10948_v39 = vpop.eup %10947  ;;  %v4770_v55 = vadd.f32 1.0, %v10946_v14  ;;  %9528 = vmatpush3.bf16.msra.mxu1 %v10480_v40  ;;  %v10484_v14 = vld [vmem:[%s16627_s16 + $0x88] sm:$0xff]  }
0x1dcc   : > { %v10950_v27 = vpop.eup %10949  ;;  %10230 = vmatprep.mubr.bf16.mxu1 %v4786_v57  ;;  %v4768_v38 = vadd.f32 1.0, %v10948_v39  ;;  %v10478_v57 = vld [vmem:[%s16627_s16 + $0x10] sm:$0xff]  }
0x1dcd   : > { %v10952_v7 = vpop.eup %10951  ;;  %10231 = vmatmul.mubr.bf16.gmra.mrb[92].mxu1 %v4787_v33  ;;  %v4771_v34 = vadd.f32 1.0, %v10950_v27  ;;  %v4782_v3 = vmul.f32 %v4770_v55, %v4686_v13  ;;  %v10483_v33 = vld [vmem:[%s16627_s16 + $0xc8] sm:$0xff]   ;;  %v10487_v39 = vld [vmem:[%s16627_s16 + $0xd0] sm:$0xff]   ;;  %v10481_v27 = vld [vmem:[%s16627_s16 + $0x58] sm:$0xff]  }
0x1dce   : > { %v4769_v21 = vadd.f32 1.0, %v10952_v7  ;;  %v4780_v60 = vmul.f32 %v4768_v38, %v4684_v19  ;;  %9529 = vmatprep.subr.bf16.mxu1 %v10483_v33  ;;  %v10488_v38 = vld [vmem:[%s16627_s16 + $0x90] sm:$0xff]   ;;  %v10482_v7 = vld [vmem:[%s16627_s16 + $0x18] sm:$0xff]  }
0x1dcf   : > { %v4783_v10 = vmul.f32 %v4771_v34, %v4687_v24  ;;  %9530 = vmatpush3.bf16.msra.mxu1 %v10484_v14  ;;  %v10491_v13 = vld [vmem:[%s16627_s16 + $0xd8] sm:$0xff]   ;;  %v10485_v34 = vld [vmem:[%s16627_s16 + $0x60] sm:$0xff]  }
0x1dd0   : > { %v4781_v63 = vmul.f32 %v4769_v21, %v4685_v17  ;;  %9531 = vmatprep.subr.bf16.mxu1 %v10487_v39  ;;  %v10492_v17 = vld [vmem:[%s16627_s16 + $0x98] sm:$0xff]  }
0x1dd1   : > { %v4789_v52 = vpack.c.bf16 %v4783_v10, %v4782_v3  ;;  %v10486_v3 = vld [vmem:[%s16627_s16 + $0x20] sm:$0xff]  }
0x1dd2   : > { %v4788_v8 = vpack.c.bf16 %v4781_v63, %v4780_v60  ;;  %v10495_v10 = vld [vmem:[%s16627_s16 + $0xe0] sm:$0xff]   ;;  %v10489_v63 = vld [vmem:[%s16627_s16 + $0x68] sm:$0xff]  }
0x1dd3   : > { %9532 = vmatpush3.bf16.msra.mxu1 %v10488_v38 }
0x1dd4   : > { %10234 = vmatprep.mubr.bf16.mxu1 %v4788_v8  ;;  %9533 = vmatprep.subr.bf16.mxu1 %v10491_v13 }
0x1dd5   : > { %10235 = vmatmul.mubr.bf16.gmra.mrb[96].mxu1 %v4789_v52 }
0x1dd7   : > { %9534 = vmatpush3.bf16.msra.mxu1 %v10492_v17  ;;  %v17047_v17 = vmov 0 }
0x1dd8   : > { %9535 = vmatprep.subr.bf16.mxu1 %v10495_v10  ;;  %v17050_v10 = vmov 0 }
0x1e1b   : > { %v10228_v48 = vpop.f32.mrb[88].mxu1 }
0x1e1c   : > { %v4897_v16 = vpop.f32.mrb[89].mxu1  ;;  %v10490_v48 = vld [vmem:[%s16627_s16 + $0x28] sm:$0xff]  }
0x1e1d   : > { %v10229_v35 = vpop.f32.mrb[90].mxu1  ;;  %v10493_v16 = vld [vmem:[%s16627_s16 + $0x70] sm:$0xff]  }
0x1e1e   : > { %v4899_v23 = vpop.f32.mrb[91].mxu1 }
0x1e1f   : > { %v17033_v23 = vmov 0 }
0x1ea0   : > { %v10232_v46 = vpop.f32.mrb[92].mxu1 }
0x1ea1   : > { %v4909_v29 = vpop.f32.mrb[93].mxu1  ;;  %v4918_v12 = vadd.f32 %v10232_v46, %v8891_v6  ;;  %v17036_v46 = vmov 0 }
0x1ea2   : > { %v4910_v22 = vadd.f32 %v8891_v6, %v4909_v29  ;;  %v10233_v56 = vpop.f32.mrb[94].mxu1 }
0x1ea3   : > { %v4912_v1 = vpop.f32.mrb[95].mxu1  ;;  %v4921_v25 = vadd.f32 %v10233_v56, %v8891_v6  ;;  %v12894_v44 = vadd.f32 %v4918_v12, %v12619_v18  ;;  %v12908_v18 = vshrl.u32 %v16671_v59, 7  ;;  %v17136_v59 = vmov 0 }
0x1ea4   : > { %v4913_v9 = vadd.f32 %v8891_v6, %v4912_v1  ;;  %v12876_v4 = vadd.f32 %v4910_v22, %v12614_v32 }
0x1ea5   : > { %v12887_v28 = vadd.f32 %v4921_v25, %v12627_v5  ;;  %17029 = vst [vmem:[#allocation3_spill] sm:$0xff] %v12894_v44  ;;  %17032 = vst [vmem:[#allocation6_spill] sm:$0xff] %v12908_v18  ;;  %v4991_v53 = vadd.s32 16, %v12908_v18  ;;  %v4992_v19 = vadd.s32 24, %v12908_v18  ;;  %v4990_v25 = vadd.s32 8, %v12908_v18 }
0x1ea6   : > { %v12879_v50 = vadd.f32 %v4913_v9, %v12622_v0  ;;  %v4994_v9 = vadd.s32 40, %v12908_v18 }
0x1ea7   : > { %17028 = vst [vmem:[#allocation2_spill] sm:$0xff] %v12887_v28  ;;  %v4999_v15 = vcvt.s32.f32 %v4991_v53  ;;  %v5000_v52 = vcvt.s32.f32 %v4992_v19  ;;  %v4998_v12 = vcvt.s32.f32 %v4990_v25  ;;  %v17062_v25 = vmov 0 }
0x1ea8   : > { %v10425_v54 = vpack.i.bf16 %v12879_v50, %v12876_v4  ;;  %v10236_v31 = vpop.f32.mrb[96].mxu1 }
0x1ea9   : > { %v4934_v20 = vadd.f32 %v10236_v31, %v8891_v6  ;;  %v4925_v41 = vpop.f32.mrb[97].mxu1  ;;  %v5007_v30 = vmul.f32 0.125, %v4999_v15  ;;  %v5008_v35 = vmul.f32 0.125, %v5000_v52  ;;  %v4996_v31 = vadd.s32 56, %v12908_v18 }
0x1eaa   : > { %10426 = vrot.lane.b32.xlu0 %v10425_v54, %s10971_s29  ;;  %v10237_v47 = vpop.f32.mrb[98].mxu1  ;;  %v4926_v49 = vadd.f32 %v8891_v6, %v4925_v41  ;;  %v17040_v41 = vmov 0 }
0x1eab   : > { %v12884_v58 = vadd.f32 %v4934_v20, %v12646_v51  ;;  %v4937_v37 = vadd.f32 %v10237_v47, %v8891_v6  ;;  %v4928_v32 = vpop.f32.mrb[99].mxu1  ;;  %v10430_v51 = vpack.i.bf16 %v12887_v28, %v12894_v44  ;;  %v12944_v55 = vfloor.f32 %v5007_v30 }
0x1eac   : > { %v4929_v45 = vadd.f32 %v8891_v6, %v4928_v32  ;;  %v12903_v5 = vadd.f32 %v4926_v49, %v12636_v36  ;;  %v10474_v36 = vld [vmem:[%s16627_s16] sm:$0xff]   ;;  %v10494_v6 = vld [vmem:[%s16627_s16 + $0x30] sm:$0xff]   ;;  %v13006_v29 = vfloor.f32 %v5008_v35  ;;  %v5002_v20 = vcvt.s32.f32 %v4994_v9 }
0x1ead   : > { %v12890_v0 = vadd.f32 %v4937_v37, %v12657_v62  ;;  %v5023_v24 = vmul.f32 8.0, %v12944_v55  ;;  %v5271_v21 = vadd.f32 1.0, %v12944_v55  ;;  %v5004_v47 = vcvt.s32.f32 %v4996_v31 }
0x1eae   : > { %4968 = vrot.lane.b32.xlu0 %v12884_v58, %s10971_s29  ;;  %v12900_v42 = vadd.f32 %v4929_v45, %v12649_v26  ;;  %17031 = vst [vmem:[#allocation5_spill] sm:$0xff] %v12903_v5  ;;  %v10473_v26 = vld [vmem:[%s16627_s16 + $0x40] sm:$0xff]   ;;  %v5024_v22 = vmul.f32 8.0, %v13006_v29  ;;  %v5272_v1 = vadd.f32 1.0, %v13006_v29  ;;  %v17043_v37 = vmov 0 }
0x1eaf   : > { %4970 = vrot.lane.b32.xlu1 %v12890_v0, %s10971_s29  ;;  %9487 = vmatprep.subr.bf16.mxu0 %v10473_v26  ;;  %v12973_v60 = vsub.f32 %v4999_v15, %v5023_v24  ;;  %vm5279_vm4 = vcmp.ge.f32.partialorder %v5271_v21, 0.0  ;;  %vm5287_vm5 = vcmp.le.f32.partialorder %v5271_v21, 7.0  ;;  %v13035_v32 = vadd.s32 48, %v12908_v18 }
0x1eb0   : > { %17030 = vst [vmem:[#allocation4_spill] sm:$0xff] %v12900_v42  ;;  %v10435_v62 = vpack.i.bf16 %v12900_v42, %v12903_v5  ;;  %9488 = vmatpush3.bf16.msra.mxu0 %v10474_v36  ;;  %vm12988_vm7 = vmand %vm5279_vm4, %vm5287_vm5  ;;  %v13009_v56 = vsub.f32 %v5000_v52, %v5024_v22  ;;  %vm5280_vm11 = vcmp.ge.f32.partialorder %v5272_v1, 0.0  ;;  %vm5288_vm12 = vcmp.le.f32.partialorder %v5272_v1, 7.0 }
0x1eb1   : > { %9489 = vmatprep.subr.bf16.mxu0 %v10475_v11  ;;  %v12979_v8 = vadd.f32 1.0, %v12973_v60  ;;  %v17034_v23 = vsel %vm12988_vm7, 4294967295, %v17033_v23  ;;  %vm13019_vm14 = vmand %vm5280_vm11, %vm5288_vm12  ;;  %v4997_v45 = vcvt.s32.f32 %v12908_v18  ;;  %v5010_v49 = vmul.f32 0.125, %v5002_v20 }
0x1eb2   : > { %17035 = vst [vmem:[#allocation7_spill] sm:$0xff] %v17034_v23  ;;  %v13014_v54 = vadd.f32 1.0, %v13009_v56  ;;  %v17041_v41 = vsel %vm13019_vm14, 4294967295, %v17040_v41  ;;  %v5003_v53 = vcvt.s32.f32 %v13035_v32  ;;  %v5039_v24 = vadd.f32 -1.0, %v12944_v55 }
0x1eb3   : > { %10431 = vrot.lane.b32.xlu1 %v10430_v51, %s10971_s29  ;;  %vm16649_vm6 = vcmp.ge.f32.partialorder %v12979_v8, 0.0  ;;  %vm16647_vm8 = vcmp.le.f32.partialorder %v12979_v8, 7.0  ;;  %17042 = vst [vmem:[#allocation10_spill] sm:$0xff] %v17041_v41  ;;  %v5012_v51 = vmul.f32 0.125, %v5004_v47  ;;  %v5005_v15 = vmul.f32 0.125, %v4997_v45 }
0x1eb4   : > { %9490 = vmatpush3.bf16.msra.mxu0 %v10476_v2  ;;  %vm5335_vm9 = vmand %vm12988_vm7, %vm16649_vm6  ;;  %17039 = vst [vmem:[#allocation9_spill] sm:$0xff] %v13014_v54  ;;  %vm16648_vm13 = vcmp.ge.f32.partialorder %v13014_v54, 0.0  ;;  %vm16646_vm15 = vcmp.le.f32.partialorder %v13014_v54, 7.0  ;;  %v13039_v26 = vfloor.f32 %v5010_v49  ;;  %v13044_v2 = vadd.s32 32, %v12908_v18 }
0x1eb5   : > { %9491 = vmatprep.subr.bf16.mxu0 %v10477_v43  ;;  %vm13002_vm10 = vmand %vm5335_vm9, %vm16647_vm8  ;;  %v13041_v36 = vfloor.f32 %v5012_v51  ;;  %v5011_v40 = vmul.f32 0.125, %v5003_v53  ;;  %v5013_v30 = vfloor.f32 %v5005_v15  ;;  %v5040_v19 = vadd.f32 -1.0, %v13006_v29 }
0x1eb6   : > { %v17037_v46 = vsel %vm13002_vm10, 4294967295, %v17036_v46  ;;  %vm5336_vm0 = vmand %vm13019_vm14, %vm16648_vm13  ;;  %v5274_v43 = vadd.f32 1.0, %v13039_v26  ;;  %v5026_v13 = vmul.f32 8.0, %v13039_v26  ;;  %v17053_v52 = vmov 0 }
0x1eb7   : > { %10436 = vrot.lane.b32.xlu1 %v10435_v62, %s10971_s29  ;;  %17038 = vst [vmem:[#allocation8_spill] sm:$0xff] %v17037_v46  ;;  %vm13030_vm2 = vmand %vm5336_vm0, %vm16646_vm15  ;;  %v5006_v62 = vmul.f32 0.125, %v4998_v12  ;;  %v5044_v61 = vadd.f32 -1.0, %v13041_v36  ;;  %v5028_v33 = vmul.f32 8.0, %v13041_v36  ;;  %v5037_v14 = vadd.f32 -1.0, %v5013_v30 }
0x1eb8   : > { %9492 = vmatpush3.bf16.msra.mxu0 %v10478_v57  ;;  %v17044_v37 = vsel %vm13030_vm2, 4294967295, %v17043_v37  ;;  %v13050_v38 = vfloor.f32 %v5011_v40  ;;  %vm5282_vm5 = vcmp.ge.f32.partialorder %v5274_v43, 0.0  ;;  %vm5290_vm9 = vcmp.le.f32.partialorder %v5274_v43, 7.0 }
0x1eb9   : > { %9493 = vmatprep.subr.bf16.mxu0 %v10481_v27  ;;  %17045 = vst [vmem:[#allocation11_spill] sm:$0xff] %v17044_v37  ;;  %v5014_v11 = vfloor.f32 %v5006_v62  ;;  %v5001_v27 = vcvt.s32.f32 %v13044_v2  ;;  %vm5052_vm3 = vcmp.ge.f32.partialorder %v5044_v61, 0.0  ;;  %vm5060_vm4 = vcmp.le.f32.partialorder %v5044_v61, 7.0  ;;  %vm13065_vm8 = vmand %vm5282_vm5, %vm5290_vm9 }
0x1eba   : > { %vm5045_vm11 = vcmp.ge.f32.partialorder %v5037_v14, 0.0  ;;  %vm5053_vm12 = vcmp.le.f32.partialorder %v5037_v14, 7.0  ;;  %vm13057_vm0 = vmand %vm5052_vm3, %vm5060_vm4  ;;  %v17051_v10 = vsel %vm13065_vm8, 4294967295, %v17050_v10  ;;  %vm5197_vm13 = vcmp.ge.f32.partialorder %v5013_v30, 0.0 }
0x1ebb   : > { %v5022_v57 = vmul.f32 8.0, %v5014_v11  ;;  %v5038_v39 = vadd.f32 -1.0, %v5014_v11  ;;  %v17048_v17 = vsel %vm13057_vm0, 4294967295, %v17047_v17  ;;  %17052 = vst [vmem:[#allocation14_spill] sm:$0xff] %v17051_v10  ;;  %vm5198_vm6 = vcmp.ge.f32.partialorder %v5014_v11, 0.0  ;;  %vm13071_vm3 = vmand %vm5045_vm11, %vm5053_vm12 }
0x1ebc   : > { %9494 = vmatpush3.bf16.msra.mxu0 %v10482_v7  ;;  %v5021_v7 = vmul.f32 8.0, %v5013_v30  ;;  %17049 = vst [vmem:[#allocation13_spill] sm:$0xff] %v17048_v17  ;;  %vm5205_vm2 = vcmp.le.f32.partialorder %v5013_v30, 7.0  ;;  %vm5206_vm10 = vcmp.le.f32.partialorder %v5014_v11, 7.0  ;;  %v17054_v52 = vsel %vm13071_vm3, 4294967295, %v17053_v52 }
0x1ebd   : > { %9495 = vmatprep.subr.bf16.mxu0 %v10485_v34  ;;  %v13054_v34 = vsub.f32 %v5004_v47, %v5028_v33  ;;  %v13061_v21 = vsub.f32 %v4998_v12, %v5022_v57  ;;  %vm5046_vm1 = vcmp.ge.f32.partialorder %v5038_v39, 0.0  ;;  %vm5054_vm15 = vcmp.le.f32.partialorder %v5038_v39, 7.0  ;;  %vm13085_vm8 = vmand %vm5197_vm13, %vm5205_vm2 }
0x1ebe   : > { %vm5047_vm4 = vcmp.ge.f32.partialorder %v5039_v24, 0.0  ;;  %vm5055_vm14 = vcmp.le.f32.partialorder %v5039_v24, 7.0  ;;  %vm13078_vm5 = vmand %vm5046_vm1, %vm5054_vm15  ;;  %v17056_v35 = vmov 0  ;;  %vm5048_vm9 = vcmp.ge.f32.partialorder %v5040_v19, 0.0 }
0x1ebf   : > { %17046 = vst [vmem:[#allocation12_spill] sm:$0xff] %v13054_v34  ;;  %v17057_v35 = vsel %vm13078_vm5, 4294967295, %v17056_v35  ;;  %vm5056_vm7 = vcmp.le.f32.partialorder %v5040_v19, 7.0  ;;  %v17058_v22 = vmov 0  ;;  %vm13089_vm11 = vmand %vm5198_vm6, %vm5206_vm10  ;;  %v17060_v1 = vmov 0 }
0x1ec0   : > { %9496 = vmatpush3.bf16.msra.mxu0 %v10486_v3  ;;  %v5009_v3 = vmul.f32 0.125, %v5001_v27  ;;  %v17059_v22 = vsel %vm13085_vm8, 4294967295, %v17058_v22  ;;  %v17061_v1 = vsel %vm13089_vm11, 4294967295, %v17060_v1  ;;  %v5269_v9 = vadd.f32 1.0, %v5013_v30  ;;  %vm13097_vm12 = vmand %vm5047_vm4, %vm5055_vm14 }
0x1ec1   : > { %9497 = vmatprep.subr.bf16.mxu0 %v10489_v63  ;;  %v13069_v63 = vsub.f32 %v4997_v45, %v5021_v7  ;;  %vm16657_vm15 = vcmp.ge.f32.partialorder %v13061_v21, 0.0  ;;  %v17063_v25 = vsel %vm13097_vm12, 4294967295, %v17062_v25  ;;  %vm16660_vm13 = vcmp.ge.f32.partialorder %v12973_v60, 0.0  ;;  %vm13102_vm2 = vmand %vm5048_vm9, %vm5056_vm7 }
0x1ec2   : > { %v13093_v31 = vfloor.f32 %v5009_v3  ;;  %v5270_v12 = vadd.f32 1.0, %v5014_v11  ;;  %vm17067_vm7 = vcmp.ge.f32.partialorder %v12979_v8, 0.0  ;;  %vm13126_vm9 = vmand %vm13078_vm5, %vm16657_vm15  ;;  %v17068_v49 = vmov 0 }
0x1ec3   : > { %v13109_v47 = vadd.f32 1.0, %v13069_v63  ;;  %v13116_v45 = vadd.f32 -1.0, %v13069_v63  ;;  %vm5167_vm4 = vmand %vm13097_vm12, %vm17067_vm7  ;;  %v17069_v49 = vsel %vm13126_vm9, 4294967295, %v17068_v49  ;;  %vm17072_vm10 = vcmp.ge.f32.partialorder %v13014_v54, 0.0 }
0x1ec4   : > { %9498 = vmatpush3.bf16.msra.mxu0 %v10490_v48  ;;  %v13075_v48 = vsub.f32 %v5002_v20, %v5026_v13  ;;  %v17064_v20 = vmov 0  ;;  %vm13135_vm14 = vmand %vm13097_vm12, %vm16660_vm13  ;;  %v5041_v62 = vadd.f32 -1.0, %v13093_v31  ;;  %vm17073_vm9 = vcmp.le.f32.partialorder %v12944_v55, 7.0 }
0x1ec5   : > { %9499 = vmatprep.subr.bf16.mxu0 %v10493_v16  ;;  %v5027_v16 = vmul.f32 8.0, %v13050_v38  ;;  %v17065_v20 = vsel %vm13102_vm2, 4294967295, %v17064_v20  ;;  %vm5168_vm15 = vmand %vm13102_vm2, %vm17072_vm10  ;;  %vm17074_vm13 = vcmp.ge.f32.partialorder %v12944_v55, 0.0  ;;  %v5025_v15 = vmul.f32 8.0, %v13093_v31 }
0x1ec6   : > { %17055 = vst [vmem:[#allocation15_spill] sm:$0xff] %v13075_v48  ;;  %vm13150_vm12 = vmand %vm17074_vm13, %vm17073_vm9  ;;  %v5042_v11 = vadd.f32 -1.0, %v13039_v26  ;;  %vm17078_vm6 = vcmp.le.f32.partialorder %v12979_v8, 7.0  ;;  %v17079_v61 = vmov 0  ;;  %vm17082_vm10 = vcmp.ge.f32.partialorder %v13069_v63, 0.0 }
0x1ec7   : > { %v13112_v32 = vsub.f32 %v5003_v53, %v5027_v16  ;;  %v17075_v53 = vmov 0  ;;  %vm13158_vm7 = vmand %vm5167_vm4, %vm17078_vm6  ;;  %v17083_v55 = vmov 0  ;;  %v13171_v40 = vadd.f32 1.0, %v13050_v38 }
0x1ec8   : > { %9500 = vmatpush3.bf16.msra.mxu0 %v10494_v6  ;;  %v13083_v6 = vadd.f32 -1.0, %v13061_v21  ;;  %v17076_v53 = vsel %vm13150_vm12, 4294967295, %v17075_v53  ;;  %v17080_v61 = vsel %vm13158_vm7, 4294967295, %v17079_v61  ;;  %vm13166_vm5 = vmand %vm13071_vm3, %vm17082_vm10  ;;  %vm17085_vm6 = vcmp.le.f32.partialorder %v13014_v54, 7.0 }
0x1ec9   : > { %17066 = vst [vmem:[#allocation16_spill] sm:$0xff] %v13112_v32  ;;  %17077 = vst [vmem:[#allocation17_spill] sm:$0xff] %v17076_v53  ;;  %v17084_v55 = vsel %vm13166_vm5, 4294967295, %v17083_v55  ;;  %v17086_v30 = vmov 0  ;;  %vm17089_vm7 = vcmp.ge.f32.partialorder %v13054_v34, 0.0  ;;  %v17090_v43 = vmov 0 }
0x1eca   : > { %17081 = vst [vmem:[#allocation18_spill] sm:$0xff] %v17080_v61  ;;  %vm13176_vm4 = vmand %vm5168_vm15, %vm17085_vm6  ;;  %vm17092_vm13 = vcmp.ge.f32.partialorder %v13075_v48, 0.0  ;;  %vm17093_vm9 = vnez %v17051_v10  ;;  %v17094_v33 = vmov 0  ;;  %v17097_v14 = vmov 0 }
0x1ecb   : > { %v17087_v30 = vsel %vm13176_vm4, 4294967295, %v17086_v30  ;;  %vm13184_vm10 = vmand %vm13057_vm0, %vm17089_vm7  ;;  %vm17096_vm7 = vcmp.ge.f32.partialorder %v13083_v6, 0.0  ;;  %v13209_v57 = vadd.f32 -1.0, %v13009_v56  ;;  %vm17100_vm3 = vcmp.ge.f32.partialorder %v5269_v9, 0.0 }
0x1ecc   : > { %17088 = vst [vmem:[#allocation19_spill] sm:$0xff] %v17087_v30  ;;  %v17091_v43 = vsel %vm13184_vm10, 4294967295, %v17090_v43  ;;  %vm13193_vm1 = vmand %vm17093_vm9, %vm17092_vm13  ;;  %vm17099_vm13 = vcmp.le.f32.partialorder %v5269_v9, 7.0  ;;  %v17101_v39 = vmov 0  ;;  %v13218_v7 = vadd.f32 -1.0, %v12973_v60 }
0x1ecd   : > { %v17095_v33 = vsel %vm13193_vm1, 4294967295, %v17094_v33  ;;  %vm13204_vm0 = vmand %vm13089_vm11, %vm17096_vm7  ;;  %vm17104_vm15 = vcmp.le.f32.partialorder %v13006_v29, 7.0  ;;  %vm17105_vm6 = vcmp.ge.f32.partialorder %v13006_v29, 0.0  ;;  %v17106_v13 = vmov 0 }
0x1ece   : > { %v17098_v14 = vsel %vm13204_vm0, 4294967295, %v17097_v14  ;;  %vm13213_vm9 = vmand %vm17100_vm3, %vm17099_vm13  ;;  %v5043_v24 = vadd.f32 -1.0, %v13050_v38  ;;  %vm17109_vm13 = vcmp.ge.f32.partialorder %v13116_v45, 0.0  ;;  %v17110_v19 = vmov 0 }
0x1ecf   : > { %v17102_v39 = vsel %vm13213_vm9, 4294967295, %v17101_v39  ;;  %vm13224_vm7 = vmand %vm17105_vm6, %vm17104_vm15  ;;  %vm17112_vm15 = vcmp.ge.f32.partialorder %v13109_v47, 0.0  ;;  %v17113_v29 = vmov 0  ;;  %vm17115_vm4 = vcmp.le.f32.partialorder %v5270_v12, 7.0 }
0x1ed0   : > { %17103 = vst [vmem:[#allocation20_spill] sm:$0xff] %v17102_v39  ;;  %v17107_v13 = vsel %vm13224_vm7, 4294967295, %v17106_v13  ;;  %vm13234_vm1 = vmand %vm13085_vm8, %vm17109_vm13  ;;  %vm17116_vm3 = vcmp.ge.f32.partialorder %v5270_v12, 0.0  ;;  %v17117_v3 = vmov 0  ;;  %v13255_v16 = vsub.f32 %v5001_v27, %v5025_v15 }
0x1ed1   : > { %17108 = vst [vmem:[#allocation21_spill] sm:$0xff] %v17107_v13  ;;  %v17111_v19 = vsel %vm13234_vm1, 4294967295, %v17110_v19  ;;  %vm13243_vm6 = vmand %vm13085_vm8, %vm17112_vm15  ;;  %vm5058_vm10 = vcmp.le.f32.partialorder %v5042_v11, 7.0  ;;  %v13259_v9 = vadd.f32 1.0, %v13061_v21  ;;  %vm17121_vm15 = vcmp.ge.f32.partialorder %v13069_v63, 0.0 }
0x1ed2   : > { %v17114_v29 = vsel %vm13243_vm6, 4294967295, %v17113_v29  ;;  %vm13249_vm0 = vmand %vm17116_vm3, %vm17115_vm4  ;;  %17120 = vst [vmem:[#allocation23_spill] sm:$0xff] %v13255_v16  ;;  %v17122_v12 = vmov 0  ;;  %vm5209_vm3 = vcmp.le.f32.partialorder %v13093_v31, 7.0  ;;  %vm17124_vm6 = vcmp.le.f32.partialorder %v5041_v62, 7.0 }
0x1ed3   : > { %v17118_v3 = vsel %vm13249_vm0, 4294967295, %v17117_v3  ;;  %vm13265_vm8 = vmand %vm13213_vm9, %vm17121_vm15  ;;  %vm17125_vm5 = vcmp.ge.f32.partialorder %v5041_v62, 0.0  ;;  %v17126_v2 = vmov 0  ;;  %v13279_v27 = vadd.f32 -1.0, %v13075_v48 }
0x1ed4   : > { %17119 = vst [vmem:[#allocation22_spill] sm:$0xff] %v17118_v3  ;;  %v17123_v12 = vsel %vm13265_vm8, 4294967295, %v17122_v12  ;;  %vm13274_vm1 = vmand %vm17125_vm5, %vm17124_vm6  ;;  %vm17129_vm8 = vcmp.ge.f32.partialorder %v13009_v56, 0.0  ;;  %v17130_v15 = vmov 0  ;;  %vm17132_vm6 = vcmp.ge.f32.partialorder %v13061_v21, 0.0 }
0x1ed5   : > { %v17127_v2 = vsel %vm13274_vm1, 4294967295, %v17126_v2  ;;  %vm13287_vm4 = vmand %vm13102_vm2, %vm17129_vm8  ;;  %v17133_v62 = vmov 0  ;;  %vm17135_vm15 = vcmp.ge.f32.partialorder %v5042_v11, 0.0  ;;  %v13306_v30 = vadd.f32 -1.0, %v13054_v34 }
0x1ed6   : > { %17128 = vst [vmem:[#allocation24_spill] sm:$0xff] %v17127_v2  ;;  %v17131_v15 = vsel %vm13287_vm4, 4294967295, %v17130_v15  ;;  %vm13296_vm13 = vmand %vm13249_vm0, %vm17132_vm6  ;;  %v13309_v61 = vadd.f32 -1.0, %v13255_v16  ;;  %vm17140_vm5 = vcmp.ge.f32.partialorder %v13093_v31, 0.0  ;;  %v17141_v37 = vmov 0 }
0x1ed7   : > { %v17134_v62 = vsel %vm13296_vm13, 4294967295, %v17133_v62  ;;  %vm13301_vm9 = vmand %vm17135_vm15, %vm5058_vm10  ;;  %17139 = vst [vmem:[#allocation26_spill] sm:$0xff] %v13306_v30  ;;  %v5273_v11 = vadd.f32 1.0, %v13093_v31  ;;  %vm17144_vm1 = vcmp.ge.f32.partialorder %v13218_v7, 0.0  ;;  %v17145_v46 = vmov 0 }
0x1ed8   : > { %v17137_v59 = vsel %vm13301_vm9, 4294967295, %v17136_v59  ;;  %vm13313_vm2 = vmand %vm17140_vm5, %vm5209_vm3  ;;  %vm17147_vm3 = vcmp.ge.f32.partialorder %v13209_v57, 0.0  ;;  %v17148_v10 = vmov 0  ;;  %vm17150_vm6 = vcmp.le.f32.partialorder %v13039_v26, 7.0 }
0x1ed9   : > { %17138 = vst [vmem:[#allocation25_spill] sm:$0xff] %v17137_v59  ;;  %v17142_v37 = vsel %vm13313_vm2, 4294967295, %v17141_v37  ;;  %vm13325_vm8 = vmand %vm13150_vm12, %vm17144_vm1  ;;  %vm17151_vm15 = vcmp.ge.f32.partialorder %v13039_v26, 0.0  ;;  %v17152_v31 = vmov 0  ;;  %v13348_v17 = vadd.f32 1.0, %v13112_v32 }
0x1eda   : > { %17143 = vst [vmem:[#allocation27_spill] sm:$0xff] %v17142_v37  ;;  %v17146_v46 = vsel %vm13325_vm8, 4294967295, %v17145_v46  ;;  %vm13333_vm5 = vmand %vm13224_vm7, %vm17147_vm3  ;;  %vm17156_vm3 = vcmp.le.f32.partialorder %v13061_v21, 7.0  ;;  %vm17157_vm8 = vnez %v17069_v49  ;;  %v17158_v5 = vmov 0 }
0x1edb   : > { %v17149_v10 = vsel %vm13333_vm5, 4294967295, %v17148_v10  ;;  %vm13341_vm10 = vmand %vm17151_vm15, %vm17150_vm6  ;;  %17155 = vst [vmem:[#allocation29_spill] sm:$0xff] %v13348_v17  ;;  %vm17161_vm15 = vcmp.le.f32.partialorder %v12973_v60, 7.0  ;;  %v17162_v26 = vmov 0  ;;  %vm16693_vm0 = vcmp.ge.f32.partialorder %v13259_v9, 0.0 }
0x1edc   : > { %v17153_v31 = vsel %vm13341_vm10, 4294967295, %v17152_v31  ;;  %vm13354_vm5 = vmand %vm17157_vm8, %vm17156_vm3  ;;  %vm17165_vm8 = vcmp.le.f32.partialorder %v5043_v24, 7.0  ;;  %vm17166_vm3 = vcmp.ge.f32.partialorder %v5043_v24, 0.0  ;;  %v17167_v49 = vmov 0 }
0x1edd   : > { %17154 = vst [vmem:[#allocation28_spill] sm:$0xff] %v17153_v31  ;;  %v17159_v5 = vsel %vm13354_vm5, 4294967295, %v17158_v5  ;;  %vm13363_vm1 = vmand %vm13135_vm14, %vm17161_vm15  ;;  %v17170_v51 = vmov 0  ;;  %vm17172_vm15 = vcmp.le.f32.partialorder %v13069_v63, 7.0  ;;  %vm17173_vm4 = vnez %v17123_v12 }
0x1ede   : > { %17160 = vst [vmem:[#allocation30_spill] sm:$0xff] %v17159_v5  ;;  %v17163_v26 = vsel %vm13363_vm1, 4294967295, %v17162_v26  ;;  %vm13372_vm12 = vmand %vm17166_vm3, %vm17165_vm8  ;;  %v17174_v24 = vmov 0  ;;  %v13395_v42 = vadd.f32 -1.0, %v13112_v32  ;;  %vm17177_vm6 = vcmp.le.f32.partialorder %v13050_v38, 7.0 }
0x1edf   : > { %17164 = vst [vmem:[#allocation31_spill] sm:$0xff] %v17163_v26  ;;  %v17168_v49 = vsel %vm13372_vm12, 4294967295, %v17167_v49  ;;  %vm13382_vm14 = vmand %vm13089_vm11, %vm16693_vm0  ;;  %vm17178_vm0 = vcmp.ge.f32.partialorder %v13050_v38, 0.0  ;;  %v17179_v44 = vmov 0  ;;  %v13407_v28 = vadd.f32 1.0, %v13255_v16 }
0x1ee0   : > { %17169 = vst [vmem:[#allocation32_spill] sm:$0xff] %v17168_v49  ;;  %v17171_v51 = vsel %vm13382_vm14, 4294967295, %v17170_v51  ;;  %vm13390_vm8 = vmand %vm17173_vm4, %vm17172_vm15  ;;  %vm17183_vm13 = vnez %v17084_v55  ;;  %v17184_v12 = vmov 0  ;;  %v17188_v38 = vmov 0  ;;  %v10499_v49 = vld [vmem:[%s16627_s16 + $0xe8] sm:$0xff]  }
0x1ee1   : > { %v17175_v24 = vsel %vm13390_vm8, 4294967295, %v17174_v24  ;;  %vm13402_vm5 = vmand %vm17178_vm0, %vm17177_vm6  ;;  %17182 = vst [vmem:[#allocation35_spill] sm:$0xff] %v13407_v28  ;;  %vm17187_vm0 = vcmp.ge.f32.partialorder %v13075_v48, 0.0  ;;  %vm17190_vm8 = vcmp.le.f32.partialorder %v13041_v36, 7.0  ;;  %vm17191_vm14 = vcmp.ge.f32.partialorder %v13041_v36, 0.0 }
0x1ee2   : > { %17176 = vst [vmem:[#allocation33_spill] sm:$0xff] %v17175_v24  ;;  %v17180_v44 = vsel %vm13402_vm5, 4294967295, %v17179_v44  ;;  %vm13414_vm11 = vmand %vm17183_vm13, %vm17172_vm15  ;;  %v17192_v55 = vmov 0  ;;  %vm17196_vm1 = vnez %v17091_v43  ;;  %v17197_v59 = vmov 0 }
0x1ee3   : > { %17181 = vst [vmem:[#allocation34_spill] sm:$0xff] %v17180_v44  ;;  %v17185_v12 = vsel %vm13414_vm11, 4294967295, %v17184_v12  ;;  %vm13423_vm6 = vmand %vm13301_vm9, %vm17187_vm0  ;;  %vm17195_vm11 = vcmp.le.f32.partialorder %v13054_v34, 7.0  ;;  %vm17200_vm4 = vcmp.le.f32.partialorder %v13075_v48, 7.0  ;;  %vm17201_vm9 = vnez %v17095_v33 }
0x1ee4   : > { %17186 = vst [vmem:[#allocation36_spill] sm:$0xff] %v17185_v12  ;;  %v17189_v38 = vsel %vm13423_vm6, 4294967295, %v17188_v38  ;;  %vm13432_vm13 = vmand %vm17191_vm14, %vm17190_vm8  ;;  %v17202_v3 = vmov 0  ;;  %vm17205_vm8 = vcmp.le.f32.partialorder %v13083_v6, 7.0  ;;  %vm17206_vm15 = vnez %v17098_v14 }
0x1ee5   : > { %v17193_v55 = vsel %vm13432_vm13, 4294967295, %v17192_v55  ;;  %vm13440_vm0 = vmand %vm17196_vm1, %vm17195_vm11  ;;  %v17207_v43 = vmov 0  ;;  %vm17210_vm11 = vcmp.ge.f32.partialorder %v13255_v16, 0.0  ;;  %vm17211_vm1 = vnez %v17127_v2 }
0x1ee6   : > { %17194 = vst [vmem:[#allocation37_spill] sm:$0xff] %v17193_v55  ;;  %v17198_v59 = vsel %vm13440_vm0, 4294967295, %v17197_v59  ;;  %vm13448_vm6 = vmand %vm17201_vm9, %vm17200_vm4  ;;  %v17212_v33 = vmov 0  ;;  %vm17215_vm9 = vcmp.ge.f32.partialorder %v13309_v61, 0.0  ;;  %v17220_v14 = vmov 0 }
0x1ee7   : > { %17199 = vst [vmem:[#allocation38_spill] sm:$0xff] %v17198_v59  ;;  %v17203_v3 = vsel %vm13448_vm6, 4294967295, %v17202_v3  ;;  %vm13457_vm3 = vmand %vm17206_vm15, %vm17205_vm8  ;;  %vm17219_vm15 = vcmp.ge.f32.partialorder %v13279_v27, 0.0  ;;  %v13486_v2 = vadd.f32 1.0, %v13075_v48  ;;  %vm17224_vm14 = vcmp.ge.f32.partialorder %v13014_v54, 0.0 }
0x1ee8   : > { %17204 = vst [vmem:[#allocation39_spill] sm:$0xff] %v17203_v3  ;;  %v17208_v43 = vsel %vm13457_vm3, 4294967295, %v17207_v43  ;;  %vm13465_vm0 = vmand %vm17211_vm1, %vm17210_vm11  ;;  %v17216_v3 = vmov 0  ;;  %v13518_v39 = vadd.f32 1.0, %v13054_v34  ;;  %v17231_v13 = vmov 0 }
0x1ee9   : > { %17209 = vst [vmem:[#allocation40_spill] sm:$0xff] %v17208_v43  ;;  %v17213_v33 = vsel %vm13465_vm0, 4294967295, %v17212_v33  ;;  %vm13473_vm4 = vmand %vm13313_vm2, %vm17215_vm9  ;;  %v10498_v43 = vld [vmem:[%s16627_s16 + $0x38] sm:$0xff]   ;;  %vm16727_vm9 = vcmp.le.f32.partialorder %v13116_v45, 7.0  ;;  %v17236_v34 = vmov 0  ;;  %vm17239_vm3 = vcmp.ge.f32.partialorder %v12979_v8, 0.0 }
0x1eea   : > { %17214 = vst [vmem:[#allocation41_spill] sm:$0xff] %v17213_v33  ;;  %v17217_v3 = vsel %vm13473_vm4, 4294967295, %v17216_v3  ;;  %vm13481_vm8 = vmand %vm13341_vm10, %vm17219_vm15  ;;  %v10496_v33 = vld [vmem:[%s16627_s16 + $0xa0] sm:$0xff]   ;;  %vm17240_vm6 = vnez %v17076_v53  ;;  %v17253_v53 = vmov 0  ;;  %v17276_v59 = vmov 0 }
0x1eeb   : > { %17218 = vst [vmem:[#allocation42_spill] sm:$0xff] %v17217_v3  ;;  %v17221_v14 = vsel %vm13481_vm8, 4294967295, %v17220_v14  ;;  %17223 = vst [vmem:[#allocation44_spill] sm:$0xff] %v13486_v2  ;;  %v10497_v3 = vld [vmem:[%s16627_s16 + $0x78] sm:$0xff]   ;;  %vm17227_vm8 = vcmp.ge.f32.partialorder %v13306_v30, 0.0  ;;  %9536 = vmatpush3.bf16.msra.mxu1 %v10496_v33 }
0x1eec   : > { %17222 = vst [vmem:[#allocation43_spill] sm:$0xff] %v17221_v14  ;;  %vm13504_vm11 = vmand %vm13224_vm7, %vm17224_vm14  ;;  %v17225_v14 = vmov 0  ;;  %vm17230_vm14 = vnez %v17111_v19  ;;  %v17241_v19 = vmov 0  ;;  %vm17244_vm7 = vnez %v17034_v23  ;;  %9501 = vmatprep.subr.bf16.mxu0 %v10497_v3  ;;  %9537 = vmatprep.subr.bf16.mxu1 %v10499_v49  ;;  %v10500_v3 = vld [vmem:[%s16627_s16 + $0xa8] sm:$0xff]  }
0x1eed   : > { %v17226_v14 = vsel %vm13504_vm11, 4294967295, %v17225_v14  ;;  %vm13513_vm4 = vmand %vm13432_vm13, %vm17227_vm8  ;;  %vm17234_vm8 = vcmp.le.f32.partialorder %v13109_v47, 7.0  ;;  %vm17235_vm11 = vnez %v17114_v29  ;;  %v17249_v29 = vmov 0  ;;  %9502 = vmatpush3.bf16.msra.mxu0 %v10498_v43 }
0x1eee   : > { %vm13524_vm15 = vmand %vm17230_vm14, %vm16727_vm9  ;;  %vm17243_vm9 = vcmp.ge.f32.partialorder %v12973_v60, 0.0  ;;  %v17281_v49 = vmov 0 }
0x1eef   : > { %v17232_v13 = vsel %vm13524_vm15, 4294967295, %v17231_v13  ;;  %vm13534_vm0 = vmand %vm17235_vm11, %vm17234_vm8  ;;  %vm17247_vm11 = vcmp.ge.f32.partialorder %v13009_v56, 0.0  ;;  %vm17248_vm8 = vnez %v17041_v41  ;;  %v17258_v41 = vmov 0  ;;  %9538 = vmatpush3.bf16.msra.mxu1 %v10500_v3 }
0x1ef0   : > { %17233 = vst [vmem:[#allocation45_spill] sm:$0xff] %v17232_v13  ;;  %v17237_v34 = vsel %vm13534_vm0, 4294967295, %v17236_v34  ;;  %vm13542_vm14 = vmand %vm17240_vm6, %vm17239_vm3  ;;  %v17245_v13 = vmov 0  ;;  %vm17252_vm3 = vcmp.ge.f32.partialorder %v13112_v32, 0.0  ;;  %v17306_v3 = vmov 0 }
0x1ef1   : > { %17238 = vst [vmem:[#allocation46_spill] sm:$0xff] %v17237_v34  ;;  %v17242_v19 = vsel %vm13542_vm14, 4294967295, %v17241_v19  ;;  %vm13550_vm1 = vmand %vm17244_vm7, %vm17243_vm9  ;;  %vm17257_vm14 = vcmp.ge.f32.partialorder %v5273_v11, 0.0 }
0x1ef2   : > { %v17246_v13 = vsel %vm13550_vm1, 4294967295, %v17245_v13  ;;  %vm13558_vm0 = vmand %vm17248_vm8, %vm17247_vm11  ;;  %vm17256_vm1 = vcmp.le.f32.partialorder %v5273_v11, 7.0  ;;  %vm17264_vm11 = vcmp.ge.f32.partialorder %v13395_v42, 0.0  ;;  %v17301_v11 = vmov 0 }
0x1ef3   : > { %v17250_v29 = vsel %vm13558_vm0, 4294967295, %v17249_v29  ;;  %vm13566_vm6 = vmand %vm13372_vm12, %vm17252_vm3  ;;  %vm17261_vm3 = vcmp.ge.f32.partialorder %v13348_v17, 0.0 }
0x1ef4   : > { %17251 = vst [vmem:[#allocation47_spill] sm:$0xff] %v17250_v29  ;;  %v17254_v53 = vsel %vm13566_vm6, 4294967295, %v17253_v53  ;;  %vm13574_vm15 = vmand %vm17257_vm14, %vm17256_vm1  ;;  %vm17279_vm14 = vcmp.le.f32.partialorder %v13061_v21, 7.0  ;;  %vm17280_vm1 = vnez %v17134_v62 }
0x1ef5   : > { %17255 = vst [vmem:[#allocation48_spill] sm:$0xff] %v17254_v53  ;;  %v17259_v41 = vsel %vm13574_vm15, 4294967295, %v17258_v41  ;;  %vm13586_vm7 = vmand %vm13402_vm5, %vm17261_vm3  ;;  %v5276_v53 = vadd.f32 1.0, %v13041_v36  ;;  %vm17267_vm3 = vcmp.le.f32.partialorder %v13306_v30, 7.0  ;;  %v17268_v36 = vmov 0 }
0x1ef6   : > { %17260 = vst [vmem:[#allocation49_spill] sm:$0xff] %v17259_v41  ;;  %vm13599_vm8 = vmand %vm13402_vm5, %vm17264_vm11  ;;  %vm17271_vm11 = vcmask 261120   ;;  %v17294_v41 = vmov 0  ;;  %v17325_v30 = vmov 0 }
0x1ef7   : > { %vm13607_vm6 = vmand %vm13513_vm4, %vm17267_vm3  ;;  %vm17274_vm4 = vcmp.le.f32.partialorder %v13009_v56, 7.0  ;;  %vm17275_vm3 = vnez %v17131_v15  ;;  %v10501_v15 = vld [vmem:[%s16627_s16 + $0xf0] sm:$0xff]  }
0x1ef8   : > { %v17269_v36 = vsel %vm13607_vm6, 4294967295, %v17268_v36  ;;  %vm17272_vm12 = vmmov %vm17271_vm11  ;;  %9539 = vmatprep.subr.bf16.mxu1 %v10501_v15  ;;  %v17335_v15 = vmov 0 }
0x1ef9   : > { %17270 = vst [vmem:[#allocation50_spill] sm:$0xff] %v17269_v36  ;;  %vm13627_vm9 = vmand %vm17275_vm3, %vm17274_vm4  ;;  %vm17287_vm4 = vcmp.ge.f32.partialorder %v13486_v2, 0.0 }
0x1efa   : > { %v17277_v59 = vsel %vm13627_vm9, 4294967295, %v17276_v59  ;;  %vm13635_vm5 = vmand %vm17280_vm1, %vm17279_vm14  ;;  %vm17290_vm1 = vcmp.ge.f32.partialorder %v13255_v16, 0.0 }
0x1efb   : > { %17278 = vst [vmem:[#allocation52_spill] sm:$0xff] %v17277_v59  ;;  %v17282_v49 = vsel %vm13635_vm5, 4294967295, %v17281_v49  ;;  %vm13652_vm3 = vmand %vm13341_vm10, %vm17287_vm4  ;;  %vm17299_vm4 = vcmp.le.f32.partialorder %v13218_v7, 7.0  ;;  %vm17300_vm10 = vnez %v17146_v46  ;;  %vm17313_vm5 = vnez %v17054_v52 }
0x1efc   : > { %17283 = vst [vmem:[#allocation53_spill] sm:$0xff] %v17282_v49  ;;  %vm13660_vm14 = vmand %vm13574_vm15, %vm17290_vm1  ;;  %vm17293_vm1 = vcmp.le.f32.partialorder %v13348_v17, 7.0  ;;  %v17314_v46 = vmov 0 }
0x1f1c   : > { %v10427_v54 = vpop.permute.xlu0 %10426 }
0x1f1d   : > { %v10429_v23 = vunpack.i.h.bf16 %v10427_v54  ;;  %v10428_v29 = vunpack.i.l.bf16 %v10427_v54  ;;  %v17265_v54 = vmov 0 }
0x1f1e   : > { %v17266_v54 = vsel %vm13599_vm8, 4294967295, %v17265_v54 }
0x1f1f   : > { %v13617_v43 = vsel %vm17271_vm11, %v12879_v50, %v10429_v23  ;;  %v13621_v33 = vsel %vm17272_vm12, %v12876_v4, %v10428_v29  ;;  %vm17284_vm12 = vcmp.ge.f32.partialorder %v13407_v28, 0.0  ;;  %v17285_v4 = vmov 0  ;;  %vm13677_vm11 = vmand %vm13586_vm7, %vm17293_vm1  ;;  %v10502_v29 = vld [vmem:[%s16627_s16 + $0xb0] sm:$0xff]  }
0x1f20   : > { %17273 = vst [vmem:[#allocation51_spill] sm:$0xff] %v13621_v33  ;;  %vm13644_vm8 = vmand %vm13313_vm2, %vm17284_vm12  ;;  %v17288_v50 = vmov 0  ;;  %v5349_v44 = vrot.slane %v13621_v33, 7  ;;  %v4969_v37 = vpop.permute.xlu0 %4968  ;;  %v17295_v41 = vsel %vm13677_vm11, 4294967295, %v17294_v41  ;;  %vm17297_vm12 = vcmask 261120   ;;  %9540 = vmatpush3.bf16.msra.mxu1 %v10502_v29  ;;  %v17379_v29 = vld [vmem:[#allocation20_spill] sm:$0xff] }
0x1f21   : > { %v17286_v4 = vsel %vm13644_vm8, 4294967295, %v17285_v4  ;;  %v17289_v50 = vsel %vm13652_vm3, 4294967295, %v17288_v50  ;;  %17296 = vst [vmem:[#allocation54_spill] sm:$0xff] %v17295_v41  ;;  %v13686_v62 = vsel %vm17297_vm12, %v12884_v58, %v4969_v37  ;;  %v4971_v31 = vpop.permute.xlu1 %4970  ;;  %vm13692_vm2 = vmand %vm17300_vm10, %vm17299_vm4  ;;  %vm17304_vm7 = vcmp.le.f32.partialorder %v13209_v57, 7.0 }
0x1f22   : > { %17298 = vst [vmem:[#allocation55_spill] sm:$0xff] %v13686_v62  ;;  %v17302_v11 = vsel %vm13692_vm2, 4294967295, %v17301_v11  ;;  %vm17305_vm1 = vnez %v17149_v10  ;;  %vm17309_vm3 = vcmp.ge.f32.partialorder %v13518_v39, 0.0  ;;  %v17310_v58 = vmov 0 }
0x1f23   : > { %17303 = vst [vmem:[#allocation56_spill] sm:$0xff] %v17302_v11  ;;  %vm13700_vm15 = vmand %vm17305_vm1, %vm17304_vm7  ;;  %vm17312_vm2 = vcmp.ge.f32.partialorder %v13116_v45, 0.0  ;;  %vm17316_vm1 = vcmp.ge.f32.partialorder %v13083_v6, 0.0  ;;  %vm17317_vm12 = vnez %v17057_v35  ;;  %v17318_v37 = vmov 0 }
0x1f24   : > { %v17307_v3 = vsel %vm13700_vm15, 4294967295, %v17306_v3  ;;  %vm13709_vm8 = vmand %vm13432_vm13, %vm17309_vm3  ;;  %vm17320_vm3 = vcmp.ge.f32.partialorder %v13109_v47, 0.0  ;;  %v17321_v10 = vmov 0  ;;  %vm17324_vm4 = vcmp.ge.f32.partialorder %v13171_v40, 0.0 }
0x1f25   : > { %17308 = vst [vmem:[#allocation57_spill] sm:$0xff] %v17307_v3  ;;  %v17311_v58 = vsel %vm13709_vm8, 4294967295, %v17310_v58  ;;  %vm13717_vm7 = vmand %vm17313_vm5, %vm17312_vm2  ;;  %vm17323_vm2 = vcmp.le.f32.partialorder %v13171_v40, 7.0  ;;  %v17331_v40 = vmov 0  ;;  %v17339_v35 = vrot.slane %v13617_v43, 7 }
0x1f26   : > { %v17315_v46 = vsel %vm13717_vm7, 4294967295, %v17314_v46  ;;  %vm13725_vm15 = vmand %vm17317_vm12, %vm17316_vm1  ;;  %vm17328_vm1 = vnez %v17159_v5  ;;  %v17354_v52 = vrot.slane %v13617_v43, 1  ;;  %v17355_v24 = vrot.slane %v13621_v33, 1 }
0x1f27   : > { %v17319_v37 = vsel %vm13725_vm15, 4294967295, %v17318_v37  ;;  %vm13733_vm10 = vmand %vm17313_vm5, %vm17320_vm3  ;;  %v5411_v17 = vsel %vm17328_vm1, %v13621_v33, 0.0  ;;  %vm17329_vm5 = vnez %v17163_v26  ;;  %vm17337_vm3 = vcmask 261120  }
0x1f28   : > { %v17322_v10 = vsel %vm13733_vm10, 4294967295, %v17321_v10  ;;  %vm13742_vm13 = vmand %vm17324_vm4, %vm17323_vm2  ;;  %vm17330_vm10 = vcmp.ge.f32.partialorder %v13259_v9, 0.0  ;;  %vm17333_vm4 = vcmp.ge.f32.partialorder %v13069_v63, 0.0  ;;  %vm17334_vm2 = vnez %v17059_v22 }
0x1f29   : > { %v17326_v30 = vsel %vm13742_vm13, 4294967295, %v17325_v30  ;;  %vm13757_vm15 = vmand %vm17317_vm12, %vm17330_vm10  ;;  %v13772_v55 = vsel %vm17337_vm3, %v12890_v0, %v4971_v31  ;;  %vm17340_vm12 = vcmp.lt.s32.totalorder %v12908_v18, 1  ;;  %vm17342_vm10 = vcmp.le.f32.partialorder %v13259_v9, 7.0 }
0x1f2a   : > { %17327 = vst [vmem:[#allocation58_spill] sm:$0xff] %v17326_v30  ;;  %v17332_v40 = vsel %vm13757_vm15, 4294967295, %v17331_v40  ;;  %vm13765_vm13 = vmand %vm17334_vm2, %vm17333_vm4  ;;  %v13778_v5 = vsel %vm17340_vm12, %v5349_v44, %v17339_v35  ;;  %vm17343_vm1 = vnez %v17171_v51  ;;  %v17344_v22 = vmov 0 }
0x1f2b   : > { %v17336_v15 = vsel %vm13765_vm13, 4294967295, %v17335_v15  ;;  %17338 = vst [vmem:[#allocation59_spill] sm:$0xff] %v13772_v55  ;;  %17341 = vst [vmem:[#allocation60_spill] sm:$0xff] %v13778_v5  ;;  %vm17348_vm13 = vcmp.ge.f32.partialorder %v13061_v21, 0.0  ;;  %vm17349_vm15 = vnez %v17061_v1  ;;  %v17350_v0 = vmov 0 }
0x1f2c   : > { %vm13784_vm4 = vmand %vm17343_vm1, %vm17342_vm10  ;;  %v5356_v31 = vrot.slane %v13772_v55, 7  ;;  %vm17353_vm1 = vnez %v17185_v12  ;;  %v5429_v35 = vrot.slane %v13772_v55, 1  ;;  %vm17356_vm10 = vcmp.lt.s32.totalorder %v12908_v18, 7 }
0x1f2d   : > { %v17345_v22 = vsel %vm13784_vm4, 4294967295, %v17344_v22  ;;  %vm13796_vm12 = vmand %vm17349_vm15, %vm17348_vm13  ;;  %v5410_v51 = vsel %vm17353_vm1, %v13772_v55, 0.0  ;;  %vm17358_vm13 = vcmp.le.f32.partialorder %v13075_v48, 7.0  ;;  %vm17359_vm15 = vnez %v17189_v38  ;;  %v17397_v48 = vld [vmem:[#allocation42_spill] sm:$0xff] }
0x1f2e   : > { %17346 = vst [vmem:[#allocation61_spill] sm:$0xff] %v17345_v22  ;;  %v17351_v0 = vsel %vm13796_vm12, 4294967295, %v17350_v0  ;;  %v13811_v22 = vsel %vm17356_vm10, %v17355_v24, %v17354_v52  ;;  %vm13817_vm3 = vmand %vm17359_vm15, %vm17358_vm13  ;;  %v17360_v1 = vmov 0  ;;  %vm17363_vm2 = vcmp.le.f32.partialorder %v5276_v53, 7.0  ;;  %v10503_v24 = vld [vmem:[%s16627_s16 + $0xf8] sm:$0xff]  }
0x1f2f   : > { %17352 = vst [vmem:[#allocation62_spill] sm:$0xff] %v17351_v0  ;;  %17357 = vst [vmem:[#allocation63_spill] sm:$0xff] %v13811_v22  ;;  %v17361_v1 = vsel %vm13817_vm3, 4294967295, %v17360_v1  ;;  %vm17364_vm1 = vcmp.ge.f32.partialorder %v5276_v53, 0.0  ;;  %v17365_v12 = vmov 0  ;;  %v10504_v52 = vld [vmem:[%s16627_s16 + $0xb8] sm:$0xff]   ;;  %vm17369_vm13 = vnez %v17063_v25  ;;  %9541 = vmatprep.subr.bf16.mxu1 %v10503_v24 }
0x1f30   : > { %17362 = vst [vmem:[#allocation64_spill] sm:$0xff] %v17361_v1  ;;  %vm13823_vm4 = vmand %vm17364_vm1, %vm17363_vm2  ;;  %vm17368_vm10 = vcmp.ge.f32.partialorder %v13218_v7, 0.0  ;;  %v17370_v38 = vmov 0  ;;  %vm17373_vm2 = vcmp.ge.f32.partialorder %v13209_v57, 0.0  ;;  %vm17374_vm1 = vnez %v17065_v20  ;;  %9542 = vmatpush3.bf16.msra.mxu1 %v10504_v52 }
0x1f31   : > { %v17366_v12 = vsel %vm13823_vm4, 4294967295, %v17365_v12  ;;  %vm13837_vm15 = vmand %vm17369_vm13, %vm17368_vm10  ;;  %v17375_v53 = vmov 0  ;;  %vm17378_vm3 = vcmp.ge.f32.partialorder %v13116_v45, 0.0  ;;  %vm17380_vm12 = vnez %v17379_v29  ;;  %v17391_v29 = vld [vmem:[#allocation41_spill] sm:$0xff] }
0x1f32   : > { %17367 = vst [vmem:[#allocation65_spill] sm:$0xff] %v17366_v12  ;;  %v17371_v38 = vsel %vm13837_vm15, 4294967295, %v17370_v38  ;;  %vm13845_vm4 = vmand %vm17374_vm1, %vm17373_vm2  ;;  %v17381_v55 = vmov 0  ;;  %v10432_v12 = vpop.permute.xlu1 %10431  ;;  %v5418_v1 = vpack.c.bf16 %v5411_v17, %v5410_v51  ;;  %vm17390_vm1 = vcmp.le.f32.partialorder %v13255_v16, 7.0  ;;  %v17403_v17 = vld [vmem:[#allocation43_spill] sm:$0xff] }
0x1f33   : > { %17372 = vst [vmem:[#allocation66_spill] sm:$0xff] %v17371_v38  ;;  %v17376_v53 = vsel %vm13845_vm4, 4294967295, %v17375_v53  ;;  %vm13853_vm7 = vmand %vm17380_vm12, %vm17378_vm3  ;;  %vm17392_vm3 = vnez %v17391_v29  ;;  %vm17396_vm10 = vcmp.le.f32.partialorder %v13309_v61, 7.0  ;;  %v17399_v20 = vmov 0  ;;  %v17409_v29 = vld [vmem:[#allocation22_spill] sm:$0xff] }
0x1f34   : > { %17377 = vst [vmem:[#allocation67_spill] sm:$0xff] %v17376_v53  ;;  %v17382_v55 = vsel %vm13853_vm7, 4294967295, %v17381_v55  ;;  %v17388_v53 = vld [vmem:[#allocation40_spill] sm:$0xff]  ;;  %vm13870_vm12 = vmand %vm17392_vm3, %vm17390_vm1  ;;  %vm17398_vm7 = vnez %v17397_v48  ;;  %vm17402_vm13 = vcmp.le.f32.partialorder %v13279_v27, 7.0  ;;  %v17405_v51 = vmov 0  ;;  %5639 = vrot.lane.b32.xlu0 %v5418_v1, %s17435_s27 }
0x1f35   : > { %17383 = vst [vmem:[#allocation68_spill] sm:$0xff] %v17382_v55  ;;  %vm17389_vm2 = vnez %v17388_v53  ;;  %v17393_v55 = vmov 0  ;;  %vm13878_vm4 = vmand %vm17398_vm7, %vm17396_vm10  ;;  %vm17408_vm1 = vcmp.ge.f32.partialorder %v13083_v6, 0.0  ;;  %vm17410_vm3 = vnez %v17409_v29  ;;  %v17415_v48 = vld [vmem:[#allocation24_spill] sm:$0xff] }
0x1f36   : > { %v5484_v0 = vsel %vm17389_vm2, %v13778_v5, 0.0  ;;  %v17394_v55 = vsel %vm13870_vm12, 4294967295, %v17393_v55  ;;  %v17400_v20 = vsel %vm13878_vm4, 4294967295, %v17399_v20  ;;  %vm17404_vm2 = vnez %v17403_v17  ;;  %vm13894_vm12 = vmand %vm17410_vm3, %vm17408_vm1 }
0x1f37   : > { %17395 = vst [vmem:[#allocation41_spill] sm:$0xff] %v17394_v55  ;;  %17401 = vst [vmem:[#allocation42_spill] sm:$0xff] %v17400_v20  ;;  %v17411_v53 = vmov 0  ;;  %vm17414_vm7 = vcmp.ge.f32.partialorder %v13407_v28, 0.0  ;;  %vm17416_vm10 = vnez %v17415_v48  ;;  %v17417_v5 = vmov 0 }
0x1f38   : > { %vm13886_vm15 = vmand %vm17404_vm2, %vm17402_vm13  ;;  %v17412_v53 = vsel %vm13894_vm12, 4294967295, %v17411_v53  ;;  %v10434_v17 = vunpack.i.h.bf16 %v10432_v12  ;;  %v10433_v38 = vunpack.i.l.bf16 %v10432_v12  ;;  %vm17419_vm13 = vcmp.lt.s32.totalorder %v12908_v18, 1  ;;  %v17431_v12 = vld [vmem:[#allocation25_spill] sm:$0xff] }
0x1f39   : > { %v17406_v51 = vsel %vm13886_vm15, 4294967295, %v17405_v51  ;;  %17413 = vst [vmem:[#allocation69_spill] sm:$0xff] %v17412_v53  ;;  %vm13902_vm4 = vmand %vm17416_vm10, %vm17414_vm7  ;;  %v13908_v25 = vsel %vm17419_vm13, %v5356_v31, %v5349_v44  ;;  %vm17423_vm1 = vnez %v17226_v14  ;;  %v17424_v29 = vmov 0  ;;  %v13927_v44 = vld [vmem:[%s16627_s16 + $0x100] sm:$0xff]  }
0x1f3a   : > { %17407 = vst [vmem:[#allocation43_spill] sm:$0xff] %v17406_v51  ;;  %v17418_v5 = vsel %vm13902_vm4, 4294967295, %v17417_v5  ;;  %17420 = vst [vmem:[#allocation24_spill] sm:$0xff] %v13908_v25  ;;  %v17421_v51 = vld [vmem:[#allocation9_spill] sm:$0xff]  ;;  %v17427_v53 = vrot.slane %v13686_v62, 7  ;;  %vm17432_vm4 = vnez %v17431_v12  ;;  %v17433_v14 = vmov 0  ;;  %10238 = vmatprep.subr.bf16.mxu0 %v13927_v44 }
0x1f3b   : > { %vm17422_vm2 = vcmp.le.f32.partialorder %v17421_v51, 7.0  ;;  %vm17428_vm7 = vmmov %vm17419_vm13  ;;  %17429 = vst [vmem:[#allocation70_spill] sm:$0xff] %v13927_v44  ;;  %vm17430_vm13 = vcmp.ge.f32.partialorder %v13486_v2, 0.0  ;;  %v17436_v51 = vld [vmem:[#allocation45_spill] sm:$0xff]  ;;  %vm17440_vm12 = vnez %v17242_v19  ;;  %v17446_v1 = vmov 0  ;;  %v17455_v19 = vld [vmem:[#allocation48_spill] sm:$0xff] }
0x1f3c   : > { %vm13914_vm3 = vmand %vm17423_vm1, %vm17422_vm2  ;;  %v13922_v20 = vsel %vm17428_vm7, %v17427_v53, %v5356_v31  ;;  %vm17437_vm1 = vnez %v17436_v51  ;;  %vm17438_vm7 = vnez %v17237_v34  ;;  %v17441_v53 = vmov 0 }
0x1f3d   : > { %v17425_v29 = vsel %vm13914_vm3, 4294967295, %v17424_v29  ;;  %vm13933_vm2 = vmand %vm17432_vm4, %vm17430_vm13  ;;  %v5483_v31 = vsel %vm17437_vm1, %v13908_v25, 0.0  ;;  %v5539_v24 = vsel %vm17438_vm7, %v13811_v22, 0.0  ;;  %vm17439_vm3 = vcmp.le.f32.partialorder %v12979_v8, 7.0 }
0x1f3e   : > { %17426 = vst [vmem:[#allocation9_spill] sm:$0xff] %v17425_v29  ;;  %v17434_v14 = vsel %vm13933_vm2, 4294967295, %v17433_v14  ;;  %vm13948_vm15 = vmand %vm17440_vm12, %vm17439_vm3  ;;  %vm17444_vm13 = vcmp.le.f32.partialorder %v12973_v60, 7.0  ;;  %vm17445_vm2 = vnez %v17246_v13  ;;  %vm17449_vm1 = vcmp.le.f32.partialorder %v13009_v56, 7.0 }
0x1f3f   : > { %v17442_v53 = vsel %vm13948_vm15, 4294967295, %v17441_v53  ;;  %vm13956_vm8 = vmand %vm17445_vm2, %vm17444_vm13  ;;  %v17451_v8 = vmov 0  ;;  %vm17454_vm12 = vcmp.le.f32.partialorder %v13112_v32, 7.0  ;;  %vm17456_vm3 = vnez %v17455_v19 }
0x1f40   : > { %17443 = vst [vmem:[#allocation25_spill] sm:$0xff] %v17442_v53  ;;  %v17447_v1 = vsel %vm13956_vm8, 4294967295, %v17446_v1  ;;  %vm13964_vm7 = vmand %vm13558_vm0, %vm17449_vm1  ;;  %v17457_v34 = vmov 0  ;;  %v17460_v13 = vrot.slane %v13686_v62, 1  ;;  %vm17461_vm2 = vcmp.lt.s32.totalorder %v12908_v18, 7 }
0x1f41   : > { %17448 = vst [vmem:[#allocation71_spill] sm:$0xff] %v17447_v1  ;;  %v17452_v8 = vsel %vm13964_vm7, 4294967295, %v17451_v8  ;;  %vm13972_vm15 = vmand %vm17456_vm3, %vm17454_vm12  ;;  %v17463_v51 = vrot.slane %v13621_v33, 1  ;;  %vm17465_vm1 = vcmp.ge.f32.partialorder %v13309_v61, 0.0  ;;  %vm17469_vm12 = vcmask 261120  }
0x1f42   : > { %17453 = vst [vmem:[#allocation47_spill] sm:$0xff] %v17452_v8  ;;  %v17458_v34 = vsel %vm13972_vm15, 4294967295, %v17457_v34  ;;  %v13980_v22 = vsel %vm17461_vm2, %v17460_v13, %v5429_v35  ;;  %vm17464_vm0 = vmmov %vm17461_vm2  ;;  %v17470_v13 = vld [vmem:[#allocation3_spill] sm:$0xff]  ;;  %v5491_v33 = vpack.c.bf16 %v5484_v0, %v5483_v31  ;;  %v17477_v52 = vmov 0 }
0x1f43   : > { %17459 = vst [vmem:[#allocation48_spill] sm:$0xff] %v17458_v34  ;;  %17462 = vst [vmem:[#allocation72_spill] sm:$0xff] %v13980_v22  ;;  %v13986_v25 = vsel %vm17464_vm0, %v5429_v35, %v17463_v51  ;;  %v17468_v34 = vld [vmem:[#allocation2_spill] sm:$0xff]  ;;  %vm17475_vm0 = vcmp.le.f32.partialorder %v13395_v42, 7.0  ;;  %v17481_v12 = vmov 0  ;;  %v17485_v51 = vld [vmem:[#allocation7_spill] sm:$0xff]  ;;  %vm17496_vm11 = vnez %v17289_v50 }
0x1f44   : > { %vm13992_vm13 = vmand %vm17416_vm10, %vm17465_vm1  ;;  %v13998_v62 = vsel %vm17469_vm12, %v17468_v34, %v10434_v17  ;;  %vm17472_vm10 = vcmp.ge.f32.partialorder %v13279_v27, 0.0  ;;  %v10437_v17 = vpop.permute.xlu1 %10436  ;;  %vm17476_vm1 = vnez %v17266_v54  ;;  %vm17486_vm6 = vnez %v17485_v51  ;;  %5651 = vrot.lane.b32.xlu1 %v5491_v33, %s17435_s27  ;;  %v17520_v22 = vld [vmem:[#allocation4_spill] sm:$0xff] }
0x1f45   : > { %vm17471_vm3 = vmmov %vm17469_vm12  ;;  %v5352_v34 = vrot.slane %v13998_v62, 7  ;;  %v17487_v54 = vmov 0  ;;  %v10438_v35 = vunpack.i.l.bf16 %v10437_v17  ;;  %v17492_v51 = vmov 0 }
0x1f46   : > { %v14002_v8 = vsel %vm17471_vm3, %v17470_v13, %v10433_v38  ;;  %vm14012_vm2 = vmand %vm17432_vm4, %vm17472_vm10  ;;  %vm17480_vm4 = vcmp.le.f32.partialorder %v13255_v16, 7.0  ;;  %vm17484_vm10 = vcmp.ge.f32.partialorder %v13218_v7, 0.0  ;;  %v10439_v13 = vunpack.i.h.bf16 %v10437_v17  ;;  %v17501_v17 = vld [vmem:[#allocation10_spill] sm:$0xff] }
0x1f47   : > { %v5351_v38 = vrot.slane %v14002_v8, 7  ;;  %vm14023_vm12 = vmand %vm17476_vm1, %vm17475_vm0  ;;  %v5413_v23 = vsel %vm13627_vm9, %v14002_v8, 0.0  ;;  %vm17490_vm1 = vcmp.le.f32.partialorder %v13407_v28, 7.0  ;;  %v17497_v33 = vmov 0 }
0x1f48   : > { %v17478_v52 = vsel %vm14023_vm12, 4294967295, %v17477_v52  ;;  %vm14031_vm3 = vmand %vm13660_vm14, %vm17480_vm4  ;;  %vm17489_vm14 = vnez %v17282_v49  ;;  %vm17491_vm4 = vnez %v17286_v4  ;;  %vm17500_vm9 = vcmp.ge.f32.partialorder %v13209_v57, 0.0 }
0x1f49   : > { %17479 = vst [vmem:[#allocation2_spill] sm:$0xff] %v17478_v52  ;;  %v17482_v12 = vsel %vm14031_vm3, 4294967295, %v17481_v12  ;;  %vm14042_vm0 = vmand %vm17486_vm6, %vm17484_vm10  ;;  %v5596_v31 = vsel %vm17489_vm14, %v14002_v8, 0.0  ;;  %vm17495_vm10 = vcmp.le.f32.partialorder %v13486_v2, 7.0  ;;  %vm17502_vm14 = vnez %v17501_v17 }
0x1f4a   : > { %17483 = vst [vmem:[#allocation3_spill] sm:$0xff] %v17482_v12  ;;  %v17488_v54 = vsel %vm14042_vm0, 4294967295, %v17487_v54  ;;  %vm14057_vm6 = vmand %vm17491_vm4, %vm17490_vm1  ;;  %v17503_v0 = vmov 0  ;;  %v17505_v4 = vsel %vm17329_vm5, %v13617_v43, 0.0  ;;  %vm17506_vm1 = vcmp.lt.s32.totalorder %v12908_v18, 1 }
0x1f4b   : > { %v17493_v51 = vsel %vm14057_vm6, 4294967295, %v17492_v51  ;;  %vm14065_vm3 = vmand %vm17496_vm11, %vm17495_vm10  ;;  %v5419_v49 = vpack.c.bf16 %v5413_v23, %v17505_v4  ;;  %v14083_v50 = vsel %vm17506_vm1, %v5351_v38, %v5352_v34  ;;  %v17508_v59 = vrot.slane %v13617_v43, 7  ;;  %v17516_v23 = vld [vmem:[#allocation17_spill] sm:$0xff] }
0x1f4c   : > { %17494 = vst [vmem:[#allocation7_spill] sm:$0xff] %v17493_v51  ;;  %v17498_v33 = vsel %vm14065_vm3, 4294967295, %v17497_v33  ;;  %vm14073_vm12 = vmand %vm17502_vm14, %vm17500_vm9  ;;  %v17511_v17 = vrot.slane %v14002_v8, 1  ;;  %v17512_v41 = vrot.slane %v13617_v43, 1  ;;  %vm17513_vm9 = vcmp.lt.s32.totalorder %v12908_v18, 7 }
0x1f4d   : > { %17499 = vst [vmem:[#allocation73_spill] sm:$0xff] %v17498_v33  ;;  %v17504_v0 = vsel %vm14073_vm12, 4294967295, %v17503_v0  ;;  %17507 = vst [vmem:[#allocation10_spill] sm:$0xff] %v14083_v50  ;;  %vm17515_vm14 = vcmp.ge.f32.partialorder %v12973_v60, 0.0  ;;  %vm17517_vm4 = vnez %v17516_v23  ;;  %v17518_v4 = vmov 0  ;;  %5641 = vrot.lane.b32.xlu0 %v5419_v49, %s17435_s27 }
0x1f4e   : > { %vm17509_vm11 = vmmov %vm17506_vm1  ;;  %v14097_v26 = vsel %vm17513_vm9, %v17512_v41, %v17511_v17  ;;  %vm17521_vm1 = vcmask 261120   ;;  %vm17525_vm9 = vnez %v17302_v11  ;;  %vm17526_vm5 = vnez %v17307_v3 }
0x1f4f   : > { %v14089_v44 = vsel %vm17509_vm11, %v17508_v59, %v5351_v38  ;;  %17514 = vst [vmem:[#allocation75_spill] sm:$0xff] %v14097_v26  ;;  %vm14103_vm10 = vmand %vm17517_vm4, %vm17515_vm14  ;;  %v14109_v59 = vsel %vm17521_vm1, %v17520_v22, %v10439_v13  ;;  %v17522_v38 = vld [vmem:[#allocation5_spill] sm:$0xff]  ;;  %v5486_v17 = vsel %vm17526_vm5, %v14083_v50, 0.0  ;;  %vm17527_vm14 = vcmp.le.f32.partialorder %v13518_v39, 7.0  ;;  %v17568_v50 = vld [vmem:[#allocation62_spill] sm:$0xff] }
0x1f50   : > { %17510 = vst [vmem:[#allocation74_spill] sm:$0xff] %v14089_v44  ;;  %v17519_v4 = vsel %vm14103_vm10, 4294967295, %v17518_v4  ;;  %vm17523_vm11 = vmmov %vm17521_vm1  ;;  %v5485_v41 = vsel %vm17525_vm9, %v14089_v44, 0.0  ;;  %vm17528_vm4 = vnez %v17311_v58  ;;  %v17529_v23 = vmov 0  ;;  %v17575_v44 = vld [vmem:[#allocation32_spill] sm:$0xff] }
0x1f51   : > { %v14113_v16 = vsel %vm17523_vm11, %v17522_v38, %v10438_v35  ;;  %vm14125_vm3 = vmand %vm17528_vm4, %vm17527_vm14  ;;  %vm17532_vm1 = vcmp.le.f32.partialorder %v13116_v45, 7.0  ;;  %vm17533_vm11 = vnez %v17315_v46  ;;  %v17534_v22 = vmov 0  ;;  %v17548_v46 = vld [vmem:[#allocation21_spill] sm:$0xff] }
0x1f52   : > { %17524 = vst [vmem:[#allocation17_spill] sm:$0xff] %v14113_v16  ;;  %v17530_v23 = vsel %vm14125_vm3, 4294967295, %v17529_v23  ;;  %vm14133_vm6 = vmand %vm17533_vm11, %vm17532_vm1  ;;  %vm17537_vm9 = vcmp.le.f32.partialorder %v13083_v6, 7.0  ;;  %vm17538_vm5 = vnez %v17319_v37  ;;  %v17539_v35 = vmov 0 }
0x1f53   : > { %17531 = vst [vmem:[#allocation4_spill] sm:$0xff] %v17530_v23  ;;  %v17535_v22 = vsel %vm14133_vm6, 4294967295, %v17534_v22  ;;  %vm14141_vm10 = vmand %vm17538_vm5, %vm17537_vm9  ;;  %vm17542_vm14 = vcmp.le.f32.partialorder %v13109_v47, 7.0  ;;  %vm17543_vm4 = vnez %v17322_v10  ;;  %v17544_v58 = vmov 0 }
0x1f54   : > { %17536 = vst [vmem:[#allocation5_spill] sm:$0xff] %v17535_v22  ;;  %v17540_v35 = vsel %vm14141_vm10, 4294967295, %v17539_v35  ;;  %vm14149_vm3 = vmand %vm17543_vm4, %vm17542_vm14  ;;  %vm17547_vm1 = vcmp.ge.f32.partialorder %v13009_v56, 0.0  ;;  %vm17549_vm11 = vnez %v17548_v46  ;;  %v17550_v13 = vmov 0 }
0x1f55   : > { %17541 = vst [vmem:[#allocation76_spill] sm:$0xff] %v17540_v35  ;;  %v17545_v58 = vsel %vm14149_vm3, 4294967295, %v17544_v58  ;;  %vm14157_vm6 = vmand %vm17549_vm11, %vm17547_vm1  ;;  %vm17552_vm5 = vcmp.ge.f32.partialorder %v13112_v32, 0.0  ;;  %vm17553_vm9 = vnez %v17326_v30  ;;  %v17554_v37 = vmov 0  ;;  %v17585_v32 = vld [vmem:[#allocation13_spill] sm:$0xff] }
0x1f56   : > { %17546 = vst [vmem:[#allocation77_spill] sm:$0xff] %v17545_v58  ;;  %v17551_v13 = vsel %vm14157_vm6, 4294967295, %v17550_v13  ;;  %vm14165_vm10 = vmand %vm17553_vm9, %vm17552_vm5  ;;  %v5425_v10 = vrot.slane %v13998_v62, 1  ;;  %v5354_v38 = vrot.slane %v14109_v59, 7  ;;  %v5353_v11 = vrot.slane %v14113_v16, 7 }
0x1f57   : > { %v17555_v37 = vsel %vm14165_vm10, 4294967295, %v17554_v37  ;;  %v5426_v46 = vrot.slane %v14113_v16, 1  ;;  %vm17557_vm14 = vcmp.le.f32.partialorder %v13259_v9, 7.0  ;;  %vm17558_vm4 = vnez %v17332_v40  ;;  %v17573_v40 = vld [vmem:[#allocation29_spill] sm:$0xff] }
0x1f58   : > { %17556 = vst [vmem:[#allocation21_spill] sm:$0xff] %v17555_v37  ;;  %vm14178_vm1 = vmand %vm17558_vm4, %vm17557_vm14  ;;  %v17559_v3 = vmov 0  ;;  %vm17562_vm11 = vcmp.le.f32.partialorder %v13069_v63, 7.0  ;;  %vm17563_vm5 = vnez %v17336_v15  ;;  %v17564_v30 = vmov 0 }
0x1f59   : > { %v17560_v3 = vsel %vm14178_vm1, 4294967295, %v17559_v3  ;;  %vm14186_vm9 = vmand %vm17563_vm5, %vm17562_vm11  ;;  %vm17567_vm10 = vcmp.le.f32.partialorder %v13061_v21, 7.0  ;;  %vm17569_vm3 = vnez %v17568_v50  ;;  %v17570_v49 = vmov 0  ;;  %v17581_v50 = vld [vmem:[#allocation33_spill] sm:$0xff] }
0x1f5a   : > { %17561 = vst [vmem:[#allocation78_spill] sm:$0xff] %v17560_v3  ;;  %v17565_v30 = vsel %vm14186_vm9, 4294967295, %v17564_v30  ;;  %vm14194_vm6 = vmand %vm17569_vm3, %vm17567_vm10  ;;  %vm17574_vm14 = vcmp.ge.f32.partialorder %v17573_v40, 0.0  ;;  %vm17576_vm4 = vnez %v17575_v44  ;;  %v17577_v63 = vmov 0 }
0x1f5b   : > { %17566 = vst [vmem:[#allocation79_spill] sm:$0xff] %v17565_v30  ;;  %v17571_v49 = vsel %vm14194_vm6, 4294967295, %v17570_v49  ;;  %vm14202_vm1 = vmand %vm17576_vm4, %vm17574_vm14  ;;  %v5427_v15 = vrot.slane %v14109_v59, 1  ;;  %v5492_v3 = vpack.c.bf16 %v5486_v17, %v5485_v41  ;;  %v17579_v30 = vld [vmem:[#allocation61_spill] sm:$0xff]  ;;  %vm17582_vm3 = vnez %v17581_v50  ;;  %v17589_v41 = vld [vmem:[#allocation64_spill] sm:$0xff] }
0x1f5c   : > { %17572 = vst [vmem:[#allocation62_spill] sm:$0xff] %v17571_v49  ;;  %v17578_v63 = vsel %vm14202_vm1, 4294967295, %v17577_v63  ;;  %vm17580_vm11 = vnez %v17579_v30  ;;  %v17583_v37 = vsel %vm17582_vm3, %v13617_v43, 0.0  ;;  %vm17584_vm10 = vcmp.ge.f32.partialorder %v13518_v39, 0.0  ;;  %v17595_v50 = vld [vmem:[#allocation65_spill] sm:$0xff] }
0x1f5d   : > { %v5540_v21 = vsel %vm17580_vm11, %v14097_v26, 0.0  ;;  %v5603_v49 = vpack.c.bf16 %v5596_v31, %v17583_v37  ;;  %vm17586_vm5 = vnez %v17585_v32  ;;  %v17587_v58 = vmov 0  ;;  %v17593_v37 = vld [vmem:[#allocation12_spill] sm:$0xff]  ;;  %5653 = vrot.lane.b32.xlu1 %v5492_v3, %s17435_s27 }
0x1f5e   : > { %vm14218_vm14 = vmand %vm17586_vm5, %vm17584_vm10  ;;  %v5547_v35 = vpack.c.bf16 %v5540_v21, %v5539_v24  ;;  %vm17590_vm6 = vnez %v17589_v41  ;;  %vm17591_vm11 = vcmp.lt.s32.totalorder %v12908_v18, 1  ;;  %vm17594_vm9 = vcmp.ge.f32.partialorder %v17593_v37, 0.0  ;;  %v17600_v24 = vld [vmem:[#allocation66_spill] sm:$0xff]  ;;  %v17612_v41 = vld [vmem:[#allocation68_spill] sm:$0xff] }
0x1f5f   : > { %v17588_v58 = vsel %vm14218_vm14, 4294967295, %v17587_v58  ;;  %v5415_v17 = vsel %vm17590_vm6, %v14113_v16, 0.0  ;;  %v14227_v30 = vsel %vm17591_vm11, %v5353_v11, %v5354_v38  ;;  %vm17592_vm3 = vmmov %vm17591_vm11  ;;  %vm17596_vm10 = vnez %v17595_v50 }
0x1f60   : > { %v14231_v31 = vsel %vm17592_vm3, %v5352_v34, %v5353_v11  ;;  %vm14237_vm1 = vmand %vm17596_vm10, %vm17594_vm9  ;;  %v17597_v26 = vmov 0  ;;  %vm17599_vm14 = vcmp.le.f32.partialorder %v13218_v7, 7.0  ;;  %vm17601_vm6 = vnez %v17600_v24  ;;  %v17606_v11 = vld [vmem:[#allocation67_spill] sm:$0xff]  ;;  %5663 = vrot.lane.b32.xlu0 %v5547_v35, %s17435_s27 }
0x1f61   : > { %v17598_v26 = vsel %vm14237_vm1, 4294967295, %v17597_v26  ;;  %vm14245_vm12 = vmand %vm17601_vm6, %vm17599_vm14  ;;  %v17602_v21 = vmov 0  ;;  %vm17605_vm11 = vcmp.le.f32.partialorder %v13209_v57, 7.0  ;;  %vm17607_vm3 = vnez %v17606_v11  ;;  %5675 = vrot.lane.b32.xlu1 %v5603_v49, %s17435_s27 }
0x1f62   : > { %v17603_v21 = vsel %vm14245_vm12, 4294967295, %v17602_v21  ;;  %vm14253_vm0 = vmand %vm17607_vm3, %vm17605_vm11  ;;  %v17608_v34 = vmov 0  ;;  %vm17611_vm9 = vcmp.le.f32.partialorder %v13116_v45, 7.0  ;;  %vm17613_vm10 = vnez %v17612_v41  ;;  %v17621_v41 = vld [vmem:[#allocation42_spill] sm:$0xff] }
0x1f63   : > { %17604 = vst [vmem:[#allocation29_spill] sm:$0xff] %v17603_v21  ;;  %v17609_v34 = vsel %vm14253_vm0, 4294967295, %v17608_v34  ;;  %vm14261_vm1 = vmand %vm17613_vm10, %vm17611_vm9  ;;  %v17614_v50 = vmov 0  ;;  %vm17617_vm6 = vcmp.ge.f32.partialorder %v13395_v42, 0.0  ;;  %vm17620_vm11 = vnez %v17394_v55  ;;  %v17627_v21 = vld [vmem:[#allocation69_spill] sm:$0xff] }
0x1f64   : > { %17610 = vst [vmem:[#allocation32_spill] sm:$0xff] %v17609_v34  ;;  %v17615_v50 = vsel %vm14261_vm1, 4294967295, %v17614_v50  ;;  %vm14269_vm14 = vmand %vm17576_vm4, %vm17617_vm6  ;;  %v5414_v45 = vsel %vm17620_vm11, %v13998_v62, 0.0  ;;  %vm17622_vm10 = vnez %v17621_v41  ;;  %vm17625_vm9 = vcmp.lt.s32.totalorder %v12908_v18, 7 }
0x1f65   : > { %17616 = vst [vmem:[#allocation13_spill] sm:$0xff] %v17615_v50  ;;  %v5487_v11 = vsel %vm17622_vm10, %v14231_v31, 0.0  ;;  %v17623_v50 = vld [vmem:[#allocation43_spill] sm:$0xff]  ;;  %v14285_v44 = vsel %vm17625_vm9, %v5425_v10, %v5426_v46  ;;  %vm17626_vm4 = vcmp.le.f32.partialorder %v13083_v6, 7.0  ;;  %vm17628_vm6 = vnez %v17627_v21  ;;  %v17639_v21 = vld [vmem:[#allocation26_spill] sm:$0xff] }
0x1f66   : > { %vm17624_vm3 = vnez %v17623_v50  ;;  %vm14291_vm1 = vmand %vm17628_vm6, %vm17626_vm4  ;;  %v17629_v3 = vmov 0  ;;  %vm17631_vm11 = vcmp.le.f32.partialorder %v13407_v28, 7.0  ;;  %vm17632_vm10 = vnez %v17418_v5 }
0x1f67   : > { %v5488_v34 = vsel %vm17624_vm3, %v14227_v30, 0.0  ;;  %v17630_v3 = vsel %vm14291_vm1, 4294967295, %v17629_v3  ;;  %vm14299_vm0 = vmand %vm17632_vm10, %vm17631_vm11  ;;  %v17633_v41 = vmov 0  ;;  %vm17635_vm3 = vcmp.le.f32.partialorder %v13486_v2, 7.0 }
0x1f68   : > { %v17634_v41 = vsel %vm14299_vm0, 4294967295, %v17633_v41  ;;  %vm17636_vm9 = vnez %v17434_v14  ;;  %v17637_v6 = vmov 0  ;;  %vm17640_vm4 = vcmp.ge.f32.partialorder %v17639_v21, 0.0 }
0x1f69   : > { %vm14307_vm12 = vmand %vm17636_vm9, %vm17635_vm3  ;;  %v5420_v5 = vpack.c.bf16 %v5415_v17, %v5414_v45  ;;  %v5493_v55 = vpack.c.bf16 %v5488_v34, %v5487_v11  ;;  %v17643_v2 = vrot.slane %v14002_v8, 1  ;;  %vm17644_vm11 = vcmp.lt.s32.totalorder %v12908_v18, 7  ;;  %v17677_v45 = vld [vmem:[#allocation8_spill] sm:$0xff] }
0x1f6a   : > { %v17638_v6 = vsel %vm14307_vm12, 4294967295, %v17637_v6  ;;  %vm14315_vm6 = vmand %vm17586_vm5, %vm17640_vm4  ;;  %vm17645_vm10 = vnez %v17425_v29  ;;  %vm17646_vm3 = vcmp.le.f32.partialorder %v13309_v61, 7.0  ;;  %v17647_v32 = vmov 0 }
0x1f6b   : > { %v14324_v14 = vsel %vm17644_vm11, %v17643_v2, %v5425_v10  ;;  %v5542_v28 = vsel %vm17645_vm10, %v14285_v44, 0.0  ;;  %vm14333_vm5 = vmand %vm13992_vm13, %vm17646_vm3  ;;  %vm17649_vm9 = vcmp.le.f32.partialorder %v13279_v27, 7.0  ;;  %v17650_v35 = vmov 0  ;;  %v17653_v2 = vld [vmem:[#allocation49_spill] sm:$0xff]  ;;  %5643 = vrot.lane.b32.xlu0 %v5420_v5, %s17435_s27  ;;  %5655 = vrot.lane.b32.xlu1 %v5493_v55, %s17435_s27 }
0x1f6c   : > { %v17648_v32 = vsel %vm14333_vm5, 4294967295, %v17647_v32  ;;  %vm14341_vm4 = vmand %vm14012_vm2, %vm17649_vm9  ;;  %vm17652_vm11 = vcmp.ge.f32.partialorder %v13309_v61, 0.0  ;;  %vm17654_vm10 = vnez %v17653_v2  ;;  %vm17657_vm13 = vnez %v17442_v53  ;;  %v17679_v53 = vld [vmem:[#allocation55_spill] sm:$0xff] }
0x1f6d   : > { %v17651_v35 = vsel %vm14341_vm4, 4294967295, %v17650_v35  ;;  %vm14349_vm12 = vmand %vm17654_vm10, %vm17652_vm11  ;;  %v5541_v19 = vsel %vm17657_vm13, %v14324_v14, 0.0  ;;  %v5597_v48 = vsel %vm13956_vm8, %v13998_v62, 0.0  ;;  %v5598_v34 = vsel %vm13964_vm7, %v14113_v16, 0.0 }
0x1f6e   : > { %v5416_v11 = vsel %vm13972_vm15, %v14109_v59, 0.0  ;;  %vm17660_vm2 = vcmp.le.f32.partialorder %v13218_v7, 7.0  ;;  %vm17661_vm3 = vnez %v17488_v54  ;;  %v17662_v29 = vmov 0  ;;  %v17673_v54 = vld [vmem:[#allocation14_spill] sm:$0xff] }
0x1f6f   : > { %vm14369_vm9 = vmand %vm17661_vm3, %vm17660_vm2  ;;  %vm17664_vm11 = vcmp.le.f32.partialorder %v13209_v57, 7.0  ;;  %vm17665_vm8 = vnez %v17504_v0  ;;  %v17666_v1 = vmov 0  ;;  %vm17668_vm7 = vcmp.le.f32.partialorder %v12973_v60, 7.0 }
0x1f70   : > { %v17663_v29 = vsel %vm14369_vm9, 4294967295, %v17662_v29  ;;  %vm14377_vm13 = vmand %vm17665_vm8, %vm17664_vm11  ;;  %vm17669_vm15 = vnez %v17519_v4  ;;  %v17670_v7 = vmov 0  ;;  %vm17672_vm2 = vcmp.ge.f32.partialorder %v13279_v27, 0.0 }
0x1f71   : > { %v17667_v1 = vsel %vm14377_vm13, 4294967295, %v17666_v1  ;;  %vm14385_vm10 = vmand %vm17669_vm15, %vm17668_vm7  ;;  %vm17674_vm3 = vnez %v17673_v54  ;;  %v5548_v0 = vpack.c.bf16 %v5542_v28, %v5541_v19  ;;  %vm17678_vm8 = vnez %v17677_v45  ;;  %v17765_v45 = vld [vmem:[#allocation23_spill] sm:$0xff] }
0x1f72   : > { %v17671_v7 = vsel %vm14385_vm10, 4294967295, %v17670_v7  ;;  %vm14393_vm9 = vmand %vm17674_vm3, %vm17672_vm2  ;;  %v5625_v17 = vsel %vm17678_vm8, %v14285_v44, 0.0  ;;  %v5604_v60 = vpack.c.bf16 %v5598_v34, %v5597_v48  ;;  %v17680_v4 = vrot.slane %v17679_v53, 7 }
0x1f73   : > { %vm17681_vm15 = vcmp.lt.s32.totalorder %v12908_v18, 1  ;;  %vm17682_vm7 = vcmp.le.f32.partialorder %v13009_v56, 7.0  ;;  %vm17683_vm11 = vnez %v17551_v13  ;;  %v17684_v54 = vmov 0  ;;  %5665 = vrot.lane.b32.xlu0 %v5548_v0, %s17435_s27  ;;  %v17784_v0 = vld [vmem:[#allocation60_spill] sm:$0xff] }
0x1f74   : > { %v14404_v16 = vsel %vm17681_vm15, %v5354_v38, %v17680_v4  ;;  %vm14410_vm2 = vmand %vm17683_vm11, %vm17682_vm7  ;;  %vm17686_vm3 = vcmp.le.f32.partialorder %v17573_v40, 7.0  ;;  %vm17687_vm10 = vnez %v17578_v63  ;;  %v17688_v28 = vmov 0  ;;  %5677 = vrot.lane.b32.xlu1 %v5604_v60, %s17435_s27 }
0x1f75   : > { %v17685_v54 = vsel %vm14410_vm2, 4294967295, %v17684_v54  ;;  %vm14418_vm8 = vmand %vm17687_vm10, %vm17686_vm3  ;;  %vm17690_vm13 = vcmp.le.f32.partialorder %v13518_v39, 7.0  ;;  %vm17691_vm15 = vnez %v17588_v58  ;;  %v17692_v56 = vmov 0 }
0x1f76   : > { %v17689_v28 = vsel %vm14418_vm8, 4294967295, %v17688_v28  ;;  %vm14426_vm4 = vmand %vm17691_vm15, %vm17690_vm13  ;;  %vm17694_vm7 = vnez %v17478_v52  ;;  %v17695_v38 = vrot.slane %v17679_v53, 1  ;;  %vm17696_vm10 = vcmp.lt.s32.totalorder %v12908_v18, 7  ;;  %v17767_v18 = vld [vmem:[#allocation27_spill] sm:$0xff] }
0x1f77   : > { %v17693_v56 = vsel %vm14426_vm4, 4294967295, %v17692_v56  ;;  %v5489_v13 = vsel %vm17694_vm7, %v14404_v16, 0.0  ;;  %vm17697_vm3 = vmmov %vm17696_vm10  ;;  %vm17698_vm13 = vnez %v17482_v12  ;;  %vm17699_vm11 = vcmp.le.f32.partialorder %v13395_v42, 7.0 }
0x1f78   : > { %v14438_v63 = vsel %vm17696_vm10, %v5427_v15, %v17695_v38  ;;  %v5433_v19 = vsel %vm17697_vm3, %v5426_v46, %v5427_v15  ;;  %v5599_v58 = vsel %vm17698_vm13, %v14109_v59, 0.0  ;;  %vm14449_vm15 = vmand %vm14269_vm14, %vm17699_vm11  ;;  %v17700_v49 = vmov 0  ;;  %v17708_v46 = vld [vmem:[#allocation20_spill] sm:$0xff]  ;;  %v17710_v15 = vld [vmem:[#allocation38_spill] sm:$0xff] }
0x1f79   : > { %v17701_v49 = vsel %vm14449_vm15, 4294967295, %v17700_v49  ;;  %vm17703_vm7 = vcmp.le.f32.partialorder %v17639_v21, 7.0  ;;  %v17704_v48 = vmov 0  ;;  %vm17707_vm3 = vcmp.ge.f32.partialorder %v13109_v47, 0.0  ;;  %v17715_v38 = vld [vmem:[#allocation11_spill] sm:$0xff] }
0x1f7a   : > { %17702 = vst [vmem:[#allocation12_spill] sm:$0xff] %v17701_v49  ;;  %vm14457_vm10 = vmand %vm14315_vm6, %vm17703_vm7  ;;  %vm17709_vm13 = vnez %v17708_v46  ;;  %vm17711_vm14 = vnez %v17710_v15  ;;  %vm17713_vm11 = vnez %v17493_v51  ;;  %vm17714_vm6 = vnez %v17498_v33  ;;  %v17726_v46 = vld [vmem:[#allocation22_spill] sm:$0xff] }
0x1f7b   : > { %v17705_v48 = vsel %vm14457_vm10, 4294967295, %v17704_v48  ;;  %vm5333_vm4 = vmand %vm17709_vm13, %vm17707_vm3  ;;  %v17712_v24 = vsel %vm17711_vm14, %v17679_v53, 0.0  ;;  %v5543_v4 = vsel %vm17713_vm11, %v5433_v19, 0.0  ;;  %v5544_v50 = vsel %vm17714_vm6, %v14438_v63, 0.0  ;;  %v17763_v15 = vld [vmem:[#allocation62_spill] sm:$0xff] }
0x1f7c   : > { %17706 = vst [vmem:[#allocation66_spill] sm:$0xff] %v17705_v48  ;;  %v5421_v34 = vpack.c.bf16 %v17712_v24, %v5416_v11  ;;  %vm17716_vm7 = vnez %v17715_v38  ;;  %vm17717_vm10 = vcmp.le.f32.partialorder %v13309_v61, 7.0  ;;  %v17718_v5 = vmov 0 }
0x1f7d   : > { %v5626_v12 = vsel %vm17716_vm7, %v5433_v19, 0.0  ;;  %vm14481_vm13 = vmand %vm14349_vm12, %vm17717_vm10  ;;  %vm17721_vm3 = vcmp.le.f32.partialorder %v13279_v27, 7.0  ;;  %v17722_v11 = vmov 0  ;;  %vm17725_vm6 = vcmp.ge.f32.partialorder %v13259_v9, 0.0  ;;  %v17731_v27 = vld [vmem:[#allocation39_spill] sm:$0xff] }
0x1f7e   : > { %v17719_v5 = vsel %vm14481_vm13, 4294967295, %v17718_v5  ;;  %vm14489_vm11 = vmand %vm14393_vm9, %vm17721_vm3  ;;  %vm17727_vm7 = vnez %v17726_v46  ;;  %vm17728_vm15 = vnez %v17269_v36  ;;  %v5549_v24 = vpack.c.bf16 %v5544_v50, %v5543_v4  ;;  %v17761_v36 = vld [vmem:[#allocation79_spill] sm:$0xff]  ;;  %5645 = vrot.lane.b32.xlu0 %v5421_v34, %s17435_s27 }
0x1f7f   : > { %17720 = vst [vmem:[#allocation67_spill] sm:$0xff] %v17719_v5  ;;  %v17723_v11 = vsel %vm14489_vm11, 4294967295, %v17722_v11  ;;  %vm5334_vm14 = vmand %vm17727_vm7, %vm17725_vm6  ;;  %v17729_v61 = vsel %vm17728_vm15, %v13922_v20, 0.0  ;;  %v14501_v38 = vpack.c.bf16 %v5626_v12, %v5625_v17  ;;  %vm17732_vm12 = vnez %v17731_v27  ;;  %v17740_v17 = vld [vmem:[#allocation24_spill] sm:$0xff]  ;;  %v17760_v27 = vld [vmem:[#allocation51_spill] sm:$0xff] }
0x1f80   : > { %17724 = vst [vmem:[#allocation68_spill] sm:$0xff] %v17723_v11  ;;  %v5494_v10 = vpack.c.bf16 %v17729_v61, %v5489_v13  ;;  %v17733_v57 = vsel %vm17732_vm12, %v17679_v53, 0.0  ;;  %vm17734_vm9 = vcmp.le.f32.partialorder %v13109_v47, 7.0  ;;  %v17735_v33 = vmov 0  ;;  %v17741_v13 = vld [vmem:[#allocation76_spill] sm:$0xff] }
0x1f81   : > { %17730 = vst [vmem:[#allocation69_spill] sm:$0xff] %v14501_v38  ;;  %v14507_v51 = vpack.c.bf16 %v17733_v57, %v5599_v58  ;;  %vm14511_vm10 = vmand %vm5333_vm4, %vm17734_vm9  ;;  %vm17739_vm7 = vnez %v17535_v22  ;;  %vm17742_vm3 = vnez %v17741_v13  ;;  %v17743_v58 = vld [vmem:[#allocation77_spill] sm:$0xff]  ;;  %vm17745_vm4 = vcmp.le.f32.partialorder %v13259_v9, 7.0  ;;  %v17749_v61 = vld [vmem:[#allocation16_spill] sm:$0xff] }
0x1f82   : > { %v17736_v33 = vsel %vm14511_vm10, 4294967295, %v17735_v33  ;;  %v5382_v12 = vsel %vm17739_vm7, %v13922_v20, 0.0  ;;  %v5383_v4 = vsel %vm17742_vm3, %v17740_v17, 0.0  ;;  %vm17744_vm12 = vnez %v17743_v58  ;;  %vm14529_vm9 = vmand %vm5334_vm14, %vm17745_vm4  ;;  %v17751_v57 = vld [vmem:[#allocation21_spill] sm:$0xff]  ;;  %v17757_v58 = vld [vmem:[#allocation63_spill] sm:$0xff]  ;;  %5657 = vrot.lane.b32.xlu1 %v5494_v10, %s17435_s27  ;;  %5667 = vrot.lane.b32.xlu0 %v5549_v24, %s17435_s27 }
0x1f83   : > { %17737 = vst [vmem:[#allocation26_spill] sm:$0xff] %v17736_v33  ;;  %v5455_v47 = vsel %vm17744_vm12, %v13986_v25, 0.0  ;;  %v17746_v50 = vmov 0  ;;  %vm17750_vm15 = vcmp.le.f32.partialorder %v17749_v61, 7.0  ;;  %vm17752_vm6 = vnez %v17751_v57  ;;  %v17758_v22 = vld [vmem:[#allocation78_spill] sm:$0xff]  ;;  %v17773_v38 = vld [vmem:[#allocation19_spill] sm:$0xff] }
0x1f84   : > { %v17747_v50 = vsel %vm14529_vm9, 4294967295, %v17746_v50  ;;  %vm14537_vm10 = vmand %vm17752_vm6, %vm17750_vm15  ;;  %v17753_v46 = vmov 0  ;;  %v14542_v13 = vpack.c.bf16 %v5383_v4, %v5382_v12  ;;  %vm17759_vm12 = vnez %v17758_v22  ;;  %v17770_v4 = vld [vmem:[#allocation75_spill] sm:$0xff]  ;;  %v17771_v22 = vld [vmem:[#allocation18_spill] sm:$0xff] }
0x1f85   : > { %17748 = vst [vmem:[#allocation49_spill] sm:$0xff] %v17747_v50  ;;  %v17754_v46 = vsel %vm14537_vm10, 4294967295, %v17753_v46  ;;  %v5456_v9 = vsel %vm17759_vm12, %v17757_v58, 0.0  ;;  %vm17762_vm14 = vnez %v17761_v36  ;;  %vm17764_vm4 = vnez %v17763_v15 }
0x1f86   : > { %17755 = vst [vmem:[#allocation55_spill] sm:$0xff] %v17754_v46  ;;  %17756 = vst [vmem:[#allocation20_spill] sm:$0xff] %v14542_v13  ;;  %v5511_v52 = vsel %vm17762_vm14, %v17760_v27, 0.0  ;;  %v5512_v57 = vsel %vm17764_vm4, %v13617_v43, 0.0  ;;  %vm17766_vm15 = vcmp.ge.f32.partialorder %v17765_v45, 0.0  ;;  %vm17768_vm6 = vnez %v17767_v18  ;;  %v17775_v43 = vld [vmem:[#allocation15_spill] sm:$0xff]  ;;  %5679 = vrot.lane.b32.xlu1 %v14507_v51, %s17435_s27 }
0x1f87   : > { %vm5241_vm3 = vmand %vm17768_vm6, %vm17766_vm15  ;;  %v14558_v55 = vpack.c.bf16 %v5456_v9, %v5455_v47  ;;  %v14560_v12 = vpack.c.bf16 %v5512_v57, %v5511_v52  ;;  %vm17772_vm12 = vnez %v17771_v22  ;;  %vm17774_vm14 = vnez %v17773_v38  ;;  %v17777_v13 = vld [vmem:[#allocation28_spill] sm:$0xff]  ;;  %v17785_v47 = vld [vmem:[#allocation29_spill] sm:$0xff] }
0x1f88   : > { %v5457_v36 = vsel %vm17772_vm12, %v17770_v4, 0.0  ;;  %v5458_v15 = vsel %vm17774_vm14, %v14324_v14, 0.0  ;;  %vm17776_vm4 = vcmp.ge.f32.partialorder %v17775_v43, 0.0  ;;  %vm17778_vm7 = vnez %v17777_v13  ;;  %v17787_v57 = vld [vmem:[#allocation74_spill] sm:$0xff]  ;;  %v17788_v38 = vld [vmem:[#allocation32_spill] sm:$0xff]  ;;  %v17790_v13 = vld [vmem:[#allocation13_spill] sm:$0xff] }
0x1f89   : > { %17769 = vst [vmem:[#allocation22_spill] sm:$0xff] %v14560_v12  ;;  %vm5242_vm10 = vmand %vm17778_vm7, %vm17776_vm4  ;;  %vm17779_vm15 = vcmp.le.f32.partialorder %v17593_v37, 7.0  ;;  %vm17780_vm6 = vnez %v17598_v26  ;;  %v17781_v18 = vmov 0  ;;  %v14580_v52 = vpack.c.bf16 %v5458_v15, %v5457_v36  ;;  %v17853_v51 = vld [vmem:[#allocation37_spill] sm:$0xff] }
0x1f8a   : > { %vm14576_vm9 = vmand %vm17780_vm6, %vm17779_vm15  ;;  %vm17786_vm12 = vnez %v17785_v47  ;;  %vm17789_vm14 = vnez %v17788_v38  ;;  %vm17791_vm7 = vnez %v17790_v13  ;;  %vm17792_vm4 = vcmp.le.f32.partialorder %v17765_v45, 7.0 }
0x1f8b   : > { %v17782_v18 = vsel %vm14576_vm9, 4294967295, %v17781_v18  ;;  %v5384_v9 = vsel %vm17786_vm12, %v17784_v0, 0.0  ;;  %v5385_v22 = vsel %vm17789_vm14, %v17787_v57, 0.0  ;;  %v5567_v12 = vsel %vm17791_vm7, %v17784_v0, 0.0  ;;  %vm14593_vm15 = vmand %vm5241_vm3, %vm17792_vm4 }
0x1f8c   : > { %17783 = vst [vmem:[#allocation24_spill] sm:$0xff] %v17782_v18  ;;  %v17793_v26 = vmov 0  ;;  %v14597_v36 = vpack.c.bf16 %v5385_v22, %v5384_v9  ;;  %v5568_v15 = vsel %vm14291_vm1, %v17787_v57, 0.0  ;;  %v5459_v38 = vsel %vm14299_vm0, %v14285_v44, 0.0  ;;  %v17801_v9 = vld [vmem:[#allocation10_spill] sm:$0xff] }
0x1f8d   : > { %v17794_v26 = vsel %vm14593_vm15, 4294967295, %v17793_v26  ;;  %vm17796_vm6 = vnez %v17638_v6  ;;  %vm17797_vm14 = vcmp.le.f32.partialorder %v17775_v43, 7.0  ;;  %v17798_v45 = vmov 0 }
0x1f8e   : > { %17795 = vst [vmem:[#allocation16_spill] sm:$0xff] %v17794_v26  ;;  %v5460_v47 = vsel %vm17796_vm6, %v5433_v19, 0.0  ;;  %vm14609_vm12 = vmand %vm5242_vm10, %vm17797_vm14  ;;  %v14614_v22 = vpack.c.bf16 %v5568_v15, %v5567_v12  ;;  %v5386_v57 = vsel %vm14333_vm5, %v17801_v9, 0.0  ;;  %vm17802_vm3 = vnez %v17651_v35  ;;  %v17804_v19 = vld [vmem:[#allocation58_spill] sm:$0xff] }
0x1f8f   : > { %v17799_v45 = vsel %vm14609_vm12, 4294967295, %v17798_v45  ;;  %v14616_v0 = vpack.c.bf16 %v5460_v47, %v5459_v38  ;;  %v5387_v44 = vsel %vm17802_vm3, %v14231_v31, 0.0  ;;  %vm17803_vm4 = vcmp.ge.f32.partialorder %v13395_v42, 0.0  ;;  %v17810_v47 = vld [vmem:[#allocation65_spill] sm:$0xff] }
0x1f90   : > { %17800 = vst [vmem:[#allocation21_spill] sm:$0xff] %v17799_v45  ;;  %vm17805_vm10 = vnez %v17804_v19  ;;  %v14629_v60 = vpack.c.bf16 %v5387_v44, %v5386_v57  ;;  %vm17806_vm6 = vnez %v17663_v29  ;;  %vm17807_vm5 = vnez %v17667_v1 }
0x1f91   : > { %vm5307_vm14 = vmand %vm17805_vm10, %vm17803_vm4  ;;  %v5569_v38 = vsel %vm17806_vm6, %v17801_v9, 0.0  ;;  %v5570_v12 = vsel %vm17807_vm5, %v14231_v31, 0.0  ;;  %vm17808_vm3 = vnez %v17671_v7  ;;  %vm17809_vm0 = vcmp.ge.f32.partialorder %v17639_v21, 0.0  ;;  %v17812_v31 = vld [vmem:[#allocation72_spill] sm:$0xff] }
0x1f92   : > { %v5513_v43 = vsel %vm17808_vm3, %v14002_v8, 0.0  ;;  %vm17811_vm4 = vnez %v17810_v47  ;;  %v14644_v34 = vpack.c.bf16 %v5570_v12, %v5569_v38  ;;  %v5514_v15 = vsel %vm14410_vm2, %v13998_v62, 0.0 }
0x1f93   : > { %vm5308_vm1 = vmand %vm17811_vm4, %vm17809_vm0  ;;  %v5461_v9 = vsel %vm14418_vm8, %v14438_v63, 0.0  ;;  %vm17813_vm5 = vnez %v17693_v56  ;;  %vm17814_vm3 = vcmp.le.f32.partialorder %v13395_v42, 7.0  ;;  %v17815_v8 = vmov 0 }
0x1f94   : > { %v5462_v57 = vsel %vm17813_vm5, %v17812_v31, 0.0  ;;  %vm14657_vm6 = vmand %vm5307_vm14, %vm17814_vm3  ;;  %v14661_v44 = vpack.c.bf16 %v5514_v15, %v5513_v43  ;;  %vm17818_vm0 = vnez %v17701_v49  ;;  %vm17819_vm8 = vnez %v17705_v48 }
0x1f95   : > { %v17816_v8 = vsel %vm14657_vm6, 4294967295, %v17815_v8  ;;  %v14663_v38 = vpack.c.bf16 %v5462_v57, %v5461_v9  ;;  %v5388_v62 = vsel %vm17818_vm0, %v14227_v30, 0.0  ;;  %v5389_v12 = vsel %vm17819_vm8, %v14404_v16, 0.0  ;;  %v17825_v57 = vld [vmem:[#allocation35_spill] sm:$0xff] }
0x1f96   : > { %17817 = vst [vmem:[#allocation63_spill] sm:$0xff] %v17816_v8  ;;  %vm17820_vm5 = vcmp.le.f32.partialorder %v17639_v21, 7.0  ;;  %v17821_v42 = vmov 0  ;;  %v14678_v43 = vpack.c.bf16 %v5389_v12, %v5388_v62  ;;  %v5571_v15 = vsel %vm14481_vm13, %v14227_v30, 0.0  ;;  %v17829_v62 = vld [vmem:[#allocation17_spill] sm:$0xff]  ;;  %v17830_v12 = vld [vmem:[#allocation44_spill] sm:$0xff] }
0x1f97   : > { %vm14673_vm2 = vmand %vm5308_vm1, %vm17820_vm5  ;;  %v5572_v9 = vsel %vm14489_vm11, %v14404_v16, 0.0  ;;  %vm17824_vm3 = vnez %v17736_v33  ;;  %vm17826_vm1 = vcmp.ge.f32.partialorder %v17825_v57, 0.0  ;;  %vm17827_vm5 = vnez %v17653_v2  ;;  %v17832_v2 = vld [vmem:[#allocation14_spill] sm:$0xff]  ;;  %v17932_v33 = vld [vmem:[#allocation25_spill] sm:$0xff] }
0x1f98   : > { %v17822_v42 = vsel %vm14673_vm2, 4294967295, %v17821_v42  ;;  %v5623_v21 = vsel %vm17824_vm3, %v17770_v4, 0.0  ;;  %vm5337_vm14 = vmand %vm17827_vm5, %vm17826_vm1  ;;  %v14694_v10 = vpack.c.bf16 %v5572_v9, %v5571_v15  ;;  %vm17828_vm8 = vnez %v17747_v50  ;;  %v17930_v50 = vld [vmem:[#allocation8_spill] sm:$0xff] }
0x1f99   : > { %17823 = vst [vmem:[#allocation51_spill] sm:$0xff] %v17822_v42  ;;  %v5624_v30 = vsel %vm17828_vm8, %v14324_v14, 0.0  ;;  %v5515_v16 = vsel %vm14593_vm15, %v17829_v62, 0.0  ;;  %v5516_v4 = vsel %vm14609_vm12, %v14109_v59, 0.0  ;;  %vm17831_vm3 = vcmp.ge.f32.partialorder %v17830_v12, 0.0  ;;  %v17838_v62 = vld [vmem:[#allocation59_spill] sm:$0xff] }
0x1f9a   : > { %vm17833_vm1 = vnez %v17832_v2  ;;  %v14709_v24 = vpack.c.bf16 %v5624_v30, %v5623_v21  ;;  %v14711_v15 = vpack.c.bf16 %v5516_v4, %v5515_v16  ;;  %v5573_v14 = vsel %vm14657_vm6, %v13922_v20, 0.0  ;;  %v17840_v30 = vld [vmem:[#allocation54_spill] sm:$0xff] }
0x1f9b   : > { %vm5338_vm5 = vmand %vm17833_vm1, %vm17831_vm3  ;;  %v5574_v9 = vsel %vm14673_vm2, %v17740_v17, 0.0  ;;  %vm17834_vm8 = vcmp.le.f32.partialorder %v17825_v57, 7.0  ;;  %v17835_v59 = vmov 0  ;;  %vm17839_vm3 = vnez %v17754_v46 }
0x1f9c   : > { %vm14721_vm12 = vmand %vm5337_vm14, %vm17834_vm8  ;;  %v5601_v21 = vsel %vm17839_vm3, %v17838_v62, 0.0  ;;  %vm17841_vm1 = vnez %v17840_v30  ;;  %vm17843_vm6 = vnez %v17530_v23  ;;  %v14736_v17 = vpack.c.bf16 %v5574_v9, %v5573_v14  ;;  %v17850_v14 = vld [vmem:[#allocation34_spill] sm:$0xff]  ;;  %v17969_v30 = vld [vmem:[#allocation77_spill] sm:$0xff] }
0x1f9d   : > { %v17836_v59 = vsel %vm14721_vm12, 4294967295, %v17835_v59  ;;  %v17842_v16 = vsel %vm17841_vm1, %v17812_v31, 0.0  ;;  %v17844_v20 = vsel %vm17843_vm6, %v13986_v25, 0.0  ;;  %vm17845_vm8 = vcmp.le.f32.partialorder %v17830_v12, 7.0 }
0x1f9e   : > { %17837 = vst [vmem:[#allocation23_spill] sm:$0xff] %v17836_v59  ;;  %v5550_v4 = vpack.c.bf16 %v17844_v20, %v17842_v16  ;;  %vm14740_vm14 = vmand %vm5338_vm5, %vm17845_vm8  ;;  %v17846_v57 = vmov 0  ;;  %v5627_v2 = vsel %vm14721_vm12, %v14438_v63, 0.0  ;;  %vm17849_vm2 = vcmp.ge.f32.partialorder %v17749_v61, 0.0  ;;  %v10506_v20 = vld [vmem:[%s16627_s16 + $0x108] sm:$0xff]  }
0x1f9f   : > { %v17847_v57 = vsel %vm14740_vm14, 4294967295, %v17846_v57  ;;  %v5628_v42 = vsel %vm14740_vm14, %v17812_v31, 0.0  ;;  %vm17851_vm15 = vnez %v17850_v14  ;;  %v5602_v12 = vsel %vm14576_vm9, %v17760_v27, 0.0  ;;  %v17874_v14 = vld [vmem:[#allocation70_spill] sm:$0xff] }
0x1fa0   : > { %17848 = vst [vmem:[#allocation27_spill] sm:$0xff] %v17847_v57  ;;  %vm5243_vm0 = vmand %vm17851_vm15, %vm17849_vm2  ;;  %5669 = vrot.lane.b32.xlu0 %v5550_v4, %s17435_s27  ;;  %v14760_v9 = vpack.c.bf16 %v5628_v42, %v5627_v2  ;;  %vm17852_vm5 = vcmp.ge.f32.partialorder %v17593_v37, 0.0  ;;  %vm17854_vm8 = vnez %v17853_v51  ;;  %v5606_v63 = vpack.c.bf16 %v5602_v12, %v5601_v21  ;;  %v17873_v4 = vld [vmem:[#allocation20_spill] sm:$0xff] }
0x1fa1   : > { %vm5244_vm12 = vmand %vm17854_vm8, %vm17852_vm5  ;;  %vm17855_vm14 = vcmp.le.f32.partialorder %v17749_v61, 7.0  ;;  %v17856_v31 = vmov 0  ;;  %vm17859_vm2 = vcmp.le.f32.partialorder %v17593_v37, 7.0  ;;  %v17860_v16 = vmov 0 }
0x1fa2   : > { %vm14768_vm11 = vmand %vm5243_vm0, %vm17855_vm14  ;;  %5681 = vrot.lane.b32.xlu1 %v5606_v63, %s17435_s27  ;;  %vm17863_vm0 = vcmp.ge.f32.partialorder %v17573_v40, 0.0  ;;  %vm17865_vm8 = vcmp.le.f32.partialorder %v17573_v40, 7.0  ;;  %v17870_v42 = vmov 0  ;;  %v10508_v63 = vld [vmem:[%s16627_s16 + $0x118] sm:$0xff]  }
0x1fa3   : > { %v17857_v31 = vsel %vm14768_vm11, 4294967295, %v17856_v31  ;;  %vm14774_vm15 = vmand %vm5244_vm12, %vm17859_vm2  ;;  %v5517_v27 = vsel %vm14768_vm11, %v17679_v53, 0.0  ;;  %vm17864_vm12 = vcmp.ge.f32.partialorder %v13518_v39, 0.0  ;;  %v17866_v53 = vmov 0 }
0x1fa4   : > { %17858 = vst [vmem:[#allocation75_spill] sm:$0xff] %v17857_v31  ;;  %v17861_v16 = vsel %vm14774_vm15, 4294967295, %v17860_v16  ;;  %v5518_v61 = vsel %vm14774_vm15, %v17838_v62, 0.0  ;;  %vm5339_vm14 = vmand %vm17805_vm10, %vm17863_vm0  ;;  %vm17869_vm15 = vcmp.le.f32.partialorder %v13518_v39, 7.0  ;;  %vm16952_vm10 = vcmask 523264   ;;  %v17912_v31 = vld [vmem:[#allocation64_spill] sm:$0xff] }
0x1fa5   : > { %17862 = vst [vmem:[#allocation15_spill] sm:$0xff] %v17861_v16  ;;  %v14789_v37 = vpack.c.bf16 %v5518_v61, %v5517_v27  ;;  %vm5340_vm5 = vmand %vm17811_vm4, %vm17864_vm12 }
0x1fa6   : > { %vm14797_vm2 = vmand %vm5339_vm14, %vm17865_vm8  ;;  %v5640_v40 = vpop.permute.xlu0 %5639 }
0x1fa7   : > { %v17867_v53 = vsel %vm14797_vm2, 4294967295, %v17866_v53  ;;  %vm14803_vm11 = vmand %vm5340_vm5, %vm17869_vm15  ;;  %v5629_v19 = vsel %vm14797_vm2, %v13986_v25, 0.0  ;;  %v5686_v2 = vsel %vm16952_vm10, %v17873_v4, %v5640_v40  ;;  %v17875_v40 = vld [vmem:[#allocation22_spill] sm:$0xff] }
0x1fa8   : > { %17868 = vst [vmem:[#allocation28_spill] sm:$0xff] %v17867_v53  ;;  %v17871_v42 = vsel %vm14803_vm11, 4294967295, %v17870_v42  ;;  %v5630_v47 = vsel %vm14803_vm11, %v17757_v58, 0.0  ;;  %v10507_v58 = vld [vmem:[%s16627_s16 + $0x110] sm:$0xff]  }
0x1fa9   : > { %17872 = vst [vmem:[#allocation60_spill] sm:$0xff] %v17871_v42  ;;  %v14813_v62 = vpack.c.bf16 %v5630_v47, %v5629_v19 }
0x1fb6   : > { %v5652_v21 = vpop.permute.xlu1 %5651 }
0x1fb7   : > { %v5702_v39 = vsel %vm16952_vm10, %v14558_v55, %v5652_v21 }
0x1fb8   : > { %6087 = vmatprep.mubr.bf16.mxu0 %v5702_v39 }
0x1fb9   : > { %6088 = vmatmul.mubr.bf16.vlgmr.msra.gmra.mrb[104].mxu0 %v5686_v2 }
0x1fba   : > { %10239 = vmatpush3.bf16.msra.mxu0 %v17874_v14 }
0x1fbb   : > { %10240 = vmatprep.subr.bf16.mxu0 %v10506_v20 }
0x1fbe   : > { %10241 = vmatpush3.bf16.msra.mxu0 %v10506_v20 }
0x1fbf   : > { %v5642_v25 = vpop.permute.xlu0 %5641  ;;  %10242 = vmatprep.subr.bf16.mxu0 %v10507_v58 }
0x1fc0   : > { %v5690_v61 = vsel %vm16952_vm10, %v14597_v36, %v5642_v25 }
0x1fc2   : > { %10243 = vmatpush3.bf16.msra.mxu0 %v10507_v58 }
0x1fc3   : > { %10244 = vmatprep.subr.bf16.mxu0 %v10508_v63 }
0x1fc6   : > { %10245 = vmatpush3.bf16.msra.mxu0 %v10508_v63  ;;  %v17876_v63 = vld [vmem:[#allocation69_spill] sm:$0xff] }
0x1fcf   : > { %v5654_v12 = vpop.permute.xlu1 %5653 }
0x1fd0   : > { %v5706_v55 = vsel %vm16952_vm10, %v14580_v52, %v5654_v12 }
0x1fd1   : > { %6095 = vmatprep.mubr.bf16.mxu0 %v5706_v55 }
0x1fd2   : > { %v5664_v51 = vpop.permute.xlu0 %5663  ;;  %6096 = vmatmul.mubr.bf16.gmra.mrb[108].mxu0 %v5690_v61  ;;  %v10520_v61 = vld [vmem:[%s16627_s16 + $0x1a8] sm:$0xff]  }
0x1fd3   : > { %v5676_v27 = vpop.permute.xlu1 %5675  ;;  %v5718_v21 = vsel %vm16952_vm10, %v17875_v40, %v5664_v51  ;;  %v10517_v40 = vld [vmem:[%s16627_s16 + $0x178] sm:$0xff]  }
0x1fd4   : > { %v5734_v47 = vsel %vm16952_vm10, %v14614_v22, %v5676_v27  ;;  %v10513_v27 = vld [vmem:[%s16627_s16 + $0x170] sm:$0xff]  }
0x1fd5   : > { %6152 = vmatprep.mubr.bf16.mxu1 %v5734_v47  ;;  %v10515_v47 = vld [vmem:[%s16627_s16 + $0x130] sm:$0xff]  }
0x1fd6   : > { %6153 = vmatmul.mubr.bf16.vlgmr.msra.gmra.mrb[100].mxu1 %v5718_v21  ;;  %v10524_v21 = vld [vmem:[%s16627_s16 + $0x1b0] sm:$0xff]  }
0x1fdd   : > { %v5644_v19 = vpop.permute.xlu0 %5643  ;;  %v5656_v52 = vpop.permute.xlu1 %5655 }
0x1fde   : > { %v5710_v20 = vsel %vm16952_vm10, %v14616_v0, %v5656_v52  ;;  %v5694_v4 = vsel %vm16952_vm10, %v14629_v60, %v5644_v19  ;;  %v10522_v19 = vld [vmem:[%s16627_s16 + $0x1f0] sm:$0xff]   ;;  %v10526_v52 = vld [vmem:[%s16627_s16 + $0x1f8] sm:$0xff]  }
0x1fdf   : > { %6103 = vmatprep.mubr.bf16.mxu0 %v5710_v20  ;;  %v10521_v20 = vld [vmem:[%s16627_s16 + $0x180] sm:$0xff]  }
0x1fe0   : > { %6104 = vmatmul.mubr.bf16.gmra.mrb[112].mxu0 %v5694_v4  ;;  %v10530_v4 = vld [vmem:[%s16627_s16 + $0x200] sm:$0xff]  }
0x1fe5   : > { %v5666_v39 = vpop.permute.xlu0 %5665 }
0x1fe6   : > { %v5678_v36 = vpop.permute.xlu1 %5677  ;;  %v5722_v25 = vsel %vm16952_vm10, %v14661_v44, %v5666_v39  ;;  %v10519_v39 = vld [vmem:[%s16627_s16 + $0x138] sm:$0xff]  }
0x1fe7   : > { %v5738_v22 = vsel %vm16952_vm10, %v14644_v34, %v5678_v36  ;;  %v10528_v36 = vld [vmem:[%s16627_s16 + $0x1b8] sm:$0xff]  }
0x1fe8   : > { %6160 = vmatprep.mubr.bf16.mxu1 %v5738_v22  ;;  %v10525_v22 = vld [vmem:[%s16627_s16 + $0x188] sm:$0xff]  }
0x1fe9   : > { %6161 = vmatmul.mubr.bf16.gmra.mrb[104].mxu1 %v5722_v25  ;;  %v10532_v25 = vld [vmem:[%s16627_s16 + $0x1c0] sm:$0xff]  }
0x1ff0   : > { %v5646_v2 = vpop.permute.xlu0 %5645 }
0x1ff1   : > { %v5698_v60 = vsel %vm16952_vm10, %v14678_v43, %v5646_v2  ;;  %v10523_v2 = vld [vmem:[%s16627_s16 + $0x140] sm:$0xff]  }
0x1ff4   : > { %v5658_v14 = vpop.permute.xlu1 %5657  ;;  %v5668_v58 = vpop.permute.xlu0 %5667 }
0x1ff5   : > { %v5714_v0 = vsel %vm16952_vm10, %v14663_v38, %v5658_v14  ;;  %v5726_v34 = vsel %vm16952_vm10, %v14711_v15, %v5668_v58  ;;  %v10511_v15 = vld [vmem:[%s16627_s16 + $0x168] sm:$0xff]   ;;  %v10531_v58 = vld [vmem:[%s16627_s16 + $0x150] sm:$0xff]  }
0x1ff6   : > { %6111 = vmatprep.mubr.bf16.mxu0 %v5714_v0  ;;  %v10527_v14 = vld [vmem:[%s16627_s16 + $0x148] sm:$0xff]   ;;  %v10529_v0 = vld [vmem:[%s16627_s16 + $0x190] sm:$0xff]  }
0x1ff7   : > { %6112 = vmatmul.mubr.bf16.gmra.mrb[116].mxu0 %v5698_v60 }
0x1ff8   : > { %v5680_v12 = vpop.permute.xlu1 %5679  ;;  %10246 = vmatprep.mubr.msk.bf16.mxu0 %vm16952_vm10, %v14709_v24  ;;  %v10510_v24 = vld [vmem:[%s16627_s16 + $0x120] sm:$0xff]  }
0x1ff9   : > { %v5742_v51 = vsel %vm16952_vm10, %v14694_v10, %v5680_v12  ;;  %v10509_v10 = vld [vmem:[%s16627_s16 + $0x160] sm:$0xff]  }
0x1ffa   : > { %6168 = vmatprep.mubr.bf16.mxu1 %v5742_v51  ;;  %9575 = vmatprep.subr.bf16.mxu1 %v10509_v10 }
0x1ffb   : > { %6169 = vmatmul.mubr.bf16.gmra.mrb[108].mxu1 %v5726_v34 }
0x1ffc   : > { %9576 = vmatpush3.bf16.msra.mxu1 %v10510_v24 }
0x1ffd   : > { %9577 = vmatprep.subr.bf16.mxu1 %v10511_v15 }
0x1fff   : > { %10247 = vmatmul.mubr.msk.bf16.vlgmr.msra.gmra.mrb[120].mxu0 %vm16952_vm10, %v17876_v63  ;;  %v8900_v63 = vld [vmem:[%s16628_s17] ss:$0 sm:$0xff] }
0x2000   : > { %10250 = vmatprep.mubr.msk.bf16.mxu0 %vm16952_vm10, %v14760_v9  ;;  %v10516_v9 = vld [vmem:[%s16627_s16 + $0x1a0] sm:$0xff]  }
0x2007   : > { %10251 = vmatmul.mubr.msk.bf16.gmra.mrb[124].mxu0 %vm16952_vm10, %v14813_v62  ;;  %v10518_v62 = vld [vmem:[%s16627_s16 + $0x1e8] sm:$0xff]  }
0x2012   : > { %v5670_v55 = vpop.permute.xlu0 %5669 }
0x2013   : > { %v5730_v43 = vsel %vm16952_vm10, %v14789_v37, %v5670_v55  ;;  %v10512_v37 = vld [vmem:[%s16627_s16 + $0x128] sm:$0xff]  }
0x2014   : > { %v5682_v44 = vpop.permute.xlu1 %5681  ;;  %9578 = vmatpush3.bf16.msra.mxu1 %v10512_v37 }
0x2015   : > { %v5746_v38 = vsel %vm16952_vm10, %v14736_v17, %v5682_v44  ;;  %v10514_v17 = vld [vmem:[%s16627_s16 + $0x1e0] sm:$0xff]   ;;  %9579 = vmatprep.subr.bf16.mxu1 %v10513_v27 }
0x2016   : > { %6176 = vmatprep.mubr.bf16.mxu1 %v5746_v38  ;;  %9615 = vmatprep.subr.bf16.mxu0 %v10514_v17 }
0x2017   : > { %6177 = vmatmul.mubr.bf16.gmra.mrb[112].mxu1 %v5730_v43  ;;  %9616 = vmatpush3.bf16.msra.mxu0 %v10516_v9 }
0x2018   : > { %9617 = vmatprep.subr.bf16.mxu0 %v10518_v62  ;;  %9580 = vmatpush3.bf16.msra.mxu1 %v10515_v47 }
0x2019   : > { %9581 = vmatprep.subr.bf16.mxu1 %v10517_v40 }
0x201b   : > { %9618 = vmatpush3.bf16.msra.mxu0 %v10520_v61 }
0x201c   : > { %9619 = vmatprep.subr.bf16.mxu0 %v10522_v19  ;;  %9582 = vmatpush3.bf16.msra.mxu1 %v10519_v39 }
0x201d   : > { %9583 = vmatprep.subr.bf16.mxu1 %v10521_v20 }
0x201f   : > { %9620 = vmatpush3.bf16.msra.mxu0 %v10524_v21 }
0x2020   : > { %9621 = vmatprep.subr.bf16.mxu0 %v10526_v52  ;;  %9584 = vmatpush3.bf16.msra.mxu1 %v10523_v2 }
0x2021   : > { %9585 = vmatprep.subr.bf16.mxu1 %v10525_v22 }
0x2023   : > { %9622 = vmatpush3.bf16.msra.mxu0 %v10528_v36 }
0x2024   : > { %9623 = vmatprep.subr.bf16.mxu0 %v10530_v4  ;;  %9586 = vmatpush3.bf16.msra.mxu1 %v10527_v14 }
0x2025   : > { %9587 = vmatprep.subr.bf16.mxu1 %v10529_v0 }
0x2027   : > { %9624 = vmatpush3.bf16.msra.mxu0 %v10532_v25 }
0x2028   : > { %9588 = vmatpush3.bf16.msra.mxu1 %v10531_v58 }
0x208c   : > { %v9503_v12 = vpop.f32.mrb[104].mxu0 }
0x208d   : > { %v9504_v60 = vpop.f32.mrb[105].mxu0 }
0x208e   : > { %v9505_v51 = vadd.f32 %v9504_v60, %v9503_v12  ;;  %v9506_v34 = vpop.f32.mrb[106].mxu0 }
0x208f   : > { %v9507_v44 = vpop.f32.mrb[107].mxu0 }
0x2090   : > { %v9508_v38 = vadd.f32 %v9507_v44, %v9506_v34  ;;  %v6090_v37 = vadd.f32 %v9505_v51, %v8900_v63 }
0x2092   : > { %v6093_v47 = vadd.f32 %v9508_v38, %v8900_v63 }
0x20a5   : > { %v9509_v55 = vpop.f32.mrb[108].mxu0 }
0x20a6   : > { %v9510_v43 = vpop.f32.mrb[109].mxu0 }
0x20a7   : > { %v9511_v10 = vadd.f32 %v9510_v43, %v9509_v55  ;;  %v9512_v24 = vpop.f32.mrb[110].mxu0 }
0x20a8   : > { %v9513_v17 = vpop.f32.mrb[111].mxu0 }
0x20a9   : > { %v9543_v15 = vpop.f32.mrb[100].mxu1  ;;  %v9514_v62 = vadd.f32 %v9513_v17, %v9512_v24  ;;  %v6098_v14 = vadd.f32 %v9511_v10, %v8900_v63 }
0x20aa   : > { %v9544_v9 = vpop.f32.mrb[101].mxu1 }
0x20ab   : > { %v9545_v27 = vadd.f32 %v9544_v9, %v9543_v15  ;;  %v9546_v61 = vpop.f32.mrb[102].mxu1  ;;  %v6101_v51 = vadd.f32 %v9514_v62, %v8900_v63 }
0x20ac   : > { %v9547_v19 = vpop.f32.mrb[103].mxu1 }
0x20ad   : > { %v9548_v40 = vadd.f32 %v9547_v19, %v9546_v61  ;;  %v6155_v21 = vadd.f32 %v9545_v27, %v6090_v37 }
0x20af   : > { %v6158_v39 = vadd.f32 %v9548_v40, %v6093_v47 }
0x20b3   : > { %v9515_v52 = vpop.f32.mrb[112].mxu0 }
0x20b4   : > { %v9516_v20 = vpop.f32.mrb[113].mxu0 }
0x20b5   : > { %v9517_v36 = vadd.f32 %v9516_v20, %v9515_v52  ;;  %v9518_v4 = vpop.f32.mrb[114].mxu0 }
0x20b6   : > { %v9519_v22 = vpop.f32.mrb[115].mxu0 }
0x20b7   : > { %v9520_v0 = vadd.f32 %v9519_v22, %v9518_v4  ;;  %v6106_v27 = vadd.f32 %v9517_v36, %v8900_v63 }
0x20b9   : > { %v6109_v40 = vadd.f32 %v9520_v0, %v8900_v63 }
0x20bc   : > { %v9549_v2 = vpop.f32.mrb[104].mxu1 }
0x20bd   : > { %v9550_v25 = vpop.f32.mrb[105].mxu1 }
0x20be   : > { %v9551_v58 = vadd.f32 %v9550_v25, %v9549_v2  ;;  %v9552_v12 = vpop.f32.mrb[106].mxu1 }
0x20bf   : > { %v9553_v60 = vpop.f32.mrb[107].mxu1 }
0x20c0   : > { %v9554_v34 = vadd.f32 %v9553_v60, %v9552_v12  ;;  %v6163_v44 = vadd.f32 %v9551_v58, %v6098_v14 }
0x20c2   : > { %v6166_v38 = vadd.f32 %v9554_v34, %v6101_v51 }
0x20ca   : > { %v9521_v55 = vpop.f32.mrb[116].mxu0 }
0x20cb   : > { %v9522_v43 = vpop.f32.mrb[117].mxu0 }
0x20cc   : > { %v9523_v24 = vadd.f32 %v9522_v43, %v9521_v55  ;;  %v9524_v15 = vpop.f32.mrb[118].mxu0 }
0x20cd   : > { %v9525_v9 = vpop.f32.mrb[119].mxu0 }
0x20ce   : > { %v9555_v17 = vpop.f32.mrb[108].mxu1  ;;  %v9526_v61 = vadd.f32 %v9525_v9, %v9524_v15  ;;  %v6114_v12 = vadd.f32 %v9523_v24, %v8900_v63  ;;  %v17877_v24 = vld [vmem:[#allocation52_spill] sm:$0xff] }
0x20cf   : > { %v9556_v37 = vpop.f32.mrb[109].mxu1  ;;  %vm17878_vm4 = vnez %v17877_v24 }
0x20d0   : > { %v9557_v19 = vadd.f32 %v9556_v37, %v9555_v17  ;;  %v9558_v47 = vpop.f32.mrb[110].mxu1  ;;  %v6117_v55 = vadd.f32 %v9526_v61, %v8900_v63  ;;  %v10533_v63 = vld [vmem:[%s16627_s16 + $0x198] sm:$0xff]  }
0x20d1   : > { %v9559_v10 = vpop.f32.mrb[111].mxu1  ;;  %9589 = vmatprep.subr.bf16.mxu1 %v10533_v63 }
0x20d2   : > { %v9560_v52 = vadd.f32 %v9559_v10, %v9558_v47  ;;  %v6171_v20 = vadd.f32 %v9557_v19, %v6106_v27  ;;  %v10248_v4 = vpop.f32.mrb[120].mxu0  ;;  %v10534_v47 = vld [vmem:[%s16627_s16 + $0x208] sm:$0xff]   ;;  %v10535_v10 = vld [vmem:[%s16627_s16 + $0x158] sm:$0xff]  }
0x20d3   : > { %v6228_v2 = vadd.f32 %v10248_v4, %v6163_v44  ;;  %v6219_v22 = vpop.f32.mrb[121].mxu0  ;;  %9625 = vmatprep.subr.bf16.mxu0 %v10534_v47  ;;  %9590 = vmatpush3.bf16.msra.mxu1 %v10535_v10  ;;  %v17885_v4 = vld [vmem:[#allocation33_spill] sm:$0xff] }
0x20d4   : > { %v6174_v62 = vadd.f32 %v9560_v52, %v6109_v40  ;;  %v6220_v25 = vadd.f32 %v6219_v22, %v6155_v21  ;;  %v10249_v58 = vpop.f32.mrb[122].mxu0  ;;  %v10536_v40 = vld [vmem:[%s16627_s16 + $0x1c8] sm:$0xff]   ;;  %v17879_v22 = vld [vmem:[#allocation30_spill] sm:$0xff]  ;;  %vm17886_vm12 = vnez %v17885_v4  ;;  %v17889_v10 = vld [vmem:[#allocation57_spill] sm:$0xff] }
0x20d5   : > { %v14940_v60 = vmax.f32 %v6228_v2, 0.0  ;;  %v6231_v51 = vadd.f32 %v10249_v58, %v6166_v38  ;;  %v6222_v36 = vpop.f32.mrb[123].mxu0  ;;  %vm17880_vm15 = vnez %v17879_v22  ;;  %9626 = vmatpush3.bf16.msra.mxu0 %v10536_v40  ;;  %v10537_v40 = vld [vmem:[%s16627_s16 + $0x210] sm:$0xff]   ;;  %v17904_v22 = vld [vmem:[#allocation61_spill] sm:$0xff] }
0x20d6   : > { %v14942_v43 = vmax.f32 %v6220_v25, 0.0  ;;  %v6223_v0 = vadd.f32 %v6222_v36, %v6158_v39  ;;  %v17881_v36 = vld [vmem:[#allocation31_spill] sm:$0xff]  ;;  %9627 = vmatprep.subr.bf16.mxu0 %v10537_v40 }
0x20d7   : > { %v6260_v9 = vrot.slane %v14940_v60, 7  ;;  %v14946_v37 = vmax.f32 %v6231_v51, 0.0  ;;  %v6289_v27 = vsel %vm17878_vm4, %v14940_v60, 0.0  ;;  %vm17882_vm0 = vnez %v17881_v36 }
0x20d8   : > { %v16951_v38 = vrot.slane %v14942_v43, 7  ;;  %v14956_v61 = vmax.f32 %v6223_v0, 0.0  ;;  %v6287_v25 = vsel %vm17880_vm15, %v14942_v43, 0.0  ;;  %v17896_v36 = vrot.slane %v14940_v60, 1 }
0x20d9   : > { %v16950_v52 = vrot.slane %v14946_v37, 7  ;;  %v17906_v57 = vrot.slane %v14942_v43, 7 }
0x20da   : > { %v6299_v58 = vrot.slane %v14956_v61, 1  ;;  %v10252_v51 = vpop.f32.mrb[124].mxu0  ;;  %v6288_v0 = vsel %vm17882_vm0, %v14956_v61, 0.0 }
0x20ea   : > { %v9561_v14 = vpop.f32.mrb[112].mxu1 }
0x20eb   : > { %v9562_v34 = vpop.f32.mrb[113].mxu1 }
0x20ec   : > { %v9563_v15 = vadd.f32 %v9562_v34, %v9561_v14  ;;  %v9564_v17 = vpop.f32.mrb[114].mxu1  ;;  %v6259_v14 = vrot.slane %v14956_v61, 7 }
0x20ed   : > { %v9565_v21 = vpop.f32.mrb[115].mxu1 }
0x20ee   : > { %v9566_v19 = vadd.f32 %v9565_v21, %v9564_v17  ;;  %v6179_v2 = vadd.f32 %v9563_v15, %v6114_v12  ;;  %v6235_v21 = vpop.f32.mrb[125].mxu0  ;;  %v14977_v12 = vpack.c.bf16 %v6289_v27, %v6288_v0  ;;  %v17883_v15 = vld [vmem:[#allocation6_spill] sm:$0xff] }
0x20ef   : > { %vm17884_vm14 = vcmp.lt.s32.totalorder %v17883_v15, 1  ;;  %v10253_v39 = vpop.f32.mrb[126].mxu0  ;;  %vm17897_vm10 = vcmp.lt.s32.totalorder %v17883_v15, 7  ;;  %vm17945_vm0 = vcmp.lt.s32.totalorder %v17883_v15, 7 }
0x20f0   : > { %v6182_v34 = vadd.f32 %v9566_v19, %v6117_v55  ;;  %v6244_v17 = vadd.f32 %v10252_v51, %v6179_v2  ;;  %v14983_v63 = vsel %vm17884_vm14, %v6260_v9, %v16950_v52  ;;  %v6374_v55 = vsel %vm17886_vm12, %v14956_v61, 0.0  ;;  %vm17887_vm5 = vmmov %vm17884_vm14  ;;  %v17891_v52 = vld [vmem:[#allocation40_spill] sm:$0xff] }
0x20f1   : > { %v6236_v19 = vadd.f32 %v6235_v21, %v6171_v20  ;;  %v14992_v47 = vsel %vm17887_vm5, %v16951_v38, %v6259_v14  ;;  %vm17888_vm8 = vmmov %vm17887_vm5  ;;  %vm17890_vm14 = vnez %v17889_v10  ;;  %v10538_v20 = vld [vmem:[%s16627_s16 + $0x1d0] sm:$0xff]   ;;  %v6238_v21 = vpop.f32.mrb[127].mxu0  ;;  %vm17892_vm5 = vnez %v17891_v52 }
0x20f2   : > { %v14996_v27 = vsel %vm17888_vm8, %v6259_v14, %v6260_v9  ;;  %v6329_v2 = vsel %vm17890_vm14, %v14983_v63, 0.0  ;;  %v15007_v51 = vmax.f32 %v6244_v17, 0.0  ;;  %v6247_v0 = vadd.f32 %v10253_v39, %v6182_v34  ;;  %v17893_v14 = vld [vmem:[#allocation56_spill] sm:$0xff]  ;;  %9628 = vmatpush3.bf16.msra.mxu0 %v10538_v20 }
0x20f3   : > { %v6327_v9 = vsel %vm17892_vm5, %v14992_v47, 0.0  ;;  %vm17894_vm8 = vnez %v17893_v14  ;;  %v15015_v44 = vmax.f32 %v6236_v19, 0.0  ;;  %v6239_v10 = vadd.f32 %v6238_v21, %v6174_v62  ;;  %v10539_v62 = vld [vmem:[%s16627_s16 + $0x218] sm:$0xff]  }
0x20f4   : > { %v6328_v38 = vsel %vm17894_vm8, %v14996_v27, 0.0  ;;  %v15021_v17 = vsel %vm17897_vm10, %v6299_v58, %v17896_v36  ;;  %v6264_v39 = vrot.slane %v15007_v51, 7  ;;  %v15025_v52 = vmax.f32 %v6247_v0, 0.0  ;;  %vm17899_vm8 = vmmov %vm17897_vm10  ;;  %v17900_v0 = vld [vmem:[#allocation46_spill] sm:$0xff]  ;;  %9629 = vmatprep.subr.bf16.mxu0 %v10539_v62 }
0x20f5   : > { %17895 = vst [vmem:[#allocation74_spill] sm:$0xff] %v15015_v44  ;;  %v6335_v4 = vpack.c.bf16 %v6329_v2, %v6328_v38  ;;  %v17898_v14 = vrot.slane %v14942_v43, 1  ;;  %v10540_v38 = vld [vmem:[%s16627_s16 + $0x1d8] sm:$0xff]   ;;  %v6262_v36 = vrot.slane %v15015_v44, 7  ;;  %v6302_v2 = vrot.slane %v15015_v44, 1 }
0x20f6   : > { %v15041_v40 = vmax.f32 %v6239_v10, 0.0  ;;  %vm17901_vm10 = vnez %v17900_v0  ;;  %v6265_v20 = vrot.slane %v15025_v52, 7  ;;  %v6305_v21 = vrot.slane %v15025_v52, 1  ;;  %9630 = vmatpush3.bf16.msra.mxu0 %v10540_v38 }
0x20f7   : > { %v15031_v19 = vsel %vm17899_vm8, %v17898_v14, %v6299_v58  ;;  %v17902_v14 = vld [vmem:[#allocation36_spill] sm:$0xff]  ;;  %vm17905_vm5 = vnez %v17904_v22  ;;  %v17910_v22 = vld [vmem:[#allocation41_spill] sm:$0xff]  ;;  %vm17913_vm14 = vnez %v17912_v31  ;;  %v17917_v38 = vrot.slane %v14946_v37, 7 }
0x20f8   : > { %v6350_v58 = vsel %vm17901_vm10, %v15031_v19, 0.0  ;;  %vm17903_vm8 = vnez %v17902_v14  ;;  %v6351_v24 = vsel %vm17905_vm5, %v15021_v17, 0.0  ;;  %v6263_v10 = vrot.slane %v15041_v40, 7  ;;  %v17908_v14 = vld [vmem:[#allocation53_spill] sm:$0xff] }
0x20f9   : > { %v6286_v34 = vsel %vm17903_vm8, %v15025_v52, 0.0  ;;  %v6303_v42 = vrot.slane %v15041_v40, 1  ;;  %v6358_v0 = vpack.c.bf16 %v6351_v24, %v6350_v58  ;;  %vm17907_vm10 = vcmp.lt.s32.totalorder %v17883_v15, 1  ;;  %v17914_v24 = vld [vmem:[#allocation45_spill] sm:$0xff] }
0x20fa   : > { %v6294_v53 = vpack.c.bf16 %v6287_v25, %v6286_v34  ;;  %v15060_v59 = vsel %vm17907_vm10, %v6265_v20, %v17906_v57  ;;  %vm17909_vm8 = vnez %v17908_v14  ;;  %vm17911_vm5 = vnez %v17910_v22  ;;  %v15082_v22 = vld [vmem:[%s16627_s16 + $0x220] sm:$0xff]  }
0x20fb   : > { %v6375_v16 = vsel %vm17909_vm8, %v14940_v60, 0.0  ;;  %v6290_v62 = vsel %vm17911_vm5, %v14946_v37, 0.0  ;;  %v6291_v8 = vsel %vm17913_vm14, %v15015_v44, 0.0  ;;  %vm17915_vm12 = vnez %v17914_v24  ;;  %17916 = vst [vmem:[#allocation10_spill] sm:$0xff] %v15082_v22  ;;  %vm17918_vm14 = vmmov %vm17907_vm10  ;;  %v17919_v24 = vld [vmem:[#allocation43_spill] sm:$0xff]  ;;  %10254 = vmatprep.subr.bf16.mxu1 %v15082_v22 }
0x20fc   : > { %6402 = vrot.lane.b32.xlu0 %v6294_v53, %s17435_s27  ;;  %v6326_v57 = vsel %vm17915_vm12, %v15060_v59, 0.0  ;;  %v6382_v25 = vpack.c.bf16 %v6375_v16, %v6374_v55  ;;  %v6296_v34 = vpack.c.bf16 %v6291_v8, %v6290_v62  ;;  %v15077_v58 = vsel %vm17907_vm10, %v6262_v36, %v6263_v10  ;;  %v17923_v62 = vld [vmem:[#allocation42_spill] sm:$0xff] }
0x20fd   : > { %v6334_v31 = vpack.c.bf16 %v6327_v9, %v6326_v57  ;;  %v15088_v53 = vsel %vm17918_vm14, %v17917_v38, %v6262_v36  ;;  %vm17920_vm12 = vnez %v17919_v24  ;;  %v17921_v16 = vrot.slane %v14946_v37, 1  ;;  %v17928_v38 = vld [vmem:[#allocation9_spill] sm:$0xff] }
0x20fe   : > { %v6331_v8 = vsel %vm17920_vm12, %v15077_v58, 0.0  ;;  %vm17922_vm10 = vcmp.lt.s32.totalorder %v17883_v15, 7  ;;  %vm17924_vm5 = vnez %v17923_v62  ;;  %v17926_v14 = vrot.slane %v14940_v60, 1 }
0x20ff   : > { %v15097_v55 = vsel %vm17922_vm10, %v17921_v16, %v6302_v2  ;;  %v6330_v9 = vsel %vm17924_vm5, %v15088_v53, 0.0  ;;  %v17925_v57 = vmov %v17921_v16  ;;  %vm17927_vm14 = vmmov %vm17922_vm10  ;;  %vm17929_vm12 = vnez %v17928_v38  ;;  %6414 = vrot.lane.b32.xlu1 %v6334_v31, %s17435_s27  ;;  %v17936_v38 = vld [vmem:[#allocation47_spill] sm:$0xff]  ;;  %v17938_v31 = vld [vmem:[#allocation48_spill] sm:$0xff] }
0x2100   : > { %v15108_v36 = vsel %vm17927_vm14, %v17926_v14, %v17925_v57  ;;  %v6353_v24 = vsel %vm17929_vm12, %v15097_v55, 0.0  ;;  %vm17931_vm10 = vnez %v17930_v50  ;;  %v6336_v62 = vpack.c.bf16 %v6331_v8, %v6330_v9  ;;  %v17934_v14 = vld [vmem:[#allocation71_spill] sm:$0xff]  ;;  %6404 = vrot.lane.b32.xlu0 %v14977_v12, %s17435_s27  ;;  %v17940_v9 = vld [vmem:[#allocation38_spill] sm:$0xff] }
0x2101   : > { %v6388_v16 = vsel %vm17931_vm10, %v15097_v55, 0.0  ;;  %vm17933_vm5 = vnez %v17932_v33  ;;  %vm17935_vm14 = vnez %v17934_v14  ;;  %vm17937_vm12 = vnez %v17936_v38 }
0x2102   : > { %v6352_v45 = vsel %vm17933_vm5, %v15108_v36, 0.0  ;;  %v6376_v57 = vsel %vm17935_vm14, %v14946_v37, 0.0  ;;  %v6377_v26 = vsel %vm17937_vm12, %v15015_v44, 0.0  ;;  %vm17939_vm10 = vnez %v17938_v31 }
0x2103   : > { %v6359_v50 = vpack.c.bf16 %v6353_v24, %v6352_v45  ;;  %v15129_v22 = vpack.c.bf16 %v6377_v26, %v6376_v57  ;;  %v6292_v8 = vsel %vm17939_vm10, %v15041_v40, 0.0  ;;  %vm17941_vm5 = vnez %v17940_v9  ;;  %v17946_v24 = vld [vmem:[#allocation2_spill] sm:$0xff]  ;;  %6416 = vrot.lane.b32.xlu1 %v6335_v4, %s17435_s27  ;;  %v17959_v4 = vld [vmem:[#allocation39_spill] sm:$0xff] }
0x2104   : > { %v6293_v33 = vsel %vm17941_vm5, %v15007_v51, 0.0  ;;  %vm17942_vm14 = vcmp.lt.s32.totalorder %v17883_v15, 1  ;;  %v17944_v26 = vrot.slane %v15007_v51, 1  ;;  %vm17947_vm10 = vnez %v17946_v24  ;;  %v17955_v24 = vld [vmem:[#allocation11_spill] sm:$0xff]  ;;  %6426 = vrot.lane.b32.xlu0 %v6358_v0, %s17435_s27 }
0x2105   : > { %v15137_v14 = vpack.c.bf16 %v6293_v33, %v6292_v8  ;;  %v15141_v38 = vsel %vm17942_vm14, %v6264_v39, %v6265_v20  ;;  %vm17943_vm12 = vmmov %vm17942_vm14  ;;  %v17948_v33 = vld [vmem:[#allocation50_spill] sm:$0xff] }
0x2106   : > { %v15145_v12 = vsel %vm17943_vm12, %v6263_v10, %v6264_v39  ;;  %v15151_v45 = vsel %vm17945_vm0, %v6303_v42, %v17944_v26  ;;  %vm17949_vm5 = vnez %v17948_v33  ;;  %vm17950_vm14 = vmmov %vm17945_vm0  ;;  %v17951_v39 = vld [vmem:[#allocation73_spill] sm:$0xff]  ;;  %v17953_v26 = vld [vmem:[#allocation7_spill] sm:$0xff] }
0x2107   : > { %v6332_v57 = vsel %vm17947_vm10, %v15145_v12, 0.0  ;;  %v6333_v8 = vsel %vm17949_vm5, %v15141_v38, 0.0  ;;  %v6308_v20 = vsel %vm17950_vm14, %v6302_v2, %v6303_v42  ;;  %vm17952_vm12 = vnez %v17951_v39  ;;  %v17957_v33 = vld [vmem:[#allocation3_spill] sm:$0xff]  ;;  %6438 = vrot.lane.b32.xlu1 %v6382_v25, %s17435_s27 }
0x2108   : > { %v6355_v10 = vsel %vm17952_vm12, %v15151_v45, 0.0  ;;  %v15165_v9 = vpack.c.bf16 %v6333_v8, %v6332_v57  ;;  %vm17954_vm0 = vnez %v17953_v26  ;;  %vm17956_vm10 = vnez %v17955_v24  ;;  %6406 = vrot.lane.b32.xlu0 %v6296_v34, %s17435_s27  ;;  %v17979_v34 = vld [vmem:[#allocation19_spill] sm:$0xff] }
0x2109   : > { %v6354_v31 = vsel %vm17954_vm0, %v6308_v20, 0.0  ;;  %v6389_v44 = vsel %vm17956_vm10, %v6308_v20, 0.0  ;;  %vm17958_vm5 = vnez %v17957_v33  ;;  %vm17960_vm14 = vnez %v17959_v4 }
0x210a   : > { %v6378_v48 = vsel %vm17958_vm5, %v15041_v40, 0.0  ;;  %v15175_v42 = vpack.c.bf16 %v6355_v10, %v6354_v31  ;;  %v15177_v2 = vpack.c.bf16 %v6389_v44, %v6388_v16  ;;  %v6379_v57 = vsel %vm17960_vm14, %v15007_v51, 0.0  ;;  %v17965_v10 = vld [vmem:[#allocation5_spill] sm:$0xff] }
0x210b   : > { %v17961_v8 = vrot.slane %v15007_v51, 1  ;;  %vm17962_vm0 = vcmp.lt.s32.totalorder %v17883_v15, 7  ;;  %v15188_v26 = vpack.c.bf16 %v6379_v57, %v6378_v48  ;;  %v17963_v33 = vrot.slane %v14942_v43, 1  ;;  %6418 = vrot.lane.b32.xlu1 %v6336_v62, %s17435_s27 }
0x210c   : > { %vm17964_vm10 = vmmov %vm17962_vm0  ;;  %v6380_v16 = vsel %vm17839_vm3, %v15025_v52, 0.0  ;;  %v6381_v48 = vsel %vm14576_vm9, %v14942_v43, 0.0  ;;  %vm17970_vm3 = vnez %v17969_v30  ;;  %6428 = vrot.lane.b32.xlu0 %v6359_v50, %s17435_s27 }
0x210d   : > { %v15186_v24 = vsel %vm17962_vm0, %v17961_v8, %v6305_v21  ;;  %v15194_v0 = vsel %vm17964_vm10, %v6305_v21, %v17963_v33  ;;  %vm17966_vm10 = vnez %v17965_v10  ;;  %v17967_v33 = vld [vmem:[#allocation76_spill] sm:$0xff]  ;;  %v15217_v46 = vpack.c.bf16 %v6381_v48, %v6380_v16  ;;  %v17971_v10 = vld [vmem:[#allocation78_spill] sm:$0xff] }
0x210e   : > { %v6356_v44 = vsel %vm17841_vm1, %v15186_v24, 0.0  ;;  %v6357_v31 = vsel %vm17843_vm6, %v15194_v0, 0.0  ;;  %v6274_v21 = vsel %vm17966_vm10, %v15141_v38, 0.0  ;;  %vm17968_vm0 = vnez %v17967_v33  ;;  %v17973_v33 = vld [vmem:[#allocation79_spill] sm:$0xff] }
0x210f   : > { %v6275_v57 = vsel %vm17968_vm0, %v15060_v59, 0.0  ;;  %v15215_v8 = vpack.c.bf16 %v6357_v31, %v6356_v44  ;;  %v6314_v18 = vsel %vm17970_vm3, %v15194_v0, 0.0  ;;  %vm17972_vm10 = vnez %v17971_v10  ;;  %v17975_v44 = vld [vmem:[#allocation62_spill] sm:$0xff]  ;;  %6440 = vrot.lane.b32.xlu1 %v15129_v22, %s17435_s27 }
0x2110   : > { %v15219_v23 = vpack.c.bf16 %v6275_v57, %v6274_v21  ;;  %v6315_v4 = vsel %vm17972_vm10, %v15031_v19, 0.0  ;;  %vm17974_vm0 = vnez %v17973_v33  ;;  %vm17976_vm9 = vnez %v17975_v44  ;;  %v17977_v31 = vld [vmem:[#allocation18_spill] sm:$0xff]  ;;  %6408 = vrot.lane.b32.xlu0 %v15137_v14, %s17435_s27 }
0x2111   : > { %v6338_v25 = vsel %vm17974_vm0, %v14942_v43, 0.0  ;;  %v6339_v16 = vsel %vm17976_vm9, %v14956_v61, 0.0  ;;  %vm17978_vm6 = vnez %v17977_v31  ;;  %v6322_v21 = vpack.c.bf16 %v6315_v4, %v6314_v18  ;;  %v17982_v31 = vld [vmem:[#allocation29_spill] sm:$0xff]  ;;  %v17984_v4 = vld [vmem:[#allocation32_spill] sm:$0xff]  ;;  %v17998_v22 = vld [vmem:[#allocation66_spill] sm:$0xff] }
0x2112   : > { %v6316_v48 = vsel %vm17978_vm6, %v15021_v17, 0.0  ;;  %v15237_v57 = vpack.c.bf16 %v6339_v16, %v6338_v25  ;;  %vm17980_vm3 = vnez %v17979_v34  ;;  %v6362_v33 = vsel %vm17791_vm7, %v14992_v47, 0.0  ;;  %v18005_v14 = vld [vmem:[#allocation26_spill] sm:$0xff] }
0x2113   : > { %v6317_v10 = vsel %vm17980_vm3, %v15108_v36, 0.0  ;;  %vm17981_vm9 = vnez %v17630_v3  ;;  %vm17983_vm6 = vnez %v17982_v31  ;;  %vm17985_vm0 = vnez %v17984_v4  ;;  %6420 = vrot.lane.b32.xlu1 %v15165_v9, %s17435_s27 }
0x2114   : > { %v15245_v43 = vpack.c.bf16 %v6317_v10, %v6316_v48  ;;  %v6363_v61 = vsel %vm17981_vm9, %v14996_v27, 0.0  ;;  %v6276_v18 = vsel %vm17983_vm6, %v14992_v47, 0.0  ;;  %v6277_v25 = vsel %vm17985_vm0, %v14996_v27, 0.0  ;;  %6430 = vrot.lane.b32.xlu0 %v15175_v42, %s17435_s27 }
0x2115   : > { %v15257_v16 = vpack.c.bf16 %v6363_v61, %v6362_v33  ;;  %v15259_v13 = vpack.c.bf16 %v6277_v25, %v6276_v18  ;;  %vm17986_vm7 = vnez %v17634_v41  ;;  %vm17987_vm9 = vnez %v17638_v6 }
0x2116   : > { %v6318_v10 = vsel %vm17986_vm7, %v15097_v55, 0.0  ;;  %v6319_v48 = vsel %vm17987_vm9, %v6308_v20, 0.0  ;;  %vm17988_vm0 = vnez %v17663_v29  ;;  %vm17989_vm6 = vnez %v17667_v1 }
0x2117   : > { %v15267_v47 = vpack.c.bf16 %v6319_v48, %v6318_v10  ;;  %v6364_v27 = vsel %vm17988_vm0, %v14983_v63, 0.0  ;;  %v6365_v62 = vsel %vm17989_vm6, %v15088_v53, 0.0  ;;  %vm17990_vm3 = vnez %v17648_v32  ;;  %6442 = vrot.lane.b32.xlu1 %v15188_v26, %s17435_s27 }
0x2118   : > { %v6278_v33 = vsel %vm17990_vm3, %v14983_v63, 0.0  ;;  %v15278_v55 = vpack.c.bf16 %v6365_v62, %v6364_v27  ;;  %vm17991_vm9 = vnez %v17651_v35  ;;  %vm17992_vm7 = vnez %v17671_v7  ;;  %6432 = vrot.lane.b32.xlu0 %v15215_v8, %s17435_s27 }
0x2119   : > { %v6279_v50 = vsel %vm17991_vm9, %v15088_v53, 0.0  ;;  %v6340_v20 = vsel %vm17992_vm7, %v14940_v60, 0.0  ;;  %vm17993_vm0 = vnez %v17685_v54  ;;  %vm17994_vm3 = vnez %v17689_v28 }
0x211a   : > { %v6341_v61 = vsel %vm17993_vm0, %v14946_v37, 0.0  ;;  %v15289_v18 = vpack.c.bf16 %v6279_v50, %v6278_v33  ;;  %v6320_v63 = vsel %vm17994_vm3, %v15151_v45, 0.0  ;;  %vm17995_vm6 = vnez %v17693_v56  ;;  %v18000_v33 = vld [vmem:[#allocation74_spill] sm:$0xff]  ;;  %v18001_v50 = vld [vmem:[#allocation16_spill] sm:$0xff] }
0x211b   : > { %v15291_v25 = vpack.c.bf16 %v6341_v61, %v6340_v20  ;;  %v6321_v53 = vsel %vm17995_vm6, %v15186_v24, 0.0  ;;  %v6366_v37 = vsel %vm14481_vm13, %v15077_v58, 0.0  ;;  %vm17996_vm0 = vnez %v17723_v11  ;;  %v18003_v61 = vld [vmem:[#allocation21_spill] sm:$0xff]  ;;  %6444 = vrot.lane.b32.xlu1 %v15217_v46, %s17435_s27 }
0x211c   : > { %v15301_v60 = vpack.c.bf16 %v6321_v53, %v6320_v63  ;;  %v6367_v10 = vsel %vm17996_vm0, %v15145_v12, 0.0  ;;  %vm17997_vm3 = vnez %v17701_v49  ;;  %vm17999_vm6 = vnez %v17998_v22 }
0x211d   : > { %v6280_v48 = vsel %vm17997_vm3, %v15077_v58, 0.0  ;;  %v15314_v27 = vpack.c.bf16 %v6367_v10, %v6366_v37  ;;  %v6281_v62 = vsel %vm17999_vm6, %v15145_v12, 0.0  ;;  %vm18002_vm13 = vnez %v18001_v50  ;;  %v18007_v10 = vld [vmem:[#allocation49_spill] sm:$0xff] }
0x211e   : > { %v6342_v20 = vsel %vm18002_vm13, %v18000_v33, 0.0  ;;  %vm18004_vm0 = vnez %v18003_v61  ;;  %v15325_v53 = vpack.c.bf16 %v6281_v62, %v6280_v48  ;;  %vm18006_vm3 = vnez %v18005_v14  ;;  %v18009_v33 = vld [vmem:[#allocation63_spill] sm:$0xff] }
0x211f   : > { %v6343_v63 = vsel %vm18004_vm0, %v15041_v40, 0.0  ;;  %v6386_v37 = vsel %vm18006_vm3, %v15021_v17, 0.0  ;;  %vm18008_vm7 = vnez %v18007_v10  ;;  %vm18010_vm13 = vnez %v18009_v33  ;;  %v18011_v40 = vld [vmem:[#allocation51_spill] sm:$0xff]  ;;  %v18069_v33 = vld [vmem:[#allocation64_spill] sm:$0xff] }
0x2120   : > { %v15327_v58 = vpack.c.bf16 %v6343_v63, %v6342_v20  ;;  %v6387_v12 = vsel %vm18008_vm7, %v15108_v36, 0.0  ;;  %v6368_v50 = vsel %vm18010_vm13, %v15141_v38, 0.0  ;;  %vm18012_vm0 = vnez %v18011_v40  ;;  %v18013_v62 = vld [vmem:[#allocation75_spill] sm:$0xff]  ;;  %v18067_v40 = vld [vmem:[#allocation41_spill] sm:$0xff] }
0x2121   : > { %v15335_v22 = vpack.c.bf16 %v6387_v12, %v6386_v37  ;;  %v6369_v48 = vsel %vm18012_vm0, %v15060_v59, 0.0  ;;  %vm18014_vm6 = vnez %v18013_v62  ;;  %v18015_v36 = vld [vmem:[#allocation15_spill] sm:$0xff] }
0x2122   : > { %v6344_v20 = vsel %vm18014_vm6, %v15007_v51, 0.0  ;;  %v15348_v17 = vpack.c.bf16 %v6369_v48, %v6368_v50  ;;  %vm18016_vm7 = vnez %v18015_v36  ;;  %v18017_v37 = vld [vmem:[#allocation23_spill] sm:$0xff]  ;;  %v6392_v48 = vsel %vm14797_vm2, %v15194_v0, 0.0 }
0x2123   : > { %v6345_v63 = vsel %vm18016_vm7, %v15025_v52, 0.0  ;;  %vm18018_vm13 = vnez %v18017_v37  ;;  %v18019_v12 = vld [vmem:[#allocation27_spill] sm:$0xff]  ;;  %v6393_v37 = vsel %vm14803_vm11, %v15031_v19, 0.0  ;;  %v18064_v52 = vld [vmem:[#allocation61_spill] sm:$0xff] }
0x2124   : > { %v6390_v38 = vsel %vm18018_vm13, %v15151_v45, 0.0  ;;  %vm18020_vm0 = vnez %v18019_v12  ;;  %v15361_v51 = vpack.c.bf16 %v6345_v63, %v6344_v20  ;;  %v15371_v45 = vpack.c.bf16 %v6393_v37, %v6392_v48  ;;  %v10542_v19 = vld [vmem:[%s16627_s16 + $0x228] sm:$0xff]   ;;  %v18025_v37 = vld [vmem:[#allocation10_spill] sm:$0xff]  ;;  %v10544_v48 = vld [vmem:[%s16627_s16 + $0x238] sm:$0xff]  }
0x2125   : > { %v6391_v59 = vsel %vm18020_vm0, %v15186_v24, 0.0  ;;  %vm18023_vm0 = vcmask 523264  }
0x2126   : > { %v15363_v9 = vpack.c.bf16 %v6391_v59, %v6390_v38  ;;  %vm18024_vm11 = vmmov %vm18023_vm0 }
0x2127   : > { %vm18026_vm2 = vmmov %vm18023_vm0 }
0x2128   : > { %vm18029_vm13 = vmmov %vm18023_vm0 }
0x2129   : > { %vm18033_vm7 = vmmov %vm18023_vm0 }
0x212a   : > { %vm18039_vm6 = vmmov %vm18023_vm0 }
0x216e   : > { %v6403_v24 = vpop.permute.xlu0 %6402 }
0x216f   : > { %v6448_v63 = vsel %vm18024_vm11, %v15219_v23, %v6403_v24  ;;  %vm18027_vm11 = vmmov %vm18023_vm0 }
0x2171   : > { %v6415_v42 = vpop.permute.xlu1 %6414 }
0x2172   : > { %v6405_v20 = vpop.permute.xlu0 %6404  ;;  %v6464_v0 = vsel %vm18023_vm0, %v6322_v21, %v6415_v42  ;;  %v10543_v21 = vld [vmem:[%s16627_s16 + $0x230] sm:$0xff]  }
0x2173   : > { %6851 = vmatprep.mubr.bf16.mxu1 %v6464_v0 }
0x2174   : > { %6852 = vmatmul.mubr.bf16.vlgmr.msra.gmra.mrb[116].mxu1 %v6448_v63 }
0x2175   : > { %v6417_v26 = vpop.permute.xlu1 %6416  ;;  %10255 = vmatpush3.bf16.msra.mxu1 %v18025_v37 }
0x2176   : > { %v6427_v8 = vpop.permute.xlu0 %6426  ;;  %v6468_v46 = vsel %vm18026_vm2, %v15245_v43, %v6417_v26  ;;  %10256 = vmatprep.subr.bf16.mxu1 %v10542_v19  ;;  %vm18028_vm2 = vmmov %vm18023_vm0 }
0x2177   : > { %6859 = vmatprep.mubr.bf16.mxu1 %v6468_v46  ;;  %v6480_v43 = vsel %vm18023_vm0, %v15237_v57, %v6427_v8  ;;  %v6452_v24 = vsel %vm18028_vm2, %v15259_v13, %v6405_v20  ;;  %vm18031_vm2 = vmmov %vm18023_vm0 }
0x2179   : > { %v6439_v38 = vpop.permute.xlu1 %6438  ;;  %10257 = vmatpush3.bf16.msra.mxu1 %v10542_v19 }
0x217a   : > { %v6407_v59 = vpop.permute.xlu0 %6406  ;;  %v6496_v23 = vsel %vm18027_vm11, %v15257_v16, %v6439_v38  ;;  %10258 = vmatprep.subr.bf16.mxu1 %v10543_v21  ;;  %vm18030_vm11 = vmmov %vm18023_vm0  ;;  %v10556_v38 = vld [vmem:[%s16627_s16 + $0x2c8] sm:$0xff]  }
0x217b   : > { %6916 = vmatprep.mubr.bf16.mxu0 %v6496_v23  ;;  %v6456_v13 = vsel %vm18023_vm0, %v15289_v18, %v6407_v59  ;;  %v10558_v59 = vld [vmem:[%s16627_s16 + $0x310] sm:$0xff]  }
0x217c   : > { %6860 = vmatmul.mubr.bf16.gmra.mrb[120].mxu1 %v6452_v24  ;;  %6917 = vmatmul.mubr.bf16.vlgmr.msra.gmra.mrb[128].mxu0 %v6480_v43  ;;  %v10551_v23 = vld [vmem:[%s16627_s16 + $0x250] sm:$0xff]   ;;  %v10562_v24 = vld [vmem:[%s16627_s16 + $0x318] sm:$0xff]  }
0x217d   : > { %v6419_v42 = vpop.permute.xlu1 %6418  ;;  %10259 = vmatpush3.bf16.msra.mxu1 %v10543_v21  ;;  %v10560_v43 = vld [vmem:[%s16627_s16 + $0x2d0] sm:$0xff]  }
0x217e   : > { %v6429_v0 = vpop.permute.xlu0 %6428  ;;  %v6472_v16 = vsel %vm18029_vm13, %v15267_v47, %v6419_v42  ;;  %10260 = vmatprep.subr.bf16.mxu1 %v10544_v48  ;;  %vm18032_vm13 = vmmov %vm18023_vm0  ;;  %v10555_v42 = vld [vmem:[%s16627_s16 + $0x258] sm:$0xff]  }
0x217f   : > { %6867 = vmatprep.mubr.bf16.mxu1 %v6472_v16  ;;  %v6484_v20 = vsel %vm18031_vm2, %v15291_v25, %v6429_v0  ;;  %vm18035_vm2 = vmmov %vm18023_vm0  ;;  %v10557_v0 = vld [vmem:[%s16627_s16 + $0x2a0] sm:$0xff]   ;;  %v10564_v16 = vld [vmem:[%s16627_s16 + $0x2d8] sm:$0xff]  }
0x2181   : > { %v6441_v19 = vpop.permute.xlu1 %6440  ;;  %10261 = vmatpush3.bf16.msra.mxu1 %v10544_v48  ;;  %v10553_v48 = vld [vmem:[%s16627_s16 + $0x298] sm:$0xff]  }
0x2182   : > { %v6409_v63 = vpop.permute.xlu0 %6408  ;;  %v6500_v57 = vsel %vm18030_vm11, %v15278_v55, %v6441_v19  ;;  %vm18034_vm11 = vmmov %vm18023_vm0  ;;  %v10566_v19 = vld [vmem:[%s16627_s16 + $0x320] sm:$0xff]  }
0x2183   : > { %6924 = vmatprep.mubr.bf16.mxu0 %v6500_v57  ;;  %v6460_v55 = vsel %vm18034_vm11, %v15325_v53, %v6409_v63  ;;  %vm18038_vm11 = vmmov %vm18023_vm0  ;;  %v10546_v53 = vld [vmem:[%s16627_s16 + $0x240] sm:$0xff]   ;;  %v10561_v57 = vld [vmem:[%s16627_s16 + $0x2a8] sm:$0xff]  }
0x2184   : > { %6868 = vmatmul.mubr.bf16.gmra.mrb[124].mxu1 %v6456_v13  ;;  %6925 = vmatmul.mubr.bf16.gmra.mrb[132].mxu0 %v6484_v20  ;;  %v10559_v63 = vld [vmem:[%s16627_s16 + $0x260] sm:$0xff]   ;;  %v10563_v20 = vld [vmem:[%s16627_s16 + $0x268] sm:$0xff]  }
0x2185   : > { %v6421_v26 = vpop.permute.xlu1 %6420  ;;  %v10568_v13 = vld [vmem:[%s16627_s16 + $0x2e0] sm:$0xff]  }
0x2186   : > { %v6476_v47 = vsel %vm18032_vm13, %v15301_v60, %v6421_v26  ;;  %v6431_v37 = vpop.permute.xlu0 %6430  ;;  %vm18036_vm13 = vmmov %vm18023_vm0  ;;  %v10565_v26 = vld [vmem:[%s16627_s16 + $0x2b0] sm:$0xff]  }
0x2187   : > { %6875 = vmatprep.mubr.bf16.mxu1 %v6476_v47  ;;  %v6488_v18 = vsel %vm18023_vm0, %v15327_v58, %v6431_v37  ;;  %v10547_v58 = vld [vmem:[%s16627_s16 + $0x288] sm:$0xff]   ;;  %v10567_v47 = vld [vmem:[%s16627_s16 + $0x270] sm:$0xff]  }
0x2189   : > { %v6443_v8 = vpop.permute.xlu1 %6442 }
0x218a   : > { %v6504_v46 = vsel %vm18033_vm7, %v15314_v27, %v6443_v8  ;;  %v6433_v21 = vpop.permute.xlu0 %6432  ;;  %vm18037_vm7 = vmmov %vm18023_vm0 }
0x218b   : > { %6932 = vmatprep.mubr.bf16.mxu0 %v6504_v46  ;;  %v6492_v27 = vsel %vm18037_vm7, %v15361_v51, %v6433_v21  ;;  %v10548_v51 = vld [vmem:[%s16627_s16 + $0x248] sm:$0xff]  }
0x218c   : > { %6876 = vmatmul.mubr.bf16.gmra.mrb[128].mxu1 %v6460_v55  ;;  %6933 = vmatmul.mubr.bf16.gmra.mrb[136].mxu0 %v6488_v18 }
0x218d   : > { %v6445_v25 = vpop.permute.xlu1 %6444  ;;  %10262 = vmatprep.mubr.msk.bf16.mxu1 %vm18035_vm2, %v15335_v22  ;;  %v10545_v22 = vld [vmem:[%s16627_s16 + $0x280] sm:$0xff]  }
0x218e   : > { %v6508_v60 = vsel %vm18036_vm13, %v15348_v17, %v6445_v25  ;;  %9663 = vmatprep.subr.bf16.mxu0 %v10545_v22  ;;  %v10552_v17 = vld [vmem:[%s16627_s16 + $0x2c0] sm:$0xff]   ;;  %vm18047_vm13 = vcmp.lt.s32.totalorder %v17883_v15, 1 }
0x218f   : > { %6940 = vmatprep.mubr.bf16.mxu0 %v6508_v60  ;;  %9664 = vmatpush3.bf16.msra.mxu0 %v10546_v53  ;;  %v9014_v60 = vld [vmem:[%s16628_s17 + $0x1] ss:$0 sm:$0xff]  ;;  %vm18048_vm7 = vmmov %vm18047_vm13 }
0x2190   : > { %9665 = vmatprep.subr.bf16.mxu0 %v10547_v58 }
0x2193   : > { %9666 = vmatpush3.bf16.msra.mxu0 %v10548_v51 }
0x2194   : > { %6941 = vmatmul.mubr.bf16.gmra.mrb[140].mxu0 %v6492_v27  ;;  %10263 = vmatmul.mubr.msk.bf16.vlgmr.msra.gmra.mrb[132].mxu1 %vm18038_vm11, %v15177_v2  ;;  %v10550_v2 = vld [vmem:[%s16627_s16 + $0x300] sm:$0xff]   ;;  %vm18049_vm11 = vmmov %vm18048_vm7 }
0x2195   : > { %10266 = vmatprep.mubr.msk.bf16.mxu1 %vm18023_vm0, %v15363_v9  ;;  %9703 = vmatprep.subr.bf16.mxu1 %v10550_v2  ;;  %v10554_v9 = vld [vmem:[%s16627_s16 + $0x308] sm:$0xff]  }
0x2196   : > { %9704 = vmatpush3.bf16.msra.mxu1 %v10552_v17 }
0x2197   : > { %9705 = vmatprep.subr.bf16.mxu1 %v10554_v9 }
0x219a   : > { %9706 = vmatpush3.bf16.msra.mxu1 %v10556_v38 }
0x219b   : > { %9707 = vmatprep.subr.bf16.mxu1 %v10558_v59 }
0x219c   : > { %10267 = vmatmul.mubr.msk.bf16.gmra.mrb[136].mxu1 %vm18039_vm6, %v15371_v45  ;;  %v10549_v45 = vld [vmem:[%s16627_s16 + $0x290] sm:$0xff]  }
0x219d   : > { %9667 = vmatprep.subr.bf16.mxu0 %v10549_v45 }
0x219e   : > { %9668 = vmatpush3.bf16.msra.mxu0 %v10551_v23  ;;  %9708 = vmatpush3.bf16.msra.mxu1 %v10560_v43 }
0x219f   : > { %9669 = vmatprep.subr.bf16.mxu0 %v10553_v48  ;;  %9709 = vmatprep.subr.bf16.mxu1 %v10562_v24 }
0x21a2   : > { %9670 = vmatpush3.bf16.msra.mxu0 %v10555_v42  ;;  %9710 = vmatpush3.bf16.msra.mxu1 %v10564_v16 }
0x21a3   : > { %9671 = vmatprep.subr.bf16.mxu0 %v10557_v0  ;;  %9711 = vmatprep.subr.bf16.mxu1 %v10566_v19 }
0x21a6   : > { %9672 = vmatpush3.bf16.msra.mxu0 %v10559_v63  ;;  %9712 = vmatpush3.bf16.msra.mxu1 %v10568_v13 }
0x21a7   : > { %9673 = vmatprep.subr.bf16.mxu0 %v10561_v57 }
0x21aa   : > { %9674 = vmatpush3.bf16.msra.mxu0 %v10563_v20 }
0x21ab   : > { %9675 = vmatprep.subr.bf16.mxu0 %v10565_v26 }
0x21ae   : > { %9676 = vmatpush3.bf16.msra.mxu0 %v10567_v47 }
0x2247   : > { %v9591_v37 = vpop.f32.mrb[116].mxu1 }
0x2248   : > { %v9592_v8 = vpop.f32.mrb[117].mxu1 }
0x2249   : > { %v9593_v46 = vadd.f32 %v9592_v8, %v9591_v37  ;;  %v9594_v55 = vpop.f32.mrb[118].mxu1 }
0x224a   : > { %v9595_v18 = vpop.f32.mrb[119].mxu1 }
0x224b   : > { %v9596_v25 = vadd.f32 %v9595_v18, %v9594_v55  ;;  %v6854_v58 = vadd.f32 %v9593_v46, %v9014_v60 }
0x224d   : > { %v6857_v59 = vadd.f32 %v9596_v25, %v9014_v60 }
0x224f   : > { %v9597_v21 = vpop.f32.mrb[120].mxu1  ;;  %v9631_v27 = vpop.f32.mrb[128].mxu0 }
0x2250   : > { %v9598_v22 = vpop.f32.mrb[121].mxu1  ;;  %v9632_v53 = vpop.f32.mrb[129].mxu0 }
0x2251   : > { %v9599_v2 = vadd.f32 %v9598_v22, %v9597_v21  ;;  %v9633_v17 = vadd.f32 %v9632_v53, %v9631_v27  ;;  %v9600_v51 = vpop.f32.mrb[122].mxu1  ;;  %v9634_v9 = vpop.f32.mrb[130].mxu0 }
0x2252   : > { %v9601_v45 = vpop.f32.mrb[123].mxu1  ;;  %v9635_v38 = vpop.f32.mrb[131].mxu0 }
0x2253   : > { %v9602_v23 = vadd.f32 %v9601_v45, %v9600_v51  ;;  %v9636_v48 = vadd.f32 %v9635_v38, %v9634_v9  ;;  %v6919_v43 = vadd.f32 %v9633_v17, %v6854_v58  ;;  %v6862_v63 = vadd.f32 %v9599_v2, %v9014_v60 }
0x2255   : > { %v6922_v24 = vadd.f32 %v9636_v48, %v6857_v59  ;;  %v6865_v8 = vadd.f32 %v9602_v23, %v9014_v60 }
0x2257   : > { %v9603_v42 = vpop.f32.mrb[124].mxu1  ;;  %v9637_v0 = vpop.f32.mrb[132].mxu0 }
0x2258   : > { %v9604_v16 = vpop.f32.mrb[125].mxu1  ;;  %v9638_v19 = vpop.f32.mrb[133].mxu0 }
0x2259   : > { %v9605_v57 = vadd.f32 %v9604_v16, %v9603_v42  ;;  %v9639_v13 = vadd.f32 %v9638_v19, %v9637_v0  ;;  %v9606_v20 = vpop.f32.mrb[126].mxu1  ;;  %v9640_v26 = vpop.f32.mrb[134].mxu0 }
0x225a   : > { %v9607_v47 = vpop.f32.mrb[127].mxu1  ;;  %v9641_v37 = vpop.f32.mrb[135].mxu0 }
0x225b   : > { %v9608_v46 = vadd.f32 %v9607_v47, %v9606_v20  ;;  %v9642_v55 = vadd.f32 %v9641_v37, %v9640_v26  ;;  %v6927_v18 = vadd.f32 %v9639_v13, %v6862_v63  ;;  %v6870_v58 = vadd.f32 %v9605_v57, %v9014_v60 }
0x225d   : > { %v6930_v25 = vadd.f32 %v9642_v55, %v6865_v8  ;;  %v6873_v59 = vadd.f32 %v9608_v46, %v9014_v60 }
0x225f   : > { %v9609_v21 = vpop.f32.mrb[128].mxu1  ;;  %v9643_v27 = vpop.f32.mrb[136].mxu0 }
0x2260   : > { %v9610_v22 = vpop.f32.mrb[129].mxu1  ;;  %v9644_v53 = vpop.f32.mrb[137].mxu0 }
0x2261   : > { %v9611_v17 = vadd.f32 %v9610_v22, %v9609_v21  ;;  %v9645_v51 = vadd.f32 %v9644_v53, %v9643_v27  ;;  %v9612_v9 = vpop.f32.mrb[130].mxu1  ;;  %v9646_v2 = vpop.f32.mrb[138].mxu0 }
0x2262   : > { %v9613_v45 = vpop.f32.mrb[131].mxu1  ;;  %v9647_v38 = vpop.f32.mrb[139].mxu0 }
0x2263   : > { %v9614_v48 = vadd.f32 %v9613_v45, %v9612_v9  ;;  %v9648_v42 = vadd.f32 %v9647_v38, %v9646_v2  ;;  %v6935_v0 = vadd.f32 %v9645_v51, %v6870_v58  ;;  %v6878_v26 = vadd.f32 %v9611_v17, %v9014_v60  ;;  %v10570_v45 = vld [vmem:[%s16627_s16 + $0x328] sm:$0xff]  }
0x2264   : > { %9713 = vmatprep.subr.bf16.mxu1 %v10570_v45 }
0x2265   : > { %v15503_v23 = vadd.f32 %v9648_v42, %v6873_v59  ;;  %v6881_v55 = vadd.f32 %v9614_v48, %v9014_v60  ;;  %v10571_v42 = vld [vmem:[%s16627_s16 + $0x278] sm:$0xff]  }
0x2267   : > { %v9649_v16 = vpop.f32.mrb[140].mxu0  ;;  %v10264_v19 = vpop.f32.mrb[132].mxu1 }
0x2268   : > { %v6992_v63 = vadd.f32 %v10264_v19, %v6927_v18  ;;  %v9650_v13 = vpop.f32.mrb[141].mxu0  ;;  %v6983_v20 = vpop.f32.mrb[133].mxu1 }
0x2269   : > { %v9651_v47 = vadd.f32 %v9650_v13, %v9649_v16  ;;  %v6984_v57 = vadd.f32 %v6983_v20, %v6919_v43  ;;  %v9652_v37 = vpop.f32.mrb[142].mxu0  ;;  %v10265_v8 = vpop.f32.mrb[134].mxu1  ;;  %v10572_v16 = vld [vmem:[%s16627_s16 + $0x2e8] sm:$0xff]  }
0x226a   : > { %v15505_v21 = vmax.f32 %v6992_v63, 0.0  ;;  %v6995_v27 = vadd.f32 %v10265_v8, %v6930_v25  ;;  %v9653_v46 = vpop.f32.mrb[143].mxu0  ;;  %v6986_v22 = vpop.f32.mrb[135].mxu1  ;;  %v10569_v25 = vld [vmem:[%s16627_s16 + $0x2b8] sm:$0xff]   ;;  %9714 = vmatpush3.bf16.msra.mxu1 %v10572_v16  ;;  %v10573_v16 = vld [vmem:[%s16627_s16 + $0x330] sm:$0xff]  }
0x226b   : > { %v15507_v53 = vmax.f32 %v6984_v57, 0.0  ;;  %v9654_v58 = vadd.f32 %v9653_v46, %v9652_v37  ;;  %v6987_v51 = vadd.f32 %v6986_v22, %v6922_v24  ;;  %v6943_v9 = vadd.f32 %v9651_v47, %v6878_v26  ;;  %9677 = vmatprep.subr.bf16.mxu0 %v10569_v25  ;;  %v18045_v46 = vld [vmem:[#allocation33_spill] sm:$0xff]  ;;  %9715 = vmatprep.subr.bf16.mxu1 %v10573_v16 }
0x226c   : > { %v7024_v18 = vrot.slane %v15505_v21, 7  ;;  %v15511_v17 = vmax.f32 %v6995_v27, 0.0  ;;  %v7053_v60 = vsel %vm17878_vm4, %v15505_v21, 0.0  ;;  %v7139_v47 = vsel %vm17909_vm8, %v15505_v21, 0.0  ;;  %9678 = vmatpush3.bf16.msra.mxu0 %v10571_v42 }
0x226d   : > { %v7022_v24 = vrot.slane %v15507_v53, 7  ;;  %v15524_v59 = vmax.f32 %v6987_v51, 0.0  ;;  %v6946_v48 = vadd.f32 %v9654_v58, %v6881_v55  ;;  %v7051_v20 = vsel %vm17880_vm15, %v15507_v53, 0.0  ;;  %v18043_v55 = vld [vmem:[#allocation31_spill] sm:$0xff] }
0x226e   : > { %v7025_v19 = vrot.slane %v15511_v17, 7  ;;  %vm18044_vm6 = vnez %v18043_v55  ;;  %vm18046_vm2 = vnez %v18045_v46  ;;  %v18056_v13 = vrot.slane %v15505_v21, 1 }
0x226f   : > { %v7023_v57 = vrot.slane %v15524_v59, 7  ;;  %v7063_v37 = vrot.slane %v15524_v59, 1  ;;  %v10268_v8 = vpop.f32.mrb[136].mxu1  ;;  %v7052_v27 = vsel %vm18044_vm6, %v15524_v59, 0.0  ;;  %v7138_v22 = vsel %vm18046_vm2, %v15524_v59, 0.0 }
0x2270   : > { %v7008_v58 = vadd.f32 %v10268_v8, %v6943_v9  ;;  %v6999_v51 = vpop.f32.mrb[137].mxu1  ;;  %v15548_v63 = vpack.c.bf16 %v7053_v60, %v7052_v27  ;;  %v15552_v25 = vsel %vm18047_vm13, %v7024_v18, %v7025_v19  ;;  %v15554_v45 = vpack.c.bf16 %v7139_v47, %v7138_v22  ;;  %v18050_v9 = vld [vmem:[#allocation57_spill] sm:$0xff]  ;;  %v18052_v22 = vld [vmem:[#allocation40_spill] sm:$0xff] }
0x2271   : > { %v7000_v38 = vadd.f32 %v6999_v51, %v6935_v0  ;;  %v10269_v2 = vpop.f32.mrb[138].mxu1  ;;  %v15558_v26 = vsel %vm18048_vm7, %v7022_v24, %v7023_v57  ;;  %v15562_v42 = vsel %vm18049_vm11, %v7023_v57, %v7024_v18  ;;  %vm18051_vm0 = vnez %v18050_v9  ;;  %v10574_v0 = vld [vmem:[%s16627_s16 + $0x2f0] sm:$0xff]  }
0x2272   : > { %v7093_v60 = vsel %vm18051_vm0, %v15552_v25, 0.0  ;;  %v15573_v47 = vmax.f32 %v7008_v58, 0.0  ;;  %v7011_v8 = vadd.f32 %v10269_v2, %v6946_v48  ;;  %v7002_v27 = vpop.f32.mrb[139].mxu1  ;;  %vm18053_vm13 = vnez %v18052_v22  ;;  %v18054_v57 = vld [vmem:[#allocation56_spill] sm:$0xff]  ;;  %9716 = vmatpush3.bf16.msra.mxu1 %v10574_v0 }
0x2273   : > { %v7091_v18 = vsel %vm18053_vm13, %v15558_v26, 0.0  ;;  %vm18055_vm7 = vnez %v18054_v57  ;;  %v15581_v9 = vmax.f32 %v7000_v38, 0.0  ;;  %v7003_v46 = vadd.f32 %v7002_v27, %v15503_v23  ;;  %v10575_v23 = vld [vmem:[%s16627_s16 + $0x338] sm:$0xff]   ;;  %v18060_v27 = vld [vmem:[#allocation46_spill] sm:$0xff] }
0x2274   : > { %v7092_v51 = vsel %vm18055_vm7, %v15562_v42, 0.0  ;;  %vm18057_vm11 = vcmp.lt.s32.totalorder %v17883_v15, 7  ;;  %v7028_v2 = vrot.slane %v15573_v47, 7  ;;  %v7068_v48 = vrot.slane %v15573_v47, 1  ;;  %9717 = vmatprep.subr.bf16.mxu1 %v10575_v23 }
0x2275   : > { %v7099_v55 = vpack.c.bf16 %v7093_v60, %v7092_v51  ;;  %v15588_v58 = vsel %vm18057_vm11, %v7063_v37, %v18056_v13  ;;  %v15592_v22 = vmax.f32 %v7011_v8, 0.0  ;;  %v18058_v57 = vrot.slane %v15507_v53, 1  ;;  %vm18059_vm7 = vmmov %vm18057_vm11  ;;  %v10576_v13 = vld [vmem:[%s16627_s16 + $0x2f8] sm:$0xff]   ;;  %v18062_v51 = vld [vmem:[#allocation36_spill] sm:$0xff] }
0x2276   : > { %v7026_v60 = vrot.slane %v15581_v9, 7  ;;  %v7066_v16 = vrot.slane %v15581_v9, 1  ;;  %v15608_v8 = vmax.f32 %v7003_v46, 0.0  ;;  %vm18061_vm11 = vnez %v18060_v27  ;;  %9718 = vmatpush3.bf16.msra.mxu1 %v10576_v13 }
0x2277   : > { %v15598_v38 = vsel %vm18059_vm7, %v18058_v57, %v7063_v37  ;;  %v7029_v0 = vrot.slane %v15592_v22, 7  ;;  %v7069_v57 = vrot.slane %v15592_v22, 1  ;;  %vm18063_vm7 = vnez %v18062_v51 }
0x2278   : > { %v7114_v37 = vsel %vm18061_vm11, %v15598_v38, 0.0  ;;  %v7050_v43 = vsel %vm18063_vm7, %v15592_v22, 0.0  ;;  %vm18065_vm13 = vnez %v18064_v52  ;;  %v7027_v46 = vrot.slane %v15608_v8, 7 }
0x2279   : > { %v7115_v50 = vsel %vm18065_vm13, %v15588_v58, 0.0  ;;  %v7067_v12 = vrot.slane %v15608_v8, 1  ;;  %v7058_v36 = vpack.c.bf16 %v7051_v20, %v7050_v43  ;;  %vm18066_vm11 = vcmp.lt.s32.totalorder %v17883_v15, 1 }
0x227a   : > { %v7122_v27 = vpack.c.bf16 %v7115_v50, %v7114_v37  ;;  %v15625_v62 = vsel %vm18066_vm11, %v7029_v0, %v7022_v24  ;;  %vm18068_vm0 = vnez %v18067_v40  ;;  %vm18070_vm7 = vnez %v18069_v33  ;;  %vm18071_vm13 = vmmov %vm18066_vm11  ;;  %v18072_v50 = vld [vmem:[#allocation45_spill] sm:$0xff]  ;;  %v18074_v37 = vld [vmem:[#allocation42_spill] sm:$0xff] }
0x227b   : > { %v7054_v51 = vsel %vm18068_vm0, %v15511_v17, 0.0  ;;  %v7055_v52 = vsel %vm18070_vm7, %v15581_v9, 0.0  ;;  %v15635_v23 = vsel %vm18071_vm13, %v7025_v19, %v7026_v60  ;;  %7166 = vrot.lane.b32.xlu0 %v7058_v36, %s17435_s27  ;;  %vm18073_vm8 = vnez %v18072_v50  ;;  %v15651_v19 = vld [vmem:[%s16627_s16 + $0x340] sm:$0xff]   ;;  %v18077_v36 = vld [vmem:[#allocation43_spill] sm:$0xff] }
0x227c   : > { %v7090_v43 = vsel %vm18073_vm8, %v15625_v62, 0.0  ;;  %v7060_v24 = vpack.c.bf16 %v7055_v52, %v7054_v51  ;;  %v15643_v20 = vsel %vm18066_vm11, %v7026_v60, %v7027_v46  ;;  %vm18075_vm2 = vnez %v18074_v37  ;;  %18076 = vst [vmem:[#allocation58_spill] sm:$0xff] %v15651_v19  ;;  %10270 = vmatprep.subr.bf16.mxu0 %v15651_v19  ;;  %v18110_v19 = vld [vmem:[#allocation11_spill] sm:$0xff] }
0x227d   : > { %v7094_v33 = vsel %vm18075_vm2, %v15635_v23, 0.0  ;;  %v7098_v13 = vpack.c.bf16 %v7091_v18, %v7090_v43  ;;  %vm18078_vm13 = vnez %v18077_v36  ;;  %v18079_v52 = vrot.slane %v15511_v17, 1  ;;  %v18084_v18 = vld [vmem:[#allocation25_spill] sm:$0xff] }
0x227e   : > { %v7095_v50 = vsel %vm18078_vm13, %v15643_v20, 0.0  ;;  %vm18080_vm8 = vcmp.lt.s32.totalorder %v17883_v15, 7  ;;  %v18082_v37 = vrot.slane %v15505_v21, 1  ;;  %vm18085_vm2 = vnez %v18084_v18  ;;  %v18086_v36 = vld [vmem:[#allocation9_spill] sm:$0xff] }
0x227f   : > { %v15660_v60 = vsel %vm18080_vm8, %v18079_v52, %v7066_v16  ;;  %v18081_v51 = vmov %v18079_v52  ;;  %vm18083_vm11 = vmmov %vm18080_vm8  ;;  %v7100_v10 = vpack.c.bf16 %v7095_v50, %v7094_v33  ;;  %vm18087_vm13 = vnez %v18086_v36  ;;  %v18088_v52 = vld [vmem:[#allocation8_spill] sm:$0xff]  ;;  %7178 = vrot.lane.b32.xlu1 %v7098_v13, %s17435_s27  ;;  %v18092_v50 = vld [vmem:[#allocation47_spill] sm:$0xff]  ;;  %7168 = vrot.lane.b32.xlu0 %v15548_v63, %s17435_s27 }
0x2280   : > { %v15668_v40 = vsel %vm18083_vm11, %v18082_v37, %v18081_v51  ;;  %v7117_v14 = vsel %vm18087_vm13, %v15660_v60, 0.0  ;;  %vm18089_vm8 = vnez %v18088_v52  ;;  %v18090_v37 = vld [vmem:[#allocation71_spill] sm:$0xff]  ;;  %v18094_v36 = vld [vmem:[#allocation48_spill] sm:$0xff]  ;;  %v18096_v13 = vld [vmem:[#allocation38_spill] sm:$0xff]  ;;  %vm18098_vm7 = vcmp.lt.s32.totalorder %v17883_v15, 1 }
0x2281   : > { %v7116_v43 = vsel %vm18085_vm2, %v15668_v40, 0.0  ;;  %v7152_v61 = vsel %vm18089_vm8, %v15660_v60, 0.0  ;;  %vm18091_vm11 = vnez %v18090_v37  ;;  %vm18093_vm2 = vnez %v18092_v50 }
0x2282   : > { %v7123_v49 = vpack.c.bf16 %v7117_v14, %v7116_v43  ;;  %v7140_v33 = vsel %vm18091_vm11, %v15511_v17, 0.0  ;;  %v7141_v51 = vsel %vm18093_vm2, %v15581_v9, 0.0  ;;  %vm18095_vm13 = vnez %v18094_v36  ;;  %vm18099_vm11 = vmmov %vm18098_vm7  ;;  %v18100_v36 = vld [vmem:[#allocation2_spill] sm:$0xff] }
0x2283   : > { %v7056_v18 = vsel %vm18095_vm13, %v15608_v8, 0.0  ;;  %v15692_v52 = vpack.c.bf16 %v7141_v51, %v7140_v33  ;;  %vm18097_vm8 = vnez %v18096_v13  ;;  %v15699_v43 = vsel %vm18098_vm7, %v7028_v2, %v7029_v0  ;;  %v18102_v33 = vld [vmem:[#allocation50_spill] sm:$0xff]  ;;  %7180 = vrot.lane.b32.xlu1 %v7099_v55, %s17435_s27  ;;  %7190 = vrot.lane.b32.xlu0 %v7122_v27, %s17435_s27 }
0x2284   : > { %v7057_v14 = vsel %vm18097_vm8, %v15573_v47, 0.0  ;;  %v15703_v50 = vsel %vm18099_vm11, %v7027_v46, %v7028_v2  ;;  %vm18101_vm2 = vnez %v18100_v36  ;;  %vm18103_vm13 = vnez %v18102_v33  ;;  %v18108_v33 = vld [vmem:[#allocation7_spill] sm:$0xff] }
0x2285   : > { %v15705_v37 = vpack.c.bf16 %v7057_v14, %v7056_v18  ;;  %v7096_v63 = vsel %vm18101_vm2, %v15703_v50, 0.0  ;;  %v7097_v51 = vsel %vm18103_vm13, %v15699_v43, 0.0  ;;  %vm18104_vm8 = vcmp.lt.s32.totalorder %v17883_v15, 7 }
0x2286   : > { %v15715_v13 = vsel %vm18104_vm8, %v7067_v12, %v7068_v48  ;;  %v15717_v0 = vpack.c.bf16 %v7097_v51, %v7096_v63  ;;  %vm18106_vm7 = vmmov %vm18104_vm8  ;;  %v7142_v14 = vsel %vm17958_vm5, %v15608_v8, 0.0  ;;  %vm18109_vm11 = vnez %v18108_v33  ;;  %v18124_v51 = vld [vmem:[#allocation76_spill] sm:$0xff] }
0x2287   : > { %v7072_v2 = vsel %vm18106_vm7, %v7066_v16, %v7067_v12  ;;  %v7119_v46 = vsel %vm17952_vm12, %v15715_v13, 0.0  ;;  %vm18111_vm8 = vnez %v18110_v19  ;;  %v7143_v12 = vsel %vm17960_vm14, %v15573_v47, 0.0  ;;  %7202 = vrot.lane.b32.xlu1 %v15554_v45, %s17435_s27  ;;  %7170 = vrot.lane.b32.xlu0 %v7060_v24, %s17435_s27 }
0x2288   : > { %18105 = vst [vmem:[#allocation65_spill] sm:$0xff] %v15717_v0  ;;  %v7118_v36 = vsel %vm18109_vm11, %v7072_v2, 0.0  ;;  %v7153_v63 = vsel %vm18111_vm8, %v7072_v2, 0.0  ;;  %v15737_v16 = vsel %vm18106_vm7, %v7068_v48, %v7069_v57  ;;  %v15744_v55 = vpack.c.bf16 %v7143_v12, %v7142_v14  ;;  %vm18114_vm8 = vmmov %vm18106_vm7  ;;  %v18116_v48 = vld [vmem:[#allocation4_spill] sm:$0xff] }
0x2289   : > { %v15740_v18 = vpack.c.bf16 %v7119_v46, %v7118_v36  ;;  %v15742_v39 = vpack.c.bf16 %v7153_v63, %v7152_v61  ;;  %v18113_v33 = vrot.slane %v15507_v53, 1  ;;  %v7120_v0 = vsel %vm17841_vm1, %v15737_v16, 0.0  ;;  %v18118_v36 = vld [vmem:[#allocation55_spill] sm:$0xff]  ;;  %v18120_v46 = vld [vmem:[#allocation24_spill] sm:$0xff] }
0x228a   : > { %vm18117_vm7 = vnez %v18116_v48  ;;  %vm18119_vm14 = vnez %v18118_v36  ;;  %vm18121_vm11 = vnez %v18120_v46  ;;  %vm18125_vm1 = vnez %v18124_v51 }
0x228b   : > { %v15750_v19 = vsel %vm18114_vm8, %v7069_v57, %v18113_v33  ;;  %v7144_v61 = vsel %vm18119_vm14, %v15592_v22, 0.0  ;;  %v7145_v14 = vsel %vm18121_vm11, %v15507_v53, 0.0  ;;  %v18122_v33 = vld [vmem:[#allocation5_spill] sm:$0xff]  ;;  %v7039_v48 = vsel %vm18125_vm1, %v15625_v62, 0.0  ;;  %7182 = vrot.lane.b32.xlu1 %v7100_v10, %s17435_s27  ;;  %7192 = vrot.lane.b32.xlu0 %v7123_v49, %s17435_s27 }
0x228c   : > { %v7121_v27 = vsel %vm18117_vm7, %v15750_v19, 0.0  ;;  %v15766_v57 = vpack.c.bf16 %v7145_v14, %v7144_v61  ;;  %vm18123_vm8 = vnez %v18122_v33  ;;  %vm18126_vm11 = vnez %v17969_v30  ;;  %v18128_v14 = vld [vmem:[#allocation79_spill] sm:$0xff] }
0x228d   : > { %v15764_v63 = vpack.c.bf16 %v7121_v27, %v7120_v0  ;;  %v7038_v12 = vsel %vm18123_vm8, %v15699_v43, 0.0  ;;  %v7078_v0 = vsel %vm18126_vm11, %v15750_v19, 0.0  ;;  %v7079_v61 = vsel %vm17972_vm10, %v15598_v38, 0.0 }
0x228e   : > { %v15776_v36 = vpack.c.bf16 %v7039_v48, %v7038_v12  ;;  %vm18129_vm8 = vnez %v18128_v14  ;;  %v15788_v51 = vpack.c.bf16 %v7079_v61, %v7078_v0  ;;  %vm18130_vm1 = vnez %v17975_v44  ;;  %v18131_v48 = vld [vmem:[#allocation18_spill] sm:$0xff] }
0x228f   : > { %v7102_v33 = vsel %vm18129_vm8, %v15507_v53, 0.0  ;;  %v7103_v45 = vsel %vm18130_vm1, %v15524_v59, 0.0  ;;  %vm18132_vm14 = vnez %v18131_v48  ;;  %vm18133_vm11 = vnez %v17979_v34  ;;  %v18134_v53 = vld [vmem:[#allocation13_spill] sm:$0xff]  ;;  %7204 = vrot.lane.b32.xlu1 %v15692_v52, %s17435_s27  ;;  %7172 = vrot.lane.b32.xlu0 %v15705_v37, %s17435_s27 }
0x2290   : > { %v7080_v12 = vsel %vm18132_vm14, %v15588_v58, 0.0  ;;  %v7081_v27 = vsel %vm18133_vm11, %v15668_v40, 0.0  ;;  %v15799_v30 = vpack.c.bf16 %v7103_v45, %v7102_v33  ;;  %vm18135_vm8 = vnez %v18134_v53 }
0x2291   : > { %v15801_v14 = vpack.c.bf16 %v7081_v27, %v7080_v12  ;;  %v7126_v24 = vsel %vm18135_vm8, %v15558_v26, 0.0  ;;  %vm18136_vm10 = vnez %v17630_v3  ;;  %vm18137_vm1 = vnez %v17982_v31 }
0x2292   : > { %v7127_v59 = vsel %vm18136_vm10, %v15562_v42, 0.0  ;;  %v7040_v61 = vsel %vm18137_vm1, %v15558_v26, 0.0  ;;  %vm18138_vm11 = vnez %v17984_v4  ;;  %vm18139_vm14 = vnez %v17634_v41 }
0x2293   : > { %v15809_v0 = vpack.c.bf16 %v7127_v59, %v7126_v24  ;;  %v7041_v33 = vsel %vm18138_vm11, %v15562_v42, 0.0  ;;  %v7082_v27 = vsel %vm18139_vm14, %v15660_v60, 0.0  ;;  %vm18140_vm10 = vnez %v17638_v6  ;;  %7194 = vrot.lane.b32.xlu0 %v15740_v18, %s17435_s27 }
0x2294   : > { %v15821_v45 = vpack.c.bf16 %v7041_v33, %v7040_v61  ;;  %v7083_v12 = vsel %vm18140_vm10, %v7072_v2, 0.0  ;;  %vm18141_vm8 = vnez %v17663_v29  ;;  %vm18142_vm1 = vnez %v17667_v1 }
0x2295   : > { %v7128_v24 = vsel %vm18141_vm8, %v15552_v25, 0.0  ;;  %v7129_v26 = vsel %vm18142_vm1, %v15635_v23, 0.0  ;;  %v15832_v42 = vpack.c.bf16 %v7083_v12, %v7082_v27  ;;  %vm18143_vm14 = vnez %v17648_v32 }
0x2296   : > { %v15834_v60 = vpack.c.bf16 %v7129_v26, %v7128_v24  ;;  %v7042_v10 = vsel %vm18143_vm14, %v15552_v25, 0.0  ;;  %v7043_v2 = vsel %vm17991_vm9, %v15635_v23, 0.0  ;;  %vm18144_vm8 = vnez %v17671_v7  ;;  %v18150_v24 = vld [vmem:[#allocation12_spill] sm:$0xff] }
0x2297   : > { %v15842_v59 = vpack.c.bf16 %v7043_v2, %v7042_v10  ;;  %v7104_v61 = vsel %vm18144_vm8, %v15505_v21, 0.0  ;;  %vm18145_vm1 = vnez %v17685_v54  ;;  %vm18146_vm10 = vnez %v17689_v28  ;;  %v18152_v10 = vld [vmem:[#allocation66_spill] sm:$0xff]  ;;  %7196 = vrot.lane.b32.xlu0 %v15764_v63, %s17435_s27 }
0x2298   : > { %v7105_v49 = vsel %vm18145_vm1, %v15511_v17, 0.0  ;;  %v7084_v33 = vsel %vm18146_vm10, %v15715_v13, 0.0  ;;  %vm18147_vm14 = vnez %v17693_v56  ;;  %vm18148_vm9 = vnez %v17719_v5  ;;  %v18180_v63 = vld [vmem:[#allocation58_spill] sm:$0xff] }
0x2299   : > { %v15853_v27 = vpack.c.bf16 %v7105_v49, %v7104_v61  ;;  %v7085_v25 = vsel %vm18147_vm14, %v15737_v16, 0.0  ;;  %v7130_v23 = vsel %vm18148_vm9, %v15643_v20, 0.0  ;;  %vm18149_vm8 = vnez %v17723_v11  ;;  %v18154_v49 = vld [vmem:[#allocation16_spill] sm:$0xff] }
0x229a   : > { %v7131_v21 = vsel %vm18149_vm8, %v15703_v50, 0.0  ;;  %v15866_v17 = vpack.c.bf16 %v7085_v25, %v7084_v33  ;;  %vm18151_vm1 = vnez %v18150_v24  ;;  %vm18153_vm14 = vnez %v18152_v10  ;;  %v18156_v33 = vld [vmem:[#allocation21_spill] sm:$0xff] }
0x229b   : > { %v15868_v12 = vpack.c.bf16 %v7131_v21, %v7130_v23  ;;  %v7044_v26 = vsel %vm18151_vm1, %v15643_v20, 0.0  ;;  %v7045_v2 = vsel %vm18153_vm14, %v15703_v50, 0.0  ;;  %vm18155_vm8 = vnez %v18154_v49  ;;  %v18159_v50 = vld [vmem:[#allocation49_spill] sm:$0xff] }
0x229c   : > { %v15878_v61 = vpack.c.bf16 %v7045_v2, %v7044_v26  ;;  %v7106_v52 = vsel %vm18155_vm8, %v15581_v9, 0.0  ;;  %vm18157_vm9 = vnez %v18156_v33  ;;  %v7150_v20 = vsel %vm18006_vm3, %v15588_v58, 0.0  ;;  %v18161_v26 = vld [vmem:[#allocation63_spill] sm:$0xff] }
0x229d   : > { %v7107_v25 = vsel %vm18157_vm9, %v15608_v8, 0.0  ;;  %vm18160_vm14 = vnez %v18159_v50  ;;  %vm18162_vm1 = vnez %v18161_v26  ;;  %v18163_v9 = vld [vmem:[#allocation51_spill] sm:$0xff]  ;;  %v18169_v50 = vld [vmem:[#allocation65_spill] sm:$0xff] }
0x229e   : > { %v15889_v21 = vpack.c.bf16 %v7107_v25, %v7106_v52  ;;  %v7151_v37 = vsel %vm18160_vm14, %v15668_v40, 0.0  ;;  %v7132_v2 = vsel %vm18162_vm1, %v15699_v43, 0.0  ;;  %vm18164_vm8 = vnez %v18163_v9  ;;  %v18165_v58 = vld [vmem:[#allocation75_spill] sm:$0xff]  ;;  %7184 = vrot.lane.b32.xlu1 %v18169_v50, %s17435_s27  ;;  %v18176_v50 = vld [vmem:[#allocation60_spill] sm:$0xff] }
0x229f   : > { %v7133_v49 = vsel %vm18164_vm8, %v15625_v62, 0.0  ;;  %v15900_v33 = vpack.c.bf16 %v7151_v37, %v7150_v20  ;;  %vm18166_vm9 = vnez %v18165_v58  ;;  %v18167_v25 = vld [vmem:[#allocation15_spill] sm:$0xff]  ;;  %v18174_v37 = vld [vmem:[#allocation28_spill] sm:$0xff] }
0x22a0   : > { %v15902_v8 = vpack.c.bf16 %v7133_v49, %v7132_v2  ;;  %v7108_v52 = vsel %vm18166_vm9, %v15573_v47, 0.0  ;;  %vm18168_vm3 = vnez %v18167_v25  ;;  %v18170_v9 = vld [vmem:[#allocation23_spill] sm:$0xff]  ;;  %vm18175_vm9 = vnez %v18174_v37 }
0x22a1   : > { %v7109_v40 = vsel %vm18168_vm3, %v15592_v22, 0.0  ;;  %vm18171_vm8 = vnez %v18170_v9  ;;  %v18172_v49 = vld [vmem:[#allocation27_spill] sm:$0xff]  ;;  %v7156_v47 = vsel %vm18175_vm9, %v15750_v19, 0.0  ;;  %vm18177_vm3 = vnez %v18176_v50 }
0x22a2   : > { %v15912_v43 = vpack.c.bf16 %v7109_v40, %v7108_v52  ;;  %v7154_v62 = vsel %vm18171_vm8, %v15715_v13, 0.0  ;;  %vm18173_vm1 = vnez %v18172_v49  ;;  %v7157_v2 = vsel %vm18177_vm3, %v15598_v38, 0.0  ;;  %7206 = vrot.lane.b32.xlu1 %v15744_v55, %s17435_s27  ;;  %v10578_v38 = vld [vmem:[%s16627_s16 + $0x348] sm:$0xff]  }
0x22a3   : > { %v7155_v20 = vsel %vm18173_vm1, %v15737_v16, 0.0  ;;  %v15930_v52 = vpack.c.bf16 %v7157_v2, %v7156_v47  ;;  %vm18178_vm9 = vcmask 523264   ;;  %v10580_v2 = vld [vmem:[%s16627_s16 + $0x358] sm:$0xff]  }
0x22a4   : > { %v15925_v22 = vpack.c.bf16 %v7155_v20, %v7154_v62  ;;  %vm18179_vm3 = vmmov %vm18178_vm9 }
0x22a5   : > { %vm18181_vm1 = vmmov %vm18179_vm3 }
0x22a6   : > { %7208 = vrot.lane.b32.xlu1 %v15766_v57, %s17435_s27  ;;  %vm18184_vm8 = vmmov %vm18181_vm1 }
0x22a7   : > { %vm18188_vm14 = vmmov %vm18181_vm1 }
0x22a8   : > { %vm18195_vm10 = vmmov %vm18181_vm1 }
0x22ed   : > { %v7167_v19 = vpop.permute.xlu0 %7166 }
0x22ee   : > { %v7212_v40 = vsel %vm18179_vm3, %v15776_v36, %v7167_v19  ;;  %vm18183_vm3 = vmmov %vm18181_vm1 }
0x22f1   : > { %v7179_v13 = vpop.permute.xlu1 %7178  ;;  %v7169_v18 = vpop.permute.xlu0 %7168 }
0x22f2   : > { %v7228_v16 = vsel %vm18178_vm9, %v15788_v51, %v7179_v13  ;;  %v10579_v51 = vld [vmem:[%s16627_s16 + $0x350] sm:$0xff]   ;;  %vm18182_vm9 = vmmov %vm18181_vm1  ;;  %v7216_v19 = vsel %vm18181_vm1, %v15821_v45, %v7169_v18 }
0x22f3   : > { %7615 = vmatprep.mubr.bf16.mxu0 %v7228_v16 }
0x22f4   : > { %7616 = vmatmul.mubr.bf16.vlgmr.msra.gmra.mrb[144].mxu0 %v7212_v40 }
0x22f5   : > { %v7181_v55 = vpop.permute.xlu1 %7180  ;;  %10271 = vmatpush3.bf16.msra.mxu0 %v18180_v63  ;;  %v7191_v62 = vpop.permute.xlu0 %7190 }
0x22f6   : > { %v7232_v57 = vsel %vm18181_vm1, %v15801_v14, %v7181_v55  ;;  %10272 = vmatprep.subr.bf16.mxu0 %v10578_v38  ;;  %v7244_v14 = vsel %vm18183_vm3, %v15799_v30, %v7191_v62  ;;  %vm18186_vm3 = vmmov %vm18181_vm1 }
0x22f7   : > { %7623 = vmatprep.mubr.bf16.mxu0 %v7232_v57 }
0x22f9   : > { %v7203_v20 = vpop.permute.xlu1 %7202  ;;  %10273 = vmatpush3.bf16.msra.mxu0 %v10578_v38  ;;  %v7171_v47 = vpop.permute.xlu0 %7170 }
0x22fa   : > { %v7260_v36 = vsel %vm18182_vm9, %v15809_v0, %v7203_v20  ;;  %10274 = vmatprep.subr.bf16.mxu0 %v10579_v51  ;;  %vm18185_vm9 = vmmov %vm18181_vm1  ;;  %v7220_v45 = vsel %vm18186_vm3, %v15842_v59, %v7171_v47  ;;  %v10596_v20 = vld [vmem:[%s16627_s16 + $0x3e8] sm:$0xff]   ;;  %v10586_v47 = vld [vmem:[%s16627_s16 + $0x370] sm:$0xff]  }
0x22fb   : > { %7680 = vmatprep.mubr.bf16.mxu1 %v7260_v36  ;;  %vm18190_vm3 = vmmov %vm18181_vm1  ;;  %v10598_v36 = vld [vmem:[%s16627_s16 + $0x430] sm:$0xff]  }
0x22fc   : > { %7624 = vmatmul.mubr.bf16.gmra.mrb[148].mxu0 %v7216_v19  ;;  %7681 = vmatmul.mubr.bf16.vlgmr.msra.gmra.mrb[140].mxu1 %v7244_v14  ;;  %v10600_v14 = vld [vmem:[%s16627_s16 + $0x3f0] sm:$0xff]   ;;  %v10588_v19 = vld [vmem:[%s16627_s16 + $0x378] sm:$0xff]  }
0x22fd   : > { %v7183_v13 = vpop.permute.xlu1 %7182  ;;  %10275 = vmatpush3.bf16.msra.mxu0 %v10579_v51  ;;  %v7193_v16 = vpop.permute.xlu0 %7192 }
0x22fe   : > { %v7236_v0 = vsel %vm18184_vm8, %v15832_v42, %v7183_v13  ;;  %10276 = vmatprep.subr.bf16.mxu0 %v10580_v2  ;;  %v7248_v18 = vsel %vm18181_vm1, %v15853_v27, %v7193_v16  ;;  %vm18187_vm8 = vmmov %vm18181_vm1  ;;  %v10589_v13 = vld [vmem:[%s16627_s16 + $0x3c0] sm:$0xff]  }
0x22ff   : > { %7631 = vmatprep.mubr.bf16.mxu0 %v7236_v0  ;;  %v10591_v16 = vld [vmem:[%s16627_s16 + $0x380] sm:$0xff]   ;;  %v10593_v0 = vld [vmem:[%s16627_s16 + $0x3c8] sm:$0xff]  }
0x2301   : > { %v7205_v38 = vpop.permute.xlu1 %7204  ;;  %10277 = vmatpush3.bf16.msra.mxu0 %v10580_v2  ;;  %v7173_v40 = vpop.permute.xlu0 %7172  ;;  %v10587_v2 = vld [vmem:[%s16627_s16 + $0x3b8] sm:$0xff]  }
0x2302   : > { %v7264_v30 = vsel %vm18185_vm9, %v15834_v60, %v7205_v38  ;;  %vm18189_vm9 = vmmov %vm18181_vm1  ;;  %v10595_v38 = vld [vmem:[%s16627_s16 + $0x388] sm:$0xff]  }
0x2303   : > { %7688 = vmatprep.mubr.bf16.mxu1 %v7264_v30  ;;  %v7224_v60 = vsel %vm18189_vm9, %v15878_v61, %v7173_v40  ;;  %vm18193_vm9 = vmmov %vm18181_vm1  ;;  %v10581_v61 = vld [vmem:[%s16627_s16 + $0x3a0] sm:$0xff]   ;;  %v10597_v40 = vld [vmem:[%s16627_s16 + $0x3d0] sm:$0xff]  }
0x2304   : > { %7632 = vmatmul.mubr.bf16.gmra.mrb[152].mxu0 %v7220_v45  ;;  %7689 = vmatmul.mubr.bf16.gmra.mrb[144].mxu1 %v7248_v18  ;;  %v10599_v30 = vld [vmem:[%s16627_s16 + $0x390] sm:$0xff]  }
0x2305   : > { %v7195_v63 = vpop.permute.xlu0 %7194  ;;  %9751 = vmatprep.subr.bf16.mxu1 %v10581_v61 }
0x2306   : > { %v7252_v59 = vsel %vm18190_vm3, %v15889_v21, %v7195_v63  ;;  %vm18194_vm3 = vmmov %vm18181_vm1  ;;  %v10583_v21 = vld [vmem:[%s16627_s16 + $0x3a8] sm:$0xff]  }
0x2309   : > { %v7197_v51 = vpop.permute.xlu0 %7196 }
0x2310   : > { %v7185_v55 = vpop.permute.xlu1 %7184 }
0x2311   : > { %v7240_v42 = vsel %vm18187_vm8, %v15866_v17, %v7185_v55  ;;  %vm18191_vm8 = vmmov %vm18181_vm1 }
0x2312   : > { %7639 = vmatprep.mubr.bf16.mxu0 %v7240_v42 }
0x2313   : > { %7640 = vmatmul.mubr.bf16.gmra.mrb[156].mxu0 %v7224_v60 }
0x2314   : > { %v7207_v62 = vpop.permute.xlu1 %7206  ;;  %10278 = vmatprep.mubr.msk.bf16.mxu0 %vm18181_vm1, %v15900_v33  ;;  %v10582_v33 = vld [vmem:[%s16627_s16 + $0x360] sm:$0xff]  }
0x2315   : > { %v7268_v57 = vsel %vm18188_vm14, %v15868_v12, %v7207_v62  ;;  %vm18192_vm14 = vmmov %vm18181_vm1  ;;  %9752 = vmatpush3.bf16.msra.mxu1 %v10582_v33 }
0x2316   : > { %7696 = vmatprep.mubr.bf16.mxu1 %v7268_v57  ;;  %v7256_v12 = vsel %vm18192_vm14, %v15912_v43, %v7197_v51  ;;  %v10592_v43 = vld [vmem:[%s16627_s16 + $0x3e0] sm:$0xff]   ;;  %9753 = vmatprep.subr.bf16.mxu1 %v10583_v21 }
0x2317   : > { %7697 = vmatmul.mubr.bf16.gmra.mrb[148].mxu1 %v7252_v59  ;;  %v9128_v57 = vld [vmem:[%s16628_s17 + $0x2] ss:$0 sm:$0xff] }
0x2318   : > { %v7209_v27 = vpop.permute.xlu1 %7208 }
0x2319   : > { %v7272_v17 = vsel %vm18191_vm8, %v15902_v8, %v7209_v27  ;;  %v10590_v8 = vld [vmem:[%s16627_s16 + $0x420] sm:$0xff]  }
0x231a   : > { %7704 = vmatprep.mubr.bf16.mxu1 %v7272_v17  ;;  %9791 = vmatprep.subr.bf16.mxu0 %v10590_v8 }
0x231b   : > { %10279 = vmatmul.mubr.msk.bf16.vlgmr.msra.gmra.mrb[160].mxu0 %vm18193_vm9, %v15742_v39  ;;  %v10584_v39 = vld [vmem:[%s16627_s16 + $0x368] sm:$0xff]   ;;  %vm18215_vm9 = vcmp.lt.s32.totalorder %v17883_v15, 7 }
0x231c   : > { %10282 = vmatprep.mubr.msk.bf16.mxu0 %vm18194_vm3, %v15925_v22  ;;  %v10585_v22 = vld [vmem:[%s16627_s16 + $0x3b0] sm:$0xff]   ;;  %9792 = vmatpush3.bf16.msra.mxu0 %v10592_v43 }
0x231d   : > { %9754 = vmatpush3.bf16.msra.mxu1 %v10584_v39 }
0x231e   : > { %9755 = vmatprep.subr.bf16.mxu1 %v10585_v22 }
0x231f   : > { %7705 = vmatmul.mubr.bf16.gmra.mrb[152].mxu1 %v7256_v12 }
0x2321   : > { %9756 = vmatpush3.bf16.msra.mxu1 %v10586_v47 }
0x2322   : > { %9757 = vmatprep.subr.bf16.mxu1 %v10587_v2 }
0x2323   : > { %10283 = vmatmul.mubr.msk.bf16.gmra.mrb[164].mxu0 %vm18195_vm10, %v15930_v52  ;;  %v10594_v52 = vld [vmem:[%s16627_s16 + $0x428] sm:$0xff]  }
0x2324   : > { %9793 = vmatprep.subr.bf16.mxu0 %v10594_v52 }
0x2325   : > { %9794 = vmatpush3.bf16.msra.mxu0 %v10596_v20  ;;  %9758 = vmatpush3.bf16.msra.mxu1 %v10588_v19 }
0x2326   : > { %9795 = vmatprep.subr.bf16.mxu0 %v10598_v36  ;;  %9759 = vmatprep.subr.bf16.mxu1 %v10589_v13 }
0x2329   : > { %9796 = vmatpush3.bf16.msra.mxu0 %v10600_v14  ;;  %9760 = vmatpush3.bf16.msra.mxu1 %v10591_v16 }
0x232a   : > { %9761 = vmatprep.subr.bf16.mxu1 %v10593_v0 }
0x232d   : > { %9762 = vmatpush3.bf16.msra.mxu1 %v10595_v38 }
0x232e   : > { %9763 = vmatprep.subr.bf16.mxu1 %v10597_v40 }
0x2331   : > { %9764 = vmatpush3.bf16.msra.mxu1 %v10599_v30 }
0x23c7   : > { %v9679_v45 = vpop.f32.mrb[144].mxu0 }
0x23c8   : > { %v9680_v18 = vpop.f32.mrb[145].mxu0 }
0x23c9   : > { %v9681_v55 = vadd.f32 %v9680_v18, %v9679_v45  ;;  %v9682_v42 = vpop.f32.mrb[146].mxu0 }
0x23ca   : > { %v9683_v63 = vpop.f32.mrb[147].mxu0 }
0x23cb   : > { %v9684_v62 = vadd.f32 %v9683_v63, %v9682_v42  ;;  %v7618_v51 = vadd.f32 %v9681_v55, %v9128_v57 }
0x23cd   : > { %v7621_v43 = vadd.f32 %v9684_v62, %v9128_v57 }
0x23cf   : > { %v9685_v60 = vpop.f32.mrb[148].mxu0  ;;  %v9719_v59 = vpop.f32.mrb[140].mxu1 }
0x23d0   : > { %v9686_v27 = vpop.f32.mrb[149].mxu0  ;;  %v9720_v17 = vpop.f32.mrb[141].mxu1 }
0x23d1   : > { %v9687_v12 = vadd.f32 %v9686_v27, %v9685_v60  ;;  %v9721_v61 = vadd.f32 %v9720_v17, %v9719_v59  ;;  %v9688_v33 = vpop.f32.mrb[150].mxu0  ;;  %v9722_v21 = vpop.f32.mrb[142].mxu1 }
0x23d2   : > { %v9689_v39 = vpop.f32.mrb[151].mxu0  ;;  %v9723_v8 = vpop.f32.mrb[143].mxu1 }
0x23d3   : > { %v9690_v22 = vadd.f32 %v9689_v39, %v9688_v33  ;;  %v9724_v52 = vadd.f32 %v9723_v8, %v9722_v21  ;;  %v7683_v20 = vadd.f32 %v9721_v61, %v7618_v51  ;;  %v7626_v13 = vadd.f32 %v9687_v12, %v9128_v57 }
0x23d5   : > { %v7686_v47 = vadd.f32 %v9724_v52, %v7621_v43  ;;  %v7629_v18 = vadd.f32 %v9690_v22, %v9128_v57 }
0x23d7   : > { %v9691_v36 = vpop.f32.mrb[152].mxu0  ;;  %v9725_v2 = vpop.f32.mrb[144].mxu1 }
0x23d8   : > { %v9692_v14 = vpop.f32.mrb[153].mxu0  ;;  %v9726_v19 = vpop.f32.mrb[145].mxu1 }
0x23d9   : > { %v9693_v16 = vadd.f32 %v9692_v14, %v9691_v36  ;;  %v9727_v0 = vadd.f32 %v9726_v19, %v9725_v2  ;;  %v9694_v38 = vpop.f32.mrb[154].mxu0  ;;  %v9728_v40 = vpop.f32.mrb[146].mxu1 }
0x23da   : > { %v9695_v30 = vpop.f32.mrb[155].mxu0  ;;  %v9729_v45 = vpop.f32.mrb[147].mxu1 }
0x23db   : > { %v9696_v55 = vadd.f32 %v9695_v30, %v9694_v38  ;;  %v9730_v42 = vadd.f32 %v9729_v45, %v9728_v40  ;;  %v7691_v63 = vadd.f32 %v9727_v0, %v7626_v13  ;;  %v7634_v51 = vadd.f32 %v9693_v16, %v9128_v57 }
0x23dd   : > { %v7694_v62 = vadd.f32 %v9730_v42, %v7629_v18  ;;  %v7637_v43 = vadd.f32 %v9696_v55, %v9128_v57 }
0x23e6   : > { %v9697_v60 = vpop.f32.mrb[156].mxu0 }
0x23e7   : > { %v9698_v27 = vpop.f32.mrb[157].mxu0 }
0x23e8   : > { %v9699_v61 = vadd.f32 %v9698_v27, %v9697_v60  ;;  %v9700_v21 = vpop.f32.mrb[158].mxu0 }
0x23e9   : > { %v9701_v39 = vpop.f32.mrb[159].mxu0 }
0x23ea   : > { %v9731_v59 = vpop.f32.mrb[148].mxu1  ;;  %v9702_v52 = vadd.f32 %v9701_v39, %v9700_v21  ;;  %v7642_v40 = vadd.f32 %v9699_v61, %v9128_v57  ;;  %v10602_v39 = vld [vmem:[%s16627_s16 + $0x438] sm:$0xff]  }
0x23eb   : > { %v9732_v17 = vpop.f32.mrb[149].mxu1  ;;  %9797 = vmatprep.subr.bf16.mxu0 %v10602_v39  ;;  %v18203_v39 = vld [vmem:[#allocation53_spill] sm:$0xff] }
0x23ec   : > { %v9733_v33 = vadd.f32 %v9732_v17, %v9731_v59  ;;  %v9734_v12 = vpop.f32.mrb[150].mxu1  ;;  %v7645_v42 = vadd.f32 %v9702_v52, %v9128_v57  ;;  %vm18204_vm10 = vnez %v18203_v39  ;;  %v10612_v39 = vld [vmem:[%s16627_s16 + $0x458] sm:$0xff]  }
0x23ed   : > { %v9735_v8 = vpop.f32.mrb[151].mxu1 }
0x23ee   : > { %v9736_v36 = vadd.f32 %v9735_v8, %v9734_v12  ;;  %v7699_v2 = vadd.f32 %v9733_v33, %v7634_v51  ;;  %v10280_v19 = vpop.f32.mrb[160].mxu0 }
0x23ef   : > { %v7756_v13 = vadd.f32 %v10280_v19, %v7691_v63  ;;  %v7747_v38 = vpop.f32.mrb[161].mxu0 }
0x23f0   : > { %v16051_v22 = vadd.f32 %v9736_v36, %v7637_v43  ;;  %v7748_v16 = vadd.f32 %v7747_v38, %v7683_v20  ;;  %v10281_v18 = vpop.f32.mrb[162].mxu0  ;;  %v10603_v36 = vld [vmem:[%s16627_s16 + $0x398] sm:$0xff]  }
0x23f1   : > { %v16053_v60 = vmax.f32 %v7756_v13, 0.0  ;;  %v7759_v59 = vadd.f32 %v10281_v18, %v7694_v62  ;;  %v7750_v27 = vpop.f32.mrb[163].mxu0  ;;  %v10601_v62 = vld [vmem:[%s16627_s16 + $0x3d8] sm:$0xff]  }
0x23f2   : > { %v9737_v14 = vpop.f32.mrb[152].mxu1  ;;  %v16055_v17 = vmax.f32 %v7748_v16, 0.0  ;;  %v7751_v33 = vadd.f32 %v7750_v27, %v7686_v47  ;;  %9765 = vmatprep.subr.bf16.mxu1 %v10601_v62 }
0x23f3   : > { %v9738_v0 = vpop.f32.mrb[153].mxu1  ;;  %v7788_v63 = vrot.slane %v16053_v60, 7  ;;  %v17009_v12 = vrot.slane %v16053_v60, 1  ;;  %v16059_v61 = vmax.f32 %v7759_v59, 0.0  ;;  %v7817_v57 = vsel %vm17878_vm4, %v16053_v60, 0.0  ;;  %9766 = vmatpush3.bf16.msra.mxu1 %v10603_v36 }
0x23f4   : > { %v9739_v30 = vadd.f32 %v9738_v0, %v9737_v14  ;;  %v9740_v45 = vpop.f32.mrb[154].mxu1  ;;  %v7786_v47 = vrot.slane %v16055_v17, 7  ;;  %v16072_v43 = vmax.f32 %v7751_v33, 0.0  ;;  %v10604_v14 = vld [vmem:[%s16627_s16 + $0x3f8] sm:$0xff]   ;;  %v7815_v38 = vsel %vm17880_vm15, %v16055_v17, 0.0  ;;  %v18210_v0 = vld [vmem:[#allocation40_spill] sm:$0xff] }
0x23f5   : > { %v9741_v55 = vpop.f32.mrb[155].mxu1  ;;  %v7789_v19 = vrot.slane %v16059_v61, 7  ;;  %9798 = vmatpush3.bf16.msra.mxu0 %v10604_v14  ;;  %vm18202_vm15 = vcmp.lt.s32.totalorder %v17883_v15, 1  ;;  %v10605_v14 = vld [vmem:[%s16627_s16 + $0x440] sm:$0xff]   ;;  %vm18211_vm8 = vnez %v18210_v0  ;;  %v18238_v11 = vrot.slane %v16055_v17, 1 }
0x23f6   : > { %v9742_v51 = vadd.f32 %v9741_v55, %v9740_v45  ;;  %v7707_v21 = vadd.f32 %v9739_v30, %v7642_v40  ;;  %v7818_v30 = vsel %vm18068_vm0, %v16059_v61, 0.0  ;;  %v7787_v16 = vrot.slane %v16072_v43, 7  ;;  %v10284_v18 = vpop.f32.mrb[164].mxu0  ;;  %v18200_v55 = vld [vmem:[#allocation33_spill] sm:$0xff]  ;;  %9799 = vmatprep.subr.bf16.mxu0 %v10605_v14 }
0x23f7   : > { %v7816_v59 = vsel %vm18044_vm6, %v16072_v43, 0.0  ;;  %vm18201_vm4 = vnez %v18200_v55  ;;  %v7763_v33 = vpop.f32.mrb[165].mxu0  ;;  %v16100_v62 = vsel %vm18202_vm15, %v7788_v63, %v7789_v19  ;;  %vm18205_vm6 = vmmov %vm18202_vm15  ;;  %v18237_v23 = vrot.slane %v16072_v43, 1 }
0x23f8   : > { %v7710_v52 = vadd.f32 %v9742_v51, %v7645_v42  ;;  %v7772_v51 = vadd.f32 %v10284_v18, %v7707_v21  ;;  %v16096_v20 = vpack.c.bf16 %v7817_v57, %v7816_v59  ;;  %v7764_v40 = vadd.f32 %v7763_v33, %v7699_v2  ;;  %v10285_v42 = vpop.f32.mrb[166].mxu0  ;;  %vm18206_vm0 = vmmov %vm18205_vm6  ;;  %v18207_v57 = vld [vmem:[#allocation57_spill] sm:$0xff]  ;;  %v10606_v2 = vld [vmem:[%s16627_s16 + $0x400] sm:$0xff]  }
0x23f9   : > { %v16107_v13 = vsel %vm18205_vm6, %v7786_v47, %v7787_v16  ;;  %v16111_v21 = vsel %vm18206_vm0, %v7787_v16, %v7788_v63  ;;  %vm18208_vm1 = vnez %v18207_v57  ;;  %v7766_v33 = vpop.f32.mrb[167].mxu0  ;;  %v18212_v16 = vld [vmem:[#allocation56_spill] sm:$0xff]  ;;  %9800 = vmatpush3.bf16.msra.mxu0 %v10606_v2 }
0x23fa   : > { %v7857_v36 = vsel %vm18208_vm1, %v16100_v62, 0.0  ;;  %v16122_v18 = vmax.f32 %v7772_v51, 0.0  ;;  %v7775_v59 = vadd.f32 %v10285_v42, %v7710_v52  ;;  %v7855_v63 = vsel %vm18211_vm8, %v16107_v13, 0.0  ;;  %vm18222_vm1 = vmmov %vm18206_vm0  ;;  %v18223_v42 = vld [vmem:[#allocation42_spill] sm:$0xff] }
0x23fb   : > { %vm18213_vm14 = vnez %v18212_v16  ;;  %v16130_v27 = vmax.f32 %v7764_v40, 0.0  ;;  %v7767_v8 = vadd.f32 %v7766_v33, %v16051_v22  ;;  %v18214_v51 = vrot.slane %v16072_v43, 1  ;;  %v18216_v40 = vld [vmem:[#allocation38_spill] sm:$0xff]  ;;  %v10608_v33 = vld [vmem:[%s16627_s16 + $0x408] sm:$0xff]  }
0x23fc   : > { %18209 = vst [vmem:[#allocation72_spill] sm:$0xff] %v16122_v18  ;;  %v7856_v57 = vsel %vm18213_vm14, %v16111_v21, 0.0  ;;  %v7792_v0 = vrot.slane %v16122_v18, 7  ;;  %v16145_v16 = vmax.f32 %v7775_v59, 0.0  ;;  %vm18217_vm3 = vnez %v18216_v40  ;;  %v18218_v59 = vld [vmem:[#allocation64_spill] sm:$0xff] }
0x23fd   : > { %v16133_v45 = vpack.c.bf16 %v7857_v36, %v7856_v57  ;;  %v16141_v52 = vsel %vm18215_vm9, %v18214_v51, %v17009_v12  ;;  %v7821_v22 = vsel %vm18217_vm3, %v16122_v18, 0.0  ;;  %v10607_v36 = vld [vmem:[%s16627_s16 + $0x448] sm:$0xff]   ;;  %v7790_v14 = vrot.slane %v16130_v27, 7  ;;  %v18220_v12 = vld [vmem:[#allocation36_spill] sm:$0xff]  ;;  %vm18227_vm9 = vmmov %vm18206_vm0 }
0x23fe   : > { %v7830_v57 = vrot.slane %v16130_v27, 1  ;;  %v16158_v51 = vmax.f32 %v7767_v8, 0.0  ;;  %vm18219_vm15 = vnez %v18218_v59  ;;  %v7793_v2 = vrot.slane %v16145_v16, 7  ;;  %9801 = vmatprep.subr.bf16.mxu0 %v10607_v36 }
0x23ff   : > { %v7819_v40 = vsel %vm18219_vm15, %v16130_v27, 0.0  ;;  %vm18221_vm6 = vnez %v18220_v12  ;;  %v16172_v49 = vsel %vm18206_vm0, %v7789_v19, %v7790_v14  ;;  %vm18224_vm8 = vnez %v18223_v42  ;;  %9802 = vmatpush3.bf16.msra.mxu0 %v10608_v33  ;;  %vm18230_vm15 = vmmov %vm18206_vm0  ;;  %v16206_v33 = vld [vmem:[%s16627_s16 + $0x460] sm:$0xff]  }
0x2400   : > { %v7814_v50 = vsel %vm18221_vm6, %v16145_v16, 0.0  ;;  %v7824_v37 = vpack.c.bf16 %v7819_v40, %v7818_v30  ;;  %v7791_v25 = vrot.slane %v16158_v51, 7  ;;  %v7831_v58 = vrot.slane %v16158_v51, 1  ;;  %v18225_v30 = vld [vmem:[#allocation48_spill] sm:$0xff]  ;;  %vm18231_vm6 = vmmov %vm18206_vm0  ;;  %18232 = vst [vmem:[#allocation35_spill] sm:$0xff] %v16206_v33  ;;  %10286 = vmatprep.subr.bf16.mxu1 %v16206_v33  ;;  %v18258_v33 = vld [vmem:[#allocation71_spill] sm:$0xff] }
0x2401   : > { %v7822_v8 = vpack.c.bf16 %v7815_v38, %v7814_v50  ;;  %v16176_v59 = vsel %vm18222_vm1, %v7793_v2, %v7786_v47  ;;  %v7858_v12 = vsel %vm18224_vm8, %v16172_v49, 0.0  ;;  %vm18226_vm14 = vnez %v18225_v30  ;;  %v18228_v50 = vld [vmem:[#allocation45_spill] sm:$0xff] }
0x2402   : > { %v7820_v36 = vsel %vm18226_vm14, %v16158_v51, 0.0  ;;  %v16186_v40 = vsel %vm18227_vm9, %v7792_v0, %v7793_v2  ;;  %vm18229_vm3 = vnez %v18228_v50  ;;  %v16194_v19 = vsel %vm18230_vm15, %v7790_v14, %v7791_v25  ;;  %v10609_v2 = vld [vmem:[%s16627_s16 + $0x450] sm:$0xff]  }
0x2403   : > { %7930 = vrot.lane.b32.xlu0 %v7822_v8, %s17435_s27  ;;  %v7854_v47 = vsel %vm18229_vm3, %v16176_v59, 0.0  ;;  %v7825_v38 = vpack.c.bf16 %v7821_v22, %v7820_v36  ;;  %v16198_v42 = vsel %vm18231_vm6, %v7791_v25, %v7792_v0  ;;  %v10611_v8 = vld [vmem:[%s16627_s16 + $0x410] sm:$0xff]   ;;  %v18233_v22 = vld [vmem:[#allocation43_spill] sm:$0xff]  ;;  %v7861_v50 = vsel %vm18103_vm13, %v16186_v40, 0.0  ;;  %9803 = vmatprep.subr.bf16.mxu0 %v10609_v2 }
0x2404   : > { %v7862_v14 = vpack.c.bf16 %v7855_v63, %v7854_v47  ;;  %vm18234_vm0 = vnez %v18233_v22  ;;  %v7860_v0 = vsel %vm18101_vm2, %v16198_v42, 0.0  ;;  %vm18239_vm1 = vcmp.lt.s32.totalorder %v17883_v15, 7  ;;  %v18240_v47 = vld [vmem:[#allocation61_spill] sm:$0xff]  ;;  %9804 = vmatpush3.bf16.msra.mxu0 %v10611_v8  ;;  %v18256_v8 = vld [vmem:[#allocation8_spill] sm:$0xff] }
0x2405   : > { %v7859_v30 = vsel %vm18234_vm0, %v16194_v19, 0.0  ;;  %v16220_v26 = vpack.c.bf16 %v7861_v50, %v7860_v0  ;;  %v16228_v63 = vsel %vm18239_vm1, %v18238_v11, %v18237_v23  ;;  %vm18241_vm8 = vnez %v18240_v47  ;;  %vm18248_vm13 = vmmov %vm18239_vm1  ;;  %v10613_v50 = vld [vmem:[%s16627_s16 + $0x418] sm:$0xff]   ;;  %9805 = vmatprep.subr.bf16.mxu0 %v10612_v39  ;;  %v18270_v39 = vld [vmem:[#allocation11_spill] sm:$0xff] }
0x2406   : > { %v7864_v9 = vpack.c.bf16 %v7859_v30, %v7858_v12  ;;  %v7879_v22 = vsel %vm18241_vm8, %v16141_v52, 0.0  ;;  %7942 = vrot.lane.b32.xlu1 %v7862_v14, %s17435_s27  ;;  %v18242_v12 = vld [vmem:[#allocation46_spill] sm:$0xff]  ;;  %v18244_v25 = vsel %vm18201_vm4, %v16072_v43, 0.0  ;;  %v18245_v11 = vsel %vm18204_vm10, %v16053_v60, 0.0  ;;  %vm18251_vm14 = vmmov %vm18239_vm1 }
0x2407   : > { %vm18243_vm2 = vnez %v18242_v12  ;;  %v16246_v23 = vpack.c.bf16 %v18245_v11, %v18244_v25  ;;  %v18247_v2 = vrot.slane %v16059_v61, 1  ;;  %v18250_v36 = vrot.slane %v16053_v60, 1  ;;  %7932 = vrot.lane.b32.xlu0 %v16096_v20, %s17435_s27  ;;  %v18252_v12 = vld [vmem:[#allocation25_spill] sm:$0xff]  ;;  %vm18263_vm6 = vmmov %vm18239_vm1 }
0x2408   : > { %v7878_v30 = vsel %vm18243_vm2, %v16228_v63, 0.0  ;;  %vm18253_vm4 = vnez %v18252_v12  ;;  %v18254_v11 = vld [vmem:[#allocation9_spill] sm:$0xff]  ;;  %vm18257_vm9 = vnez %v18256_v8  ;;  %vm18259_vm3 = vnez %v18258_v33  ;;  %vm18265_vm0 = vmmov %vm18239_vm1  ;;  %v18268_v8 = vld [vmem:[#allocation7_spill] sm:$0xff]  ;;  %9806 = vmatpush3.bf16.msra.mxu0 %v10613_v50 }
0x2409   : > { %18246 = vst [vmem:[#allocation17_spill] sm:$0xff] %v16246_v23  ;;  %v7837_v0 = vsel %vm18248_vm13, %v18247_v2, %v7830_v57  ;;  %v18249_v14 = vmov %v18247_v2  ;;  %v7886_v47 = vpack.c.bf16 %v7879_v22, %v7878_v30  ;;  %vm18255_vm10 = vnez %v18254_v11  ;;  %v18260_v23 = vld [vmem:[#allocation47_spill] sm:$0xff] }
0x240a   : > { %v16258_v55 = vsel %vm18251_vm14, %v18250_v36, %v18249_v14  ;;  %v7881_v2 = vsel %vm18255_vm10, %v7837_v0, 0.0  ;;  %v7916_v14 = vsel %vm18257_vm9, %v7837_v0, 0.0  ;;  %v7904_v5 = vsel %vm18259_vm3, %v16059_v61, 0.0  ;;  %7944 = vrot.lane.b32.xlu1 %v16133_v45, %s17435_s27 }
0x240b   : > { %v7880_v25 = vsel %vm18253_vm4, %v16258_v55, 0.0  ;;  %vm18261_vm15 = vnez %v18260_v23  ;;  %v18262_v22 = vrot.slane %v16122_v18, 1  ;;  %v7906_v23 = vsel %vm17958_vm5, %v16158_v51, 0.0  ;;  %7934 = vrot.lane.b32.xlu0 %v7824_v37, %s17435_s27  ;;  %vm18279_vm5 = vmmov %vm18265_vm0  ;;  %v18290_v37 = vld [vmem:[#allocation77_spill] sm:$0xff] }
0x240c   : > { %v16275_v36 = vpack.c.bf16 %v7881_v2, %v7880_v25  ;;  %v7905_v20 = vsel %vm18261_vm15, %v16130_v27, 0.0  ;;  %v7836_v25 = vsel %vm18265_vm0, %v7830_v57, %v7831_v58  ;;  %vm18269_vm1 = vnez %v18268_v8 }
0x240d   : > { %v16287_v30 = vsel %vm18263_vm6, %v7831_v58, %v18262_v22  ;;  %v16289_v12 = vpack.c.bf16 %v7905_v20, %v7904_v5  ;;  %v7882_v22 = vsel %vm18269_vm1, %v7836_v25, 0.0  ;;  %vm18271_vm8 = vnez %v18270_v39  ;;  %v18272_v20 = vld [vmem:[#allocation39_spill] sm:$0xff] }
0x240e   : > { %v7883_v33 = vsel %vm17952_vm12, %v16287_v30, 0.0  ;;  %v7917_v5 = vsel %vm18271_vm8, %v7836_v25, 0.0  ;;  %vm18273_vm2 = vnez %v18272_v20  ;;  %v18274_v57 = vrot.slane %v16145_v16, 1  ;;  %vm18276_vm12 = vmmov %vm18265_vm0  ;;  %7946 = vrot.lane.b32.xlu1 %v7864_v9, %s17435_s27 }
0x240f   : > { %18264 = vst [vmem:[#allocation44_spill] sm:$0xff] %v16289_v12  ;;  %v7907_v58 = vsel %vm18273_vm2, %v16122_v18, 0.0  ;;  %v18275_v11 = vrot.slane %v16122_v18, 1  ;;  %v16317_v45 = vpack.c.bf16 %v7883_v33, %v7882_v22  ;;  %v16319_v8 = vpack.c.bf16 %v7917_v5, %v7916_v14  ;;  %v18283_v14 = vld [vmem:[#allocation55_spill] sm:$0xff]  ;;  %7936 = vrot.lane.b32.xlu0 %v7825_v38, %s17435_s27 }
0x2410   : > { %v16321_v39 = vpack.c.bf16 %v7907_v58, %v7906_v23  ;;  %v18277_v20 = vrot.slane %v16055_v17, 1  ;;  %v18278_v12 = vmov %v18274_v57  ;;  %vm18284_vm14 = vnez %v18283_v14 }
0x2411   : > { %v16314_v2 = vsel %vm18276_vm12, %v18275_v11, %v18274_v57  ;;  %v18280_v57 = vld [vmem:[#allocation54_spill] sm:$0xff]  ;;  %v7908_v23 = vsel %vm18284_vm14, %v16145_v16, 0.0  ;;  %vm18285_vm4 = vnez %v18120_v46  ;;  %v18288_v11 = vld [vmem:[#allocation76_spill] sm:$0xff]  ;;  %vm18294_vm15 = vnez %v18131_v48 }
0x2412   : > { %v16329_v18 = vsel %vm18279_vm5, %v18278_v12, %v18277_v20  ;;  %vm18281_vm13 = vnez %v18280_v57  ;;  %v7909_v22 = vsel %vm18285_vm4, %v16055_v17, 0.0  ;;  %v18286_v12 = vld [vmem:[#allocation5_spill] sm:$0xff]  ;;  %vm18289_vm9 = vnez %v18288_v11  ;;  %7948 = vrot.lane.b32.xlu1 %v16220_v26, %s17435_s27 }
0x2413   : > { %v7884_v50 = vsel %vm18281_vm13, %v16314_v2, 0.0  ;;  %v7885_v33 = vsel %vm18117_vm7, %v16329_v18, 0.0  ;;  %v16345_v15 = vpack.c.bf16 %v7909_v22, %v7908_v23  ;;  %vm18287_vm10 = vnez %v18286_v12  ;;  %7954 = vrot.lane.b32.xlu0 %v7886_v47, %s17435_s27  ;;  %v18317_v47 = vld [vmem:[#allocation68_spill] sm:$0xff] }
0x2414   : > { %v16343_v5 = vpack.c.bf16 %v7885_v33, %v7884_v50  ;;  %v7802_v58 = vsel %vm18287_vm10, %v16186_v40, 0.0  ;;  %v7803_v20 = vsel %vm18289_vm9, %v16176_v59, 0.0  ;;  %vm18291_vm7 = vnez %v18290_v37  ;;  %v18292_v50 = vld [vmem:[#allocation78_spill] sm:$0xff] }
0x2415   : > { %v16354_v57 = vpack.c.bf16 %v7803_v20, %v7802_v58  ;;  %v7842_v46 = vsel %vm18291_vm7, %v16329_v18, 0.0  ;;  %vm18293_vm3 = vnez %v18292_v50  ;;  %v7844_v14 = vsel %vm18294_vm15, %v16141_v52, 0.0  ;;  %v18299_v20 = vld [vmem:[#allocation79_spill] sm:$0xff]  ;;  %v18323_v50 = vld [vmem:[#allocation16_spill] sm:$0xff] }
0x2416   : > { %v7843_v33 = vsel %vm18293_vm3, %v16228_v63, 0.0  ;;  %vm18295_vm6 = vnez %v17979_v34  ;;  %vm18296_vm0 = vnez %v17982_v31  ;;  %v7805_v12 = vsel %vm18138_vm11, %v16111_v21, 0.0 }
0x2417   : > { %v16366_v23 = vpack.c.bf16 %v7843_v33, %v7842_v46  ;;  %v7845_v9 = vsel %vm18295_vm6, %v16258_v55, 0.0  ;;  %v7804_v22 = vsel %vm18296_vm0, %v16107_v13, 0.0  ;;  %vm18297_vm1 = vnez %v17634_v41  ;;  %7956 = vrot.lane.b32.xlu0 %v16275_v36, %s17435_s27 }
0x2418   : > { %v16377_v58 = vpack.c.bf16 %v7845_v9, %v7844_v14  ;;  %v16379_v48 = vpack.c.bf16 %v7805_v12, %v7804_v22  ;;  %v7846_v38 = vsel %vm18297_vm1, %v7837_v0, 0.0  ;;  %vm18298_vm8 = vnez %v17638_v6  ;;  %v18327_v14 = vld [vmem:[#allocation63_spill] sm:$0xff] }
0x2419   : > { %v7847_v11 = vsel %vm18298_vm8, %v7836_v25, 0.0  ;;  %vm18300_vm2 = vnez %v18299_v20  ;;  %vm18301_vm12 = vnez %v17975_v44  ;;  %vm18302_vm11 = vnez %v18134_v53  ;;  %v18321_v25 = vld [vmem:[#allocation49_spill] sm:$0xff]  ;;  %v18335_v20 = vld [vmem:[#allocation44_spill] sm:$0xff] }
0x241a   : > { %v16385_v34 = vpack.c.bf16 %v7847_v11, %v7846_v38  ;;  %v7866_v31 = vsel %vm18300_vm2, %v16055_v17, 0.0  ;;  %v7867_v4 = vsel %vm18301_vm12, %v16072_v43, 0.0  ;;  %v7890_v37 = vsel %vm18302_vm11, %v16107_v13, 0.0  ;;  %v18333_v11 = vld [vmem:[#allocation27_spill] sm:$0xff] }
0x241b   : > { %v16398_v41 = vpack.c.bf16 %v7867_v4, %v7866_v31  ;;  %vm18303_vm5 = vnez %v17630_v3  ;;  %vm18304_vm13 = vnez %v17648_v32  ;;  %vm18305_vm14 = vnez %v17651_v35  ;;  %v18336_v31 = vld [vmem:[#allocation72_spill] sm:$0xff]  ;;  %v18337_v4 = vld [vmem:[#allocation75_spill] sm:$0xff]  ;;  %7958 = vrot.lane.b32.xlu0 %v16317_v45, %s17435_s27 }
0x241c   : > { %v7891_v6 = vsel %vm18303_vm5, %v16111_v21, 0.0  ;;  %v7806_v17 = vsel %vm18304_vm13, %v16100_v62, 0.0  ;;  %v7807_v44 = vsel %vm18305_vm14, %v16172_v49, 0.0  ;;  %vm18306_vm4 = vnez %v17689_v28 }
0x241d   : > { %v16410_v53 = vpack.c.bf16 %v7891_v6, %v7890_v37  ;;  %v16412_v43 = vpack.c.bf16 %v7807_v44, %v7806_v17  ;;  %v7848_v26 = vsel %vm18306_vm4, %v16287_v30, 0.0  ;;  %vm18307_vm10 = vnez %v17693_v56  ;;  %v18339_v37 = vld [vmem:[#allocation15_spill] sm:$0xff]  ;;  %v18341_v17 = vld [vmem:[#allocation28_spill] sm:$0xff] }
0x241e   : > { %v7849_v3 = vsel %vm18307_vm10, %v16314_v2, 0.0  ;;  %vm18308_vm9 = vnez %v17663_v29  ;;  %vm18309_vm7 = vnez %v17667_v1  ;;  %vm18310_vm3 = vnez %v18150_v24  ;;  %v18314_v1 = vld [vmem:[#allocation17_spill] sm:$0xff]  ;;  %v18343_v44 = vld [vmem:[#allocation60_spill] sm:$0xff] }
0x241f   : > { %v16420_v32 = vpack.c.bf16 %v7849_v3, %v7848_v26  ;;  %v7892_v35 = vsel %vm18308_vm9, %v16100_v62, 0.0  ;;  %v7893_v13 = vsel %vm18309_vm7, %v16172_v49, 0.0  ;;  %v7808_v21 = vsel %vm18310_vm3, %v16194_v19, 0.0  ;;  %7966 = vrot.lane.b32.xlu1 %v18314_v1, %s17435_s27  ;;  %v18315_v62 = vld [vmem:[#allocation67_spill] sm:$0xff]  ;;  %7960 = vrot.lane.b32.xlu0 %v16343_v5, %s17435_s27 }
0x2420   : > { %v16431_v28 = vpack.c.bf16 %v7893_v13, %v7892_v35  ;;  %vm18311_vm15 = vnez %v18152_v10  ;;  %vm18312_vm6 = vnez %v17671_v7  ;;  %vm18313_vm0 = vnez %v17685_v54  ;;  %v18347_v5 = vld [vmem:[#allocation35_spill] sm:$0xff] }
0x2421   : > { %v7809_v56 = vsel %vm18311_vm15, %v16198_v42, 0.0  ;;  %v7868_v0 = vsel %vm18312_vm6, %v16053_v60, 0.0  ;;  %v7869_v29 = vsel %vm18313_vm0, %v16059_v61, 0.0  ;;  %vm18316_vm1 = vnez %v18315_v62  ;;  %v18319_v60 = vld [vmem:[#allocation26_spill] sm:$0xff] }
0x2422   : > { %v16444_v49 = vpack.c.bf16 %v7809_v56, %v7808_v21  ;;  %v16446_v24 = vpack.c.bf16 %v7869_v29, %v7868_v0  ;;  %v7894_v10 = vsel %vm18316_vm1, %v16194_v19, 0.0  ;;  %vm18318_vm8 = vnez %v18317_v47 }
0x2423   : > { %v7895_v7 = vsel %vm18318_vm8, %v16198_v42, 0.0  ;;  %vm18320_vm2 = vnez %v18319_v60  ;;  %vm18322_vm12 = vnez %v18321_v25  ;;  %vm18324_vm11 = vnez %v18323_v50  ;;  %v18325_v42 = vld [vmem:[#allocation21_spill] sm:$0xff]  ;;  %7968 = vrot.lane.b32.xlu1 %v18335_v20, %s17435_s27  ;;  %v16574_v20 = vld [vmem:[%s16628_s17 + $0x3] ss:$0 sm:$0xff] }
0x2424   : > { %v16456_v54 = vpack.c.bf16 %v7895_v7, %v7894_v10  ;;  %v7914_v61 = vsel %vm18320_vm2, %v16141_v52, 0.0  ;;  %v7915_v46 = vsel %vm18322_vm12, %v16258_v55, 0.0  ;;  %v7870_v19 = vsel %vm18324_vm11, %v16130_v27, 0.0  ;;  %v18329_v52 = vld [vmem:[#allocation51_spill] sm:$0xff] }
0x2425   : > { %v16467_v33 = vpack.c.bf16 %v7915_v46, %v7914_v61  ;;  %vm18326_vm5 = vnez %v18325_v42  ;;  %vm18328_vm13 = vnez %v18327_v14  ;;  %vm18330_vm14 = vnez %v18329_v52  ;;  %v18331_v27 = vld [vmem:[#allocation23_spill] sm:$0xff] }
0x2426   : > { %v7871_v36 = vsel %vm18326_vm5, %v16158_v51, 0.0  ;;  %v7896_v9 = vsel %vm18328_vm13, %v16186_v40, 0.0  ;;  %v7897_v22 = vsel %vm18330_vm14, %v16176_v59, 0.0  ;;  %vm18332_vm4 = vnez %v18331_v27 }
0x2427   : > { %v16478_v12 = vpack.c.bf16 %v7871_v36, %v7870_v19  ;;  %v16480_v55 = vpack.c.bf16 %v7897_v22, %v7896_v9  ;;  %v7918_v38 = vsel %vm18332_vm4, %v16287_v30, 0.0  ;;  %vm18334_vm10 = vnez %v18333_v11  ;;  %7970 = vrot.lane.b32.xlu1 %v16321_v39, %s17435_s27 }
0x2428   : > { %v7919_v51 = vsel %vm18334_vm10, %v16314_v2, 0.0  ;;  %vm18338_vm9 = vnez %v18337_v4  ;;  %vm18340_vm7 = vnez %v18339_v37  ;;  %vm18342_vm3 = vnez %v18341_v17 }
0x2429   : > { %v16490_v40 = vpack.c.bf16 %v7919_v51, %v7918_v38  ;;  %v7872_v59 = vsel %vm18338_vm9, %v18336_v31, 0.0  ;;  %v7873_v6 = vsel %vm18340_vm7, %v16145_v16, 0.0  ;;  %v7920_v30 = vsel %vm18342_vm3, %v16329_v18, 0.0 }
0x242a   : > { %v16503_v2 = vpack.c.bf16 %v7873_v6, %v7872_v59  ;;  %vm18344_vm15 = vnez %v18343_v44  ;;  %vm18345_vm6 = vcmask 523264   ;;  %v10972_v19 = vmov 0.0  }
0x242b   : > { %v7921_v26 = vsel %vm18344_vm15, %v16228_v63, 0.0  ;;  %7972 = vrot.lane.b32.xlu1 %v16345_v15, %s17435_s27  ;;  %v10614_v63 = vld [vmem:[%s16627_s16 + $0x468] sm:$0xff]   ;;  %vm18346_vm0 = vmmov %vm18345_vm6  ;;  %10302 = vmatprep.subr.bf16.mxu0 %v10972_v19 }
0x242c   : > { %v16508_v3 = vpack.c.bf16 %v7921_v26, %v7920_v30  ;;  %vm18348_vm1 = vmmov %vm18346_vm0 }
0x242d   : > { %vm18349_vm8 = vmmov %vm18346_vm0 }
0x242e   : > { %vm18350_vm2 = vmmov %vm18346_vm0 }
0x242f   : > { %vm18351_vm12 = vmmov %vm18346_vm0 }
0x2430   : > { %vm18352_vm11 = vmmov %vm18346_vm0 }
0x2431   : > { %vm18353_vm5 = vmmov %vm18346_vm0 }
0x2432   : > { %vm18354_vm13 = vmmov %vm18346_vm0 }
0x2433   : > { %vm18355_vm14 = vmmov %vm18346_vm0 }
0x2434   : > { %vm18356_vm4 = vmmov %vm18346_vm0 }
0x2435   : > { %vm18357_vm10 = vmmov %vm18346_vm0 }
0x2436   : > { %vm18358_vm9 = vmmov %vm18346_vm0 }
0x2437   : > { %vm18359_vm7 = vmmov %vm18346_vm0 }
0x2438   : > { %vm18360_vm3 = vmmov %vm18346_vm0 }
0x2439   : > { %vm18361_vm15 = vmmov %vm18346_vm0 }
0x2475   : > { %v7931_v18 = vpop.permute.xlu0 %7930 }
0x2476   : > { %v7976_v13 = vsel %vm18346_vm0, %v16354_v57, %v7931_v18  ;;  %v10616_v57 = vld [vmem:[%s16627_s16 + $0x478] sm:$0xff]  }
0x2478   : > { %v7943_v16 = vpop.permute.xlu1 %7942 }
0x2479   : > { %v7933_v45 = vpop.permute.xlu0 %7932  ;;  %v7992_v35 = vsel %vm18345_vm6, %v16366_v23, %v7943_v16  ;;  %v10615_v23 = vld [vmem:[%s16627_s16 + $0x470] sm:$0xff]   ;;  %vm18362_vm6 = vmmov %vm18346_vm0 }
0x247a   : > { %8379 = vmatprep.mubr.bf16.mxu1 %v7992_v35  ;;  %v7980_v29 = vsel %vm18349_vm8, %v16379_v48, %v7933_v45  ;;  %vm18364_vm8 = vmmov %vm18346_vm0 }
0x247b   : > { %8380 = vmatmul.mubr.bf16.vlgmr.msra.gmra.mrb[156].mxu1 %v7976_v13 }
0x247c   : > { %v7945_v39 = vpop.permute.xlu1 %7944  ;;  %10287 = vmatpush3.bf16.msra.mxu1 %v18347_v5 }
0x247d   : > { %v7935_v21 = vpop.permute.xlu0 %7934  ;;  %v7996_v15 = vsel %vm18348_vm1, %v16377_v58, %v7945_v39  ;;  %10288 = vmatprep.subr.bf16.mxu1 %v10614_v63  ;;  %vm18363_vm1 = vmmov %vm18346_vm0 }
0x247e   : > { %8387 = vmatprep.mubr.bf16.mxu1 %v7996_v15  ;;  %v7984_v48 = vsel %vm18353_vm5, %v16412_v43, %v7935_v21  ;;  %vm18367_vm5 = vmmov %vm18346_vm0 }
0x2480   : > { %v7947_v56 = vpop.permute.xlu1 %7946  ;;  %10289 = vmatpush3.bf16.msra.mxu1 %v10614_v63 }
0x2481   : > { %v7937_v0 = vpop.permute.xlu0 %7936  ;;  %10290 = vmatprep.subr.bf16.mxu1 %v10615_v23  ;;  %v8000_v58 = vsel %vm18350_vm2, %v16385_v34, %v7947_v56  ;;  %vm10973_vm2 = vmmov 0  }
0x2483   : > { %8388 = vmatmul.mubr.bf16.gmra.mrb[160].mxu1 %v7980_v29 }
0x2484   : > { %v7949_v1 = vpop.permute.xlu1 %7948  ;;  %8395 = vmatprep.mubr.bf16.mxu1 %v8000_v58  ;;  %10291 = vmatpush3.bf16.msra.mxu1 %v10615_v23 }
0x2485   : > { %10292 = vmatprep.subr.bf16.mxu1 %v10616_v57  ;;  %v7955_v62 = vpop.permute.xlu0 %7954  ;;  %v8004_v34 = vsel %vm18354_vm13, %v16420_v32, %v7949_v1  ;;  %vm18368_vm13 = vmmov %vm18346_vm0 }
0x2486   : > { %v8008_v7 = vsel %vm18352_vm11, %v16398_v41, %v7955_v62  ;;  %v7988_v41 = vsel %vm18356_vm4, %v16444_v49, %v7937_v0  ;;  %vm18366_vm11 = vmmov %vm18346_vm0  ;;  %vm8616_vm4 = vcmask 517120  }
0x2488   : > { %10293 = vmatpush3.bf16.msra.mxu1 %v10616_v57 }
0x2489   : > { %v7957_v25 = vpop.permute.xlu0 %7956 }
0x248a   : > { %v8012_v46 = vsel %vm18357_vm10, %v16446_v24, %v7957_v25 }
0x248b   : > { %8396 = vmatmul.mubr.bf16.gmra.mrb[164].mxu1 %v7984_v48 }
0x248c   : > { %8403 = vmatprep.mubr.bf16.mxu1 %v8004_v34 }
0x248d   : > { %v7959_v32 = vpop.permute.xlu0 %7958 }
0x248e   : > { %v8016_v50 = vsel %vm18360_vm3, %v16478_v12, %v7959_v32 }
0x2491   : > { %v7967_v10 = vpop.permute.xlu1 %7966  ;;  %v7961_v24 = vpop.permute.xlu0 %7960 }
0x2492   : > { %v8024_v47 = vsel %vm18351_vm12, %v16410_v53, %v7967_v10  ;;  %vm18365_vm12 = vmmov %vm18346_vm0 }
0x2493   : > { %8444 = vmatprep.mubr.bf16.mxu0 %v8024_v47  ;;  %8404 = vmatmul.mubr.bf16.gmra.mrb[168].mxu1 %v7988_v41 }
0x2494   : > { %8445 = vmatmul.mubr.bf16.vlgmr.msra.gmra.mrb[168].mxu0 %v8008_v7  ;;  %10294 = vmatprep.mubr.msk.bf16.mxu1 %vm18359_vm7, %v16467_v33  ;;  %v10974_v33 = vmov 0  }
0x2495   : > { %v7969_v60 = vpop.permute.xlu1 %7968  ;;  %10440 = vset.pattern.permute.xlu1 %v10974_v33  ;;  %10441 = vset.pattern.permute.xlu0 %v10974_v33 }
0x2496   : > { %v8028_v61 = vsel %vm18355_vm14, %v16431_v28, %v7969_v60  ;;  %vm18369_vm14 = vmmov %vm18346_vm0 }
0x2497   : > { %8452 = vmatprep.mubr.bf16.mxu0 %v8028_v61 }
0x2499   : > { %v7971_v53 = vpop.permute.xlu1 %7970 }
0x249a   : > { %v8032_v43 = vsel %vm18358_vm9, %v16456_v54, %v7971_v53  ;;  %v8020_v54 = vsel %vm18363_vm1, %v16503_v2, %v7961_v24 }
0x249b   : > { %10295 = vmatmul.mubr.msk.bf16.vlgmr.msra.gmra.mrb[172].mxu1 %vm18361_vm15, %v16319_v8  ;;  %v8555_v8 = vld [vmem:[%s16630_s19] sm:$0x3]  ;;  %vm8671_vm15 = vcmask 24576  }
0x249c   : > { %8453 = vmatmul.mubr.bf16.gmra.mrb[172].mxu0 %v8012_v46  ;;  %10298 = vmatprep.mubr.msk.bf16.mxu1 %vm18346_vm0, %v16490_v40 }
0x249d   : > { %8460 = vmatprep.mubr.bf16.mxu0 %v8032_v43  ;;  %v7973_v28 = vpop.permute.xlu1 %7972  ;;  %8558 = vperm.xlu1 %10440, %v8555_v8  }
0x249e   : > { %v8036_v49 = vsel %vm18362_vm6, %v16480_v55, %v7973_v28 }
0x24a3   : > { %10299 = vmatmul.mubr.msk.bf16.gmra.mrb[176].mxu1 %vm18364_vm8, %v16508_v3 }
0x24a4   : > { %8461 = vmatmul.mubr.bf16.gmra.mrb[176].mxu0 %v8016_v50 }
0x24a5   : > { %8468 = vmatprep.mubr.bf16.mxu0 %v8036_v49 }
0x24ac   : > { %8469 = vmatmul.mubr.bf16.gmra.mrb[180].mxu0 %v8020_v54 }
0x24ad   : > { %10310 = vmatprep.mubr.msk.bf16.mxu0 %vm10973_vm2, %v10972_v19 }
0x254e   : > { %v9767_v42 = vpop.f32.mrb[156].mxu1 }
0x254f   : > { %v9768_v36 = vpop.f32.mrb[157].mxu1 }
0x2550   : > { %v9769_v14 = vadd.f32 %v9768_v36, %v9767_v42  ;;  %v9770_v9 = vpop.f32.mrb[158].mxu1 }
0x2551   : > { %v9771_v52 = vpop.f32.mrb[159].mxu1 }
0x2552   : > { %v9772_v22 = vadd.f32 %v9771_v52, %v9770_v9  ;;  %v8382_v37 = vadd.f32 %v9769_v14, %v16574_v20 }
0x2554   : > { %v8385_v3 = vadd.f32 %v9772_v22, %v16574_v20 }
0x2556   : > { %v9773_v12 = vpop.f32.mrb[160].mxu1 }
0x2557   : > { %v9774_v55 = vpop.f32.mrb[161].mxu1 }
0x2558   : > { %v9775_v27 = vadd.f32 %v9774_v55, %v9773_v12  ;;  %v9776_v38 = vpop.f32.mrb[162].mxu1 }
0x2559   : > { %v9777_v11 = vpop.f32.mrb[163].mxu1 }
0x255a   : > { %v9778_v51 = vadd.f32 %v9777_v11, %v9776_v38  ;;  %v8390_v21 = vadd.f32 %v9775_v27, %v16574_v20 }
0x255c   : > { %v8393_v58 = vadd.f32 %v9778_v51, %v16574_v20 }
0x255e   : > { %v9779_v40 = vpop.f32.mrb[164].mxu1 }
0x255f   : > { %v9780_v4 = vpop.f32.mrb[165].mxu1 }
0x2560   : > { %v9781_v6 = vadd.f32 %v9780_v4, %v9779_v40  ;;  %v9782_v30 = vpop.f32.mrb[166].mxu1 }
0x2561   : > { %v9783_v44 = vpop.f32.mrb[167].mxu1 }
0x2562   : > { %v9784_v18 = vadd.f32 %v9783_v44, %v9782_v30  ;;  %v8398_v25 = vadd.f32 %v9781_v6, %v16574_v20 }
0x2564   : > { %v8401_v49 = vadd.f32 %v9784_v18, %v16574_v20 }
0x2566   : > { %v9785_v63 = vpop.f32.mrb[168].mxu1 }
0x2567   : > { %v9807_v31 = vpop.f32.mrb[168].mxu0  ;;  %v9786_v39 = vpop.f32.mrb[169].mxu1 }
0x2568   : > { %v9808_v59 = vpop.f32.mrb[169].mxu0  ;;  %v9787_v15 = vadd.f32 %v9786_v39, %v9785_v63  ;;  %v9788_v56 = vpop.f32.mrb[170].mxu1 }
0x2569   : > { %v9809_v17 = vadd.f32 %v9808_v59, %v9807_v31  ;;  %v9810_v2 = vpop.f32.mrb[170].mxu0  ;;  %v9789_v57 = vpop.f32.mrb[171].mxu1 }
0x256a   : > { %v9811_v26 = vpop.f32.mrb[171].mxu0  ;;  %v9790_v1 = vadd.f32 %v9789_v57, %v9788_v56  ;;  %v8406_v11 = vadd.f32 %v9787_v15, %v16574_v20  ;;  %v8550_v15 = vld [vmem:[%s16629_s18] sm:$0x1] }
0x256b   : > { %v9812_v16 = vadd.f32 %v9811_v26, %v9810_v2  ;;  %v8447_v45 = vadd.f32 %v9809_v17, %v8382_v37 }
0x256c   : > { %v8409_v17 = vadd.f32 %v9790_v1, %v16574_v20 }
0x256d   : > { %v8450_v35 = vadd.f32 %v9812_v16, %v8385_v3 }
0x256e   : > { %v10296_v48 = vpop.f32.mrb[172].mxu1 }
0x256f   : > { %v9813_v13 = vpop.f32.mrb[172].mxu0  ;;  %v8511_v61 = vpop.f32.mrb[173].mxu1 }
0x2570   : > { %v9814_v5 = vpop.f32.mrb[173].mxu0  ;;  %v8512_v41 = vadd.f32 %v8511_v61, %v8447_v45  ;;  %v10297_v43 = vpop.f32.mrb[174].mxu1 }
0x2571   : > { %v9815_v23 = vadd.f32 %v9814_v5, %v9813_v13  ;;  %v9816_v0 = vpop.f32.mrb[174].mxu0  ;;  %v8514_v50 = vpop.f32.mrb[175].mxu1 }
0x2572   : > { %v9817_v29 = vpop.f32.mrb[175].mxu0  ;;  %v8515_v54 = vadd.f32 %v8514_v50, %v8450_v35  ;;  %v8542_v36 = vmax.f32 %v8512_v41, 0.0 }
0x2573   : > { %v9818_v62 = vadd.f32 %v9817_v29, %v9816_v0  ;;  %v8455_v10 = vadd.f32 %v9815_v23, %v8390_v21  ;;  %v8559_v23 = vpop.permute.xlu1 %8558 }
0x2574   : > { %v8543_v14 = vmax.f32 %v8515_v54, 0.0 }
0x2575   : > { %v8458_v47 = vadd.f32 %v9818_v62, %v8393_v58  ;;  %v8520_v34 = vadd.f32 %v10296_v48, %v8455_v10 }
0x2576   : > { %v8551_v22 = vpack.c.bf16 %v8543_v14, %v8542_v36  ;;  %v10300_v55 = vpop.f32.mrb[176].mxu1 }
0x2577   : > { %v9819_v7 = vpop.f32.mrb[176].mxu0  ;;  %v8523_v32 = vadd.f32 %v10297_v43, %v8458_v47  ;;  %v8544_v33 = vmax.f32 %v8520_v34, 0.0  ;;  %v8527_v38 = vpop.f32.mrb[177].mxu1  ;;  %v18370_v34 = vlaneseq }
0x2578   : > { %v9820_v60 = vpop.f32.mrb[177].mxu0  ;;  %v10301_v4 = vpop.f32.mrb[178].mxu1  ;;  %v8565_v59 = vsel %vm18365_vm12, %v8551_v22, 0 }
0x2579   : > { %v9821_v53 = vadd.f32 %v9820_v60, %v9819_v7  ;;  %v9822_v46 = vpop.f32.mrb[178].mxu0  ;;  %v8545_v42 = vmax.f32 %v8523_v32, 0.0  ;;  %v8530_v6 = vpop.f32.mrb[179].mxu1  ;;  %10303 = vmatpush3.bf16.xpose.msra.mxu0 %v8565_v59  ;;  %v8629_v60 = vand.u32 127, %v18370_v34 }
0x257a   : > { %v9823_v28 = vpop.f32.mrb[179].mxu0  ;;  %10304 = vmatprep.subr.bf16.mxu0 %v10972_v19 }
0x257b   : > { %v9824_v24 = vadd.f32 %v9823_v28, %v9822_v46  ;;  %v8463_v8 = vadd.f32 %v9821_v53, %v8398_v25  ;;  %v8552_v52 = vpack.c.bf16 %v8545_v42, %v8544_v33  ;;  %v8630_v61 = vcvt.s32.f32 %v8629_v60 }
0x257c   : > { %vm8654_vm10 = vcmp.eq.s32.totalorder %v8629_v60, 2  ;;  %vm8645_vm9 = vcmp.eq.s32.totalorder %v8629_v60, 0  ;;  %vm8649_vm7 = vcmp.eq.s32.totalorder %v8629_v60, 1  ;;  %vm8662_vm3 = vcmp.eq.s32.totalorder %v8629_v60, 3 }
0x257d   : > { %v8466_v9 = vadd.f32 %v9824_v24, %v8401_v49  ;;  %v8528_v40 = vadd.f32 %v8527_v38, %v8463_v8  ;;  %v8568_v39 = vsel %vm18366_vm11, %v8552_v52, 0  ;;  %v8631_v25 = vmul.f32 0.125, %v8630_v61 }
0x257e   : > { %v9286_v42 = vsel %vm8654_vm10, 1.0, %v10972_v19  ;;  %v9284_v14 = vsel %vm8645_vm9, 1.0, %v10972_v19  ;;  %v9287_v52 = vsel %vm8662_vm3, 1.0, %v10972_v19 }
0x257f   : > { %v9825_v12 = vpop.f32.mrb[180].mxu0  ;;  %v8531_v44 = vadd.f32 %v8530_v6, %v8466_v9  ;;  %v8546_v3 = vmax.f32 %v8528_v40, 0.0  ;;  %v8632_v53 = vfloor.f32 %v8631_v25  ;;  %v9285_v9 = vsel %vm8649_vm7, 1.0, %v10972_v19 }
0x2580   : > { %v9826_v27 = vpop.f32.mrb[181].mxu0 }
0x2581   : > { %v9827_v51 = vadd.f32 %v9826_v27, %v9825_v12  ;;  %v9828_v31 = vpop.f32.mrb[182].mxu0  ;;  %v8547_v16 = vmax.f32 %v8531_v44, 0.0  ;;  %10305 = vmatpush3.bf16.xpose.msra.mxu0 %v8568_v39  ;;  %v8633_v46 = vmul.f32 8.0, %v8632_v53  ;;  %v8636_v49 = vmul.f32 4.0, %v8632_v53 }
0x2582   : > { %v9829_v37 = vpop.f32.mrb[183].mxu0  ;;  %10306 = vmatprep.subr.bf16.mxu0 %v10972_v19 }
0x2583   : > { %v8471_v30 = vadd.f32 %v9827_v51, %v8406_v11  ;;  %v9830_v2 = vadd.f32 %v9829_v37, %v9828_v31  ;;  %v8553_v35 = vpack.c.bf16 %v8547_v16, %v8546_v3  ;;  %v8634_v43 = vsub.f32 %v8630_v61, %v8633_v46 }
0x2585   : > { %v8536_v26 = vadd.f32 %v10300_v55, %v8471_v30  ;;  %v8474_v18 = vadd.f32 %v9830_v2, %v8409_v17  ;;  %v8571_v20 = vsel %vm18367_vm5, %v8553_v35, 0  ;;  %v8635_v32 = vmul.f32 4.0, %v8634_v43 }
0x2587   : > { %v8539_v45 = vadd.f32 %v10301_v4, %v8474_v18  ;;  %v8548_v63 = vmax.f32 %v8536_v26, 0.0 }
0x2589   : > { %v8549_v13 = vmax.f32 %v8539_v45, 0.0  ;;  %10307 = vmatpush3.bf16.xpose.msra.mxu0 %v8571_v20 }
0x258a   : > { %10308 = vmatprep.subr.bf16.mxu0 %v10972_v19 }
0x258b   : > { %v8554_v5 = vpack.c.bf16 %v8549_v13, %v8548_v63 }
0x258d   : > { %v8574_v21 = vsel %vm18368_vm13, %v8554_v5, 0 }
0x2591   : > { %10309 = vmatpush3.bf16.xpose.msra.mxu0 %v8574_v21 }
0x2598   : > { %10311 = vmatmul.mubr.msk.bf16.vlgmr.msra.gmra.mrb[184].mxu0 %vm18369_vm14, %v8550_v15 }
0x266b   : > { %v8610_v56 = vpop.f32.mrb[184].mxu0 }
0x266c   : > { %v8611_v0 = vadd.f32 %v8610_v56, %v8559_v23  ;;  %v10312_v57 = vpop.f32.mrb[185].mxu0 }
0x266d   : > { %v8613_v29 = vpop.f32.mrb[186].mxu0 }
0x266e   : > { %v8617_v58 = vsel %vm8616_vm4, %v8611_v0, -inf  ;;  %v10313_v1 = vpop.f32.mrb[187].mxu0 }
0x266f   : > { %8618 = vmax.xlane.f32.xlu0 %v8617_v58 }
0x26fc   : > { %v8619_v62 = vpop.xlane.xlu0 %8618 }
0x26fd   : > { %v8620_v10 = vsub.f32 %v8611_v0, %v8619_v62 }
0x26ff   : > { %v8621_v47 = vmul.f32 1.442695, %v8620_v10 }
0x2701   : > { %10953 = vpow2.f32 %v8621_v47 }
0x270b   : > { %v10954_v7 = vpop.eup %10953 }
0x270c   : > { %v8623_v48 = vsel %vm8616_vm4, %v10954_v7, 0.0 }
0x270d   : > { %8624 = vadd.xlane.f32.xlu1 %v8623_v48 }
0x279a   : > { %v8625_v41 = vpop.xlane.xlu1 %8624 }
0x279b   : > { %10955 = vrcp.f32 %v8625_v41 }
0x27a5   : > { %v10956_v28 = vpop.eup %10955 }
0x27a6   : > { %v8627_v50 = vmul.f32 %v10956_v28, %v10954_v7 }
0x27a8   : > { %v8637_v24 = vmul.f32 %v8635_v32, %v8627_v50  ;;  %v8641_v8 = vmul.f32 %v8636_v49, %v8627_v50 }
0x27aa   : > { %v8638_v54 = vsel %vm8616_vm4, %v8637_v24, 0.0  ;;  %v8642_v33 = vsel %vm8616_vm4, %v8641_v8, 0.0 }
0x27ab   : > { %8639 = vadd.xlane.f32.xlu0 %v8638_v54 }
0x27af   : > { %8643 = vadd.xlane.f32.xlu0 %v8642_v33 }
0x2838   : > { %v8640_v36 = vpop.xlane.xlu0 %8639 }
0x2839   : > { %v8657_v22 = vmul.f32 %v9286_v42, %v8640_v36  ;;  %v8648_v55 = vmul.f32 %v9284_v14, %v8640_v36 }
0x283b   : > { %v8659_v11 = vrot.slane %v8657_v22, 1 }
0x283c   : > { %v8644_v12 = vpop.xlane.xlu0 %8643 }
0x283d   : > { %v8652_v27 = vmul.f32 %v9285_v9, %v8644_v12  ;;  %v8665_v38 = vmul.f32 %v9287_v52, %v8644_v12 }
0x283f   : > { %v8653_v51 = vadd.f32 %v8652_v27, %v8648_v55  ;;  %v8667_v31 = vrot.slane %v8665_v38, 1 }
0x2841   : > { %v8661_v40 = vadd.f32 %v8659_v11, %v8653_v51 }
0x2843   : > { %v8669_v4 = vadd.f32 %v8667_v31, %v8661_v40 }
0x2845   : > { %v8670_v59 = vmul.f32 0.03125, %v8669_v4 }
0x2847   : > { %8672 = vst.msk [vmem:[%s625_s2] sm:$0x1] %vm8671_vm15, %v8670_v59 }
0x2848 PF: > { %s30_s1 = sadd.s32 1, %s10963_s1  }
0x2849   : > { %p27_p4 = scmp.ge.s32.totalorder %s30_s1, 4  }
0x284b   :  { %29 = sbr.rel (!%p27_p4) target bundleno = 6 (0x6), region = 148 }

</bundles_post_ra>
